<compile_context>
chip_gen: v7x
topology: tpu7x:2x2x1
jax: 0.10.0
libtpu: 0.0.40
codegen_flags: <defaults>
</compile_context>

<pallas_src>
import math

import numpy as np
import jax
import jax.numpy as jnp
from jax import lax
from jax.experimental import pallas as pl
from jax.experimental.pallas import tpu as pltpu

LEAKY_SLOPE = 0.2
BN_EPS = 0.8      # nn.BatchNorm2d(C, 0.8): the positional 0.8 is `eps`
KSIZE = 4         # every conv / conv-transpose uses kernel 4, stride 2, pad 1
STRIDE = 2
PAD = 1
LANE = 128


def _round_up(x, m):
    return (x + m - 1) // m * m


# ----------------------------------------------------------------------------
# Init-time lowering: conv / conv-transpose -> dense per-sample matrix
# (flatten convention: NHWC per sample, index = (h*W + w)*C + c)
# ----------------------------------------------------------------------------
def _conv_dense_matrix(w_oihw, hw_in):
    """Conv2d(k=4, s=2, p=1); weight OIHW -> B (Sin*Cin, Sout*Cout)."""
    w = np.asarray(w_oihw, np.float32)
    c_out, c_in, k, _ = w.shape
    hw_out = (hw_in + 2 * PAD - k) // STRIDE + 1
    B = np.zeros((hw_in * hw_in * c_in, hw_out * hw_out * c_out), np.float32)
    for oh in range(hw_out):
        for ow in range(hw_out):
            dst = (oh * hw_out + ow) * c_out
            for kh in range(k):
                ih = oh * STRIDE - PAD + kh
                if not (0 <= ih < hw_in):
                    continue
                for kw in range(k):
                    iw = ow * STRIDE - PAD + kw
                    if not (0 <= iw < hw_in):
                        continue
                    src = (ih * hw_in + iw) * c_in
                    B[src:src + c_in, dst:dst + c_out] += w[:, :, kh, kw].T  # (Cin,Cout)
    return B, hw_out


def _convt_dense_matrix(w_iohw, hw_in):
    """ConvTranspose2d(k=4, s=2, p=1); weight IOHW.
    out[ih*s-p+kh, iw*s-p+kw, co] += in[ih, iw, ci] * W[ci, co, kh, kw]."""
    w = np.asarray(w_iohw, np.float32)
    c_in, c_out, k, _ = w.shape
    hw_out = (hw_in - 1) * STRIDE - 2 * PAD + k
    B = np.zeros((hw_in * hw_in * c_in, hw_out * hw_out * c_out), np.float32)
    for ih in range(hw_in):
        for iw in range(hw_in):
            src = (ih * hw_in + iw) * c_in
            for kh in range(k):
                oh = ih * STRIDE - PAD + kh
                if not (0 <= oh < hw_out):
                    continue
                for kw in range(k):
                    ow = iw * STRIDE - PAD + kw
                    if not (0 <= ow < hw_out):
                        continue
                    dst = (oh * hw_out + ow) * c_out
                    B[src:src + c_in, dst:dst + c_out] += w[:, :, kh, kw]    # (Cin,Cout)
    return B, hw_out


# ----------------------------------------------------------------------------
# Generator definition (layer configs + deterministic parameter init)
# ----------------------------------------------------------------------------
def generator_layer_configs(img_size, mask_size, p2_deep, p2_offset, channels):
    assert math.log2(img_size).is_integer() and math.log2(mask_size).is_integer()
    assert img_size > mask_size
    p2_img = int(math.log2(img_size))
    p2_diff = p2_img - int(math.log2(mask_size))
    assert p2_img > p2_diff + p2_deep, "Model is too deep. Reduce p2_deep"
    cfg = []
    # downsample
    for i in range(p2_offset, p2_offset + p2_deep + p2_diff + 1):
        if i == p2_offset:
            cfg.append(dict(kind="conv", cin=channels, cout=2 ** i, bn=False, act="leaky"))
        else:
            cfg.append(dict(kind="conv", cin=2 ** (i - 1), cout=2 ** i, bn=True, act="leaky"))
    # upsample
    for i in range(p2_offset + p2_deep + p2_diff, p2_offset + p2_diff - 1, -1):
        if i == p2_offset + p2_diff:
            cfg.append(dict(kind="convT", cin=2 ** i, cout=channels, bn=False, act="tanh"))
        else:
            cfg.append(dict(kind="convT", cin=2 ** i, cout=2 ** (i - 1), bn=True, act="leaky"))
    return cfg


def init_params(key, cfg, k=KSIZE):
    """weights_init_normal semantics: conv weights ~ N(0, 0.02), BN gamma ~ N(1, 0.02),
    BN beta = 0.  Conv biases are initialized deterministically (small normal)."""
    params = []
    for layer in cfg:
        key, kw, kb, kg = jax.random.split(key, 4)
        cin, cout = layer["cin"], layer["cout"]
        if layer["kind"] == "conv":
            w = 0.02 * jax.random.normal(kw, (cout, cin, k, k), jnp.float32)   # OIHW
        else:
            w = 0.02 * jax.random.normal(kw, (cin, cout, k, k), jnp.float32)   # IOHW
        b = 0.01 * jax.random.normal(kb, (cout,), jnp.float32)
        if layer["bn"]:
            gamma = 1.0 + 0.02 * jax.random.normal(kg, (cout,), jnp.float32)
        else:
            gamma = jnp.ones((cout,), jnp.float32)
        beta = jnp.zeros((cout,), jnp.float32)
        params.append(dict(w=w, b=b, gamma=gamma, beta=beta))
    return params


# ----------------------------------------------------------------------------
# Init-time parameter preparation for the fused kernel
# ----------------------------------------------------------------------------
def prepare_fused(cfg, params, img_size, channels, lane=LANE):
    """Lower every conv / convT to a dense (Sin*Cin, Sout*Cout) matrix (bf16), fold the
    NCHW<->NHWC permutations into the first / last matrix, lane-pad the bottleneck and the
    final output, and drop the (exactly-cancelling) conv biases on BN layers."""
    h = img_size
    n_layers = len(cfg)
    flat_args, meta = [], []
    prev_cols = img_size * img_size * channels            # NCHW-flat input width (768)
    for li, (layer, p) in enumerate(zip(cfg, params)):
        c_in, c_out = layer["cin"], layer["cout"]
        s_in = h * h
        if layer["kind"] == "conv":
            B, h_out = _conv_dense_matrix(np.asarray(p["w"], np.float32), h)
        else:
            B, h_out = _convt_dense_matrix(np.asarray(p["w"], np.float32), h)
        s_out = h_out * h_out
        cols = s_out * c_out

        if li == 0:
            # fold the NCHW->NHWC input permutation into B's rows (no runtime transpose)
            B = B.reshape(s_in, c_in, cols).transpose(1, 0, 2).reshape(s_in * c_in, cols)
        if li == n_layers - 1:
            # fold the NHWC->NCHW output permutation into B's columns
            B = B.reshape(B.shape[0], s_out, c_out).transpose(0, 2, 1).reshape(B.shape[0], cols)

        # previous layer's lane padding appended zero channels -> pad this B's rows to match
        if B.shape[0] < prev_cols:
            B = np.pad(B, ((0, prev_cols - B.shape[0]), (0, 0)))
        assert B.shape[0] == prev_cols, (li, B.shape, prev_cols)

        c_pad = c_out
        if layer["bn"] and cols < lane:
            # 1x1-spatial bottleneck layer: pad channels so the slab is lane-dense.
            assert s_out == 1, "lane padding only implemented for 1x1 bottleneck layers"
            c_pad = lane
            B = np.pad(B, ((0, 0), (0, lane - cols)))
            cols = lane
        if li == n_layers - 1:
            cols_p = _round_up(cols, lane)                 # lane-dense final HBM store
            if cols_p > cols:
                B = np.pad(B, ((0, 0), (0, cols_p - cols)))
                cols = cols_p

        slots = {"B": len(flat_args)}
        flat_args.append(jnp.asarray(B, jnp.bfloat16))     # bf16 MXU operand
        if layer["bn"]:
            # Conv bias dropped: a per-channel constant cancels exactly through
            # batch-statistics BatchNorm (mean shift, variance unchanged).
            gamma = np.zeros((1, c_pad), np.float32)
            beta = np.zeros((1, c_pad), np.float32)
            gamma[0, :c_out] = np.asarray(p["gamma"], np.float32)
            beta[0, :c_out] = np.asarray(p["beta"], np.float32)
            slots["gamma"] = len(flat_args); flat_args.append(jnp.asarray(gamma))
            slots["beta"] = len(flat_args); flat_args.append(jnp.asarray(beta))
        else:
            b_np = np.asarray(p["b"], np.float32)
            if li == n_layers - 1:
                bias = np.repeat(b_np, s_out)              # NCHW column order
            else:
                bias = np.tile(b_np, s_out)                # NHWC column order
            bias = np.pad(bias, (0, cols - bias.shape[0])).reshape(1, cols)
            slots["bias"] = len(flat_args); flat_args.append(jnp.asarray(bias))

        meta.append(dict(bn=bool(layer["bn"]), act=layer["act"], s_out=s_out, c_pad=c_pad,
                         cols_in=prev_cols, cols_out=cols, slots=slots))
        prev_cols = cols
        h = h_out

    out_info = dict(h_out=h, c_out=cfg[-1]["cout"],
                    n_valid=cfg[-1]["cout"] * h * h, n_padded=meta[-1]["cols_out"])
    return flat_args, meta, out_info


# ----------------------------------------------------------------------------
# The fused Pallas kernel: grid = (stage, batch_block), deferred global BatchNorm
# ----------------------------------------------------------------------------
def _make_fused_kernel(meta, n_total, blk):
    n_layers = len(meta)
    n_param = sum(len(m["slots"]) for m in meta)

    def kernel(*refs):
        x_ref = refs[0]
        prm = refs[1:1 + n_param]
        o_ref = refs[1 + n_param]
        buf = (refs[2 + n_param], refs[3 + n_param])       # full-batch ping-pong staging
        acc = (refs[4 + n_param], refs[5 + n_param])       # per-channel [sum; sumsq]

        l_idx = pl.program_id(0)                           # stage (layer) index
        b_idx = pl.program_id(1)                           # batch block index
        row0 = pl.multiple_of(b_idx * blk, blk)

        for i in range(n_layers):
            lm = meta[i]

            def stage(i=i, lm=lm):
                # ---- previous layer's deferred BatchNorm + LeakyReLU ----
                if i == 0:
                    a_prev = x_ref[...]                    # (blk, 768) bf16 block
                else:
                    pm = meta[i - 1]
                    z_prev = buf[(i - 1) % 2][pl.ds(row0, blk), 0:pm["cols_out"]]   # f32
                    if pm["bn"]:
                        st = acc[(i - 1) % 2]
                        g = prm[pm["slots"]["gamma"]][...]
                        bt = prm[pm["slots"]["beta"]][...]
                        c = pm["c_pad"]
                        inv_cnt = 1.0 / float(n_total * pm["s_out"])
                        mean = st[0:1, 0:c] * inv_cnt
                        var = st[1:2, 0:c] * inv_cnt - mean * mean
                        scale = g * lax.rsqrt(var + BN_EPS)                  # (1, C)
                        shift = bt - mean * scale                            # (1, C)
                        if pm["s_out"] > 1:                 # tile per-channel vec over lanes
                            scale = jnp.concatenate([scale] * pm["s_out"], axis=1)
                            shift = jnp.concatenate([shift] * pm["s_out"], axis=1)
                        z_prev = z_prev * scale + shift
                    if pm["act"] == "leaky":
                        z_prev = jnp.where(z_prev >= 0.0, z_prev, LEAKY_SLOPE * z_prev)
                    # TODO(synk): nn.Dropout(0.1) is stochastic in train mode; identity here.
                    a_prev = z_prev.astype(jnp.bfloat16)

                # ---- this layer's conv / convT as one dense MXU matmul (bf16 -> f32) ----
                z = jnp.dot(a_prev, prm[lm["slots"]["B"]][...],
                            preferred_element_type=jnp.float32)              # (blk, cols)
                if "bias" in lm["slots"]:
                    z = z + prm[lm["slots"]["bias"]][...]

                # ---- accumulate this layer's GLOBAL BatchNorm batch statistics ----
                if lm["bn"]:
                    st = acc[i % 2]

                    @pl.when(b_idx == 0)
                    def _zero():
                        st[...] = jnp.zeros_like(st)

                    c, s = lm["c_pad"], lm["s_out"]
                    rsum = jnp.sum(z, axis=0, keepdims=True)                 # (1, s*c)
                    rsq = jnp.sum(z * z, axis=0, keepdims=True)
                    ch_sum = rsum[:, 0:c]
                    ch_sq = rsq[:, 0:c]
                    for sp in range(1, s):                                   # fold spatial
                        ch_sum = ch_sum + rsum[:, sp * c:(sp + 1) * c]
                        ch_sq = ch_sq + rsq[:, sp * c:(sp + 1) * c]
                    st[0:1, 0:c] = st[0:1, 0:c] + ch_sum
                    st[1:2, 0:c] = st[1:2, 0:c] + ch_sq

                # ---- stage raw pre-BN output, or emit the final tanh block ----
                if i < n_layers - 1:
                    buf[i % 2][pl.ds(row0, blk), 0:lm["cols_out"]] = z
                else:
                    o_ref[...] = jnp.tanh(z)

            pl.when(l_idx == i)(stage)

    return kernel


def generator_forward(img_nchw, flat_args, meta, out_info, *, block_rows=256):
    n = img_nchw.shape[0]
    blk = min(block_rows, n)
    assert n % blk == 0 and blk % 8 == 0, (n, blk)
    n_stages = len(meta)
    n_blocks = n // blk
    last = n_stages - 1

    # NCHW flatten only (the NCHW->NHWC permutation is folded into B0's rows), bf16 input.
    x = img_nchw.reshape(n, meta[0]["cols_in"]).astype(jnp.bfloat16)

    # ping-pong full-batch VMEM staging widths (raw pre-BN layer outputs)
    buf_cols = [LANE, LANE]
    for i, m in enumerate(meta[:-1]):
        buf_cols[i % 2] = max(buf_cols[i % 2], m["cols_out"])
    out_cols = out_info["n_padded"]

    # explicit VMEM budget (v7x: 64 MiB physical, 32 MiB scoped default)
    w_bytes = sum(int(np.prod(a.shape)) * a.dtype.itemsize for a in flat_args)
    stage_bytes = n * sum(buf_cols) * 4
    io_bytes = 2 * blk * meta[0]["cols_in"] * 2 + 2 * blk * out_cols * 4
    max_cols = max(max(m["cols_out"] for m in meta), meta[0]["cols_in"])
    tmp_bytes = 8 * blk * max_cols * 4
    need = w_bytes + stage_bytes + io_bytes + tmp_bytes + (1 << 20)
    if need > 56 * 2 ** 20:
        # TODO(synk): beyond this batch the full-batch VMEM staging no longer fits on v7x;
        # switch the staging buffers to HBM with manual double-buffered DMA.
        raise ValueError(f"batch {n} too large for VMEM-staged intermediates ({need} bytes)")
    vmem_limit = int(min(max(2 * need, 32 * 2 ** 20), 56 * 2 ** 20))

    kernel = _make_fused_kernel(meta, n_total=n, blk=blk)

    in_specs = [pl.BlockSpec((blk, meta[0]["cols_in"]),
                             lambda l, b: (jnp.where(l == 0, b, 0), 0))]
    # weights / biases / BN params: whole-array VMEM residents, fetched once
    in_specs += [pl.BlockSpec(memory_space=pltpu.MemorySpace.VMEM)] * len(flat_args)
    out_spec = pl.BlockSpec((blk, out_cols),
                            lambda l, b: (jnp.where(l == last, b, 0), 0))

    grid_spec = pltpu.PrefetchScalarGridSpec(
        num_scalar_prefetch=0,
        grid=(n_stages, n_blocks),
        in_specs=in_specs,
        out_specs=out_spec,
        scratch_shapes=[
            pltpu.VMEM((n, buf_cols[0]), jnp.float32),   # staging (even stages write here)
            pltpu.VMEM((n, buf_cols[1]), jnp.float32),   # staging (odd stages write here)
            pltpu.VMEM((8, LANE), jnp.float32),          # BN stats accumulator (parity 0)
            pltpu.VMEM((8, LANE), jnp.float32),          # BN stats accumulator (parity 1)
        ])

    out = pl.pallas_call(
        kernel,
        out_shape=jax.ShapeDtypeStruct((n, out_cols), jnp.float32),
        grid_spec=grid_spec,
        compiler_params=pltpu.CompilerParams(
            # TODO(synk): batch axis kept "arbitrary" -- v7x megacore sharding of the batch
            # axis would need a cross-core reduction of the BatchNorm batch statistics.
            # TODO(synk): fp8 (e4m3) storage of the B matrices on v7x is a further option.
            dimension_semantics=("arbitrary", "arbitrary"),
            vmem_limit_bytes=vmem_limit),
    )(x, *flat_args)

    ho, co = out_info["h_out"], out_info["c_out"]
    # output columns are already in NCHW order (folded into B_last); just slice + reshape
    return out[:, :out_info["n_valid"]].reshape(n, co, ho, ho)


# ----------------------------------------------------------------------------
# Pure-XLA reference (lax.conv_general_dilated) for correctness checking
# ----------------------------------------------------------------------------
def reference_forward(img_nchw, cfg, params):
    x = jnp.transpose(img_nchw, (0, 2, 3, 1))
    dn = ("NHWC", "OIHW", "NHWC")
    for layer, p in zip(cfg, params):
        if layer["kind"] == "conv":
            y = lax.conv_general_dilated(x, p["w"], (2, 2), ((1, 1), (1, 1)),
                                         dimension_numbers=dn)
        else:
            w_eq = jnp.transpose(jnp.flip(p["w"], axis=(2, 3)), (1, 0, 2, 3))
            y = lax.conv_general_dilated(x, w_eq, (1, 1), ((2, 2), (2, 2)),
                                         lhs_dilation=(2, 2), dimension_numbers=dn)
        y = y + p["b"][None, None, None, :]
        if layer["bn"]:
            mu = jnp.mean(y, axis=(0, 1, 2), keepdims=True)
            var = jnp.mean(jnp.square(y - mu), axis=(0, 1, 2), keepdims=True)
            y = p["gamma"] * (y - mu) * lax.rsqrt(var + BN_EPS) + p["beta"]
        if layer["act"] == "leaky":
            y = jnp.where(y >= 0, y, LEAKY_SLOPE * y)
        elif layer["act"] == "tanh":
            y = jnp.tanh(y)
        x = y
    return jnp.transpose(x, (0, 3, 1, 2))


if __name__ == "__main__":
    img_size, mask_size = 16, 8
    p2_deep, p2_offset, channels = 2, 3, 3
    batch, block_rows = 512, 256        # >=256 rows per grid step feeds the MXU a real M

    cfg = generator_layer_configs(img_size, mask_size, p2_deep, p2_offset, channels)

    key = jax.random.PRNGKey(0)
    kp, kx = jax.random.split(key)
    params = init_params(kp, cfg)
    img = jax.random.normal(kx, (batch, channels, img_size, img_size), jnp.float32)

    # init-time lowering of all layers (weight transforms / permutations / padding hoisted)
    flat_args, meta, out_info = prepare_fused(cfg, params, img_size, channels)

    fwd = jax.jit(lambda x, fa: generator_forward(x, fa, meta, out_info,
                                                  block_rows=block_rows))
    out = jax.block_until_ready(fwd(img, flat_args))

    assert out.shape == (batch, channels, mask_size, mask_size), out.shape
    assert bool(jnp.all(jnp.isfinite(out)))

    ref = jax.block_until_ready(reference_forward(img, cfg, params))
    err = jnp.abs(out - ref)
    max_err = float(jnp.max(err))
    mean_err = float(jnp.mean(err))
    ref_scale = float(jnp.max(jnp.abs(ref)))
    assert max_err < 7.5e-2, f"abs mismatch vs XLA reference: {max_err}"
    assert mean_err < 1e-2, f"mean mismatch vs XLA reference: {mean_err}"
    assert max_err <= 0.25 * ref_scale + 1e-6, (
        f"rel mismatch vs XLA reference: err={max_err} scale={ref_scale}")

    print("KERNEL_OK")
</pallas_src>

<mosaic_0001>
module attributes {stable_mosaic.version = 11 : i64} {
  func.func @kernel(%arg0: i32, %arg1: i32, %arg2: memref<256x768xbf16, #tpu.memory_space<vmem>>, %arg3: memref<768x512xbf16, #tpu.memory_space<vmem>>, %arg4: memref<1x512xf32, #tpu.memory_space<vmem>>, %arg5: memref<512x256xbf16, #tpu.memory_space<vmem>>, %arg6: memref<1x16xf32, #tpu.memory_space<vmem>>, %arg7: memref<1x16xf32, #tpu.memory_space<vmem>>, %arg8: memref<256x128xbf16, #tpu.memory_space<vmem>>, %arg9: memref<1x32xf32, #tpu.memory_space<vmem>>, %arg10: memref<1x32xf32, #tpu.memory_space<vmem>>, %arg11: memref<128x128xbf16, #tpu.memory_space<vmem>>, %arg12: memref<1x128xf32, #tpu.memory_space<vmem>>, %arg13: memref<1x128xf32, #tpu.memory_space<vmem>>, %arg14: memref<128x128xbf16, #tpu.memory_space<vmem>>, %arg15: memref<1x32xf32, #tpu.memory_space<vmem>>, %arg16: memref<1x32xf32, #tpu.memory_space<vmem>>, %arg17: memref<128x256xbf16, #tpu.memory_space<vmem>>, %arg18: memref<1x16xf32, #tpu.memory_space<vmem>>, %arg19: memref<1x16xf32, #tpu.memory_space<vmem>>, %arg20: memref<256x256xbf16, #tpu.memory_space<vmem>>, %arg21: memref<1x256xf32, #tpu.memory_space<vmem>>, %arg22: memref<256x256xf32, #tpu.memory_space<vmem>>, %arg23: memref<512x512xf32, #tpu.memory_space<vmem>>, %arg24: memref<512x256xf32, #tpu.memory_space<vmem>>, %arg25: memref<8x128xf32, #tpu.memory_space<vmem>>, %arg26: memref<8x128xf32, #tpu.memory_space<vmem>>) attributes {dimension_semantics = [#tpu.dimension_semantics<arbitrary>, #tpu.dimension_semantics<arbitrary>], iteration_bounds = array<i64: 7, 2>, scalar_prefetch = 0 : i64, scratch_operands = 4 : i64, tpu.core_type = #tpu.core_type<tc>, window_params = [{transform_indices = @transform_0, window_bounds = array<i64: 256, 768>}, {pipeline_mode = #tpu.pipeline_mode<synchronous>, transform_indices = @transform_1, window_bounds = array<i64: 768, 512>}, {pipeline_mode = #tpu.pipeline_mode<synchronous>, transform_indices = @transform_2, window_bounds = array<i64: 1, 512>}, {pipeline_mode = #tpu.pipeline_mode<synchronous>, transform_indices = @transform_3, window_bounds = array<i64: 512, 256>}, {pipeline_mode = #tpu.pipeline_mode<synchronous>, transform_indices = @transform_4, window_bounds = array<i64: 1, 16>}, {pipeline_mode = #tpu.pipeline_mode<synchronous>, transform_indices = @transform_5, window_bounds = array<i64: 1, 16>}, {pipeline_mode = #tpu.pipeline_mode<synchronous>, transform_indices = @transform_6, window_bounds = array<i64: 256, 128>}, {pipeline_mode = #tpu.pipeline_mode<synchronous>, transform_indices = @transform_7, window_bounds = array<i64: 1, 32>}, {pipeline_mode = #tpu.pipeline_mode<synchronous>, transform_indices = @transform_8, window_bounds = array<i64: 1, 32>}, {pipeline_mode = #tpu.pipeline_mode<synchronous>, transform_indices = @transform_9, window_bounds = array<i64: 128, 128>}, {pipeline_mode = #tpu.pipeline_mode<synchronous>, transform_indices = @transform_10, window_bounds = array<i64: 1, 128>}, {pipeline_mode = #tpu.pipeline_mode<synchronous>, transform_indices = @transform_11, window_bounds = array<i64: 1, 128>}, {pipeline_mode = #tpu.pipeline_mode<synchronous>, transform_indices = @transform_12, window_bounds = array<i64: 128, 128>}, {pipeline_mode = #tpu.pipeline_mode<synchronous>, transform_indices = @transform_13, window_bounds = array<i64: 1, 32>}, {pipeline_mode = #tpu.pipeline_mode<synchronous>, transform_indices = @transform_14, window_bounds = array<i64: 1, 32>}, {pipeline_mode = #tpu.pipeline_mode<synchronous>, transform_indices = @transform_15, window_bounds = array<i64: 128, 256>}, {pipeline_mode = #tpu.pipeline_mode<synchronous>, transform_indices = @transform_16, window_bounds = array<i64: 1, 16>}, {pipeline_mode = #tpu.pipeline_mode<synchronous>, transform_indices = @transform_17, window_bounds = array<i64: 1, 16>}, {pipeline_mode = #tpu.pipeline_mode<synchronous>, transform_indices = @transform_18, window_bounds = array<i64: 256, 256>}, {pipeline_mode = #tpu.pipeline_mode<synchronous>, transform_indices = @transform_19, window_bounds = array<i64: 1, 256>}, {transform_indices = @transform_20, window_bounds = array<i64: 256, 256>}]} {
    %c256_i32 = arith.constant 256 : i32
    %0 = arith.muli %arg1, %c256_i32 : i32
    %1 = tpu.assume_multiple %0, 256 : i32
    %c0_i32 = arith.constant 0 : i32
    %2 = arith.cmpi eq, %arg0, %c0_i32 : i32
    %3 = arith.extui %2 : i1 to i32
    %c0_i32_0 = arith.constant 0 : i32
    %4 = arith.cmpi ne, %3, %c0_i32_0 : i32
    scf.if %4 {
      %c0 = arith.constant 0 : index
      %c0_7 = arith.constant 0 : index
      %23 = vector.load %arg2[%c0, %c0_7] : memref<256x768xbf16, #tpu.memory_space<vmem>>, vector<256x768xbf16>
      %c0_8 = arith.constant 0 : index
      %c0_9 = arith.constant 0 : index
      %24 = vector.load %arg3[%c0_8, %c0_9] : memref<768x512xbf16, #tpu.memory_space<vmem>>, vector<768x512xbf16>
      %cst = arith.constant dense<0.000000e+00> : vector<256x512xf32>
      %25 = tpu.matmul %23, %24, %cst {dimension_numbers = #tpu.dot_dimension_numbers<[1], [0], [0], [1], [0, 0, 1, 1], [], []>} : vector<256x768xbf16>, vector<768x512xbf16>, vector<256x512xf32> -> vector<256x512xf32>
      %c0_10 = arith.constant 0 : index
      %c0_11 = arith.constant 0 : index
      %26 = vector.load %arg4[%c0_10, %c0_11] : memref<1x512xf32, #tpu.memory_space<vmem>>, vector<1x512xf32>
      %27 = vector.broadcast %26 : vector<1x512xf32> to vector<256x512xf32>
      %28 = arith.addf %25, %27 : vector<256x512xf32>
      %29 = arith.index_cast %1 : i32 to index
      %c0_12 = arith.constant 0 : index
      %30 = vector.load %arg23[%29, %c0_12] : memref<512x512xf32, #tpu.memory_space<vmem>>, vector<256x512xf32>
      tpu.vector_store %arg23[%29, %c0_12], %28 {strides = array<i32>} : memref<512x512xf32, #tpu.memory_space<vmem>>, vector<256x512xf32>,
    } else {
    }
    %c1_i32 = arith.constant 1 : i32
    %5 = arith.cmpi eq, %arg0, %c1_i32 : i32
    %6 = arith.extui %5 : i1 to i32
    %c0_i32_1 = arith.constant 0 : i32
    %7 = arith.cmpi ne, %6, %c0_i32_1 : i32
    scf.if %7 {
      %23 = arith.index_cast %1 : i32 to index
      %c0 = arith.constant 0 : index
      %24 = vector.load %arg23[%23, %c0] : memref<512x512xf32, #tpu.memory_space<vmem>>, vector<256x512xf32>
      %cst = arith.constant 0.000000e+00 : f32
      %25 = vector.broadcast %cst : f32 to vector<256x512xf32>
      %26 = arith.cmpf oge, %24, %25 : vector<256x512xf32>
      %cst_7 = arith.constant 2.000000e-01 : f32
      %27 = vector.broadcast %cst_7 : f32 to vector<256x512xf32>
      %28 = arith.mulf %27, %24 : vector<256x512xf32>
      %29 = arith.select %26, %24, %28 : vector<256x512xi1>, vector<256x512xf32>
      %30 = arith.truncf %29 : vector<256x512xf32> to vector<256x512xbf16>
      %c0_8 = arith.constant 0 : index
      %c0_9 = arith.constant 0 : index
      %31 = vector.load %arg5[%c0_8, %c0_9] : memref<512x256xbf16, #tpu.memory_space<vmem>>, vector<512x256xbf16>
      %cst_10 = arith.constant dense<0.000000e+00> : vector<256x256xf32>
      %32 = tpu.matmul %30, %31, %cst_10 {dimension_numbers = #tpu.dot_dimension_numbers<[1], [0], [0], [1], [0, 0, 1, 1], [], []>} : vector<256x512xbf16>, vector<512x256xbf16>, vector<256x256xf32> -> vector<256x256xf32>
      %c0_i32_11 = arith.constant 0 : i32
      %33 = arith.cmpi eq, %arg1, %c0_i32_11 : i32
      %34 = arith.extui %33 : i1 to i32
      %c0_i32_12 = arith.constant 0 : i32
      %35 = arith.cmpi ne, %34, %c0_i32_12 : i32
      scf.if %35 {
        %cst_23 = arith.constant 0.000000e+00 : f32
        %111 = vector.broadcast %cst_23 : f32 to vector<8x128xf32>
        %c0_24 = arith.constant 0 : index
        %c0_25 = arith.constant 0 : index
        %112 = vector.load %arg26[%c0_24, %c0_25] : memref<8x128xf32, #tpu.memory_space<vmem>>, vector<8x128xf32>
        tpu.vector_store %arg26[%c0_24, %c0_25], %111 {strides = array<i32>} : memref<8x128xf32, #tpu.memory_space<vmem>>, vector<8x128xf32>,
      } else {
      }
      %cst_13 = arith.constant dense<0.000000e+00> : vector<256xf32>
      %36 = vector.multi_reduction <add>, %32, %cst_13 [0] : vector<256x256xf32> to vector<256xf32>
      %37 = vector.shape_cast %36 : vector<256xf32> to vector<1x256xf32>
      %38 = arith.mulf %32, %32 : vector<256x256xf32>
      %cst_14 = arith.constant dense<0.000000e+00> : vector<256xf32>
      %39 = vector.multi_reduction <add>, %38, %cst_14 [0] : vector<256x256xf32> to vector<256xf32>
      %40 = vector.shape_cast %39 : vector<256xf32> to vector<1x256xf32>
      %41 = vector.extract_strided_slice %37 {offsets = [0, 0], sizes = [1, 16], strides = [1, 1]} : vector<1x256xf32> to vector<1x16xf32>
      %42 = vector.extract_strided_slice %40 {offsets = [0, 0], sizes = [1, 16], strides = [1, 1]} : vector<1x256xf32> to vector<1x16xf32>
      %43 = vector.extract_strided_slice %37 {offsets = [0, 16], sizes = [1, 16], strides = [1, 1]} : vector<1x256xf32> to vector<1x16xf32>
      %44 = arith.addf %41, %43 : vector<1x16xf32>
      %45 = vector.extract_strided_slice %40 {offsets = [0, 16], sizes = [1, 16], strides = [1, 1]} : vector<1x256xf32> to vector<1x16xf32>
      %46 = arith.addf %42, %45 : vector<1x16xf32>
      %47 = vector.extract_strided_slice %37 {offsets = [0, 32], sizes = [1, 16], strides = [1, 1]} : vector<1x256xf32> to vector<1x16xf32>
      %48 = arith.addf %44, %47 : vector<1x16xf32>
      %49 = vector.extract_strided_slice %40 {offsets = [0, 32], sizes = [1, 16], strides = [1, 1]} : vector<1x256xf32> to vector<1x16xf32>
      %50 = arith.addf %46, %49 : vector<1x16xf32>
      %51 = vector.extract_strided_slice %37 {offsets = [0, 48], sizes = [1, 16], strides = [1, 1]} : vector<1x256xf32> to vector<1x16xf32>
      %52 = arith.addf %48, %51 : vector<1x16xf32>
      %53 = vector.extract_strided_slice %40 {offsets = [0, 48], sizes = [1, 16], strides = [1, 1]} : vector<1x256xf32> to vector<1x16xf32>
      %54 = arith.addf %50, %53 : vector<1x16xf32>
      %55 = vector.extract_strided_slice %37 {offsets = [0, 64], sizes = [1, 16], strides = [1, 1]} : vector<1x256xf32> to vector<1x16xf32>
      %56 = arith.addf %52, %55 : vector<1x16xf32>
      %57 = vector.extract_strided_slice %40 {offsets = [0, 64], sizes = [1, 16], strides = [1, 1]} : vector<1x256xf32> to vector<1x16xf32>
      %58 = arith.addf %54, %57 : vector<1x16xf32>
      %59 = vector.extract_strided_slice %37 {offsets = [0, 80], sizes = [1, 16], strides = [1, 1]} : vector<1x256xf32> to vector<1x16xf32>
      %60 = arith.addf %56, %59 : vector<1x16xf32>
      %61 = vector.extract_strided_slice %40 {offsets = [0, 80], sizes = [1, 16], strides = [1, 1]} : vector<1x256xf32> to vector<1x16xf32>
      %62 = arith.addf %58, %61 : vector<1x16xf32>
      %63 = vector.extract_strided_slice %37 {offsets = [0, 96], sizes = [1, 16], strides = [1, 1]} : vector<1x256xf32> to vector<1x16xf32>
      %64 = arith.addf %60, %63 : vector<1x16xf32>
      %65 = vector.extract_strided_slice %40 {offsets = [0, 96], sizes = [1, 16], strides = [1, 1]} : vector<1x256xf32> to vector<1x16xf32>
      %66 = arith.addf %62, %65 : vector<1x16xf32>
      %67 = vector.extract_strided_slice %37 {offsets = [0, 112], sizes = [1, 16], strides = [1, 1]} : vector<1x256xf32> to vector<1x16xf32>
      %68 = arith.addf %64, %67 : vector<1x16xf32>
      %69 = vector.extract_strided_slice %40 {offsets = [0, 112], sizes = [1, 16], strides = [1, 1]} : vector<1x256xf32> to vector<1x16xf32>
      %70 = arith.addf %66, %69 : vector<1x16xf32>
      %71 = vector.extract_strided_slice %37 {offsets = [0, 128], sizes = [1, 16], strides = [1, 1]} : vector<1x256xf32> to vector<1x16xf32>
      %72 = arith.addf %68, %71 : vector<1x16xf32>
      %73 = vector.extract_strided_slice %40 {offsets = [0, 128], sizes = [1, 16], strides = [1, 1]} : vector<1x256xf32> to vector<1x16xf32>
      %74 = arith.addf %70, %73 : vector<1x16xf32>
      %75 = vector.extract_strided_slice %37 {offsets = [0, 144], sizes = [1, 16], strides = [1, 1]} : vector<1x256xf32> to vector<1x16xf32>
      %76 = arith.addf %72, %75 : vector<1x16xf32>
      %77 = vector.extract_strided_slice %40 {offsets = [0, 144], sizes = [1, 16], strides = [1, 1]} : vector<1x256xf32> to vector<1x16xf32>
      %78 = arith.addf %74, %77 : vector<1x16xf32>
      %79 = vector.extract_strided_slice %37 {offsets = [0, 160], sizes = [1, 16], strides = [1, 1]} : vector<1x256xf32> to vector<1x16xf32>
      %80 = arith.addf %76, %79 : vector<1x16xf32>
      %81 = vector.extract_strided_slice %40 {offsets = [0, 160], sizes = [1, 16], strides = [1, 1]} : vector<1x256xf32> to vector<1x16xf32>
      %82 = arith.addf %78, %81 : vector<1x16xf32>
      %83 = vector.extract_strided_slice %37 {offsets = [0, 176], sizes = [1, 16], strides = [1, 1]} : vector<1x256xf32> to vector<1x16xf32>
      %84 = arith.addf %80, %83 : vector<1x16xf32>
      %85 = vector.extract_strided_slice %40 {offsets = [0, 176], sizes = [1, 16], strides = [1, 1]} : vector<1x256xf32> to vector<1x16xf32>
      %86 = arith.addf %82, %85 : vector<1x16xf32>
      %87 = vector.extract_strided_slice %37 {offsets = [0, 192], sizes = [1, 16], strides = [1, 1]} : vector<1x256xf32> to vector<1x16xf32>
      %88 = arith.addf %84, %87 : vector<1x16xf32>
      %89 = vector.extract_strided_slice %40 {offsets = [0, 192], sizes = [1, 16], strides = [1, 1]} : vector<1x256xf32> to vector<1x16xf32>
      %90 = arith.addf %86, %89 : vector<1x16xf32>
      %91 = vector.extract_strided_slice %37 {offsets = [0, 208], sizes = [1, 16], strides = [1, 1]} : vector<1x256xf32> to vector<1x16xf32>
      %92 = arith.addf %88, %91 : vector<1x16xf32>
      %93 = vector.extract_strided_slice %40 {offsets = [0, 208], sizes = [1, 16], strides = [1, 1]} : vector<1x256xf32> to vector<1x16xf32>
      %94 = arith.addf %90, %93 : vector<1x16xf32>
      %95 = vector.extract_strided_slice %37 {offsets = [0, 224], sizes = [1, 16], strides = [1, 1]} : vector<1x256xf32> to vector<1x16xf32>
      %96 = arith.addf %92, %95 : vector<1x16xf32>
      %97 = vector.extract_strided_slice %40 {offsets = [0, 224], sizes = [1, 16], strides = [1, 1]} : vector<1x256xf32> to vector<1x16xf32>
      %98 = arith.addf %94, %97 : vector<1x16xf32>
      %99 = vector.extract_strided_slice %37 {offsets = [0, 240], sizes = [1, 16], strides = [1, 1]} : vector<1x256xf32> to vector<1x16xf32>
      %100 = arith.addf %96, %99 : vector<1x16xf32>
      %101 = vector.extract_strided_slice %40 {offsets = [0, 240], sizes = [1, 16], strides = [1, 1]} : vector<1x256xf32> to vector<1x16xf32>
      %102 = arith.addf %98, %101 : vector<1x16xf32>
      %c0_15 = arith.constant 0 : index
      %c0_16 = arith.constant 0 : index
      %103 = vector.load %arg26[%c0_15, %c0_16] : memref<8x128xf32, #tpu.memory_space<vmem>>, vector<1x16xf32>
      %104 = arith.addf %103, %100 : vector<1x16xf32>
      %c0_17 = arith.constant 0 : index
      %c0_18 = arith.constant 0 : index
      %105 = vector.load %arg26[%c0_17, %c0_18] : memref<8x128xf32, #tpu.memory_space<vmem>>, vector<1x16xf32>
      tpu.vector_store %arg26[%c0_17, %c0_18], %104 {strides = array<i32>} : memref<8x128xf32, #tpu.memory_space<vmem>>, vector<1x16xf32>,
      %c1 = arith.constant 1 : index
      %c0_19 = arith.constant 0 : index
      %106 = vector.load %arg26[%c1, %c0_19] : memref<8x128xf32, #tpu.memory_space<vmem>>, vector<1x16xf32>
      %107 = arith.addf %106, %102 : vector<1x16xf32>
      %c1_20 = arith.constant 1 : index
      %c0_21 = arith.constant 0 : index
      %108 = vector.load %arg26[%c1_20, %c0_21] : memref<8x128xf32, #tpu.memory_space<vmem>>, vector<1x16xf32>
      tpu.vector_store %arg26[%c1_20, %c0_21], %107 {strides = array<i32>} : memref<8x128xf32, #tpu.memory_space<vmem>>, vector<1x16xf32>,
      %109 = arith.index_cast %1 : i32 to index
      %c0_22 = arith.constant 0 : index
      %110 = vector.load %arg24[%109, %c0_22] : memref<512x256xf32, #tpu.memory_space<vmem>>, vector<256x256xf32>
      tpu.vector_store %arg24[%109, %c0_22], %32 {strides = array<i32>} : memref<512x256xf32, #tpu.memory_space<vmem>>, vector<256x256xf32>,
    } else {
    }
    %c2_i32 = arith.constant 2 : i32
    %8 = arith.cmpi eq, %arg0, %c2_i32 : i32
    %9 = arith.extui %8 : i1 to i32
    %c0_i32_2 = arith.constant 0 : i32
    %10 = arith.cmpi ne, %9, %c0_i32_2 : i32
    scf.if %10 {
      %23 = arith.index_cast %1 : i32 to index
      %c0 = arith.constant 0 : index
      %24 = vector.load %arg24[%23, %c0] : memref<512x256xf32, #tpu.memory_space<vmem>>, vector<256x256xf32>
      %c0_7 = arith.constant 0 : index
      %c0_8 = arith.constant 0 : index
      %25 = vector.load %arg6[%c0_7, %c0_8] : memref<1x16xf32, #tpu.memory_space<vmem>>, vector<1x16xf32>
      %c0_9 = arith.constant 0 : index
      %c0_10 = arith.constant 0 : index
      %26 = vector.load %arg7[%c0_9, %c0_10] : memref<1x16xf32, #tpu.memory_space<vmem>>, vector<1x16xf32>
      %c0_11 = arith.constant 0 : index
      %c0_12 = arith.constant 0 : index
      %27 = vector.load %arg26[%c0_11, %c0_12] : memref<8x128xf32, #tpu.memory_space<vmem>>, vector<1x16xf32>
      %cst = arith.constant 1.22070313E-4 : f32
      %28 = vector.broadcast %cst : f32 to vector<1x16xf32>
      %29 = arith.mulf %27, %28 : vector<1x16xf32>
      %c1 = arith.constant 1 : index
      %c0_13 = arith.constant 0 : index
      %30 = vector.load %arg26[%c1, %c0_13] : memref<8x128xf32, #tpu.memory_space<vmem>>, vector<1x16xf32>
      %cst_14 = arith.constant 1.22070313E-4 : f32
      %31 = vector.broadcast %cst_14 : f32 to vector<1x16xf32>
      %32 = arith.mulf %30, %31 : vector<1x16xf32>
      %33 = arith.mulf %29, %29 : vector<1x16xf32>
      %34 = arith.subf %32, %33 : vector<1x16xf32>
      %cst_15 = arith.constant 8.000000e-01 : f32
      %35 = vector.broadcast %cst_15 : f32 to vector<1x16xf32>
      %36 = arith.addf %34, %35 : vector<1x16xf32>
      %37 = math.rsqrt %36 : vector<1x16xf32>
      %38 = arith.mulf %25, %37 : vector<1x16xf32>
      %39 = arith.mulf %29, %38 : vector<1x16xf32>
      %40 = arith.subf %26, %39 : vector<1x16xf32>
      %41 = tpu.concatenate %38, %38, %38, %38, %38, %38, %38, %38, %38, %38, %38, %38, %38, %38, %38, %38 in 1 : vector<1x16xf32>, vector<1x16xf32>, vector<1x16xf32>, vector<1x16xf32>, vector<1x16xf32>, vector<1x16xf32>, vector<1x16xf32>, vector<1x16xf32>, vector<1x16xf32>, vector<1x16xf32>, vector<1x16xf32>, vector<1x16xf32>, vector<1x16xf32>, vector<1x16xf32>, vector<1x16xf32>, vector<1x16xf32> -> vector<1x256xf32>
      %42 = tpu.concatenate %40, %40, %40, %40, %40, %40, %40, %40, %40, %40, %40, %40, %40, %40, %40, %40 in 1 : vector<1x16xf32>, vector<1x16xf32>, vector<1x16xf32>, vector<1x16xf32>, vector<1x16xf32>, vector<1x16xf32>, vector<1x16xf32>, vector<1x16xf32>, vector<1x16xf32>, vector<1x16xf32>, vector<1x16xf32>, vector<1x16xf32>, vector<1x16xf32>, vector<1x16xf32>, vector<1x16xf32>, vector<1x16xf32> -> vector<1x256xf32>
      %43 = vector.broadcast %41 : vector<1x256xf32> to vector<256x256xf32>
      %44 = arith.mulf %24, %43 : vector<256x256xf32>
      %45 = vector.broadcast %42 : vector<1x256xf32> to vector<256x256xf32>
      %46 = arith.addf %44, %45 : vector<256x256xf32>
      %cst_16 = arith.constant 0.000000e+00 : f32
      %47 = vector.broadcast %cst_16 : f32 to vector<256x256xf32>
      %48 = arith.cmpf oge, %46, %47 : vector<256x256xf32>
      %cst_17 = arith.constant 2.000000e-01 : f32
      %49 = vector.broadcast %cst_17 : f32 to vector<256x256xf32>
      %50 = arith.mulf %49, %46 : vector<256x256xf32>
      %51 = arith.select %48, %46, %50 : vector<256x256xi1>, vector<256x256xf32>
      %52 = arith.truncf %51 : vector<256x256xf32> to vector<256x256xbf16>
      %c0_18 = arith.constant 0 : index
      %c0_19 = arith.constant 0 : index
      %53 = vector.load %arg8[%c0_18, %c0_19] : memref<256x128xbf16, #tpu.memory_space<vmem>>, vector<256x128xbf16>
      %cst_20 = arith.constant dense<0.000000e+00> : vector<256x128xf32>
      %54 = tpu.matmul %52, %53, %cst_20 {dimension_numbers = #tpu.dot_dimension_numbers<[1], [0], [0], [1], [0, 0, 1, 1], [], []>} : vector<256x256xbf16>, vector<256x128xbf16>, vector<256x128xf32> -> vector<256x128xf32>
      %c0_i32_21 = arith.constant 0 : i32
      %55 = arith.cmpi eq, %arg1, %c0_i32_21 : i32
      %56 = arith.extui %55 : i1 to i32
      %c0_i32_22 = arith.constant 0 : i32
      %57 = arith.cmpi ne, %56, %c0_i32_22 : i32
      scf.if %57 {
        %cst_34 = arith.constant 0.000000e+00 : f32
        %85 = vector.broadcast %cst_34 : f32 to vector<8x128xf32>
        %c0_35 = arith.constant 0 : index
        %c0_36 = arith.constant 0 : index
        %86 = vector.load %arg25[%c0_35, %c0_36] : memref<8x128xf32, #tpu.memory_space<vmem>>, vector<8x128xf32>
        tpu.vector_store %arg25[%c0_35, %c0_36], %85 {strides = array<i32>} : memref<8x128xf32, #tpu.memory_space<vmem>>, vector<8x128xf32>,
      } else {
      }
      %cst_23 = arith.constant dense<0.000000e+00> : vector<128xf32>
      %58 = vector.multi_reduction <add>, %54, %cst_23 [0] : vector<256x128xf32> to vector<128xf32>
      %59 = vector.shape_cast %58 : vector<128xf32> to vector<1x128xf32>
      %60 = arith.mulf %54, %54 : vector<256x128xf32>
      %cst_24 = arith.constant dense<0.000000e+00> : vector<128xf32>
      %61 = vector.multi_reduction <add>, %60, %cst_24 [0] : vector<256x128xf32> to vector<128xf32>
      %62 = vector.shape_cast %61 : vector<128xf32> to vector<1x128xf32>
      %63 = vector.extract_strided_slice %59 {offsets = [0, 0], sizes = [1, 32], strides = [1, 1]} : vector<1x128xf32> to vector<1x32xf32>
      %64 = vector.extract_strided_slice %62 {offsets = [0, 0], sizes = [1, 32], strides = [1, 1]} : vector<1x128xf32> to vector<1x32xf32>
      %65 = vector.extract_strided_slice %59 {offsets = [0, 32], sizes = [1, 32], strides = [1, 1]} : vector<1x128xf32> to vector<1x32xf32>
      %66 = arith.addf %63, %65 : vector<1x32xf32>
      %67 = vector.extract_strided_slice %62 {offsets = [0, 32], sizes = [1, 32], strides = [1, 1]} : vector<1x128xf32> to vector<1x32xf32>
      %68 = arith.addf %64, %67 : vector<1x32xf32>
      %69 = vector.extract_strided_slice %59 {offsets = [0, 64], sizes = [1, 32], strides = [1, 1]} : vector<1x128xf32> to vector<1x32xf32>
      %70 = arith.addf %66, %69 : vector<1x32xf32>
      %71 = vector.extract_strided_slice %62 {offsets = [0, 64], sizes = [1, 32], strides = [1, 1]} : vector<1x128xf32> to vector<1x32xf32>
      %72 = arith.addf %68, %71 : vector<1x32xf32>
      %73 = vector.extract_strided_slice %59 {offsets = [0, 96], sizes = [1, 32], strides = [1, 1]} : vector<1x128xf32> to vector<1x32xf32>
      %74 = arith.addf %70, %73 : vector<1x32xf32>
      %75 = vector.extract_strided_slice %62 {offsets = [0, 96], sizes = [1, 32], strides = [1, 1]} : vector<1x128xf32> to vector<1x32xf32>
      %76 = arith.addf %72, %75 : vector<1x32xf32>
      %c0_25 = arith.constant 0 : index
      %c0_26 = arith.constant 0 : index
      %77 = vector.load %arg25[%c0_25, %c0_26] : memref<8x128xf32, #tpu.memory_space<vmem>>, vector<1x32xf32>
      %78 = arith.addf %77, %74 : vector<1x32xf32>
      %c0_27 = arith.constant 0 : index
      %c0_28 = arith.constant 0 : index
      %79 = vector.load %arg25[%c0_27, %c0_28] : memref<8x128xf32, #tpu.memory_space<vmem>>, vector<1x32xf32>
      tpu.vector_store %arg25[%c0_27, %c0_28], %78 {strides = array<i32>} : memref<8x128xf32, #tpu.memory_space<vmem>>, vector<1x32xf32>,
      %c1_29 = arith.constant 1 : index
      %c0_30 = arith.constant 0 : index
      %80 = vector.load %arg25[%c1_29, %c0_30] : memref<8x128xf32, #tpu.memory_space<vmem>>, vector<1x32xf32>
      %81 = arith.addf %80, %76 : vector<1x32xf32>
      %c1_31 = arith.constant 1 : index
      %c0_32 = arith.constant 0 : index
      %82 = vector.load %arg25[%c1_31, %c0_32] : memref<8x128xf32, #tpu.memory_space<vmem>>, vector<1x32xf32>
      tpu.vector_store %arg25[%c1_31, %c0_32], %81 {strides = array<i32>} : memref<8x128xf32, #tpu.memory_space<vmem>>, vector<1x32xf32>,
      %83 = arith.index_cast %1 : i32 to index
      %c0_33 = arith.constant 0 : index
      %84 = vector.load %arg23[%83, %c0_33] : memref<512x512xf32, #tpu.memory_space<vmem>>, vector<256x128xf32>
      tpu.vector_store %arg23[%83, %c0_33], %54 {strides = array<i32>} : memref<512x512xf32, #tpu.memory_space<vmem>>, vector<256x128xf32>,
    } else {
    }
    %c3_i32 = arith.constant 3 : i32
    %11 = arith.cmpi eq, %arg0, %c3_i32 : i32
    %12 = arith.extui %11 : i1 to i32
    %c0_i32_3 = arith.constant 0 : i32
    %13 = arith.cmpi ne, %12, %c0_i32_3 : i32
    scf.if %13 {
      %23 = arith.index_cast %1 : i32 to index
      %c0 = arith.constant 0 : index
      %24 = vector.load %arg23[%23, %c0] : memref<512x512xf32, #tpu.memory_space<vmem>>, vector<256x128xf32>
      %c0_7 = arith.constant 0 : index
      %c0_8 = arith.constant 0 : index
      %25 = vector.load %arg9[%c0_7, %c0_8] : memref<1x32xf32, #tpu.memory_space<vmem>>, vector<1x32xf32>
      %c0_9 = arith.constant 0 : index
      %c0_10 = arith.constant 0 : index
      %26 = vector.load %arg10[%c0_9, %c0_10] : memref<1x32xf32, #tpu.memory_space<vmem>>, vector<1x32xf32>
      %c0_11 = arith.constant 0 : index
      %c0_12 = arith.constant 0 : index
      %27 = vector.load %arg25[%c0_11, %c0_12] : memref<8x128xf32, #tpu.memory_space<vmem>>, vector<1x32xf32>
      %cst = arith.constant 4.8828125E-4 : f32
      %28 = vector.broadcast %cst : f32 to vector<1x32xf32>
      %29 = arith.mulf %27, %28 : vector<1x32xf32>
      %c1 = arith.constant 1 : index
      %c0_13 = arith.constant 0 : index
      %30 = vector.load %arg25[%c1, %c0_13] : memref<8x128xf32, #tpu.memory_space<vmem>>, vector<1x32xf32>
      %cst_14 = arith.constant 4.8828125E-4 : f32
      %31 = vector.broadcast %cst_14 : f32 to vector<1x32xf32>
      %32 = arith.mulf %30, %31 : vector<1x32xf32>
      %33 = arith.mulf %29, %29 : vector<1x32xf32>
      %34 = arith.subf %32, %33 : vector<1x32xf32>
      %cst_15 = arith.constant 8.000000e-01 : f32
      %35 = vector.broadcast %cst_15 : f32 to vector<1x32xf32>
      %36 = arith.addf %34, %35 : vector<1x32xf32>
      %37 = math.rsqrt %36 : vector<1x32xf32>
      %38 = arith.mulf %25, %37 : vector<1x32xf32>
      %39 = arith.mulf %29, %38 : vector<1x32xf32>
      %40 = arith.subf %26, %39 : vector<1x32xf32>
      %41 = tpu.concatenate %38, %38, %38, %38 in 1 : vector<1x32xf32>, vector<1x32xf32>, vector<1x32xf32>, vector<1x32xf32> -> vector<1x128xf32>
      %42 = tpu.concatenate %40, %40, %40, %40 in 1 : vector<1x32xf32>, vector<1x32xf32>, vector<1x32xf32>, vector<1x32xf32> -> vector<1x128xf32>
      %43 = vector.broadcast %41 : vector<1x128xf32> to vector<256x128xf32>
      %44 = arith.mulf %24, %43 : vector<256x128xf32>
      %45 = vector.broadcast %42 : vector<1x128xf32> to vector<256x128xf32>
      %46 = arith.addf %44, %45 : vector<256x128xf32>
      %cst_16 = arith.constant 0.000000e+00 : f32
      %47 = vector.broadcast %cst_16 : f32 to vector<256x128xf32>
      %48 = arith.cmpf oge, %46, %47 : vector<256x128xf32>
      %cst_17 = arith.constant 2.000000e-01 : f32
      %49 = vector.broadcast %cst_17 : f32 to vector<256x128xf32>
      %50 = arith.mulf %49, %46 : vector<256x128xf32>
      %51 = arith.select %48, %46, %50 : vector<256x128xi1>, vector<256x128xf32>
      %52 = arith.truncf %51 : vector<256x128xf32> to vector<256x128xbf16>
      %c0_18 = arith.constant 0 : index
      %c0_19 = arith.constant 0 : index
      %53 = vector.load %arg11[%c0_18, %c0_19] : memref<128x128xbf16, #tpu.memory_space<vmem>>, vector<128x128xbf16>
      %cst_20 = arith.constant dense<0.000000e+00> : vector<256x128xf32>
      %54 = tpu.matmul %52, %53, %cst_20 {dimension_numbers = #tpu.dot_dimension_numbers<[1], [0], [0], [1], [0, 0, 1, 1], [], []>} : vector<256x128xbf16>, vector<128x128xbf16>, vector<256x128xf32> -> vector<256x128xf32>
      %c0_i32_21 = arith.constant 0 : i32
      %55 = arith.cmpi eq, %arg1, %c0_i32_21 : i32
      %56 = arith.extui %55 : i1 to i32
      %c0_i32_22 = arith.constant 0 : i32
      %57 = arith.cmpi ne, %56, %c0_i32_22 : i32
      scf.if %57 {
        %cst_34 = arith.constant 0.000000e+00 : f32
        %71 = vector.broadcast %cst_34 : f32 to vector<8x128xf32>
        %c0_35 = arith.constant 0 : index
        %c0_36 = arith.constant 0 : index
        %72 = vector.load %arg26[%c0_35, %c0_36] : memref<8x128xf32, #tpu.memory_space<vmem>>, vector<8x128xf32>
        tpu.vector_store %arg26[%c0_35, %c0_36], %71 {strides = array<i32>} : memref<8x128xf32, #tpu.memory_space<vmem>>, vector<8x128xf32>,
      } else {
      }
      %cst_23 = arith.constant dense<0.000000e+00> : vector<128xf32>
      %58 = vector.multi_reduction <add>, %54, %cst_23 [0] : vector<256x128xf32> to vector<128xf32>
      %59 = vector.shape_cast %58 : vector<128xf32> to vector<1x128xf32>
      %60 = arith.mulf %54, %54 : vector<256x128xf32>
      %cst_24 = arith.constant dense<0.000000e+00> : vector<128xf32>
      %61 = vector.multi_reduction <add>, %60, %cst_24 [0] : vector<256x128xf32> to vector<128xf32>
      %62 = vector.shape_cast %61 : vector<128xf32> to vector<1x128xf32>
      %c0_25 = arith.constant 0 : index
      %c0_26 = arith.constant 0 : index
      %63 = vector.load %arg26[%c0_25, %c0_26] : memref<8x128xf32, #tpu.memory_space<vmem>>, vector<1x128xf32>
      %64 = arith.addf %63, %59 : vector<1x128xf32>
      %c0_27 = arith.constant 0 : index
      %c0_28 = arith.constant 0 : index
      %65 = vector.load %arg26[%c0_27, %c0_28] : memref<8x128xf32, #tpu.memory_space<vmem>>, vector<1x128xf32>
      tpu.vector_store %arg26[%c0_27, %c0_28], %64 {strides = array<i32>} : memref<8x128xf32, #tpu.memory_space<vmem>>, vector<1x128xf32>,
      %c1_29 = arith.constant 1 : index
      %c0_30 = arith.constant 0 : index
      %66 = vector.load %arg26[%c1_29, %c0_30] : memref<8x128xf32, #tpu.memory_space<vmem>>, vector<1x128xf32>
      %67 = arith.addf %66, %62 : vector<1x128xf32>
      %c1_31 = arith.constant 1 : index
      %c0_32 = arith.constant 0 : index
      %68 = vector.load %arg26[%c1_31, %c0_32] : memref<8x128xf32, #tpu.memory_space<vmem>>, vector<1x128xf32>
      tpu.vector_store %arg26[%c1_31, %c0_32], %67 {strides = array<i32>} : memref<8x128xf32, #tpu.memory_space<vmem>>, vector<1x128xf32>,
      %69 = arith.index_cast %1 : i32 to index
      %c0_33 = arith.constant 0 : index
      %70 = vector.load %arg24[%69, %c0_33] : memref<512x256xf32, #tpu.memory_space<vmem>>, vector<256x128xf32>
      tpu.vector_store %arg24[%69, %c0_33], %54 {strides = array<i32>} : memref<512x256xf32, #tpu.memory_space<vmem>>, vector<256x128xf32>,
    } else {
    }
    %c4_i32 = arith.constant 4 : i32
    %14 = arith.cmpi eq, %arg0, %c4_i32 : i32
    %15 = arith.extui %14 : i1 to i32
    %c0_i32_4 = arith.constant 0 : i32
    %16 = arith.cmpi ne, %15, %c0_i32_4 : i32
    scf.if %16 {
      %23 = arith.index_cast %1 : i32 to index
      %c0 = arith.constant 0 : index
      %24 = vector.load %arg24[%23, %c0] : memref<512x256xf32, #tpu.memory_space<vmem>>, vector<256x128xf32>
      %c0_7 = arith.constant 0 : index
      %c0_8 = arith.constant 0 : index
      %25 = vector.load %arg12[%c0_7, %c0_8] : memref<1x128xf32, #tpu.memory_space<vmem>>, vector<1x128xf32>
      %c0_9 = arith.constant 0 : index
      %c0_10 = arith.constant 0 : index
      %26 = vector.load %arg13[%c0_9, %c0_10] : memref<1x128xf32, #tpu.memory_space<vmem>>, vector<1x128xf32>
      %c0_11 = arith.constant 0 : index
      %c0_12 = arith.constant 0 : index
      %27 = vector.load %arg26[%c0_11, %c0_12] : memref<8x128xf32, #tpu.memory_space<vmem>>, vector<1x128xf32>
      %cst = arith.constant 0.001953125 : f32
      %28 = vector.broadcast %cst : f32 to vector<1x128xf32>
      %29 = arith.mulf %27, %28 : vector<1x128xf32>
      %c1 = arith.constant 1 : index
      %c0_13 = arith.constant 0 : index
      %30 = vector.load %arg26[%c1, %c0_13] : memref<8x128xf32, #tpu.memory_space<vmem>>, vector<1x128xf32>
      %cst_14 = arith.constant 0.001953125 : f32
      %31 = vector.broadcast %cst_14 : f32 to vector<1x128xf32>
      %32 = arith.mulf %30, %31 : vector<1x128xf32>
      %33 = arith.mulf %29, %29 : vector<1x128xf32>
      %34 = arith.subf %32, %33 : vector<1x128xf32>
      %cst_15 = arith.constant 8.000000e-01 : f32
      %35 = vector.broadcast %cst_15 : f32 to vector<1x128xf32>
      %36 = arith.addf %34, %35 : vector<1x128xf32>
      %37 = math.rsqrt %36 : vector<1x128xf32>
      %38 = arith.mulf %25, %37 : vector<1x128xf32>
      %39 = arith.mulf %29, %38 : vector<1x128xf32>
      %40 = arith.subf %26, %39 : vector<1x128xf32>
      %41 = vector.broadcast %38 : vector<1x128xf32> to vector<256x128xf32>
      %42 = arith.mulf %24, %41 : vector<256x128xf32>
      %43 = vector.broadcast %40 : vector<1x128xf32> to vector<256x128xf32>
      %44 = arith.addf %42, %43 : vector<256x128xf32>
      %cst_16 = arith.constant 0.000000e+00 : f32
      %45 = vector.broadcast %cst_16 : f32 to vector<256x128xf32>
      %46 = arith.cmpf oge, %44, %45 : vector<256x128xf32>
      %cst_17 = arith.constant 2.000000e-01 : f32
      %47 = vector.broadcast %cst_17 : f32 to vector<256x128xf32>
      %48 = arith.mulf %47, %44 : vector<256x128xf32>
      %49 = arith.select %46, %44, %48 : vector<256x128xi1>, vector<256x128xf32>
      %50 = arith.truncf %49 : vector<256x128xf32> to vector<256x128xbf16>
      %c0_18 = arith.constant 0 : index
      %c0_19 = arith.constant 0 : index
      %51 = vector.load %arg14[%c0_18, %c0_19] : memref<128x128xbf16, #tpu.memory_space<vmem>>, vector<128x128xbf16>
      %cst_20 = arith.constant dense<0.000000e+00> : vector<256x128xf32>
      %52 = tpu.matmul %50, %51, %cst_20 {dimension_numbers = #tpu.dot_dimension_numbers<[1], [0], [0], [1], [0, 0, 1, 1], [], []>} : vector<256x128xbf16>, vector<128x128xbf16>, vector<256x128xf32> -> vector<256x128xf32>
      %c0_i32_21 = arith.constant 0 : i32
      %53 = arith.cmpi eq, %arg1, %c0_i32_21 : i32
      %54 = arith.extui %53 : i1 to i32
      %c0_i32_22 = arith.constant 0 : i32
      %55 = arith.cmpi ne, %54, %c0_i32_22 : i32
      scf.if %55 {
        %cst_34 = arith.constant 0.000000e+00 : f32
        %83 = vector.broadcast %cst_34 : f32 to vector<8x128xf32>
        %c0_35 = arith.constant 0 : index
        %c0_36 = arith.constant 0 : index
        %84 = vector.load %arg25[%c0_35, %c0_36] : memref<8x128xf32, #tpu.memory_space<vmem>>, vector<8x128xf32>
        tpu.vector_store %arg25[%c0_35, %c0_36], %83 {strides = array<i32>} : memref<8x128xf32, #tpu.memory_space<vmem>>, vector<8x128xf32>,
      } else {
      }
      %cst_23 = arith.constant dense<0.000000e+00> : vector<128xf32>
      %56 = vector.multi_reduction <add>, %52, %cst_23 [0] : vector<256x128xf32> to vector<128xf32>
      %57 = vector.shape_cast %56 : vector<128xf32> to vector<1x128xf32>
      %58 = arith.mulf %52, %52 : vector<256x128xf32>
      %cst_24 = arith.constant dense<0.000000e+00> : vector<128xf32>
      %59 = vector.multi_reduction <add>, %58, %cst_24 [0] : vector<256x128xf32> to vector<128xf32>
      %60 = vector.shape_cast %59 : vector<128xf32> to vector<1x128xf32>
      %61 = vector.extract_strided_slice %57 {offsets = [0, 0], sizes = [1, 32], strides = [1, 1]} : vector<1x128xf32> to vector<1x32xf32>
      %62 = vector.extract_strided_slice %60 {offsets = [0, 0], sizes = [1, 32], strides = [1, 1]} : vector<1x128xf32> to vector<1x32xf32>
      %63 = vector.extract_strided_slice %57 {offsets = [0, 32], sizes = [1, 32], strides = [1, 1]} : vector<1x128xf32> to vector<1x32xf32>
      %64 = arith.addf %61, %63 : vector<1x32xf32>
      %65 = vector.extract_strided_slice %60 {offsets = [0, 32], sizes = [1, 32], strides = [1, 1]} : vector<1x128xf32> to vector<1x32xf32>
      %66 = arith.addf %62, %65 : vector<1x32xf32>
      %67 = vector.extract_strided_slice %57 {offsets = [0, 64], sizes = [1, 32], strides = [1, 1]} : vector<1x128xf32> to vector<1x32xf32>
      %68 = arith.addf %64, %67 : vector<1x32xf32>
      %69 = vector.extract_strided_slice %60 {offsets = [0, 64], sizes = [1, 32], strides = [1, 1]} : vector<1x128xf32> to vector<1x32xf32>
      %70 = arith.addf %66, %69 : vector<1x32xf32>
      %71 = vector.extract_strided_slice %57 {offsets = [0, 96], sizes = [1, 32], strides = [1, 1]} : vector<1x128xf32> to vector<1x32xf32>
      %72 = arith.addf %68, %71 : vector<1x32xf32>
      %73 = vector.extract_strided_slice %60 {offsets = [0, 96], sizes = [1, 32], strides = [1, 1]} : vector<1x128xf32> to vector<1x32xf32>
      %74 = arith.addf %70, %73 : vector<1x32xf32>
      %c0_25 = arith.constant 0 : index
      %c0_26 = arith.constant 0 : index
      %75 = vector.load %arg25[%c0_25, %c0_26] : memref<8x128xf32, #tpu.memory_space<vmem>>, vector<1x32xf32>
      %76 = arith.addf %75, %72 : vector<1x32xf32>
      %c0_27 = arith.constant 0 : index
      %c0_28 = arith.constant 0 : index
      %77 = vector.load %arg25[%c0_27, %c0_28] : memref<8x128xf32, #tpu.memory_space<vmem>>, vector<1x32xf32>
      tpu.vector_store %arg25[%c0_27, %c0_28], %76 {strides = array<i32>} : memref<8x128xf32, #tpu.memory_space<vmem>>, vector<1x32xf32>,
      %c1_29 = arith.constant 1 : index
      %c0_30 = arith.constant 0 : index
      %78 = vector.load %arg25[%c1_29, %c0_30] : memref<8x128xf32, #tpu.memory_space<vmem>>, vector<1x32xf32>
      %79 = arith.addf %78, %74 : vector<1x32xf32>
      %c1_31 = arith.constant 1 : index
      %c0_32 = arith.constant 0 : index
      %80 = vector.load %arg25[%c1_31, %c0_32] : memref<8x128xf32, #tpu.memory_space<vmem>>, vector<1x32xf32>
      tpu.vector_store %arg25[%c1_31, %c0_32], %79 {strides = array<i32>} : memref<8x128xf32, #tpu.memory_space<vmem>>, vector<1x32xf32>,
      %81 = arith.index_cast %1 : i32 to index
      %c0_33 = arith.constant 0 : index
      %82 = vector.load %arg23[%81, %c0_33] : memref<512x512xf32, #tpu.memory_space<vmem>>, vector<256x128xf32>
      tpu.vector_store %arg23[%81, %c0_33], %52 {strides = array<i32>} : memref<512x512xf32, #tpu.memory_space<vmem>>, vector<256x128xf32>,
    } else {
    }
    %c5_i32 = arith.constant 5 : i32
    %17 = arith.cmpi eq, %arg0, %c5_i32 : i32
    %18 = arith.extui %17 : i1 to i32
    %c0_i32_5 = arith.constant 0 : i32
    %19 = arith.cmpi ne, %18, %c0_i32_5 : i32
    scf.if %19 {
      %23 = arith.index_cast %1 : i32 to index
      %c0 = arith.constant 0 : index
      %24 = vector.load %arg23[%23, %c0] : memref<512x512xf32, #tpu.memory_space<vmem>>, vector<256x128xf32>
      %c0_7 = arith.constant 0 : index
      %c0_8 = arith.constant 0 : index
      %25 = vector.load %arg15[%c0_7, %c0_8] : memref<1x32xf32, #tpu.memory_space<vmem>>, vector<1x32xf32>
      %c0_9 = arith.constant 0 : index
      %c0_10 = arith.constant 0 : index
      %26 = vector.load %arg16[%c0_9, %c0_10] : memref<1x32xf32, #tpu.memory_space<vmem>>, vector<1x32xf32>
      %c0_11 = arith.constant 0 : index
      %c0_12 = arith.constant 0 : index
      %27 = vector.load %arg25[%c0_11, %c0_12] : memref<8x128xf32, #tpu.memory_space<vmem>>, vector<1x32xf32>
      %cst = arith.constant 4.8828125E-4 : f32
      %28 = vector.broadcast %cst : f32 to vector<1x32xf32>
      %29 = arith.mulf %27, %28 : vector<1x32xf32>
      %c1 = arith.constant 1 : index
      %c0_13 = arith.constant 0 : index
      %30 = vector.load %arg25[%c1, %c0_13] : memref<8x128xf32, #tpu.memory_space<vmem>>, vector<1x32xf32>
      %cst_14 = arith.constant 4.8828125E-4 : f32
      %31 = vector.broadcast %cst_14 : f32 to vector<1x32xf32>
      %32 = arith.mulf %30, %31 : vector<1x32xf32>
      %33 = arith.mulf %29, %29 : vector<1x32xf32>
      %34 = arith.subf %32, %33 : vector<1x32xf32>
      %cst_15 = arith.constant 8.000000e-01 : f32
      %35 = vector.broadcast %cst_15 : f32 to vector<1x32xf32>
      %36 = arith.addf %34, %35 : vector<1x32xf32>
      %37 = math.rsqrt %36 : vector<1x32xf32>
      %38 = arith.mulf %25, %37 : vector<1x32xf32>
      %39 = arith.mulf %29, %38 : vector<1x32xf32>
      %40 = arith.subf %26, %39 : vector<1x32xf32>
      %41 = tpu.concatenate %38, %38, %38, %38 in 1 : vector<1x32xf32>, vector<1x32xf32>, vector<1x32xf32>, vector<1x32xf32> -> vector<1x128xf32>
      %42 = tpu.concatenate %40, %40, %40, %40 in 1 : vector<1x32xf32>, vector<1x32xf32>, vector<1x32xf32>, vector<1x32xf32> -> vector<1x128xf32>
      %43 = vector.broadcast %41 : vector<1x128xf32> to vector<256x128xf32>
      %44 = arith.mulf %24, %43 : vector<256x128xf32>
      %45 = vector.broadcast %42 : vector<1x128xf32> to vector<256x128xf32>
      %46 = arith.addf %44, %45 : vector<256x128xf32>
      %cst_16 = arith.constant 0.000000e+00 : f32
      %47 = vector.broadcast %cst_16 : f32 to vector<256x128xf32>
      %48 = arith.cmpf oge, %46, %47 : vector<256x128xf32>
      %cst_17 = arith.constant 2.000000e-01 : f32
      %49 = vector.broadcast %cst_17 : f32 to vector<256x128xf32>
      %50 = arith.mulf %49, %46 : vector<256x128xf32>
      %51 = arith.select %48, %46, %50 : vector<256x128xi1>, vector<256x128xf32>
      %52 = arith.truncf %51 : vector<256x128xf32> to vector<256x128xbf16>
      %c0_18 = arith.constant 0 : index
      %c0_19 = arith.constant 0 : index
      %53 = vector.load %arg17[%c0_18, %c0_19] : memref<128x256xbf16, #tpu.memory_space<vmem>>, vector<128x256xbf16>
      %cst_20 = arith.constant dense<0.000000e+00> : vector<256x256xf32>
      %54 = tpu.matmul %52, %53, %cst_20 {dimension_numbers = #tpu.dot_dimension_numbers<[1], [0], [0], [1], [0, 0, 1, 1], [], []>} : vector<256x128xbf16>, vector<128x256xbf16>, vector<256x256xf32> -> vector<256x256xf32>
      %c0_i32_21 = arith.constant 0 : i32
      %55 = arith.cmpi eq, %arg1, %c0_i32_21 : i32
      %56 = arith.extui %55 : i1 to i32
      %c0_i32_22 = arith.constant 0 : i32
      %57 = arith.cmpi ne, %56, %c0_i32_22 : i32
      scf.if %57 {
        %cst_34 = arith.constant 0.000000e+00 : f32
        %133 = vector.broadcast %cst_34 : f32 to vector<8x128xf32>
        %c0_35 = arith.constant 0 : index
        %c0_36 = arith.constant 0 : index
        %134 = vector.load %arg26[%c0_35, %c0_36] : memref<8x128xf32, #tpu.memory_space<vmem>>, vector<8x128xf32>
        tpu.vector_store %arg26[%c0_35, %c0_36], %133 {strides = array<i32>} : memref<8x128xf32, #tpu.memory_space<vmem>>, vector<8x128xf32>,
      } else {
      }
      %cst_23 = arith.constant dense<0.000000e+00> : vector<256xf32>
      %58 = vector.multi_reduction <add>, %54, %cst_23 [0] : vector<256x256xf32> to vector<256xf32>
      %59 = vector.shape_cast %58 : vector<256xf32> to vector<1x256xf32>
      %60 = arith.mulf %54, %54 : vector<256x256xf32>
      %cst_24 = arith.constant dense<0.000000e+00> : vector<256xf32>
      %61 = vector.multi_reduction <add>, %60, %cst_24 [0] : vector<256x256xf32> to vector<256xf32>
      %62 = vector.shape_cast %61 : vector<256xf32> to vector<1x256xf32>
      %63 = vector.extract_strided_slice %59 {offsets = [0, 0], sizes = [1, 16], strides = [1, 1]} : vector<1x256xf32> to vector<1x16xf32>
      %64 = vector.extract_strided_slice %62 {offsets = [0, 0], sizes = [1, 16], strides = [1, 1]} : vector<1x256xf32> to vector<1x16xf32>
      %65 = vector.extract_strided_slice %59 {offsets = [0, 16], sizes = [1, 16], strides = [1, 1]} : vector<1x256xf32> to vector<1x16xf32>
      %66 = arith.addf %63, %65 : vector<1x16xf32>
      %67 = vector.extract_strided_slice %62 {offsets = [0, 16], sizes = [1, 16], strides = [1, 1]} : vector<1x256xf32> to vector<1x16xf32>
      %68 = arith.addf %64, %67 : vector<1x16xf32>
      %69 = vector.extract_strided_slice %59 {offsets = [0, 32], sizes = [1, 16], strides = [1, 1]} : vector<1x256xf32> to vector<1x16xf32>
      %70 = arith.addf %66, %69 : vector<1x16xf32>
      %71 = vector.extract_strided_slice %62 {offsets = [0, 32], sizes = [1, 16], strides = [1, 1]} : vector<1x256xf32> to vector<1x16xf32>
      %72 = arith.addf %68, %71 : vector<1x16xf32>
      %73 = vector.extract_strided_slice %59 {offsets = [0, 48], sizes = [1, 16], strides = [1, 1]} : vector<1x256xf32> to vector<1x16xf32>
      %74 = arith.addf %70, %73 : vector<1x16xf32>
      %75 = vector.extract_strided_slice %62 {offsets = [0, 48], sizes = [1, 16], strides = [1, 1]} : vector<1x256xf32> to vector<1x16xf32>
      %76 = arith.addf %72, %75 : vector<1x16xf32>
      %77 = vector.extract_strided_slice %59 {offsets = [0, 64], sizes = [1, 16], strides = [1, 1]} : vector<1x256xf32> to vector<1x16xf32>
      %78 = arith.addf %74, %77 : vector<1x16xf32>
      %79 = vector.extract_strided_slice %62 {offsets = [0, 64], sizes = [1, 16], strides = [1, 1]} : vector<1x256xf32> to vector<1x16xf32>
      %80 = arith.addf %76, %79 : vector<1x16xf32>
      %81 = vector.extract_strided_slice %59 {offsets = [0, 80], sizes = [1, 16], strides = [1, 1]} : vector<1x256xf32> to vector<1x16xf32>
      %82 = arith.addf %78, %81 : vector<1x16xf32>
      %83 = vector.extract_strided_slice %62 {offsets = [0, 80], sizes = [1, 16], strides = [1, 1]} : vector<1x256xf32> to vector<1x16xf32>
      %84 = arith.addf %80, %83 : vector<1x16xf32>
      %85 = vector.extract_strided_slice %59 {offsets = [0, 96], sizes = [1, 16], strides = [1, 1]} : vector<1x256xf32> to vector<1x16xf32>
      %86 = arith.addf %82, %85 : vector<1x16xf32>
      %87 = vector.extract_strided_slice %62 {offsets = [0, 96], sizes = [1, 16], strides = [1, 1]} : vector<1x256xf32> to vector<1x16xf32>
      %88 = arith.addf %84, %87 : vector<1x16xf32>
      %89 = vector.extract_strided_slice %59 {offsets = [0, 112], sizes = [1, 16], strides = [1, 1]} : vector<1x256xf32> to vector<1x16xf32>
      %90 = arith.addf %86, %89 : vector<1x16xf32>
      %91 = vector.extract_strided_slice %62 {offsets = [0, 112], sizes = [1, 16], strides = [1, 1]} : vector<1x256xf32> to vector<1x16xf32>
      %92 = arith.addf %88, %91 : vector<1x16xf32>
      %93 = vector.extract_strided_slice %59 {offsets = [0, 128], sizes = [1, 16], strides = [1, 1]} : vector<1x256xf32> to vector<1x16xf32>
      %94 = arith.addf %90, %93 : vector<1x16xf32>
      %95 = vector.extract_strided_slice %62 {offsets = [0, 128], sizes = [1, 16], strides = [1, 1]} : vector<1x256xf32> to vector<1x16xf32>
      %96 = arith.addf %92, %95 : vector<1x16xf32>
      %97 = vector.extract_strided_slice %59 {offsets = [0, 144], sizes = [1, 16], strides = [1, 1]} : vector<1x256xf32> to vector<1x16xf32>
      %98 = arith.addf %94, %97 : vector<1x16xf32>
      %99 = vector.extract_strided_slice %62 {offsets = [0, 144], sizes = [1, 16], strides = [1, 1]} : vector<1x256xf32> to vector<1x16xf32>
      %100 = arith.addf %96, %99 : vector<1x16xf32>
      %101 = vector.extract_strided_slice %59 {offsets = [0, 160], sizes = [1, 16], strides = [1, 1]} : vector<1x256xf32> to vector<1x16xf32>
      %102 = arith.addf %98, %101 : vector<1x16xf32>
      %103 = vector.extract_strided_slice %62 {offsets = [0, 160], sizes = [1, 16], strides = [1, 1]} : vector<1x256xf32> to vector<1x16xf32>
      %104 = arith.addf %100, %103 : vector<1x16xf32>
      %105 = vector.extract_strided_slice %59 {offsets = [0, 176], sizes = [1, 16], strides = [1, 1]} : vector<1x256xf32> to vector<1x16xf32>
      %106 = arith.addf %102, %105 : vector<1x16xf32>
      %107 = vector.extract_strided_slice %62 {offsets = [0, 176], sizes = [1, 16], strides = [1, 1]} : vector<1x256xf32> to vector<1x16xf32>
      %108 = arith.addf %104, %107 : vector<1x16xf32>
      %109 = vector.extract_strided_slice %59 {offsets = [0, 192], sizes = [1, 16], strides = [1, 1]} : vector<1x256xf32> to vector<1x16xf32>
      %110 = arith.addf %106, %109 : vector<1x16xf32>
      %111 = vector.extract_strided_slice %62 {offsets = [0, 192], sizes = [1, 16], strides = [1, 1]} : vector<1x256xf32> to vector<1x16xf32>
      %112 = arith.addf %108, %111 : vector<1x16xf32>
      %113 = vector.extract_strided_slice %59 {offsets = [0, 208], sizes = [1, 16], strides = [1, 1]} : vector<1x256xf32> to vector<1x16xf32>
      %114 = arith.addf %110, %113 : vector<1x16xf32>
      %115 = vector.extract_strided_slice %62 {offsets = [0, 208], sizes = [1, 16], strides = [1, 1]} : vector<1x256xf32> to vector<1x16xf32>
      %116 = arith.addf %112, %115 : vector<1x16xf32>
      %117 = vector.extract_strided_slice %59 {offsets = [0, 224], sizes = [1, 16], strides = [1, 1]} : vector<1x256xf32> to vector<1x16xf32>
      %118 = arith.addf %114, %117 : vector<1x16xf32>
      %119 = vector.extract_strided_slice %62 {offsets = [0, 224], sizes = [1, 16], strides = [1, 1]} : vector<1x256xf32> to vector<1x16xf32>
      %120 = arith.addf %116, %119 : vector<1x16xf32>
      %121 = vector.extract_strided_slice %59 {offsets = [0, 240], sizes = [1, 16], strides = [1, 1]} : vector<1x256xf32> to vector<1x16xf32>
      %122 = arith.addf %118, %121 : vector<1x16xf32>
      %123 = vector.extract_strided_slice %62 {offsets = [0, 240], sizes = [1, 16], strides = [1, 1]} : vector<1x256xf32> to vector<1x16xf32>
      %124 = arith.addf %120, %123 : vector<1x16xf32>
      %c0_25 = arith.constant 0 : index
      %c0_26 = arith.constant 0 : index
      %125 = vector.load %arg26[%c0_25, %c0_26] : memref<8x128xf32, #tpu.memory_space<vmem>>, vector<1x16xf32>
      %126 = arith.addf %125, %122 : vector<1x16xf32>
      %c0_27 = arith.constant 0 : index
      %c0_28 = arith.constant 0 : index
      %127 = vector.load %arg26[%c0_27, %c0_28] : memref<8x128xf32, #tpu.memory_space<vmem>>, vector<1x16xf32>
      tpu.vector_store %arg26[%c0_27, %c0_28], %126 {strides = array<i32>} : memref<8x128xf32, #tpu.memory_space<vmem>>, vector<1x16xf32>,
      %c1_29 = arith.constant 1 : index
      %c0_30 = arith.constant 0 : index
      %128 = vector.load %arg26[%c1_29, %c0_30] : memref<8x128xf32, #tpu.memory_space<vmem>>, vector<1x16xf32>
      %129 = arith.addf %128, %124 : vector<1x16xf32>
      %c1_31 = arith.constant 1 : index
      %c0_32 = arith.constant 0 : index
      %130 = vector.load %arg26[%c1_31, %c0_32] : memref<8x128xf32, #tpu.memory_space<vmem>>, vector<1x16xf32>
      tpu.vector_store %arg26[%c1_31, %c0_32], %129 {strides = array<i32>} : memref<8x128xf32, #tpu.memory_space<vmem>>, vector<1x16xf32>,
      %131 = arith.index_cast %1 : i32 to index
      %c0_33 = arith.constant 0 : index
      %132 = vector.load %arg24[%131, %c0_33] : memref<512x256xf32, #tpu.memory_space<vmem>>, vector<256x256xf32>
      tpu.vector_store %arg24[%131, %c0_33], %54 {strides = array<i32>} : memref<512x256xf32, #tpu.memory_space<vmem>>, vector<256x256xf32>,
    } else {
    }
    %c6_i32 = arith.constant 6 : i32
    %20 = arith.cmpi eq, %arg0, %c6_i32 : i32
    %21 = arith.extui %20 : i1 to i32
    %c0_i32_6 = arith.constant 0 : i32
    %22 = arith.cmpi ne, %21, %c0_i32_6 : i32
    scf.if %22 {
      %23 = arith.index_cast %1 : i32 to index
      %c0 = arith.constant 0 : index
      %24 = vector.load %arg24[%23, %c0] : memref<512x256xf32, #tpu.memory_space<vmem>>, vector<256x256xf32>
      %c0_7 = arith.constant 0 : index
      %c0_8 = arith.constant 0 : index
      %25 = vector.load %arg18[%c0_7, %c0_8] : memref<1x16xf32, #tpu.memory_space<vmem>>, vector<1x16xf32>
      %c0_9 = arith.constant 0 : index
      %c0_10 = arith.constant 0 : index
      %26 = vector.load %arg19[%c0_9, %c0_10] : memref<1x16xf32, #tpu.memory_space<vmem>>, vector<1x16xf32>
      %c0_11 = arith.constant 0 : index
      %c0_12 = arith.constant 0 : index
      %27 = vector.load %arg26[%c0_11, %c0_12] : memref<8x128xf32, #tpu.memory_space<vmem>>, vector<1x16xf32>
      %cst = arith.constant 1.22070313E-4 : f32
      %28 = vector.broadcast %cst : f32 to vector<1x16xf32>
      %29 = arith.mulf %27, %28 : vector<1x16xf32>
      %c1 = arith.constant 1 : index
      %c0_13 = arith.constant 0 : index
      %30 = vector.load %arg26[%c1, %c0_13] : memref<8x128xf32, #tpu.memory_space<vmem>>, vector<1x16xf32>
      %cst_14 = arith.constant 1.22070313E-4 : f32
      %31 = vector.broadcast %cst_14 : f32 to vector<1x16xf32>
      %32 = arith.mulf %30, %31 : vector<1x16xf32>
      %33 = arith.mulf %29, %29 : vector<1x16xf32>
      %34 = arith.subf %32, %33 : vector<1x16xf32>
      %cst_15 = arith.constant 8.000000e-01 : f32
      %35 = vector.broadcast %cst_15 : f32 to vector<1x16xf32>
      %36 = arith.addf %34, %35 : vector<1x16xf32>
      %37 = math.rsqrt %36 : vector<1x16xf32>
      %38 = arith.mulf %25, %37 : vector<1x16xf32>
      %39 = arith.mulf %29, %38 : vector<1x16xf32>
      %40 = arith.subf %26, %39 : vector<1x16xf32>
      %41 = tpu.concatenate %38, %38, %38, %38, %38, %38, %38, %38, %38, %38, %38, %38, %38, %38, %38, %38 in 1 : vector<1x16xf32>, vector<1x16xf32>, vector<1x16xf32>, vector<1x16xf32>, vector<1x16xf32>, vector<1x16xf32>, vector<1x16xf32>, vector<1x16xf32>, vector<1x16xf32>, vector<1x16xf32>, vector<1x16xf32>, vector<1x16xf32>, vector<1x16xf32>, vector<1x16xf32>, vector<1x16xf32>, vector<1x16xf32> -> vector<1x256xf32>
      %42 = tpu.concatenate %40, %40, %40, %40, %40, %40, %40, %40, %40, %40, %40, %40, %40, %40, %40, %40 in 1 : vector<1x16xf32>, vector<1x16xf32>, vector<1x16xf32>, vector<1x16xf32>, vector<1x16xf32>, vector<1x16xf32>, vector<1x16xf32>, vector<1x16xf32>, vector<1x16xf32>, vector<1x16xf32>, vector<1x16xf32>, vector<1x16xf32>, vector<1x16xf32>, vector<1x16xf32>, vector<1x16xf32>, vector<1x16xf32> -> vector<1x256xf32>
      %43 = vector.broadcast %41 : vector<1x256xf32> to vector<256x256xf32>
      %44 = arith.mulf %24, %43 : vector<256x256xf32>
      %45 = vector.broadcast %42 : vector<1x256xf32> to vector<256x256xf32>
      %46 = arith.addf %44, %45 : vector<256x256xf32>
      %cst_16 = arith.constant 0.000000e+00 : f32
      %47 = vector.broadcast %cst_16 : f32 to vector<256x256xf32>
      %48 = arith.cmpf oge, %46, %47 : vector<256x256xf32>
      %cst_17 = arith.constant 2.000000e-01 : f32
      %49 = vector.broadcast %cst_17 : f32 to vector<256x256xf32>
      %50 = arith.mulf %49, %46 : vector<256x256xf32>
      %51 = arith.select %48, %46, %50 : vector<256x256xi1>, vector<256x256xf32>
      %52 = arith.truncf %51 : vector<256x256xf32> to vector<256x256xbf16>
      %c0_18 = arith.constant 0 : index
      %c0_19 = arith.constant 0 : index
      %53 = vector.load %arg20[%c0_18, %c0_19] : memref<256x256xbf16, #tpu.memory_space<vmem>>, vector<256x256xbf16>
      %cst_20 = arith.constant dense<0.000000e+00> : vector<256x256xf32>
      %54 = tpu.matmul %52, %53, %cst_20 {dimension_numbers = #tpu.dot_dimension_numbers<[1], [0], [0], [1], [0, 0, 1, 1], [], []>} : vector<256x256xbf16>, vector<256x256xbf16>, vector<256x256xf32> -> vector<256x256xf32>
      %c0_21 = arith.constant 0 : index
      %c0_22 = arith.constant 0 : index
      %55 = vector.load %arg21[%c0_21, %c0_22] : memref<1x256xf32, #tpu.memory_space<vmem>>, vector<1x256xf32>
      %56 = vector.broadcast %55 : vector<1x256xf32> to vector<256x256xf32>
      %57 = arith.addf %54, %56 : vector<256x256xf32>
      %58 = math.tanh %57 : vector<256x256xf32>
      %c0_23 = arith.constant 0 : index
      %c0_24 = arith.constant 0 : index
      %59 = vector.load %arg22[%c0_23, %c0_24] : memref<256x256xf32, #tpu.memory_space<vmem>>, vector<256x256xf32>
      tpu.vector_store %arg22[%c0_23, %c0_24], %58 {strides = array<i32>} : memref<256x256xf32, #tpu.memory_space<vmem>>, vector<256x256xf32>,
    } else {
    }
    return
  }
  func.func @transform_0(%arg0: i32, %arg1: i32) -> (i32, i32) {
    %c0_i32 = arith.constant 0 : i32
    %0 = arith.cmpi eq, %arg0, %c0_i32 : i32
    %c0_i32_0 = arith.constant 0 : i32
    %1 = arith.select %0, %arg1, %c0_i32_0 : i32
    %c0_i32_1 = arith.constant 0 : i32
    %c0_i32_2 = arith.constant 0 : i32
    return %1, %c0_i32_1 : i32, i32
  }
  func.func @transform_1(%arg0: i32, %arg1: i32) -> (i32, i32) {
    %c0_i32 = arith.constant 0 : i32
    %c0_i32_0 = arith.constant 0 : i32
    %c0_i32_1 = arith.constant 0 : i32
    return %c0_i32, %c0_i32_0 : i32, i32
  }
  func.func @transform_2(%arg0: i32, %arg1: i32) -> (i32, i32) {
    %c0_i32 = arith.constant 0 : i32
    %c0_i32_0 = arith.constant 0 : i32
    %c0_i32_1 = arith.constant 0 : i32
    return %c0_i32, %c0_i32_0 : i32, i32
  }
  func.func @transform_3(%arg0: i32, %arg1: i32) -> (i32, i32) {
    %c0_i32 = arith.constant 0 : i32
    %c0_i32_0 = arith.constant 0 : i32
    %c0_i32_1 = arith.constant 0 : i32
    return %c0_i32, %c0_i32_0 : i32, i32
  }
  func.func @transform_4(%arg0: i32, %arg1: i32) -> (i32, i32) {
    %c0_i32 = arith.constant 0 : i32
    %c0_i32_0 = arith.constant 0 : i32
    %c0_i32_1 = arith.constant 0 : i32
    return %c0_i32, %c0_i32_0 : i32, i32
  }
  func.func @transform_5(%arg0: i32, %arg1: i32) -> (i32, i32) {
    %c0_i32 = arith.constant 0 : i32
    %c0_i32_0 = arith.constant 0 : i32
    %c0_i32_1 = arith.constant 0 : i32
    return %c0_i32, %c0_i32_0 : i32, i32
  }
  func.func @transform_6(%arg0: i32, %arg1: i32) -> (i32, i32) {
    %c0_i32 = arith.constant 0 : i32
    %c0_i32_0 = arith.constant 0 : i32
    %c0_i32_1 = arith.constant 0 : i32
    return %c0_i32, %c0_i32_0 : i32, i32
  }
  func.func @transform_7(%arg0: i32, %arg1: i32) -> (i32, i32) {
    %c0_i32 = arith.constant 0 : i32
    %c0_i32_0 = arith.constant 0 : i32
    %c0_i32_1 = arith.constant 0 : i32
    return %c0_i32, %c0_i32_0 : i32, i32
  }
  func.func @transform_8(%arg0: i32, %arg1: i32) -> (i32, i32) {
    %c0_i32 = arith.constant 0 : i32
    %c0_i32_0 = arith.constant 0 : i32
    %c0_i32_1 = arith.constant 0 : i32
    return %c0_i32, %c0_i32_0 : i32, i32
  }
  func.func @transform_9(%arg0: i32, %arg1: i32) -> (i32, i32) {
    %c0_i32 = arith.constant 0 : i32
    %c0_i32_0 = arith.constant 0 : i32
    %c0_i32_1 = arith.constant 0 : i32
    return %c0_i32, %c0_i32_0 : i32, i32
  }
  func.func @transform_10(%arg0: i32, %arg1: i32) -> (i32, i32) {
    %c0_i32 = arith.constant 0 : i32
    %c0_i32_0 = arith.constant 0 : i32
    %c0_i32_1 = arith.constant 0 : i32
    return %c0_i32, %c0_i32_0 : i32, i32
  }
  func.func @transform_11(%arg0: i32, %arg1: i32) -> (i32, i32) {
    %c0_i32 = arith.constant 0 : i32
    %c0_i32_0 = arith.constant 0 : i32
    %c0_i32_1 = arith.constant 0 : i32
    return %c0_i32, %c0_i32_0 : i32, i32
  }
  func.func @transform_12(%arg0: i32, %arg1: i32) -> (i32, i32) {
    %c0_i32 = arith.constant 0 : i32
    %c0_i32_0 = arith.constant 0 : i32
    %c0_i32_1 = arith.constant 0 : i32
    return %c0_i32, %c0_i32_0 : i32, i32
  }
  func.func @transform_13(%arg0: i32, %arg1: i32) -> (i32, i32) {
    %c0_i32 = arith.constant 0 : i32
    %c0_i32_0 = arith.constant 0 : i32
    %c0_i32_1 = arith.constant 0 : i32
    return %c0_i32, %c0_i32_0 : i32, i32
  }
  func.func @transform_14(%arg0: i32, %arg1: i32) -> (i32, i32) {
    %c0_i32 = arith.constant 0 : i32
    %c0_i32_0 = arith.constant 0 : i32
    %c0_i32_1 = arith.constant 0 : i32
    return %c0_i32, %c0_i32_0 : i32, i32
  }
  func.func @transform_15(%arg0: i32, %arg1: i32) -> (i32, i32) {
    %c0_i32 = arith.constant 0 : i32
    %c0_i32_0 = arith.constant 0 : i32
    %c0_i32_1 = arith.constant 0 : i32
    return %c0_i32, %c0_i32_0 : i32, i32
  }
  func.func @transform_16(%arg0: i32, %arg1: i32) -> (i32, i32) {
    %c0_i32 = arith.constant 0 : i32
    %c0_i32_0 = arith.constant 0 : i32
    %c0_i32_1 = arith.constant 0 : i32
    return %c0_i32, %c0_i32_0 : i32, i32
  }
  func.func @transform_17(%arg0: i32, %arg1: i32) -> (i32, i32) {
    %c0_i32 = arith.constant 0 : i32
    %c0_i32_0 = arith.constant 0 : i32
    %c0_i32_1 = arith.constant 0 : i32
    return %c0_i32, %c0_i32_0 : i32, i32
  }
  func.func @transform_18(%arg0: i32, %arg1: i32) -> (i32, i32) {
    %c0_i32 = arith.constant 0 : i32
    %c0_i32_0 = arith.constant 0 : i32
    %c0_i32_1 = arith.constant 0 : i32
    return %c0_i32, %c0_i32_0 : i32, i32
  }
  func.func @transform_19(%arg0: i32, %arg1: i32) -> (i32, i32) {
    %c0_i32 = arith.constant 0 : i32
    %c0_i32_0 = arith.constant 0 : i32
    %c0_i32_1 = arith.constant 0 : i32
    return %c0_i32, %c0_i32_0 : i32, i32
  }
  func.func @transform_20(%arg0: i32, %arg1: i32) -> (i32, i32) {
    %c6_i32 = arith.constant 6 : i32
    %0 = arith.cmpi eq, %arg0, %c6_i32 : i32
    %c0_i32 = arith.constant 0 : i32
    %1 = arith.select %0, %arg1, %c0_i32 : i32
    %c0_i32_0 = arith.constant 0 : i32
    %c0_i32_1 = arith.constant 0 : i32
    return %1, %c0_i32_0 : i32, i32
  }
}

</mosaic_0001>

<bundles_post_ra>
// kernel: _lambda_.1
= control target key start
LH: loop header
LB: loop body
LE: loop exit
PB: predicated region body
PF: predicated region fallthrough
CT: control target
= control target key end

     0   :  { %s12219_s22 = smov 0   ;;  %s12221_s23 = smov 0   ;;  %s16602_s0 = inlined_call_operand.vmem [shape: bf16[512,768], index: 0, kind: input, shape index: {}]   ;;  %s16603_s1 = inlined_call_operand.vmem [shape: bf16[768,512], index: 1, kind: input, shape index: {}]   ;;  %s16604_s2 = inlined_call_operand.vmem [shape: f32[1,512], index: 2, kind: input, shape index: {}]   ;;  %s16605_s3 = inlined_call_operand.vmem [shape: bf16[512,256], index: 3, kind: input, shape index: {}]   ;;  %s16606_s4 = inlined_call_operand.vmem [shape: f32[1,16], index: 4, kind: input, shape index: {}]   ;;  %s16607_s5 = inlined_call_operand.vmem [shape: f32[1,16], index: 5, kind: input, shape index: {}]   ;;  %s16608_s6 = inlined_call_operand.vmem [shape: bf16[256,128], index: 6, kind: input, shape index: {}]   ;;  %s16609_s7 = inlined_call_operand.vmem [shape: f32[1,32], index: 7, kind: input, shape index: {}]   ;;  %s16610_s8 = inlined_call_operand.vmem [shape: f32[1,32], index: 8, kind: input, shape index: {}]   ;;  %s16611_s9 = inlined_call_operand.vmem [shape: bf16[128,128], index: 9, kind: input, shape index: {}]   ;;  %s16612_s10 = inlined_call_operand.vmem [shape: f32[1,128], index: 10, kind: input, shape index: {}]   ;;  %s16613_s11 = inlined_call_operand.vmem [shape: f32[1,128], index: 11, kind: input, shape index: {}]   ;;  %s16614_s12 = inlined_call_operand.vmem [shape: bf16[128,128], index: 12, kind: input, shape index: {}]   ;;  %s16615_s13 = inlined_call_operand.vmem [shape: f32[1,32], index: 13, kind: input, shape index: {}]   ;;  %s16616_s14 = inlined_call_operand.vmem [shape: f32[1,32], index: 14, kind: input, shape index: {}]   ;;  %s16617_s15 = inlined_call_operand.vmem [shape: bf16[128,256], index: 15, kind: input, shape index: {}]   ;;  %s16618_s16 = inlined_call_operand.vmem [shape: f32[1,16], index: 16, kind: input, shape index: {}]   ;;  %s16619_s17 = inlined_call_operand.vmem [shape: f32[1,16], index: 17, kind: input, shape index: {}]   ;;  %s16620_s18 = inlined_call_operand.vmem [shape: bf16[256,256], index: 18, kind: input, shape index: {}]   ;;  %s16621_s19 = inlined_call_operand.vmem [shape: f32[1,256], index: 19, kind: input, shape index: {}]   ;;  %s16622_s20 = inlined_call_operand.vmem [shape: f32[512,256], index: 20, kind: output, shape index: {}]  }
   0x1   :  { %16694 = sst [smem:[#allocation68_spill]] %s16602_s0  ;;  %s12223_s24 = smov 0  }
   0x2   :  { %16695 = sst [smem:[#allocation69_spill]] %s16603_s1  ;;  %s12217_s1 = smov 0  }
   0x3   :  { %16696 = sst [smem:[#allocation70_spill]] %s16604_s2  ;;  %s12225_s2 = smov 0  }
   0x4   :  { %16697 = sst [smem:[#allocation71_spill]] %s16605_s3 }
   0x5   :  { %16698 = sst [smem:[#allocation72_spill]] %s16606_s4 }
   0x6   :  { %16699 = sst [smem:[#allocation73_spill]] %s16618_s16 }
   0x7   :  { %16700 = sst [smem:[#allocation74_spill]] %s16619_s17 }
   0x8   :  { %16701 = sst [smem:[#allocation75_spill]] %s16621_s19 }
   0x9 LB: > { %16702 = sst [smem:[#allocation6_spill]] %s12062_s23  ;;  %s39_s25 = sadd.s32 1, %s12062_s23  ;;  %s12070_s2 = sphi %s12225_s2, %s30_s2   ;;  %s12066_s24 = sphi %s12223_s24, %s16843_s24   ;;  %s12062_s23 = sphi %s12221_s23, %s16842_s23   ;;  %s12058_s22 = sphi %s12219_s22, %s16841_s22   ;;  %s12054_s1 = sphi %s12217_s1, %s16840_s1  }
   0xa   : > { %16703 = sst [smem:[#allocation7_spill]] %s12066_s24  ;;  %s42_s3 = sadd.s32 1, %s12066_s24 }
   0xb   : > { %16704 = sst [smem:[#allocation8_spill]] %s12070_s2  ;;  %p40_p0 = scmp.ge.s32.totalorder %s39_s25, 2 }
   0xc   : > { %p9891_p1 = scmp.ge.s32.totalorder %s12070_s2, 1  ;;  %p588_p2 = scmp.lt.s32.totalorder %s12070_s2, 15 }
   0xd   : > { %s16845_s25 = smov (%p40_p0, %s39_s25), 0  ;;  %s16847_s3 = smov (!%p40_p0, %s42_s3), %s12066_s24 }
   0xe   : > { %16705 = sst [smem:[#allocation9_spill]] %s16845_s25  ;;  %p589_p3 = pnand %p9891_p1, %p588_p2 }
   0xf   : > { %p44_p4 = scmp.ge.s32.totalorder %s16847_s3, 7  ;;  %p652_p5 = scmp.eq.s32.totalorder (!%p589_p3), %s12058_s22, 0 }
  0x10   : > { %592 = sbr.rel (%p589_p3) target bundleno = 4203 (0x106b), region = 100  ;;  %p663_p6 = scmp.eq.s32.totalorder (!%p589_p3), %s12058_s22, 6 }
  0x11   : > { %s16849_s3 = smov (%p44_p4, %s16847_s3), 0  ;;  %s12254_s26 = sshll.u32 (!%p589_p3), %s12054_s1, 8 }
  0x12   : > { %16706 = sst [smem:[#allocation10_spill]] %s16849_s3  ;;  %s16707_s25 = sld [smem:[#allocation68_spill]] (!%p589_p3) }
  0x13   : > { %p9898_p9 = scmp.ne.s32.totalorder (!%p589_p3), %s12058_s22, 0 }
  0x17   : > { %s653_s27 = scalar_select %p652_p5, %s12054_s1, 0 }
  0x18   : > { %s664_s28 = scalar_select %p663_p6, %s12054_s1, 0 }
  0x19   : > { %s9892_s4 = sshll.u32 %s653_s27, 5  ;;  %679 = sbr.rel (%p9898_p9) target bundleno = 692 (0x2b4), region = 104 }
  0x1a   : > { %p655_p7 = scmp.lt.s32.totalorder %s9892_s4, 63  ;;  %s9894_s29 = sshll.u32 %s664_s28, 5 }
  0x1b   : > { %p666_p8 = scmp.lt.s32.totalorder %s9894_s29, 63  ;;  %s16708_s17 = sld [smem:[#allocation69_spill]] (!%p9898_p9) }
  0x1c   : > { %s16851_s4 = smov (!%p655_p7, %s9892_s4), 63  ;;  %s16709_s28 = sld [smem:[#allocation70_spill]] (!%p9898_p9) }
  0x1d   : > { %s16853_s29 = smov (!%p666_p8, %s9894_s29), 63  ;;  %s11181_s30 = smul.u32 24, %s16851_s4 }
  0x1e   : > { %s10368_s0 = sshll.u32 %s16853_s29, 4  ;;  %s3588_s4 = sshra.s32 (!%p9898_p9), %s12254_s26, 3 }
  0x1f   : > { %s12261_s24 = scalar_lea.vmem %s16707_s25, %s11181_s30  ;;  %s12266_s19 = scalar_lea.vmem %s16622_s20, %s10368_s0 }
  0x20   : > { %v11360_v48 = vld [vmem:[%s12261_s24 + $0x4] ss:$24 sps:$4 sm:$0xff]   ;;  %s10369_s3 = sshll.u32 %s3588_s4, 5 }
  0x21   : > { %v11262_v0 = vld [vmem:[%s16708_s17 + $0x4] ss:$16 sps:$4 sm:$0xff]   ;;  %v11264_v1 = vld [vmem:[%s16708_s17 + $0xc] ss:$16 sps:$4 sm:$0xff]   ;;  %v11266_v2 = vld [vmem:[%s16708_s17] ss:$16 sps:$4 sm:$0xff]   ;;  %2462 = vmatprep.mubr.bf16.mxu0 %v11360_v48  ;;  %3041 = vmatprep.mubr.bf16.mxu1 %v11360_v48 }
  0x22   : > { %2430 = vmatprep.subr.bf16.mxu0 %v11262_v0  ;;  %v11267_v3 = vld [vmem:[%s16708_s17 + $0x8] ss:$16 sps:$4 sm:$0xff]   ;;  %3009 = vmatprep.subr.bf16.mxu1 %v11264_v1  ;;  %v11268_v4 = vld [vmem:[%s16708_s17 + $0x24] ss:$16 sps:$4 sm:$0xff]   ;;  %v11270_v5 = vld [vmem:[%s16708_s17 + $0x2c] ss:$16 sps:$4 sm:$0xff]  }
  0x23   : > { %2431 = vmatpush1.bf16.msra.mxu0 %v11266_v2  ;;  %3010 = vmatpush1.bf16.msra.mxu1 %v11267_v3  ;;  %v11272_v6 = vld [vmem:[%s16708_s17 + $0x20] ss:$16 sps:$4 sm:$0xff]   ;;  %v11273_v7 = vld [vmem:[%s16708_s17 + $0x28] ss:$16 sps:$4 sm:$0xff]   ;;  %v11274_v8 = vld [vmem:[%s16708_s17 + $0x44] ss:$16 sps:$4 sm:$0xff]  }
  0x24   : > { %2432 = vmatprep.subr.bf16.mxu0 %v11268_v4  ;;  %3011 = vmatprep.subr.bf16.mxu1 %v11270_v5  ;;  %v11276_v9 = vld [vmem:[%s16708_s17 + $0x4c] ss:$16 sps:$4 sm:$0xff]   ;;  %v11278_v10 = vld [vmem:[%s16708_s17 + $0x40] ss:$16 sps:$4 sm:$0xff]   ;;  %v11279_v11 = vld [vmem:[%s16708_s17 + $0x48] ss:$16 sps:$4 sm:$0xff]  }
  0x25   : > { %v11280_v12 = vld [vmem:[%s16708_s17 + $0x64] ss:$16 sps:$4 sm:$0xff]   ;;  %v11282_v13 = vld [vmem:[%s16708_s17 + $0x6c] ss:$16 sps:$4 sm:$0xff]   ;;  %v11284_v14 = vld [vmem:[%s16708_s17 + $0x60] ss:$16 sps:$4 sm:$0xff]  }
  0x26   : > { %v11285_v15 = vld [vmem:[%s16708_s17 + $0x68] ss:$16 sps:$4 sm:$0xff]   ;;  %v11286_v16 = vld [vmem:[%s16708_s17 + $0x84] ss:$16 sps:$4 sm:$0xff]   ;;  %v11288_v17 = vld [vmem:[%s16708_s17 + $0x8c] ss:$16 sps:$4 sm:$0xff]  }
  0x27   : > { %2433 = vmatpush1.bf16.msra.mxu0 %v11272_v6  ;;  %3012 = vmatpush1.bf16.msra.mxu1 %v11273_v7  ;;  %v11290_v18 = vld [vmem:[%s16708_s17 + $0x80] ss:$16 sps:$4 sm:$0xff]   ;;  %v11291_v19 = vld [vmem:[%s16708_s17 + $0x88] ss:$16 sps:$4 sm:$0xff]   ;;  %v11292_v20 = vld [vmem:[%s16708_s17 + $0xa4] ss:$16 sps:$4 sm:$0xff]  }
  0x28   : > { %2434 = vmatprep.subr.bf16.mxu0 %v11274_v8  ;;  %3013 = vmatprep.subr.bf16.mxu1 %v11276_v9  ;;  %v11294_v21 = vld [vmem:[%s16708_s17 + $0xac] ss:$16 sps:$4 sm:$0xff]   ;;  %v11296_v22 = vld [vmem:[%s16708_s17 + $0xa0] ss:$16 sps:$4 sm:$0xff]   ;;  %v11297_v23 = vld [vmem:[%s16708_s17 + $0xa8] ss:$16 sps:$4 sm:$0xff]  }
  0x29   : > { %v11298_v24 = vld [vmem:[%s16708_s17 + $0xc4] ss:$16 sps:$4 sm:$0xff]   ;;  %v11300_v25 = vld [vmem:[%s16708_s17 + $0xcc] ss:$16 sps:$4 sm:$0xff]   ;;  %v11302_v26 = vld [vmem:[%s16708_s17 + $0xc0] ss:$16 sps:$4 sm:$0xff]  }
  0x2a   : > { %v11303_v27 = vld [vmem:[%s16708_s17 + $0xc8] ss:$16 sps:$4 sm:$0xff]   ;;  %v11304_v28 = vld [vmem:[%s16708_s17 + $0xe4] ss:$16 sps:$4 sm:$0xff]   ;;  %v11306_v29 = vld [vmem:[%s16708_s17 + $0xec] ss:$16 sps:$4 sm:$0xff]  }
  0x2b   : > { %2435 = vmatpush1.bf16.msra.mxu0 %v11278_v10  ;;  %3014 = vmatpush1.bf16.msra.mxu1 %v11279_v11  ;;  %v11308_v30 = vld [vmem:[%s16708_s17 + $0xe0] ss:$16 sps:$4 sm:$0xff]   ;;  %v11309_v31 = vld [vmem:[%s16708_s17 + $0xe8] ss:$16 sps:$4 sm:$0xff]   ;;  %v11310_v32 = vld [vmem:[%s16708_s17 + $0x104] ss:$16 sps:$4 sm:$0xff]  }
  0x2c   : > { %2436 = vmatprep.subr.bf16.mxu0 %v11280_v12  ;;  %3015 = vmatprep.subr.bf16.mxu1 %v11282_v13  ;;  %v11312_v33 = vld [vmem:[%s16708_s17 + $0x10c] ss:$16 sps:$4 sm:$0xff]   ;;  %v11314_v34 = vld [vmem:[%s16708_s17 + $0x100] ss:$16 sps:$4 sm:$0xff]   ;;  %v11315_v35 = vld [vmem:[%s16708_s17 + $0x108] ss:$16 sps:$4 sm:$0xff]  }
  0x2d   : > { %v11316_v36 = vld [vmem:[%s16708_s17 + $0x124] ss:$16 sps:$4 sm:$0xff]   ;;  %v11318_v37 = vld [vmem:[%s16708_s17 + $0x12c] ss:$16 sps:$4 sm:$0xff]   ;;  %v11320_v38 = vld [vmem:[%s16708_s17 + $0x120] ss:$16 sps:$4 sm:$0xff]  }
  0x2e   : > { %v11321_v39 = vld [vmem:[%s16708_s17 + $0x128] ss:$16 sps:$4 sm:$0xff]   ;;  %v11322_v40 = vld [vmem:[%s16708_s17 + $0x144] ss:$16 sps:$4 sm:$0xff]   ;;  %v11324_v41 = vld [vmem:[%s16708_s17 + $0x14c] ss:$16 sps:$4 sm:$0xff]  }
  0x2f   : > { %2437 = vmatpush1.bf16.msra.mxu0 %v11284_v14  ;;  %3016 = vmatpush1.bf16.msra.mxu1 %v11285_v15  ;;  %v11326_v42 = vld [vmem:[%s16708_s17 + $0x140] ss:$16 sps:$4 sm:$0xff]   ;;  %v11327_v43 = vld [vmem:[%s16708_s17 + $0x148] ss:$16 sps:$4 sm:$0xff]   ;;  %v11328_v44 = vld [vmem:[%s16708_s17 + $0x164] ss:$16 sps:$4 sm:$0xff]  }
  0x30   : > { %2438 = vmatprep.subr.bf16.mxu0 %v11286_v16  ;;  %3017 = vmatprep.subr.bf16.mxu1 %v11288_v17  ;;  %v11330_v45 = vld [vmem:[%s16708_s17 + $0x16c] ss:$16 sps:$4 sm:$0xff]   ;;  %v11332_v46 = vld [vmem:[%s16708_s17 + $0x160] ss:$16 sps:$4 sm:$0xff]   ;;  %v11333_v47 = vld [vmem:[%s16708_s17 + $0x168] ss:$16 sps:$4 sm:$0xff]  }
  0x31   : > { %v11334_v49 = vld [vmem:[%s16708_s17 + $0x184] ss:$16 sps:$4 sm:$0xff]   ;;  %v11336_v50 = vld [vmem:[%s16708_s17 + $0x18c] ss:$16 sps:$4 sm:$0xff]   ;;  %v11338_v51 = vld [vmem:[%s16708_s17 + $0x180] ss:$16 sps:$4 sm:$0xff]  }
  0x32   : > { %v11339_v52 = vld [vmem:[%s16708_s17 + $0x188] ss:$16 sps:$4 sm:$0xff]   ;;  %v11340_v53 = vld [vmem:[%s16708_s17 + $0x1a4] ss:$16 sps:$4 sm:$0xff]   ;;  %v11342_v54 = vld [vmem:[%s16708_s17 + $0x1ac] ss:$16 sps:$4 sm:$0xff]  }
  0x33   : > { %2439 = vmatpush1.bf16.msra.mxu0 %v11290_v18  ;;  %3018 = vmatpush1.bf16.msra.mxu1 %v11291_v19  ;;  %v11344_v55 = vld [vmem:[%s16708_s17 + $0x1a0] ss:$16 sps:$4 sm:$0xff]   ;;  %v11345_v56 = vld [vmem:[%s16708_s17 + $0x1a8] ss:$16 sps:$4 sm:$0xff]   ;;  %v11346_v57 = vld [vmem:[%s16708_s17 + $0x1c4] ss:$16 sps:$4 sm:$0xff]  }
  0x34   : > { %2440 = vmatprep.subr.bf16.mxu0 %v11292_v20  ;;  %3019 = vmatprep.subr.bf16.mxu1 %v11294_v21  ;;  %v11348_v58 = vld [vmem:[%s16708_s17 + $0x1cc] ss:$16 sps:$4 sm:$0xff]   ;;  %v11350_v59 = vld [vmem:[%s16708_s17 + $0x1c0] ss:$16 sps:$4 sm:$0xff]   ;;  %v11351_v60 = vld [vmem:[%s16708_s17 + $0x1c8] ss:$16 sps:$4 sm:$0xff]  }
  0x35   : > { %v11352_v61 = vld [vmem:[%s16708_s17 + $0x1e4] ss:$16 sps:$4 sm:$0xff]   ;;  %v11354_v62 = vld [vmem:[%s16708_s17 + $0x1ec] ss:$16 sps:$4 sm:$0xff]   ;;  %v11356_v63 = vld [vmem:[%s16708_s17 + $0x1e0] ss:$16 sps:$4 sm:$0xff]  }
  0x36   : > { %v11357_v0 = vld [vmem:[%s16708_s17 + $0x1e8] ss:$16 sps:$4 sm:$0xff]   ;;  %v11363_v1 = vld [vmem:[%s16708_s17 + $0x204] ss:$16 sps:$4 sm:$0xff]   ;;  %v11366_v2 = vld [vmem:[%s16708_s17 + $0x20c] ss:$16 sps:$4 sm:$0xff]  }
  0x37   : > { %2441 = vmatpush1.bf16.msra.mxu0 %v11296_v22  ;;  %3020 = vmatpush1.bf16.msra.mxu1 %v11297_v23  ;;  %v11358_v3 = vld [vmem:[%s12261_s24] ss:$24 sps:$4 sm:$0xff]   ;;  %v11367_v6 = vld [vmem:[%s12261_s24 + $0x34] ss:$24 sps:$4 sm:$0xff]   ;;  %v11369_v13 = vld [vmem:[%s12261_s24 + $0x30] ss:$24 sps:$4 sm:$0xff]  }
  0x38   : > { %2442 = vmatprep.subr.bf16.mxu0 %v11298_v24  ;;  %3021 = vmatprep.subr.bf16.mxu1 %v11300_v25  ;;  %v11361_v4 = vld [vmem:[%s16708_s17 + $0x200] ss:$16 sps:$4 sm:$0xff]   ;;  %v11364_v5 = vld [vmem:[%s16708_s17 + $0x208] ss:$16 sps:$4 sm:$0xff]   ;;  %v11372_v7 = vld [vmem:[%s16708_s17 + $0x224] ss:$16 sps:$4 sm:$0xff]  }
  0x39   : > { %v11375_v8 = vld [vmem:[%s16708_s17 + $0x22c] ss:$16 sps:$4 sm:$0xff]   ;;  %v11370_v9 = vld [vmem:[%s16708_s17 + $0x220] ss:$16 sps:$4 sm:$0xff]   ;;  %v11373_v10 = vld [vmem:[%s16708_s17 + $0x228] ss:$16 sps:$4 sm:$0xff]  }
  0x3a   : > { %v11381_v11 = vld [vmem:[%s16708_s17 + $0x244] ss:$16 sps:$4 sm:$0xff]   ;;  %v11384_v12 = vld [vmem:[%s16708_s17 + $0x24c] ss:$16 sps:$4 sm:$0xff]   ;;  %v11379_v15 = vld [vmem:[%s16708_s17 + $0x240] ss:$16 sps:$4 sm:$0xff]  }
  0x3b   : > { %2443 = vmatpush1.bf16.msra.mxu0 %v11302_v26  ;;  %3022 = vmatpush1.bf16.msra.mxu1 %v11303_v27  ;;  %v11376_v14 = vld [vmem:[%s12261_s24 + $0x64] ss:$24 sps:$4 sm:$0xff]   ;;  %v11382_v16 = vld [vmem:[%s16708_s17 + $0x248] ss:$16 sps:$4 sm:$0xff]   ;;  %v11388_v19 = vld [vmem:[%s16708_s17 + $0x260] ss:$16 sps:$4 sm:$0xff]  }
  0x3c   : > { %2444 = vmatprep.subr.bf16.mxu0 %v11304_v28  ;;  %3023 = vmatprep.subr.bf16.mxu1 %v11306_v29  ;;  %v11390_v17 = vld [vmem:[%s16708_s17 + $0x264] ss:$16 sps:$4 sm:$0xff]   ;;  %v11393_v18 = vld [vmem:[%s16708_s17 + $0x26c] ss:$16 sps:$4 sm:$0xff]   ;;  %v11391_v20 = vld [vmem:[%s16708_s17 + $0x268] ss:$16 sps:$4 sm:$0xff]  }
  0x3d   : > { %v11399_v21 = vld [vmem:[%s16708_s17 + $0x284] ss:$16 sps:$4 sm:$0xff]   ;;  %v11402_v22 = vld [vmem:[%s16708_s17 + $0x28c] ss:$16 sps:$4 sm:$0xff]   ;;  %v11378_v23 = vld [vmem:[%s12261_s24 + $0x60] ss:$24 sps:$4 sm:$0xff]  }
  0x3e   : > { %v11385_v24 = vld [vmem:[%s12261_s24 + $0x94] ss:$24 sps:$4 sm:$0xff]   ;;  %v11397_v25 = vld [vmem:[%s16708_s17 + $0x280] ss:$16 sps:$4 sm:$0xff]   ;;  %v11400_v26 = vld [vmem:[%s16708_s17 + $0x288] ss:$16 sps:$4 sm:$0xff]  }
  0x3f   : > { %2445 = vmatpush1.bf16.msra.mxu0 %v11308_v30  ;;  %3024 = vmatpush1.bf16.msra.mxu1 %v11309_v31  ;;  %v11408_v27 = vld [vmem:[%s16708_s17 + $0x2a4] ss:$16 sps:$4 sm:$0xff]   ;;  %v11411_v28 = vld [vmem:[%s16708_s17 + $0x2ac] ss:$16 sps:$4 sm:$0xff]   ;;  %v11406_v29 = vld [vmem:[%s16708_s17 + $0x2a0] ss:$16 sps:$4 sm:$0xff]  }
  0x40   : > { %2446 = vmatprep.subr.bf16.mxu0 %v11310_v32  ;;  %3025 = vmatprep.subr.bf16.mxu1 %v11312_v33  ;;  %v11409_v30 = vld [vmem:[%s16708_s17 + $0x2a8] ss:$16 sps:$4 sm:$0xff]   ;;  %v11417_v31 = vld [vmem:[%s16708_s17 + $0x2c4] ss:$16 sps:$4 sm:$0xff]   ;;  %v11420_v32 = vld [vmem:[%s16708_s17 + $0x2cc] ss:$16 sps:$4 sm:$0xff]  }
  0x41   : > { %v11387_v33 = vld [vmem:[%s12261_s24 + $0x90] ss:$24 sps:$4 sm:$0xff]   ;;  %v11447_v48 = vld [vmem:[%s16708_s17 + $0x32c] ss:$16 sps:$4 sm:$0xff]  }
  0x43   : > { %2447 = vmatpush1.bf16.msra.mxu0 %v11314_v34  ;;  %3026 = vmatpush1.bf16.msra.mxu1 %v11315_v35  ;;  %v11394_v34 = vld [vmem:[%s12261_s24 + $0xc4] ss:$24 sps:$4 sm:$0xff]   ;;  %v11415_v35 = vld [vmem:[%s16708_s17 + $0x2c0] ss:$16 sps:$4 sm:$0xff]  }
  0x44   : > { %2448 = vmatprep.subr.bf16.mxu0 %v11316_v36  ;;  %3027 = vmatprep.subr.bf16.mxu1 %v11318_v37  ;;  %v11418_v36 = vld [vmem:[%s16708_s17 + $0x2c8] ss:$16 sps:$4 sm:$0xff]   ;;  %v11426_v37 = vld [vmem:[%s16708_s17 + $0x2e4] ss:$16 sps:$4 sm:$0xff]  }
  0x47   : > { %2449 = vmatpush1.bf16.msra.mxu0 %v11320_v38  ;;  %3028 = vmatpush1.bf16.msra.mxu1 %v11321_v39  ;;  %v11429_v38 = vld [vmem:[%s16708_s17 + $0x2ec] ss:$16 sps:$4 sm:$0xff]   ;;  %v11424_v39 = vld [vmem:[%s16708_s17 + $0x2e0] ss:$16 sps:$4 sm:$0xff]  }
  0x48   : > { %2450 = vmatprep.subr.bf16.mxu0 %v11322_v40  ;;  %3029 = vmatprep.subr.bf16.mxu1 %v11324_v41  ;;  %v11427_v40 = vld [vmem:[%s16708_s17 + $0x2e8] ss:$16 sps:$4 sm:$0xff]   ;;  %v11435_v41 = vld [vmem:[%s16708_s17 + $0x304] ss:$16 sps:$4 sm:$0xff]  }
  0x4b   : > { %2451 = vmatpush1.bf16.msra.mxu0 %v11326_v42  ;;  %3030 = vmatpush1.bf16.msra.mxu1 %v11327_v43  ;;  %v11438_v42 = vld [vmem:[%s16708_s17 + $0x30c] ss:$16 sps:$4 sm:$0xff]   ;;  %v11396_v43 = vld [vmem:[%s12261_s24 + $0xc0] ss:$24 sps:$4 sm:$0xff]  }
  0x4c   : > { %2452 = vmatprep.subr.bf16.mxu0 %v11328_v44  ;;  %3031 = vmatprep.subr.bf16.mxu1 %v11330_v45  ;;  %v11403_v44 = vld [vmem:[%s12261_s24 + $0xf4] ss:$24 sps:$4 sm:$0xff]   ;;  %v11433_v45 = vld [vmem:[%s16708_s17 + $0x300] ss:$16 sps:$4 sm:$0xff]  }
  0x4f   : > { %2453 = vmatpush1.bf16.msra.mxu0 %v11332_v46  ;;  %3032 = vmatpush1.bf16.msra.mxu1 %v11333_v47  ;;  %v11436_v46 = vld [vmem:[%s16708_s17 + $0x308] ss:$16 sps:$4 sm:$0xff]   ;;  %v11444_v47 = vld [vmem:[%s16708_s17 + $0x324] ss:$16 sps:$4 sm:$0xff]  }
  0x50   : > { %2454 = vmatprep.subr.bf16.mxu0 %v11334_v49  ;;  %3033 = vmatprep.subr.bf16.mxu1 %v11336_v50  ;;  %v11442_v49 = vld [vmem:[%s16708_s17 + $0x320] ss:$16 sps:$4 sm:$0xff]   ;;  %v11445_v50 = vld [vmem:[%s16708_s17 + $0x328] ss:$16 sps:$4 sm:$0xff]  }
  0x53   : > { %2455 = vmatpush1.bf16.msra.mxu0 %v11338_v51  ;;  %3034 = vmatpush1.bf16.msra.mxu1 %v11339_v52  ;;  %v11453_v51 = vld [vmem:[%s16708_s17 + $0x344] ss:$16 sps:$4 sm:$0xff]   ;;  %v11456_v52 = vld [vmem:[%s16708_s17 + $0x34c] ss:$16 sps:$4 sm:$0xff]  }
  0x54   : > { %2456 = vmatprep.subr.bf16.mxu0 %v11340_v53  ;;  %3035 = vmatprep.subr.bf16.mxu1 %v11342_v54  ;;  %v11405_v53 = vld [vmem:[%s12261_s24 + $0xf0] ss:$24 sps:$4 sm:$0xff]   ;;  %v11412_v54 = vld [vmem:[%s12261_s24 + $0x124] ss:$24 sps:$4 sm:$0xff]  }
  0x57   : > { %2457 = vmatpush1.bf16.msra.mxu0 %v11344_v55  ;;  %3036 = vmatpush1.bf16.msra.mxu1 %v11345_v56  ;;  %v11451_v55 = vld [vmem:[%s16708_s17 + $0x340] ss:$16 sps:$4 sm:$0xff]   ;;  %v11454_v56 = vld [vmem:[%s16708_s17 + $0x348] ss:$16 sps:$4 sm:$0xff]  }
  0x58   : > { %2458 = vmatprep.subr.bf16.mxu0 %v11346_v57  ;;  %3037 = vmatprep.subr.bf16.mxu1 %v11348_v58  ;;  %v11462_v57 = vld [vmem:[%s16708_s17 + $0x364] ss:$16 sps:$4 sm:$0xff]   ;;  %v11465_v58 = vld [vmem:[%s16708_s17 + $0x36c] ss:$16 sps:$4 sm:$0xff]  }
  0x5b   : > { %2459 = vmatpush1.bf16.msra.mxu0 %v11350_v59  ;;  %3038 = vmatpush1.bf16.msra.mxu1 %v11351_v60  ;;  %v11460_v59 = vld [vmem:[%s16708_s17 + $0x360] ss:$16 sps:$4 sm:$0xff]   ;;  %v11463_v60 = vld [vmem:[%s16708_s17 + $0x368] ss:$16 sps:$4 sm:$0xff]  }
  0x5c   : > { %2460 = vmatprep.subr.bf16.mxu0 %v11352_v61  ;;  %3039 = vmatprep.subr.bf16.mxu1 %v11354_v62  ;;  %v11471_v61 = vld [vmem:[%s16708_s17 + $0x384] ss:$16 sps:$4 sm:$0xff]   ;;  %v11474_v62 = vld [vmem:[%s16708_s17 + $0x38c] ss:$16 sps:$4 sm:$0xff]  }
  0x5f   : > { %2461 = vmatpush1.bf16.msra.mxu0 %v11356_v63  ;;  %3040 = vmatpush1.bf16.msra.mxu1 %v11357_v0  ;;  %v11414_v63 = vld [vmem:[%s12261_s24 + $0x120] ss:$24 sps:$4 sm:$0xff]   ;;  %v11421_v0 = vld [vmem:[%s12261_s24 + $0x154] ss:$24 sps:$4 sm:$0xff]  }
  0x60   : > { %2623 = vmatprep.subr.bf16.mxu0 %v11363_v1  ;;  %3202 = vmatprep.subr.bf16.mxu1 %v11366_v2  ;;  %v11469_v1 = vld [vmem:[%s16708_s17 + $0x380] ss:$16 sps:$4 sm:$0xff]   ;;  %v11472_v2 = vld [vmem:[%s16708_s17 + $0x388] ss:$16 sps:$4 sm:$0xff]  }
  0x62   : > { %2463 = vmatmul.mubr.bf16.vlgmr.msra.gmra.mrb[0].mxu0 %v11358_v3  ;;  %3042 = vmatmul.mubr.bf16.vlgmr.msra.gmra.mrb[0].mxu1 %v11358_v3  ;;  %v11480_v3 = vld [vmem:[%s16708_s17 + $0x3a4] ss:$16 sps:$4 sm:$0xff]  }
  0x63   : > { %2624 = vmatpush1.bf16.msra.mxu0 %v11361_v4  ;;  %3203 = vmatpush1.bf16.msra.mxu1 %v11364_v5  ;;  %v11483_v4 = vld [vmem:[%s16708_s17 + $0x3ac] ss:$16 sps:$4 sm:$0xff]   ;;  %v11478_v5 = vld [vmem:[%s16708_s17 + $0x3a0] ss:$16 sps:$4 sm:$0xff]  }
  0x64   : > { %2472 = vmatprep.mubr.bf16.mxu0 %v11367_v6  ;;  %3051 = vmatprep.mubr.bf16.mxu1 %v11367_v6  ;;  %v11481_v6 = vld [vmem:[%s16708_s17 + $0x3a8] ss:$16 sps:$4 sm:$0xff]  }
  0x65   : > { %2625 = vmatprep.subr.bf16.mxu0 %v11372_v7  ;;  %3204 = vmatprep.subr.bf16.mxu1 %v11375_v8  ;;  %v11489_v7 = vld [vmem:[%s16708_s17 + $0x3c4] ss:$16 sps:$4 sm:$0xff]   ;;  %v11492_v8 = vld [vmem:[%s16708_s17 + $0x3cc] ss:$16 sps:$4 sm:$0xff]  }
  0x67   : > { %2626 = vmatpush1.bf16.msra.mxu0 %v11370_v9  ;;  %3205 = vmatpush1.bf16.msra.mxu1 %v11373_v10  ;;  %v11423_v9 = vld [vmem:[%s12261_s24 + $0x150] ss:$24 sps:$4 sm:$0xff]   ;;  %v11430_v10 = vld [vmem:[%s12261_s24 + $0x184] ss:$24 sps:$4 sm:$0xff]  }
  0x68   : > { %2627 = vmatprep.subr.bf16.mxu0 %v11381_v11  ;;  %3206 = vmatprep.subr.bf16.mxu1 %v11384_v12  ;;  %v11487_v11 = vld [vmem:[%s16708_s17 + $0x3c0] ss:$16 sps:$4 sm:$0xff]   ;;  %v11490_v12 = vld [vmem:[%s16708_s17 + $0x3c8] ss:$16 sps:$4 sm:$0xff]  }
  0x6a   : > { %2473 = vmatmul.mubr.bf16.gmra.mrb[4].mxu0 %v11369_v13  ;;  %3052 = vmatmul.mubr.bf16.gmra.mrb[4].mxu1 %v11369_v13  ;;  %v11498_v13 = vld [vmem:[%s16708_s17 + $0x3e4] ss:$16 sps:$4 sm:$0xff]  }
  0x6b   : > { %2482 = vmatprep.mubr.bf16.mxu0 %v11376_v14  ;;  %3061 = vmatprep.mubr.bf16.mxu1 %v11376_v14  ;;  %v11501_v14 = vld [vmem:[%s16708_s17 + $0x3ec] ss:$16 sps:$4 sm:$0xff]  }
  0x6c   : > { %2628 = vmatpush1.bf16.msra.mxu0 %v11379_v15  ;;  %3207 = vmatpush1.bf16.msra.mxu1 %v11382_v16  ;;  %v11496_v15 = vld [vmem:[%s16708_s17 + $0x3e0] ss:$16 sps:$4 sm:$0xff]   ;;  %v11499_v16 = vld [vmem:[%s16708_s17 + $0x3e8] ss:$16 sps:$4 sm:$0xff]  }
  0x6d   : > { %2629 = vmatprep.subr.bf16.mxu0 %v11390_v17  ;;  %3208 = vmatprep.subr.bf16.mxu1 %v11393_v18  ;;  %v11507_v17 = vld [vmem:[%s16708_s17 + $0x404] ss:$16 sps:$4 sm:$0xff]   ;;  %v11510_v18 = vld [vmem:[%s16708_s17 + $0x40c] ss:$16 sps:$4 sm:$0xff]  }
  0x70   : > { %2630 = vmatpush1.bf16.msra.mxu0 %v11388_v19  ;;  %3209 = vmatpush1.bf16.msra.mxu1 %v11391_v20  ;;  %v11432_v19 = vld [vmem:[%s12261_s24 + $0x180] ss:$24 sps:$4 sm:$0xff]   ;;  %v11439_v20 = vld [vmem:[%s12261_s24 + $0x1b4] ss:$24 sps:$4 sm:$0xff]  }
  0x71   : > { %2631 = vmatprep.subr.bf16.mxu0 %v11399_v21  ;;  %3210 = vmatprep.subr.bf16.mxu1 %v11402_v22  ;;  %v11441_v21 = vld [vmem:[%s12261_s24 + $0x1b0] ss:$24 sps:$4 sm:$0xff]   ;;  %v11448_v22 = vld [vmem:[%s12261_s24 + $0x1e4] ss:$24 sps:$4 sm:$0xff]  }
  0x72   : > { %2483 = vmatmul.mubr.bf16.gmra.mrb[8].mxu0 %v11378_v23  ;;  %3062 = vmatmul.mubr.bf16.gmra.mrb[8].mxu1 %v11378_v23  ;;  %v11450_v23 = vld [vmem:[%s12261_s24 + $0x1e0] ss:$24 sps:$4 sm:$0xff]  }
  0x73   : > { %2492 = vmatprep.mubr.bf16.mxu0 %v11385_v24  ;;  %3071 = vmatprep.mubr.bf16.mxu1 %v11385_v24  ;;  %v11457_v24 = vld [vmem:[%s12261_s24 + $0x214] ss:$24 sps:$4 sm:$0xff]  }
  0x74   : > { %2632 = vmatpush1.bf16.msra.mxu0 %v11397_v25  ;;  %3211 = vmatpush1.bf16.msra.mxu1 %v11400_v26  ;;  %v11459_v25 = vld [vmem:[%s12261_s24 + $0x210] ss:$24 sps:$4 sm:$0xff]   ;;  %v11466_v26 = vld [vmem:[%s12261_s24 + $0x244] ss:$24 sps:$4 sm:$0xff]  }
  0x75   : > { %2633 = vmatprep.subr.bf16.mxu0 %v11408_v27  ;;  %3212 = vmatprep.subr.bf16.mxu1 %v11411_v28  ;;  %v11468_v27 = vld [vmem:[%s12261_s24 + $0x240] ss:$24 sps:$4 sm:$0xff]   ;;  %v11475_v28 = vld [vmem:[%s12261_s24 + $0x274] ss:$24 sps:$4 sm:$0xff]  }
  0x78   : > { %2634 = vmatpush1.bf16.msra.mxu0 %v11406_v29  ;;  %3213 = vmatpush1.bf16.msra.mxu1 %v11409_v30  ;;  %v11477_v29 = vld [vmem:[%s12261_s24 + $0x270] ss:$24 sps:$4 sm:$0xff]   ;;  %v11484_v30 = vld [vmem:[%s12261_s24 + $0x2a4] ss:$24 sps:$4 sm:$0xff]  }
  0x79   : > { %2635 = vmatprep.subr.bf16.mxu0 %v11417_v31  ;;  %3214 = vmatprep.subr.bf16.mxu1 %v11420_v32  ;;  %v11486_v31 = vld [vmem:[%s12261_s24 + $0x2a0] ss:$24 sps:$4 sm:$0xff]   ;;  %v11493_v32 = vld [vmem:[%s12261_s24 + $0x2d4] ss:$24 sps:$4 sm:$0xff]  }
  0x7a   : > { %2493 = vmatmul.mubr.bf16.gmra.mrb[12].mxu0 %v11387_v33  ;;  %3072 = vmatmul.mubr.bf16.gmra.mrb[12].mxu1 %v11387_v33  ;;  %v11495_v33 = vld [vmem:[%s12261_s24 + $0x2d0] ss:$24 sps:$4 sm:$0xff]  }
  0x7b   : > { %2502 = vmatprep.mubr.bf16.mxu0 %v11394_v34  ;;  %3081 = vmatprep.mubr.bf16.mxu1 %v11394_v34  ;;  %v11504_v34 = vld [vmem:[%s12261_s24 + $0xc] ss:$24 sps:$4 sm:$0xff]  }
  0x7c   : > { %2636 = vmatpush1.bf16.msra.mxu0 %v11415_v35  ;;  %3215 = vmatpush1.bf16.msra.mxu1 %v11418_v36  ;;  %v11502_v35 = vld [vmem:[%s12261_s24 + $0x8] ss:$24 sps:$4 sm:$0xff]  }
  0x7d   : > { %2637 = vmatprep.subr.bf16.mxu0 %v11426_v37  ;;  %3216 = vmatprep.subr.bf16.mxu1 %v11429_v38  ;;  %v11505_v36 = vld [vmem:[%s16708_s17 + $0x400] ss:$16 sps:$4 sm:$0xff]   ;;  %v11508_v37 = vld [vmem:[%s16708_s17 + $0x408] ss:$16 sps:$4 sm:$0xff]   ;;  %v11511_v38 = vld [vmem:[%s12261_s24 + $0x3c] ss:$24 sps:$4 sm:$0xff]  }
  0x80   : > { %2638 = vmatpush1.bf16.msra.mxu0 %v11424_v39  ;;  %3217 = vmatpush1.bf16.msra.mxu1 %v11427_v40  ;;  %v11516_v39 = vld [vmem:[%s16708_s17 + $0x424] ss:$16 sps:$4 sm:$0xff]   ;;  %v11519_v40 = vld [vmem:[%s16708_s17 + $0x42c] ss:$16 sps:$4 sm:$0xff]  }
  0x81   : > { %2639 = vmatprep.subr.bf16.mxu0 %v11435_v41  ;;  %3218 = vmatprep.subr.bf16.mxu1 %v11438_v42  ;;  %v11514_v41 = vld [vmem:[%s16708_s17 + $0x420] ss:$16 sps:$4 sm:$0xff]   ;;  %v11517_v42 = vld [vmem:[%s16708_s17 + $0x428] ss:$16 sps:$4 sm:$0xff]  }
  0x82   : > { %2503 = vmatmul.mubr.bf16.gmra.mrb[16].mxu0 %v11396_v43  ;;  %3082 = vmatmul.mubr.bf16.gmra.mrb[16].mxu1 %v11396_v43  ;;  %v11525_v43 = vld [vmem:[%s16708_s17 + $0x444] ss:$16 sps:$4 sm:$0xff]  }
  0x83   : > { %2512 = vmatprep.mubr.bf16.mxu0 %v11403_v44  ;;  %3091 = vmatprep.mubr.bf16.mxu1 %v11403_v44  ;;  %v11528_v44 = vld [vmem:[%s16708_s17 + $0x44c] ss:$16 sps:$4 sm:$0xff]  }
  0x84   : > { %2640 = vmatpush1.bf16.msra.mxu0 %v11433_v45  ;;  %3219 = vmatpush1.bf16.msra.mxu1 %v11436_v46  ;;  %v11513_v45 = vld [vmem:[%s12261_s24 + $0x38] ss:$24 sps:$4 sm:$0xff]   ;;  %v11520_v46 = vld [vmem:[%s12261_s24 + $0x6c] ss:$24 sps:$4 sm:$0xff]  }
  0x85   : > { %2641 = vmatprep.subr.bf16.mxu0 %v11444_v47  ;;  %3220 = vmatprep.subr.bf16.mxu1 %v11447_v48  ;;  %v11523_v47 = vld [vmem:[%s16708_s17 + $0x440] ss:$16 sps:$4 sm:$0xff]   ;;  %v11526_v48 = vld [vmem:[%s16708_s17 + $0x448] ss:$16 sps:$4 sm:$0xff]  }
  0x88   : > { %2642 = vmatpush1.bf16.msra.mxu0 %v11442_v49  ;;  %3221 = vmatpush1.bf16.msra.mxu1 %v11445_v50  ;;  %v11534_v49 = vld [vmem:[%s16708_s17 + $0x464] ss:$16 sps:$4 sm:$0xff]   ;;  %v11537_v50 = vld [vmem:[%s16708_s17 + $0x46c] ss:$16 sps:$4 sm:$0xff]  }
  0x89   : > { %2643 = vmatprep.subr.bf16.mxu0 %v11453_v51  ;;  %3222 = vmatprep.subr.bf16.mxu1 %v11456_v52  ;;  %v11532_v51 = vld [vmem:[%s16708_s17 + $0x460] ss:$16 sps:$4 sm:$0xff]   ;;  %v11535_v52 = vld [vmem:[%s16708_s17 + $0x468] ss:$16 sps:$4 sm:$0xff]  }
  0x8a   : > { %2513 = vmatmul.mubr.bf16.gmra.mrb[20].mxu0 %v11405_v53  ;;  %3092 = vmatmul.mubr.bf16.gmra.mrb[20].mxu1 %v11405_v53  ;;  %v11543_v53 = vld [vmem:[%s16708_s17 + $0x484] ss:$16 sps:$4 sm:$0xff]  }
  0x8b   : > { %2522 = vmatprep.mubr.bf16.mxu0 %v11412_v54  ;;  %3101 = vmatprep.mubr.bf16.mxu1 %v11412_v54  ;;  %v11546_v54 = vld [vmem:[%s16708_s17 + $0x48c] ss:$16 sps:$4 sm:$0xff]  }
  0x8c   : > { %2644 = vmatpush1.bf16.msra.mxu0 %v11451_v55  ;;  %3223 = vmatpush1.bf16.msra.mxu1 %v11454_v56  ;;  %v11522_v55 = vld [vmem:[%s12261_s24 + $0x68] ss:$24 sps:$4 sm:$0xff]   ;;  %v11529_v56 = vld [vmem:[%s12261_s24 + $0x9c] ss:$24 sps:$4 sm:$0xff]  }
  0x8d   : > { %2645 = vmatprep.subr.bf16.mxu0 %v11462_v57  ;;  %3224 = vmatprep.subr.bf16.mxu1 %v11465_v58  ;;  %v11541_v57 = vld [vmem:[%s16708_s17 + $0x480] ss:$16 sps:$4 sm:$0xff]   ;;  %v11544_v58 = vld [vmem:[%s16708_s17 + $0x488] ss:$16 sps:$4 sm:$0xff]  }
  0x90   : > { %2646 = vmatpush1.bf16.msra.mxu0 %v11460_v59  ;;  %3225 = vmatpush1.bf16.msra.mxu1 %v11463_v60  ;;  %v11552_v59 = vld [vmem:[%s16708_s17 + $0x4a4] ss:$16 sps:$4 sm:$0xff]   ;;  %v11555_v60 = vld [vmem:[%s16708_s17 + $0x4ac] ss:$16 sps:$4 sm:$0xff]  }
  0x91   : > { %2647 = vmatprep.subr.bf16.mxu0 %v11471_v61  ;;  %3226 = vmatprep.subr.bf16.mxu1 %v11474_v62  ;;  %v11550_v61 = vld [vmem:[%s16708_s17 + $0x4a0] ss:$16 sps:$4 sm:$0xff]   ;;  %v11553_v62 = vld [vmem:[%s16708_s17 + $0x4a8] ss:$16 sps:$4 sm:$0xff]  }
  0x92   : > { %2523 = vmatmul.mubr.bf16.gmra.mrb[24].mxu0 %v11414_v63  ;;  %3102 = vmatmul.mubr.bf16.gmra.mrb[24].mxu1 %v11414_v63  ;;  %v11561_v63 = vld [vmem:[%s16708_s17 + $0x4c4] ss:$16 sps:$4 sm:$0xff]  }
  0x93   : > { %2532 = vmatprep.mubr.bf16.mxu0 %v11421_v0  ;;  %3111 = vmatprep.mubr.bf16.mxu1 %v11421_v0  ;;  %v11564_v0 = vld [vmem:[%s16708_s17 + $0x4cc] ss:$16 sps:$4 sm:$0xff]  }
  0x94   : > { %2648 = vmatpush1.bf16.msra.mxu0 %v11469_v1  ;;  %3227 = vmatpush1.bf16.msra.mxu1 %v11472_v2  ;;  %v11531_v1 = vld [vmem:[%s12261_s24 + $0x98] ss:$24 sps:$4 sm:$0xff]   ;;  %v11538_v2 = vld [vmem:[%s12261_s24 + $0xcc] ss:$24 sps:$4 sm:$0xff]  }
  0x95   : > { %2649 = vmatprep.subr.bf16.mxu0 %v11480_v3  ;;  %3228 = vmatprep.subr.bf16.mxu1 %v11483_v4  ;;  %v11559_v3 = vld [vmem:[%s16708_s17 + $0x4c0] ss:$16 sps:$4 sm:$0xff]   ;;  %v11562_v4 = vld [vmem:[%s16708_s17 + $0x4c8] ss:$16 sps:$4 sm:$0xff]  }
  0x98   : > { %2650 = vmatpush1.bf16.msra.mxu0 %v11478_v5  ;;  %3229 = vmatpush1.bf16.msra.mxu1 %v11481_v6  ;;  %v11570_v5 = vld [vmem:[%s16708_s17 + $0x4e4] ss:$16 sps:$4 sm:$0xff]   ;;  %v11573_v6 = vld [vmem:[%s16708_s17 + $0x4ec] ss:$16 sps:$4 sm:$0xff]  }
  0x99   : > { %2651 = vmatprep.subr.bf16.mxu0 %v11489_v7  ;;  %3230 = vmatprep.subr.bf16.mxu1 %v11492_v8  ;;  %v11568_v7 = vld [vmem:[%s16708_s17 + $0x4e0] ss:$16 sps:$4 sm:$0xff]   ;;  %v11571_v8 = vld [vmem:[%s16708_s17 + $0x4e8] ss:$16 sps:$4 sm:$0xff]  }
  0x9a   : > { %2533 = vmatmul.mubr.bf16.gmra.mrb[28].mxu0 %v11423_v9  ;;  %3112 = vmatmul.mubr.bf16.gmra.mrb[28].mxu1 %v11423_v9  ;;  %v11579_v9 = vld [vmem:[%s16708_s17 + $0x504] ss:$16 sps:$4 sm:$0xff]  }
  0x9b   : > { %2542 = vmatprep.mubr.bf16.mxu0 %v11430_v10  ;;  %3121 = vmatprep.mubr.bf16.mxu1 %v11430_v10  ;;  %v11582_v10 = vld [vmem:[%s16708_s17 + $0x50c] ss:$16 sps:$4 sm:$0xff]  }
  0x9c   : > { %2652 = vmatpush1.bf16.msra.mxu0 %v11487_v11  ;;  %3231 = vmatpush1.bf16.msra.mxu1 %v11490_v12  ;;  %v11540_v11 = vld [vmem:[%s12261_s24 + $0xc8] ss:$24 sps:$4 sm:$0xff]   ;;  %v11547_v12 = vld [vmem:[%s12261_s24 + $0xfc] ss:$24 sps:$4 sm:$0xff]  }
  0x9d   : > { %2653 = vmatprep.subr.bf16.mxu0 %v11498_v13  ;;  %3232 = vmatprep.subr.bf16.mxu1 %v11501_v14  ;;  %v11577_v13 = vld [vmem:[%s16708_s17 + $0x500] ss:$16 sps:$4 sm:$0xff]   ;;  %v11580_v14 = vld [vmem:[%s16708_s17 + $0x508] ss:$16 sps:$4 sm:$0xff]  }
  0xa0   : > { %2654 = vmatpush1.bf16.msra.mxu0 %v11496_v15  ;;  %3233 = vmatpush1.bf16.msra.mxu1 %v11499_v16  ;;  %v11588_v15 = vld [vmem:[%s16708_s17 + $0x524] ss:$16 sps:$4 sm:$0xff]   ;;  %v11591_v16 = vld [vmem:[%s16708_s17 + $0x52c] ss:$16 sps:$4 sm:$0xff]  }
  0xa1   : > { %2816 = vmatprep.subr.bf16.mxu0 %v11507_v17  ;;  %3395 = vmatprep.subr.bf16.mxu1 %v11510_v18  ;;  %v11586_v17 = vld [vmem:[%s16708_s17 + $0x520] ss:$16 sps:$4 sm:$0xff]   ;;  %v11589_v18 = vld [vmem:[%s16708_s17 + $0x528] ss:$16 sps:$4 sm:$0xff]  }
  0xa2   : > { %2543 = vmatmul.mubr.bf16.gmra.mrb[32].mxu0 %v11432_v19  ;;  %3122 = vmatmul.mubr.bf16.gmra.mrb[32].mxu1 %v11432_v19  ;;  %v11597_v19 = vld [vmem:[%s16708_s17 + $0x544] ss:$16 sps:$4 sm:$0xff]  }
  0xa3   : > { %2552 = vmatprep.mubr.bf16.mxu0 %v11439_v20  ;;  %3131 = vmatprep.mubr.bf16.mxu1 %v11439_v20  ;;  %v11600_v20 = vld [vmem:[%s16708_s17 + $0x54c] ss:$16 sps:$4 sm:$0xff]  }
  0xaa   : > { %2553 = vmatmul.mubr.bf16.gmra.mrb[36].mxu0 %v11441_v21  ;;  %3132 = vmatmul.mubr.bf16.gmra.mrb[36].mxu1 %v11441_v21  ;;  %v11549_v21 = vld [vmem:[%s12261_s24 + $0xf8] ss:$24 sps:$4 sm:$0xff]  }
  0xab   : > { %2562 = vmatprep.mubr.bf16.mxu0 %v11448_v22  ;;  %3141 = vmatprep.mubr.bf16.mxu1 %v11448_v22  ;;  %v11556_v22 = vld [vmem:[%s12261_s24 + $0x12c] ss:$24 sps:$4 sm:$0xff]  }
  0xb2   : > { %2563 = vmatmul.mubr.bf16.gmra.mrb[40].mxu0 %v11450_v23  ;;  %3142 = vmatmul.mubr.bf16.gmra.mrb[40].mxu1 %v11450_v23  ;;  %v11595_v23 = vld [vmem:[%s16708_s17 + $0x540] ss:$16 sps:$4 sm:$0xff]  }
  0xb3   : > { %2572 = vmatprep.mubr.bf16.mxu0 %v11457_v24  ;;  %3151 = vmatprep.mubr.bf16.mxu1 %v11457_v24  ;;  %v11598_v24 = vld [vmem:[%s16708_s17 + $0x548] ss:$16 sps:$4 sm:$0xff]  }
  0xba   : > { %2573 = vmatmul.mubr.bf16.gmra.mrb[44].mxu0 %v11459_v25  ;;  %3152 = vmatmul.mubr.bf16.gmra.mrb[44].mxu1 %v11459_v25  ;;  %v11606_v25 = vld [vmem:[%s16708_s17 + $0x564] ss:$16 sps:$4 sm:$0xff]  }
  0xbb   : > { %2582 = vmatprep.mubr.bf16.mxu0 %v11466_v26  ;;  %3161 = vmatprep.mubr.bf16.mxu1 %v11466_v26  ;;  %v11609_v26 = vld [vmem:[%s16708_s17 + $0x56c] ss:$16 sps:$4 sm:$0xff]  }
  0xc2   : > { %2583 = vmatmul.mubr.bf16.gmra.mrb[48].mxu0 %v11468_v27  ;;  %3162 = vmatmul.mubr.bf16.gmra.mrb[48].mxu1 %v11468_v27  ;;  %v11604_v27 = vld [vmem:[%s16708_s17 + $0x560] ss:$16 sps:$4 sm:$0xff]  }
  0xc3   : > { %2592 = vmatprep.mubr.bf16.mxu0 %v11475_v28  ;;  %3171 = vmatprep.mubr.bf16.mxu1 %v11475_v28  ;;  %v11607_v28 = vld [vmem:[%s16708_s17 + $0x568] ss:$16 sps:$4 sm:$0xff]  }
  0xca   : > { %2593 = vmatmul.mubr.bf16.gmra.mrb[52].mxu0 %v11477_v29  ;;  %3172 = vmatmul.mubr.bf16.gmra.mrb[52].mxu1 %v11477_v29  ;;  %v11615_v29 = vld [vmem:[%s16708_s17 + $0x584] ss:$16 sps:$4 sm:$0xff]  }
  0xcb   : > { %2602 = vmatprep.mubr.bf16.mxu0 %v11484_v30  ;;  %3181 = vmatprep.mubr.bf16.mxu1 %v11484_v30  ;;  %v11618_v30 = vld [vmem:[%s16708_s17 + $0x58c] ss:$16 sps:$4 sm:$0xff]  }
  0xd2   : > { %2603 = vmatmul.mubr.bf16.gmra.mrb[56].mxu0 %v11486_v31  ;;  %3182 = vmatmul.mubr.bf16.gmra.mrb[56].mxu1 %v11486_v31  ;;  %v11558_v31 = vld [vmem:[%s12261_s24 + $0x128] ss:$24 sps:$4 sm:$0xff]  }
  0xd3   : > { %2612 = vmatprep.mubr.bf16.mxu0 %v11493_v32  ;;  %3191 = vmatprep.mubr.bf16.mxu1 %v11493_v32  ;;  %v11565_v32 = vld [vmem:[%s12261_s24 + $0x15c] ss:$24 sps:$4 sm:$0xff]  }
  0xda   : > { %2613 = vmatmul.mubr.bf16.gmra.mrb[60].mxu0 %v11495_v33  ;;  %3192 = vmatmul.mubr.bf16.gmra.mrb[60].mxu1 %v11495_v33  ;;  %v11613_v33 = vld [vmem:[%s16708_s17 + $0x580] ss:$16 sps:$4 sm:$0xff]  }
  0xdb   : > { %2655 = vmatprep.mubr.bf16.mxu0 %v11504_v34  ;;  %3234 = vmatprep.mubr.bf16.mxu1 %v11504_v34  ;;  %v11616_v34 = vld [vmem:[%s16708_s17 + $0x588] ss:$16 sps:$4 sm:$0xff]  }
  0xe2   : > { %2656 = vmatmul.mubr.bf16.vlgmr.msra.gmra.mrb[0].mxu0 %v11502_v35  ;;  %3235 = vmatmul.mubr.bf16.vlgmr.msra.gmra.mrb[0].mxu1 %v11502_v35  ;;  %v11624_v35 = vld [vmem:[%s16708_s17 + $0x5a4] ss:$16 sps:$4 sm:$0xff]  }
  0xe3   : > { %2817 = vmatpush1.bf16.msra.mxu0 %v11505_v36  ;;  %3396 = vmatpush1.bf16.msra.mxu1 %v11508_v37  ;;  %v11627_v36 = vld [vmem:[%s16708_s17 + $0x5ac] ss:$16 sps:$4 sm:$0xff]   ;;  %v11622_v37 = vld [vmem:[%s16708_s17 + $0x5a0] ss:$16 sps:$4 sm:$0xff]  }
  0xe4   : > { %2665 = vmatprep.mubr.bf16.mxu0 %v11511_v38  ;;  %3244 = vmatprep.mubr.bf16.mxu1 %v11511_v38  ;;  %v11625_v38 = vld [vmem:[%s16708_s17 + $0x5a8] ss:$16 sps:$4 sm:$0xff]  }
  0xe5   : > { %2818 = vmatprep.subr.bf16.mxu0 %v11516_v39  ;;  %3397 = vmatprep.subr.bf16.mxu1 %v11519_v40  ;;  %v11633_v39 = vld [vmem:[%s16708_s17 + $0x5c4] ss:$16 sps:$4 sm:$0xff]   ;;  %v11636_v40 = vld [vmem:[%s16708_s17 + $0x5cc] ss:$16 sps:$4 sm:$0xff]  }
  0xe7   : > { %2819 = vmatpush1.bf16.msra.mxu0 %v11514_v41  ;;  %3398 = vmatpush1.bf16.msra.mxu1 %v11517_v42  ;;  %v11567_v41 = vld [vmem:[%s12261_s24 + $0x158] ss:$24 sps:$4 sm:$0xff]   ;;  %v11574_v42 = vld [vmem:[%s12261_s24 + $0x18c] ss:$24 sps:$4 sm:$0xff]  }
  0xe8   : > { %2820 = vmatprep.subr.bf16.mxu0 %v11525_v43  ;;  %3399 = vmatprep.subr.bf16.mxu1 %v11528_v44  ;;  %v11631_v43 = vld [vmem:[%s16708_s17 + $0x5c0] ss:$16 sps:$4 sm:$0xff]   ;;  %v11634_v44 = vld [vmem:[%s16708_s17 + $0x5c8] ss:$16 sps:$4 sm:$0xff]  }
  0xea   : > { %2666 = vmatmul.mubr.bf16.gmra.mrb[4].mxu0 %v11513_v45  ;;  %3245 = vmatmul.mubr.bf16.gmra.mrb[4].mxu1 %v11513_v45  ;;  %v11642_v45 = vld [vmem:[%s16708_s17 + $0x5e4] ss:$16 sps:$4 sm:$0xff]  }
  0xeb   : > { %2675 = vmatprep.mubr.bf16.mxu0 %v11520_v46  ;;  %3254 = vmatprep.mubr.bf16.mxu1 %v11520_v46  ;;  %v11645_v46 = vld [vmem:[%s16708_s17 + $0x5ec] ss:$16 sps:$4 sm:$0xff]  }
  0xec   : > { %2821 = vmatpush1.bf16.msra.mxu0 %v11523_v47  ;;  %3400 = vmatpush1.bf16.msra.mxu1 %v11526_v48  ;;  %v11640_v47 = vld [vmem:[%s16708_s17 + $0x5e0] ss:$16 sps:$4 sm:$0xff]   ;;  %v11643_v48 = vld [vmem:[%s16708_s17 + $0x5e8] ss:$16 sps:$4 sm:$0xff]  }
  0xed   : > { %2822 = vmatprep.subr.bf16.mxu0 %v11534_v49  ;;  %3401 = vmatprep.subr.bf16.mxu1 %v11537_v50  ;;  %v11576_v49 = vld [vmem:[%s12261_s24 + $0x188] ss:$24 sps:$4 sm:$0xff]   ;;  %v11583_v50 = vld [vmem:[%s12261_s24 + $0x1bc] ss:$24 sps:$4 sm:$0xff]  }
  0xf0   : > { %2823 = vmatpush1.bf16.msra.mxu0 %v11532_v51  ;;  %3402 = vmatpush1.bf16.msra.mxu1 %v11535_v52  ;;  %v11585_v51 = vld [vmem:[%s12261_s24 + $0x1b8] ss:$24 sps:$4 sm:$0xff]   ;;  %v11592_v52 = vld [vmem:[%s12261_s24 + $0x1ec] ss:$24 sps:$4 sm:$0xff]  }
  0xf1   : > { %2824 = vmatprep.subr.bf16.mxu0 %v11543_v53  ;;  %3403 = vmatprep.subr.bf16.mxu1 %v11546_v54  ;;  %v11594_v53 = vld [vmem:[%s12261_s24 + $0x1e8] ss:$24 sps:$4 sm:$0xff]   ;;  %v11601_v54 = vld [vmem:[%s12261_s24 + $0x21c] ss:$24 sps:$4 sm:$0xff]  }
  0xf2   : > { %2676 = vmatmul.mubr.bf16.gmra.mrb[8].mxu0 %v11522_v55  ;;  %3255 = vmatmul.mubr.bf16.gmra.mrb[8].mxu1 %v11522_v55  ;;  %v11603_v55 = vld [vmem:[%s12261_s24 + $0x218] ss:$24 sps:$4 sm:$0xff]  }
  0xf3   : > { %2685 = vmatprep.mubr.bf16.mxu0 %v11529_v56  ;;  %3264 = vmatprep.mubr.bf16.mxu1 %v11529_v56  ;;  %v11610_v56 = vld [vmem:[%s12261_s24 + $0x24c] ss:$24 sps:$4 sm:$0xff]  }
  0xf4   : > { %2825 = vmatpush1.bf16.msra.mxu0 %v11541_v57  ;;  %3404 = vmatpush1.bf16.msra.mxu1 %v11544_v58  ;;  %v11612_v57 = vld [vmem:[%s12261_s24 + $0x248] ss:$24 sps:$4 sm:$0xff]   ;;  %v11619_v58 = vld [vmem:[%s12261_s24 + $0x27c] ss:$24 sps:$4 sm:$0xff]  }
  0xf5   : > { %2826 = vmatprep.subr.bf16.mxu0 %v11552_v59  ;;  %3405 = vmatprep.subr.bf16.mxu1 %v11555_v60  ;;  %v11621_v59 = vld [vmem:[%s12261_s24 + $0x278] ss:$24 sps:$4 sm:$0xff]   ;;  %v11628_v60 = vld [vmem:[%s12261_s24 + $0x2ac] ss:$24 sps:$4 sm:$0xff]  }
  0xf8   : > { %2827 = vmatpush1.bf16.msra.mxu0 %v11550_v61  ;;  %3406 = vmatpush1.bf16.msra.mxu1 %v11553_v62  ;;  %v11630_v61 = vld [vmem:[%s12261_s24 + $0x2a8] ss:$24 sps:$4 sm:$0xff]   ;;  %v11637_v62 = vld [vmem:[%s12261_s24 + $0x2dc] ss:$24 sps:$4 sm:$0xff]  }
  0xf9   : > { %2828 = vmatprep.subr.bf16.mxu0 %v11561_v63  ;;  %3407 = vmatprep.subr.bf16.mxu1 %v11564_v0  ;;  %v11639_v63 = vld [vmem:[%s12261_s24 + $0x2d8] ss:$24 sps:$4 sm:$0xff]   ;;  %v11648_v0 = vld [vmem:[%s12261_s24 + $0x14] ss:$24 sps:$4 sm:$0xff]  }
  0xfa   : > { %2686 = vmatmul.mubr.bf16.gmra.mrb[12].mxu0 %v11531_v1  ;;  %3265 = vmatmul.mubr.bf16.gmra.mrb[12].mxu1 %v11531_v1  ;;  %v11646_v1 = vld [vmem:[%s12261_s24 + $0x10] ss:$24 sps:$4 sm:$0xff]  }
  0xfb   : > { %2695 = vmatprep.mubr.bf16.mxu0 %v11538_v2  ;;  %3274 = vmatprep.mubr.bf16.mxu1 %v11538_v2  ;;  %v11649_v2 = vld [vmem:[%s12261_s24 + $0x44] ss:$24 sps:$4 sm:$0xff]  }
  0xfc   : > { %2829 = vmatpush1.bf16.msra.mxu0 %v11559_v3  ;;  %3408 = vmatpush1.bf16.msra.mxu1 %v11562_v4  ;;  %v11651_v3 = vld [vmem:[%s12261_s24 + $0x40] ss:$24 sps:$4 sm:$0xff]   ;;  %v11652_v4 = vld [vmem:[%s12261_s24 + $0x74] ss:$24 sps:$4 sm:$0xff]  }
  0xfd   : > { %2830 = vmatprep.subr.bf16.mxu0 %v11570_v5  ;;  %3409 = vmatprep.subr.bf16.mxu1 %v11573_v6  ;;  %v11654_v5 = vld [vmem:[%s12261_s24 + $0x70] ss:$24 sps:$4 sm:$0xff]   ;;  %v11655_v6 = vld [vmem:[%s12261_s24 + $0xa4] ss:$24 sps:$4 sm:$0xff]  }
 0x100   : > { %2831 = vmatpush1.bf16.msra.mxu0 %v11568_v7  ;;  %3410 = vmatpush1.bf16.msra.mxu1 %v11571_v8  ;;  %v11657_v7 = vld [vmem:[%s12261_s24 + $0xa0] ss:$24 sps:$4 sm:$0xff]   ;;  %v11658_v8 = vld [vmem:[%s12261_s24 + $0xd4] ss:$24 sps:$4 sm:$0xff]  }
 0x101   : > { %2832 = vmatprep.subr.bf16.mxu0 %v11579_v9  ;;  %3411 = vmatprep.subr.bf16.mxu1 %v11582_v10  ;;  %v11660_v9 = vld [vmem:[%s12261_s24 + $0xd0] ss:$24 sps:$4 sm:$0xff]   ;;  %v11661_v10 = vld [vmem:[%s12261_s24 + $0x104] ss:$24 sps:$4 sm:$0xff]  }
 0x102   : > { %2696 = vmatmul.mubr.bf16.gmra.mrb[16].mxu0 %v11540_v11  ;;  %3275 = vmatmul.mubr.bf16.gmra.mrb[16].mxu1 %v11540_v11  ;;  %v11663_v11 = vld [vmem:[%s12261_s24 + $0x100] ss:$24 sps:$4 sm:$0xff]  }
 0x103   : > { %2705 = vmatprep.mubr.bf16.mxu0 %v11547_v12  ;;  %3284 = vmatprep.mubr.bf16.mxu1 %v11547_v12  ;;  %v11664_v12 = vld [vmem:[%s12261_s24 + $0x134] ss:$24 sps:$4 sm:$0xff]  }
 0x104   : > { %2833 = vmatpush1.bf16.msra.mxu0 %v11577_v13  ;;  %3412 = vmatpush1.bf16.msra.mxu1 %v11580_v14  ;;  %v11666_v13 = vld [vmem:[%s12261_s24 + $0x130] ss:$24 sps:$4 sm:$0xff]   ;;  %v11667_v14 = vld [vmem:[%s12261_s24 + $0x164] ss:$24 sps:$4 sm:$0xff]  }
 0x105   : > { %2834 = vmatprep.subr.bf16.mxu0 %v11588_v15  ;;  %3413 = vmatprep.subr.bf16.mxu1 %v11591_v16  ;;  %v11669_v15 = vld [vmem:[%s12261_s24 + $0x160] ss:$24 sps:$4 sm:$0xff]   ;;  %v11670_v16 = vld [vmem:[%s12261_s24 + $0x194] ss:$24 sps:$4 sm:$0xff]  }
 0x108   : > { %2835 = vmatpush1.bf16.msra.mxu0 %v11586_v17  ;;  %3414 = vmatpush1.bf16.msra.mxu1 %v11589_v18  ;;  %v11672_v17 = vld [vmem:[%s12261_s24 + $0x190] ss:$24 sps:$4 sm:$0xff]   ;;  %v11673_v18 = vld [vmem:[%s12261_s24 + $0x1c4] ss:$24 sps:$4 sm:$0xff]  }
 0x109   : > { %2836 = vmatprep.subr.bf16.mxu0 %v11597_v19  ;;  %3415 = vmatprep.subr.bf16.mxu1 %v11600_v20  ;;  %v11675_v19 = vld [vmem:[%s12261_s24 + $0x1c0] ss:$24 sps:$4 sm:$0xff]   ;;  %v11676_v20 = vld [vmem:[%s12261_s24 + $0x1f4] ss:$24 sps:$4 sm:$0xff]  }
 0x10a   : > { %2706 = vmatmul.mubr.bf16.gmra.mrb[20].mxu0 %v11549_v21  ;;  %3285 = vmatmul.mubr.bf16.gmra.mrb[20].mxu1 %v11549_v21  ;;  %v11678_v21 = vld [vmem:[%s12261_s24 + $0x1f0] ss:$24 sps:$4 sm:$0xff]  }
 0x10b   : > { %2715 = vmatprep.mubr.bf16.mxu0 %v11556_v22  ;;  %3294 = vmatprep.mubr.bf16.mxu1 %v11556_v22  ;;  %v11679_v22 = vld [vmem:[%s12261_s24 + $0x224] ss:$24 sps:$4 sm:$0xff]  }
 0x10c   : > { %2837 = vmatpush1.bf16.msra.mxu0 %v11595_v23  ;;  %3416 = vmatpush1.bf16.msra.mxu1 %v11598_v24  ;;  %v11681_v23 = vld [vmem:[%s12261_s24 + $0x220] ss:$24 sps:$4 sm:$0xff]   ;;  %v11682_v24 = vld [vmem:[%s12261_s24 + $0x254] ss:$24 sps:$4 sm:$0xff]  }
 0x10d   : > { %2838 = vmatprep.subr.bf16.mxu0 %v11606_v25  ;;  %3417 = vmatprep.subr.bf16.mxu1 %v11609_v26  ;;  %v11684_v25 = vld [vmem:[%s12261_s24 + $0x250] ss:$24 sps:$4 sm:$0xff]   ;;  %v11685_v26 = vld [vmem:[%s12261_s24 + $0x284] ss:$24 sps:$4 sm:$0xff]  }
 0x110   : > { %2839 = vmatpush1.bf16.msra.mxu0 %v11604_v27  ;;  %3418 = vmatpush1.bf16.msra.mxu1 %v11607_v28  ;;  %v11687_v27 = vld [vmem:[%s12261_s24 + $0x280] ss:$24 sps:$4 sm:$0xff]   ;;  %v11688_v28 = vld [vmem:[%s12261_s24 + $0x2b4] ss:$24 sps:$4 sm:$0xff]  }
 0x111   : > { %2840 = vmatprep.subr.bf16.mxu0 %v11615_v29  ;;  %3419 = vmatprep.subr.bf16.mxu1 %v11618_v30  ;;  %v11690_v29 = vld [vmem:[%s12261_s24 + $0x2b0] ss:$24 sps:$4 sm:$0xff]   ;;  %v11691_v30 = vld [vmem:[%s12261_s24 + $0x2e4] ss:$24 sps:$4 sm:$0xff]  }
 0x112   : > { %2716 = vmatmul.mubr.bf16.gmra.mrb[24].mxu0 %v11558_v31  ;;  %3295 = vmatmul.mubr.bf16.gmra.mrb[24].mxu1 %v11558_v31  ;;  %v11693_v31 = vld [vmem:[%s12261_s24 + $0x2e0] ss:$24 sps:$4 sm:$0xff]   ;;  %s12957_s24 = scalar_lea.vmem [#allocation2], %s10369_s3 }
 0x113   : > { %2725 = vmatprep.mubr.bf16.mxu0 %v11565_v32  ;;  %3304 = vmatprep.mubr.bf16.mxu1 %v11565_v32  ;;  %v970_v32 = vlaneseq }
 0x114   : > { %2841 = vmatpush1.bf16.msra.mxu0 %v11613_v33  ;;  %3420 = vmatpush1.bf16.msra.mxu1 %v11616_v34 }
 0x115   : > { %2842 = vmatprep.subr.bf16.mxu0 %v11624_v35  ;;  %3421 = vmatprep.subr.bf16.mxu1 %v11627_v36  ;;  %v971_v33 = vshrl.u32 %v970_v32, 7  ;;  %v968_v36 = vld [vmem:[%s16709_s28] sm:$0xf] }
 0x117   : > { %v972_v34 = vsub.s32 0, %v971_v33  ;;  %v980_v35 = vsub.s32 2, %v971_v33 }
 0x118   : > { %2843 = vmatpush1.bf16.msra.mxu0 %v11622_v37  ;;  %3422 = vmatpush1.bf16.msra.mxu1 %v11625_v38  ;;  %v976_v37 = vsub.s32 1, %v971_v33  ;;  %v984_v38 = vsub.s32 3, %v971_v33 }
 0x119   : > { %2844 = vmatprep.subr.bf16.mxu0 %v11633_v39  ;;  %3423 = vmatprep.subr.bf16.mxu1 %v11636_v40  ;;  %v12945_v39 = vrot.slane %v968_v36, %v972_v34  ;;  %v12947_v40 = vrot.slane %v968_v36, %v980_v35 }
 0x11a   : > { %2726 = vmatmul.mubr.bf16.gmra.mrb[28].mxu0 %v11567_v41  ;;  %3305 = vmatmul.mubr.bf16.gmra.mrb[28].mxu1 %v11567_v41  ;;  %v12949_v41 = vrot.slane %v968_v36, %v976_v37 }
 0x11b   : > { %2735 = vmatprep.mubr.bf16.mxu0 %v11574_v42  ;;  %3314 = vmatprep.mubr.bf16.mxu1 %v11574_v42  ;;  %v12951_v42 = vrot.slane %v968_v36, %v984_v38 }
 0x11c   : > { %2845 = vmatpush1.bf16.msra.mxu0 %v11631_v43  ;;  %3424 = vmatpush1.bf16.msra.mxu1 %v11634_v44 }
 0x11d   : > { %2846 = vmatprep.subr.bf16.mxu0 %v11642_v45  ;;  %3425 = vmatprep.subr.bf16.mxu1 %v11645_v46 }
 0x120   : > { %2847 = vmatpush1.bf16.msra.mxu0 %v11640_v47  ;;  %3426 = vmatpush1.bf16.msra.mxu1 %v11643_v48 }
 0x122   : > { %2736 = vmatmul.mubr.bf16.gmra.mrb[32].mxu0 %v11576_v49  ;;  %3315 = vmatmul.mubr.bf16.gmra.mrb[32].mxu1 %v11576_v49 }
 0x123   : > { %2745 = vmatprep.mubr.bf16.mxu0 %v11583_v50  ;;  %3324 = vmatprep.mubr.bf16.mxu1 %v11583_v50 }
 0x12a   : > { %2746 = vmatmul.mubr.bf16.gmra.mrb[36].mxu0 %v11585_v51  ;;  %3325 = vmatmul.mubr.bf16.gmra.mrb[36].mxu1 %v11585_v51 }
 0x12b   : > { %2755 = vmatprep.mubr.bf16.mxu0 %v11592_v52  ;;  %3334 = vmatprep.mubr.bf16.mxu1 %v11592_v52 }
 0x132   : > { %2756 = vmatmul.mubr.bf16.gmra.mrb[40].mxu0 %v11594_v53  ;;  %3335 = vmatmul.mubr.bf16.gmra.mrb[40].mxu1 %v11594_v53 }
 0x133   : > { %2765 = vmatprep.mubr.bf16.mxu0 %v11601_v54  ;;  %3344 = vmatprep.mubr.bf16.mxu1 %v11601_v54 }
 0x13a   : > { %2766 = vmatmul.mubr.bf16.gmra.mrb[44].mxu0 %v11603_v55  ;;  %3345 = vmatmul.mubr.bf16.gmra.mrb[44].mxu1 %v11603_v55 }
 0x13b   : > { %2775 = vmatprep.mubr.bf16.mxu0 %v11610_v56  ;;  %3354 = vmatprep.mubr.bf16.mxu1 %v11610_v56 }
 0x142   : > { %2776 = vmatmul.mubr.bf16.gmra.mrb[48].mxu0 %v11612_v57  ;;  %3355 = vmatmul.mubr.bf16.gmra.mrb[48].mxu1 %v11612_v57 }
 0x143   : > { %2785 = vmatprep.mubr.bf16.mxu0 %v11619_v58  ;;  %3364 = vmatprep.mubr.bf16.mxu1 %v11619_v58 }
 0x14a   : > { %2786 = vmatmul.mubr.bf16.gmra.mrb[52].mxu0 %v11621_v59  ;;  %3365 = vmatmul.mubr.bf16.gmra.mrb[52].mxu1 %v11621_v59 }
 0x14b   : > { %2795 = vmatprep.mubr.bf16.mxu0 %v11628_v60  ;;  %3374 = vmatprep.mubr.bf16.mxu1 %v11628_v60 }
 0x152   : > { %2796 = vmatmul.mubr.bf16.gmra.mrb[56].mxu0 %v11630_v61  ;;  %3375 = vmatmul.mubr.bf16.gmra.mrb[56].mxu1 %v11630_v61 }
 0x153   : > { %2805 = vmatprep.mubr.bf16.mxu0 %v11637_v62  ;;  %3384 = vmatprep.mubr.bf16.mxu1 %v11637_v62 }
 0x15a   : > { %2806 = vmatmul.mubr.bf16.gmra.mrb[60].mxu0 %v11639_v63  ;;  %3385 = vmatmul.mubr.bf16.gmra.mrb[60].mxu1 %v11639_v63 }
 0x15b   : > { %2848 = vmatprep.mubr.bf16.mxu0 %v11648_v0  ;;  %3427 = vmatprep.mubr.bf16.mxu1 %v11648_v0 }
 0x162   : > { %2849 = vmatmul.mubr.bf16.vlgmr.msra.gmra.mrb[0].mxu0 %v11646_v1  ;;  %3428 = vmatmul.mubr.bf16.vlgmr.msra.gmra.mrb[0].mxu1 %v11646_v1 }
 0x163   : > { %2858 = vmatprep.mubr.bf16.mxu0 %v11649_v2  ;;  %3437 = vmatprep.mubr.bf16.mxu1 %v11649_v2 }
 0x16a   : > { %2859 = vmatmul.mubr.bf16.gmra.mrb[4].mxu0 %v11651_v3  ;;  %3438 = vmatmul.mubr.bf16.gmra.mrb[4].mxu1 %v11651_v3 }
 0x16b   : > { %2868 = vmatprep.mubr.bf16.mxu0 %v11652_v4  ;;  %3447 = vmatprep.mubr.bf16.mxu1 %v11652_v4 }
 0x172   : > { %2869 = vmatmul.mubr.bf16.gmra.mrb[8].mxu0 %v11654_v5  ;;  %3448 = vmatmul.mubr.bf16.gmra.mrb[8].mxu1 %v11654_v5 }
 0x173   : > { %2878 = vmatprep.mubr.bf16.mxu0 %v11655_v6  ;;  %3457 = vmatprep.mubr.bf16.mxu1 %v11655_v6 }
 0x17a   : > { %2879 = vmatmul.mubr.bf16.gmra.mrb[12].mxu0 %v11657_v7  ;;  %3458 = vmatmul.mubr.bf16.gmra.mrb[12].mxu1 %v11657_v7 }
 0x17b   : > { %2888 = vmatprep.mubr.bf16.mxu0 %v11658_v8  ;;  %3467 = vmatprep.mubr.bf16.mxu1 %v11658_v8 }
 0x182   : > { %2889 = vmatmul.mubr.bf16.gmra.mrb[16].mxu0 %v11660_v9  ;;  %3468 = vmatmul.mubr.bf16.gmra.mrb[16].mxu1 %v11660_v9 }
 0x183   : > { %2898 = vmatprep.mubr.bf16.mxu0 %v11661_v10  ;;  %3477 = vmatprep.mubr.bf16.mxu1 %v11661_v10 }
 0x18a   : > { %2899 = vmatmul.mubr.bf16.gmra.mrb[20].mxu0 %v11663_v11  ;;  %3478 = vmatmul.mubr.bf16.gmra.mrb[20].mxu1 %v11663_v11 }
 0x18b   : > { %2908 = vmatprep.mubr.bf16.mxu0 %v11664_v12  ;;  %3487 = vmatprep.mubr.bf16.mxu1 %v11664_v12 }
 0x192   : > { %2909 = vmatmul.mubr.bf16.gmra.mrb[24].mxu0 %v11666_v13  ;;  %3488 = vmatmul.mubr.bf16.gmra.mrb[24].mxu1 %v11666_v13 }
 0x193   : > { %2918 = vmatprep.mubr.bf16.mxu0 %v11667_v14  ;;  %3497 = vmatprep.mubr.bf16.mxu1 %v11667_v14 }
 0x19a   : > { %2919 = vmatmul.mubr.bf16.gmra.mrb[28].mxu0 %v11669_v15  ;;  %3498 = vmatmul.mubr.bf16.gmra.mrb[28].mxu1 %v11669_v15 }
 0x19b   : > { %2928 = vmatprep.mubr.bf16.mxu0 %v11670_v16  ;;  %3507 = vmatprep.mubr.bf16.mxu1 %v11670_v16 }
 0x1a2   : > { %2929 = vmatmul.mubr.bf16.gmra.mrb[32].mxu0 %v11672_v17  ;;  %3508 = vmatmul.mubr.bf16.gmra.mrb[32].mxu1 %v11672_v17 }
 0x1a3   : > { %2938 = vmatprep.mubr.bf16.mxu0 %v11673_v18  ;;  %3517 = vmatprep.mubr.bf16.mxu1 %v11673_v18 }
 0x1aa   : > { %2939 = vmatmul.mubr.bf16.gmra.mrb[36].mxu0 %v11675_v19  ;;  %3518 = vmatmul.mubr.bf16.gmra.mrb[36].mxu1 %v11675_v19 }
 0x1ab   : > { %2948 = vmatprep.mubr.bf16.mxu0 %v11676_v20  ;;  %3527 = vmatprep.mubr.bf16.mxu1 %v11676_v20 }
 0x1b2   : > { %2949 = vmatmul.mubr.bf16.gmra.mrb[40].mxu0 %v11678_v21  ;;  %3528 = vmatmul.mubr.bf16.gmra.mrb[40].mxu1 %v11678_v21 }
 0x1b3   : > { %2958 = vmatprep.mubr.bf16.mxu0 %v11679_v22  ;;  %3537 = vmatprep.mubr.bf16.mxu1 %v11679_v22 }
 0x1ba   : > { %2959 = vmatmul.mubr.bf16.gmra.mrb[44].mxu0 %v11681_v23  ;;  %3538 = vmatmul.mubr.bf16.gmra.mrb[44].mxu1 %v11681_v23 }
 0x1bb   : > { %2968 = vmatprep.mubr.bf16.mxu0 %v11682_v24  ;;  %3547 = vmatprep.mubr.bf16.mxu1 %v11682_v24 }
 0x1c2   : > { %2969 = vmatmul.mubr.bf16.gmra.mrb[48].mxu0 %v11684_v25  ;;  %3548 = vmatmul.mubr.bf16.gmra.mrb[48].mxu1 %v11684_v25 }
 0x1c3   : > { %2978 = vmatprep.mubr.bf16.mxu0 %v11685_v26  ;;  %3557 = vmatprep.mubr.bf16.mxu1 %v11685_v26 }
 0x1ca   : > { %2979 = vmatmul.mubr.bf16.gmra.mrb[52].mxu0 %v11687_v27  ;;  %3558 = vmatmul.mubr.bf16.gmra.mrb[52].mxu1 %v11687_v27 }
 0x1cb   : > { %2988 = vmatprep.mubr.bf16.mxu0 %v11688_v28  ;;  %3567 = vmatprep.mubr.bf16.mxu1 %v11688_v28 }
 0x1d2   : > { %2989 = vmatmul.mubr.bf16.gmra.mrb[56].mxu0 %v11690_v29  ;;  %3568 = vmatmul.mubr.bf16.gmra.mrb[56].mxu1 %v11690_v29 }
 0x1d3   : > { %2998 = vmatprep.mubr.bf16.mxu0 %v11691_v30  ;;  %3577 = vmatprep.mubr.bf16.mxu1 %v11691_v30 }
 0x1da   : > { %2999 = vmatmul.mubr.bf16.gmra.mrb[60].mxu0 %v11693_v31  ;;  %3578 = vmatmul.mubr.bf16.gmra.mrb[60].mxu1 %v11693_v31 }
 0x235   : > { %v2850_v43 = vpop.f32.mrb[0].mxu0  ;;  %v3429_v44 = vpop.f32.mrb[0].mxu1 }
 0x236   : > { %v10637_v45 = vadd.f32 %v2850_v43, %v12945_v39  ;;  %v10701_v46 = vadd.f32 %v3429_v44, %v12947_v40  ;;  %v2852_v47 = vpop.f32.mrb[1].mxu0  ;;  %v3431_v48 = vpop.f32.mrb[1].mxu1 }
 0x237   : > { %v10638_v49 = vadd.f32 %v2852_v47, %v12949_v41  ;;  %v10702_v50 = vadd.f32 %v3431_v48, %v12951_v42  ;;  %v2854_v51 = vpop.f32.mrb[2].mxu0  ;;  %v3433_v52 = vpop.f32.mrb[2].mxu1 }
 0x238   : > { %3593 = vst [vmem:[%s12957_s24] sm:$0xff] %v10637_v45  ;;  %3595 = vst [vmem:[%s12957_s24 + $0x10] sm:$0xff] %v10701_v46  ;;  %v10639_v53 = vadd.f32 %v2854_v51, %v12945_v39  ;;  %v10703_v54 = vadd.f32 %v3433_v52, %v12947_v40  ;;  %v2856_v55 = vpop.f32.mrb[3].mxu0  ;;  %v3435_v56 = vpop.f32.mrb[3].mxu1 }
 0x239   : > { %3594 = vst [vmem:[%s12957_s24 + $0x8] sm:$0xff] %v10638_v49  ;;  %3596 = vst [vmem:[%s12957_s24 + $0x18] sm:$0xff] %v10702_v50  ;;  %v10640_v57 = vadd.f32 %v2856_v55, %v12949_v41  ;;  %v10704_v58 = vadd.f32 %v3435_v56, %v12951_v42 }
 0x23a   : > { %3597 = vst [vmem:[%s12957_s24 + $0x20] sm:$0xff] %v10639_v53  ;;  %3599 = vst [vmem:[%s12957_s24 + $0x30] sm:$0xff] %v10703_v54 }
 0x23b   : > { %3598 = vst [vmem:[%s12957_s24 + $0x28] sm:$0xff] %v10640_v57  ;;  %3600 = vst [vmem:[%s12957_s24 + $0x38] sm:$0xff] %v10704_v58 }
 0x23d   : > { %v2860_v59 = vpop.f32.mrb[4].mxu0  ;;  %v3439_v60 = vpop.f32.mrb[4].mxu1 }
 0x23e   : > { %v10641_v61 = vadd.f32 %v2860_v59, %v12945_v39  ;;  %v10705_v62 = vadd.f32 %v3439_v60, %v12947_v40  ;;  %v2862_v63 = vpop.f32.mrb[5].mxu0  ;;  %v3441_v0 = vpop.f32.mrb[5].mxu1 }
 0x23f   : > { %v10642_v1 = vadd.f32 %v2862_v63, %v12949_v41  ;;  %v10706_v2 = vadd.f32 %v3441_v0, %v12951_v42  ;;  %v2864_v3 = vpop.f32.mrb[6].mxu0  ;;  %v3443_v4 = vpop.f32.mrb[6].mxu1 }
 0x240   : > { %3601 = vst [vmem:[%s12957_s24 + $0x40] sm:$0xff] %v10641_v61  ;;  %3603 = vst [vmem:[%s12957_s24 + $0x50] sm:$0xff] %v10705_v62  ;;  %v10643_v5 = vadd.f32 %v2864_v3, %v12945_v39  ;;  %v10707_v6 = vadd.f32 %v3443_v4, %v12947_v40  ;;  %v2866_v7 = vpop.f32.mrb[7].mxu0  ;;  %v3445_v8 = vpop.f32.mrb[7].mxu1 }
 0x241   : > { %3602 = vst [vmem:[%s12957_s24 + $0x48] sm:$0xff] %v10642_v1  ;;  %3604 = vst [vmem:[%s12957_s24 + $0x58] sm:$0xff] %v10706_v2  ;;  %v10644_v9 = vadd.f32 %v2866_v7, %v12949_v41  ;;  %v10708_v10 = vadd.f32 %v3445_v8, %v12951_v42 }
 0x242   : > { %3605 = vst [vmem:[%s12957_s24 + $0x60] sm:$0xff] %v10643_v5  ;;  %3607 = vst [vmem:[%s12957_s24 + $0x70] sm:$0xff] %v10707_v6 }
 0x243   : > { %3606 = vst [vmem:[%s12957_s24 + $0x68] sm:$0xff] %v10644_v9  ;;  %3608 = vst [vmem:[%s12957_s24 + $0x78] sm:$0xff] %v10708_v10 }
 0x245   : > { %v2870_v11 = vpop.f32.mrb[8].mxu0  ;;  %v3449_v12 = vpop.f32.mrb[8].mxu1 }
 0x246   : > { %v10645_v13 = vadd.f32 %v2870_v11, %v12945_v39  ;;  %v10709_v14 = vadd.f32 %v3449_v12, %v12947_v40  ;;  %v2872_v15 = vpop.f32.mrb[9].mxu0  ;;  %v3451_v16 = vpop.f32.mrb[9].mxu1 }
 0x247   : > { %v10646_v17 = vadd.f32 %v2872_v15, %v12949_v41  ;;  %v10710_v18 = vadd.f32 %v3451_v16, %v12951_v42  ;;  %v2874_v19 = vpop.f32.mrb[10].mxu0  ;;  %v3453_v20 = vpop.f32.mrb[10].mxu1 }
 0x248   : > { %3609 = vst [vmem:[%s12957_s24 + $0x80] sm:$0xff] %v10645_v13  ;;  %3611 = vst [vmem:[%s12957_s24 + $0x90] sm:$0xff] %v10709_v14  ;;  %v10647_v21 = vadd.f32 %v2874_v19, %v12945_v39  ;;  %v10711_v22 = vadd.f32 %v3453_v20, %v12947_v40  ;;  %v2876_v23 = vpop.f32.mrb[11].mxu0  ;;  %v3455_v24 = vpop.f32.mrb[11].mxu1 }
 0x249   : > { %3610 = vst [vmem:[%s12957_s24 + $0x88] sm:$0xff] %v10646_v17  ;;  %3612 = vst [vmem:[%s12957_s24 + $0x98] sm:$0xff] %v10710_v18  ;;  %v10648_v25 = vadd.f32 %v2876_v23, %v12949_v41  ;;  %v10712_v26 = vadd.f32 %v3455_v24, %v12951_v42 }
 0x24a   : > { %3613 = vst [vmem:[%s12957_s24 + $0xa0] sm:$0xff] %v10647_v21  ;;  %3615 = vst [vmem:[%s12957_s24 + $0xb0] sm:$0xff] %v10711_v22 }
 0x24b   : > { %3614 = vst [vmem:[%s12957_s24 + $0xa8] sm:$0xff] %v10648_v25  ;;  %3616 = vst [vmem:[%s12957_s24 + $0xb8] sm:$0xff] %v10712_v26 }
 0x24d   : > { %v2880_v27 = vpop.f32.mrb[12].mxu0  ;;  %v3459_v28 = vpop.f32.mrb[12].mxu1 }
 0x24e   : > { %v10649_v29 = vadd.f32 %v2880_v27, %v12945_v39  ;;  %v10713_v30 = vadd.f32 %v3459_v28, %v12947_v40  ;;  %v2882_v31 = vpop.f32.mrb[13].mxu0  ;;  %v3461_v32 = vpop.f32.mrb[13].mxu1 }
 0x24f   : > { %v10650_v33 = vadd.f32 %v2882_v31, %v12949_v41  ;;  %v10714_v34 = vadd.f32 %v3461_v32, %v12951_v42  ;;  %v2884_v35 = vpop.f32.mrb[14].mxu0  ;;  %v3463_v36 = vpop.f32.mrb[14].mxu1 }
 0x250   : > { %3617 = vst [vmem:[%s12957_s24 + $0xc0] sm:$0xff] %v10649_v29  ;;  %3619 = vst [vmem:[%s12957_s24 + $0xd0] sm:$0xff] %v10713_v30  ;;  %v10651_v37 = vadd.f32 %v2884_v35, %v12945_v39  ;;  %v10715_v38 = vadd.f32 %v3463_v36, %v12947_v40  ;;  %v2886_v43 = vpop.f32.mrb[15].mxu0  ;;  %v3465_v44 = vpop.f32.mrb[15].mxu1 }
 0x251   : > { %3618 = vst [vmem:[%s12957_s24 + $0xc8] sm:$0xff] %v10650_v33  ;;  %3620 = vst [vmem:[%s12957_s24 + $0xd8] sm:$0xff] %v10714_v34  ;;  %v10652_v45 = vadd.f32 %v2886_v43, %v12949_v41  ;;  %v10716_v46 = vadd.f32 %v3465_v44, %v12951_v42 }
 0x252   : > { %3621 = vst [vmem:[%s12957_s24 + $0xe0] sm:$0xff] %v10651_v37  ;;  %3623 = vst [vmem:[%s12957_s24 + $0xf0] sm:$0xff] %v10715_v38 }
 0x253   : > { %3622 = vst [vmem:[%s12957_s24 + $0xe8] sm:$0xff] %v10652_v45  ;;  %3624 = vst [vmem:[%s12957_s24 + $0xf8] sm:$0xff] %v10716_v46 }
 0x255   : > { %v2890_v47 = vpop.f32.mrb[16].mxu0  ;;  %v3469_v48 = vpop.f32.mrb[16].mxu1 }
 0x256   : > { %v10653_v49 = vadd.f32 %v2890_v47, %v12945_v39  ;;  %v10717_v50 = vadd.f32 %v3469_v48, %v12947_v40  ;;  %v2892_v51 = vpop.f32.mrb[17].mxu0  ;;  %v3471_v52 = vpop.f32.mrb[17].mxu1 }
 0x257   : > { %v10654_v53 = vadd.f32 %v2892_v51, %v12949_v41  ;;  %v10718_v54 = vadd.f32 %v3471_v52, %v12951_v42  ;;  %v2894_v55 = vpop.f32.mrb[18].mxu0  ;;  %v3473_v56 = vpop.f32.mrb[18].mxu1 }
 0x258   : > { %3625 = vst [vmem:[%s12957_s24 + $0x100] sm:$0xff] %v10653_v49  ;;  %3627 = vst [vmem:[%s12957_s24 + $0x110] sm:$0xff] %v10717_v50  ;;  %v10655_v57 = vadd.f32 %v2894_v55, %v12945_v39  ;;  %v10719_v58 = vadd.f32 %v3473_v56, %v12947_v40  ;;  %v2896_v59 = vpop.f32.mrb[19].mxu0  ;;  %v3475_v60 = vpop.f32.mrb[19].mxu1 }
 0x259   : > { %3626 = vst [vmem:[%s12957_s24 + $0x108] sm:$0xff] %v10654_v53  ;;  %3628 = vst [vmem:[%s12957_s24 + $0x118] sm:$0xff] %v10718_v54  ;;  %v10656_v61 = vadd.f32 %v2896_v59, %v12949_v41  ;;  %v10720_v62 = vadd.f32 %v3475_v60, %v12951_v42 }
 0x25a   : > { %3629 = vst [vmem:[%s12957_s24 + $0x120] sm:$0xff] %v10655_v57  ;;  %3631 = vst [vmem:[%s12957_s24 + $0x130] sm:$0xff] %v10719_v58 }
 0x25b   : > { %3630 = vst [vmem:[%s12957_s24 + $0x128] sm:$0xff] %v10656_v61  ;;  %3632 = vst [vmem:[%s12957_s24 + $0x138] sm:$0xff] %v10720_v62 }
 0x25d   : > { %v2900_v63 = vpop.f32.mrb[20].mxu0  ;;  %v3479_v0 = vpop.f32.mrb[20].mxu1 }
 0x25e   : > { %v10657_v1 = vadd.f32 %v2900_v63, %v12945_v39  ;;  %v10721_v2 = vadd.f32 %v3479_v0, %v12947_v40  ;;  %v2902_v3 = vpop.f32.mrb[21].mxu0  ;;  %v3481_v4 = vpop.f32.mrb[21].mxu1 }
 0x25f   : > { %v10658_v5 = vadd.f32 %v2902_v3, %v12949_v41  ;;  %v10722_v6 = vadd.f32 %v3481_v4, %v12951_v42  ;;  %v2904_v7 = vpop.f32.mrb[22].mxu0  ;;  %v3483_v8 = vpop.f32.mrb[22].mxu1 }
 0x260   : > { %3633 = vst [vmem:[%s12957_s24 + $0x140] sm:$0xff] %v10657_v1  ;;  %3635 = vst [vmem:[%s12957_s24 + $0x150] sm:$0xff] %v10721_v2  ;;  %v10659_v9 = vadd.f32 %v2904_v7, %v12945_v39  ;;  %v10723_v10 = vadd.f32 %v3483_v8, %v12947_v40  ;;  %v2906_v11 = vpop.f32.mrb[23].mxu0  ;;  %v3485_v12 = vpop.f32.mrb[23].mxu1 }
 0x261   : > { %3634 = vst [vmem:[%s12957_s24 + $0x148] sm:$0xff] %v10658_v5  ;;  %3636 = vst [vmem:[%s12957_s24 + $0x158] sm:$0xff] %v10722_v6  ;;  %v10660_v13 = vadd.f32 %v2906_v11, %v12949_v41  ;;  %v10724_v14 = vadd.f32 %v3485_v12, %v12951_v42 }
 0x262   : > { %3637 = vst [vmem:[%s12957_s24 + $0x160] sm:$0xff] %v10659_v9  ;;  %3639 = vst [vmem:[%s12957_s24 + $0x170] sm:$0xff] %v10723_v10 }
 0x263   : > { %3638 = vst [vmem:[%s12957_s24 + $0x168] sm:$0xff] %v10660_v13  ;;  %3640 = vst [vmem:[%s12957_s24 + $0x178] sm:$0xff] %v10724_v14 }
 0x265   : > { %v2910_v15 = vpop.f32.mrb[24].mxu0  ;;  %v3489_v16 = vpop.f32.mrb[24].mxu1 }
 0x266   : > { %v10661_v17 = vadd.f32 %v2910_v15, %v12945_v39  ;;  %v10725_v18 = vadd.f32 %v3489_v16, %v12947_v40  ;;  %v2912_v19 = vpop.f32.mrb[25].mxu0  ;;  %v3491_v20 = vpop.f32.mrb[25].mxu1 }
 0x267   : > { %v10662_v21 = vadd.f32 %v2912_v19, %v12949_v41  ;;  %v10726_v22 = vadd.f32 %v3491_v20, %v12951_v42  ;;  %v2914_v23 = vpop.f32.mrb[26].mxu0  ;;  %v3493_v24 = vpop.f32.mrb[26].mxu1 }
 0x268   : > { %3641 = vst [vmem:[%s12957_s24 + $0x180] sm:$0xff] %v10661_v17  ;;  %3643 = vst [vmem:[%s12957_s24 + $0x190] sm:$0xff] %v10725_v18  ;;  %v10663_v25 = vadd.f32 %v2914_v23, %v12945_v39  ;;  %v10727_v26 = vadd.f32 %v3493_v24, %v12947_v40  ;;  %v2916_v27 = vpop.f32.mrb[27].mxu0  ;;  %v3495_v28 = vpop.f32.mrb[27].mxu1 }
 0x269   : > { %3642 = vst [vmem:[%s12957_s24 + $0x188] sm:$0xff] %v10662_v21  ;;  %3644 = vst [vmem:[%s12957_s24 + $0x198] sm:$0xff] %v10726_v22  ;;  %v10664_v29 = vadd.f32 %v2916_v27, %v12949_v41  ;;  %v10728_v30 = vadd.f32 %v3495_v28, %v12951_v42 }
 0x26a   : > { %3645 = vst [vmem:[%s12957_s24 + $0x1a0] sm:$0xff] %v10663_v25  ;;  %3647 = vst [vmem:[%s12957_s24 + $0x1b0] sm:$0xff] %v10727_v26 }
 0x26b   : > { %3646 = vst [vmem:[%s12957_s24 + $0x1a8] sm:$0xff] %v10664_v29  ;;  %3648 = vst [vmem:[%s12957_s24 + $0x1b8] sm:$0xff] %v10728_v30 }
 0x26d   : > { %v2920_v31 = vpop.f32.mrb[28].mxu0  ;;  %v3499_v32 = vpop.f32.mrb[28].mxu1 }
 0x26e   : > { %v10665_v33 = vadd.f32 %v2920_v31, %v12945_v39  ;;  %v10729_v34 = vadd.f32 %v3499_v32, %v12947_v40  ;;  %v2922_v35 = vpop.f32.mrb[29].mxu0  ;;  %v3501_v36 = vpop.f32.mrb[29].mxu1 }
 0x26f   : > { %v10666_v37 = vadd.f32 %v2922_v35, %v12949_v41  ;;  %v10730_v38 = vadd.f32 %v3501_v36, %v12951_v42  ;;  %v2924_v43 = vpop.f32.mrb[30].mxu0  ;;  %v3503_v44 = vpop.f32.mrb[30].mxu1 }
 0x270   : > { %3649 = vst [vmem:[%s12957_s24 + $0x1c0] sm:$0xff] %v10665_v33  ;;  %3651 = vst [vmem:[%s12957_s24 + $0x1d0] sm:$0xff] %v10729_v34  ;;  %v10667_v45 = vadd.f32 %v2924_v43, %v12945_v39  ;;  %v10731_v46 = vadd.f32 %v3503_v44, %v12947_v40  ;;  %v2926_v47 = vpop.f32.mrb[31].mxu0  ;;  %v3505_v48 = vpop.f32.mrb[31].mxu1 }
 0x271   : > { %3650 = vst [vmem:[%s12957_s24 + $0x1c8] sm:$0xff] %v10666_v37  ;;  %3652 = vst [vmem:[%s12957_s24 + $0x1d8] sm:$0xff] %v10730_v38  ;;  %v10668_v49 = vadd.f32 %v2926_v47, %v12949_v41  ;;  %v10732_v50 = vadd.f32 %v3505_v48, %v12951_v42 }
 0x272   : > { %3653 = vst [vmem:[%s12957_s24 + $0x1e0] sm:$0xff] %v10667_v45  ;;  %3655 = vst [vmem:[%s12957_s24 + $0x1f0] sm:$0xff] %v10731_v46 }
 0x273   : > { %3654 = vst [vmem:[%s12957_s24 + $0x1e8] sm:$0xff] %v10668_v49  ;;  %3656 = vst [vmem:[%s12957_s24 + $0x1f8] sm:$0xff] %v10732_v50 }
 0x275   : > { %v2930_v51 = vpop.f32.mrb[32].mxu0  ;;  %v3509_v52 = vpop.f32.mrb[32].mxu1 }
 0x276   : > { %v10669_v53 = vadd.f32 %v2930_v51, %v12945_v39  ;;  %v10733_v54 = vadd.f32 %v3509_v52, %v12947_v40  ;;  %v2932_v55 = vpop.f32.mrb[33].mxu0  ;;  %v3511_v56 = vpop.f32.mrb[33].mxu1 }
 0x277   : > { %v10670_v57 = vadd.f32 %v2932_v55, %v12949_v41  ;;  %v10734_v58 = vadd.f32 %v3511_v56, %v12951_v42  ;;  %v2934_v59 = vpop.f32.mrb[34].mxu0  ;;  %v3513_v60 = vpop.f32.mrb[34].mxu1 }
 0x278   : > { %3657 = vst [vmem:[%s12957_s24 + $0x200] sm:$0xff] %v10669_v53  ;;  %3659 = vst [vmem:[%s12957_s24 + $0x210] sm:$0xff] %v10733_v54  ;;  %v10671_v61 = vadd.f32 %v2934_v59, %v12945_v39  ;;  %v10735_v62 = vadd.f32 %v3513_v60, %v12947_v40  ;;  %v2936_v63 = vpop.f32.mrb[35].mxu0  ;;  %v3515_v0 = vpop.f32.mrb[35].mxu1 }
 0x279   : > { %3658 = vst [vmem:[%s12957_s24 + $0x208] sm:$0xff] %v10670_v57  ;;  %3660 = vst [vmem:[%s12957_s24 + $0x218] sm:$0xff] %v10734_v58  ;;  %v10672_v1 = vadd.f32 %v2936_v63, %v12949_v41  ;;  %v10736_v2 = vadd.f32 %v3515_v0, %v12951_v42 }
 0x27a   : > { %3661 = vst [vmem:[%s12957_s24 + $0x220] sm:$0xff] %v10671_v61  ;;  %3663 = vst [vmem:[%s12957_s24 + $0x230] sm:$0xff] %v10735_v62 }
 0x27b   : > { %3662 = vst [vmem:[%s12957_s24 + $0x228] sm:$0xff] %v10672_v1  ;;  %3664 = vst [vmem:[%s12957_s24 + $0x238] sm:$0xff] %v10736_v2 }
 0x27d   : > { %v2940_v3 = vpop.f32.mrb[36].mxu0  ;;  %v3519_v4 = vpop.f32.mrb[36].mxu1 }
 0x27e   : > { %v10673_v5 = vadd.f32 %v2940_v3, %v12945_v39  ;;  %v10737_v6 = vadd.f32 %v3519_v4, %v12947_v40  ;;  %v2942_v7 = vpop.f32.mrb[37].mxu0  ;;  %v3521_v8 = vpop.f32.mrb[37].mxu1 }
 0x27f   : > { %v10674_v9 = vadd.f32 %v2942_v7, %v12949_v41  ;;  %v10738_v10 = vadd.f32 %v3521_v8, %v12951_v42  ;;  %v2944_v11 = vpop.f32.mrb[38].mxu0  ;;  %v3523_v12 = vpop.f32.mrb[38].mxu1 }
 0x280   : > { %3665 = vst [vmem:[%s12957_s24 + $0x240] sm:$0xff] %v10673_v5  ;;  %3667 = vst [vmem:[%s12957_s24 + $0x250] sm:$0xff] %v10737_v6  ;;  %v10675_v13 = vadd.f32 %v2944_v11, %v12945_v39  ;;  %v10739_v14 = vadd.f32 %v3523_v12, %v12947_v40  ;;  %v2946_v15 = vpop.f32.mrb[39].mxu0  ;;  %v3525_v16 = vpop.f32.mrb[39].mxu1 }
 0x281   : > { %3666 = vst [vmem:[%s12957_s24 + $0x248] sm:$0xff] %v10674_v9  ;;  %3668 = vst [vmem:[%s12957_s24 + $0x258] sm:$0xff] %v10738_v10  ;;  %v10676_v17 = vadd.f32 %v2946_v15, %v12949_v41  ;;  %v10740_v18 = vadd.f32 %v3525_v16, %v12951_v42 }
 0x282   : > { %3669 = vst [vmem:[%s12957_s24 + $0x260] sm:$0xff] %v10675_v13  ;;  %3671 = vst [vmem:[%s12957_s24 + $0x270] sm:$0xff] %v10739_v14 }
 0x283   : > { %3670 = vst [vmem:[%s12957_s24 + $0x268] sm:$0xff] %v10676_v17  ;;  %3672 = vst [vmem:[%s12957_s24 + $0x278] sm:$0xff] %v10740_v18 }
 0x285   : > { %v2950_v19 = vpop.f32.mrb[40].mxu0  ;;  %v3529_v20 = vpop.f32.mrb[40].mxu1 }
 0x286   : > { %v10677_v21 = vadd.f32 %v2950_v19, %v12945_v39  ;;  %v10741_v22 = vadd.f32 %v3529_v20, %v12947_v40  ;;  %v2952_v23 = vpop.f32.mrb[41].mxu0  ;;  %v3531_v24 = vpop.f32.mrb[41].mxu1 }
 0x287   : > { %v10678_v25 = vadd.f32 %v2952_v23, %v12949_v41  ;;  %v10742_v26 = vadd.f32 %v3531_v24, %v12951_v42  ;;  %v2954_v27 = vpop.f32.mrb[42].mxu0  ;;  %v3533_v28 = vpop.f32.mrb[42].mxu1 }
 0x288   : > { %3673 = vst [vmem:[%s12957_s24 + $0x280] sm:$0xff] %v10677_v21  ;;  %3675 = vst [vmem:[%s12957_s24 + $0x290] sm:$0xff] %v10741_v22  ;;  %v10679_v29 = vadd.f32 %v2954_v27, %v12945_v39  ;;  %v10743_v30 = vadd.f32 %v3533_v28, %v12947_v40  ;;  %v2956_v31 = vpop.f32.mrb[43].mxu0  ;;  %v3535_v32 = vpop.f32.mrb[43].mxu1 }
 0x289   : > { %3674 = vst [vmem:[%s12957_s24 + $0x288] sm:$0xff] %v10678_v25  ;;  %3676 = vst [vmem:[%s12957_s24 + $0x298] sm:$0xff] %v10742_v26  ;;  %v10680_v33 = vadd.f32 %v2956_v31, %v12949_v41  ;;  %v10744_v34 = vadd.f32 %v3535_v32, %v12951_v42 }
 0x28a   : > { %3677 = vst [vmem:[%s12957_s24 + $0x2a0] sm:$0xff] %v10679_v29  ;;  %3679 = vst [vmem:[%s12957_s24 + $0x2b0] sm:$0xff] %v10743_v30 }
 0x28b   : > { %3678 = vst [vmem:[%s12957_s24 + $0x2a8] sm:$0xff] %v10680_v33  ;;  %3680 = vst [vmem:[%s12957_s24 + $0x2b8] sm:$0xff] %v10744_v34 }
 0x28d   : > { %v2960_v35 = vpop.f32.mrb[44].mxu0  ;;  %v3539_v36 = vpop.f32.mrb[44].mxu1 }
 0x28e   : > { %v10681_v37 = vadd.f32 %v2960_v35, %v12945_v39  ;;  %v10745_v38 = vadd.f32 %v3539_v36, %v12947_v40  ;;  %v2962_v43 = vpop.f32.mrb[45].mxu0  ;;  %v3541_v44 = vpop.f32.mrb[45].mxu1 }
 0x28f   : > { %v10682_v45 = vadd.f32 %v2962_v43, %v12949_v41  ;;  %v10746_v46 = vadd.f32 %v3541_v44, %v12951_v42  ;;  %v2964_v47 = vpop.f32.mrb[46].mxu0  ;;  %v3543_v48 = vpop.f32.mrb[46].mxu1 }
 0x290   : > { %3681 = vst [vmem:[%s12957_s24 + $0x2c0] sm:$0xff] %v10681_v37  ;;  %3683 = vst [vmem:[%s12957_s24 + $0x2d0] sm:$0xff] %v10745_v38  ;;  %v10683_v49 = vadd.f32 %v2964_v47, %v12945_v39  ;;  %v10747_v50 = vadd.f32 %v3543_v48, %v12947_v40  ;;  %v2966_v51 = vpop.f32.mrb[47].mxu0  ;;  %v3545_v52 = vpop.f32.mrb[47].mxu1 }
 0x291   : > { %3682 = vst [vmem:[%s12957_s24 + $0x2c8] sm:$0xff] %v10682_v45  ;;  %3684 = vst [vmem:[%s12957_s24 + $0x2d8] sm:$0xff] %v10746_v46  ;;  %v10684_v53 = vadd.f32 %v2966_v51, %v12949_v41  ;;  %v10748_v54 = vadd.f32 %v3545_v52, %v12951_v42 }
 0x292   : > { %3685 = vst [vmem:[%s12957_s24 + $0x2e0] sm:$0xff] %v10683_v49  ;;  %3687 = vst [vmem:[%s12957_s24 + $0x2f0] sm:$0xff] %v10747_v50 }
 0x293   : > { %3686 = vst [vmem:[%s12957_s24 + $0x2e8] sm:$0xff] %v10684_v53  ;;  %3688 = vst [vmem:[%s12957_s24 + $0x2f8] sm:$0xff] %v10748_v54 }
 0x295   : > { %v2970_v55 = vpop.f32.mrb[48].mxu0  ;;  %v3549_v56 = vpop.f32.mrb[48].mxu1 }
 0x296   : > { %v10685_v57 = vadd.f32 %v2970_v55, %v12945_v39  ;;  %v10749_v58 = vadd.f32 %v3549_v56, %v12947_v40  ;;  %v2972_v59 = vpop.f32.mrb[49].mxu0  ;;  %v3551_v60 = vpop.f32.mrb[49].mxu1 }
 0x297   : > { %v10686_v61 = vadd.f32 %v2972_v59, %v12949_v41  ;;  %v10750_v62 = vadd.f32 %v3551_v60, %v12951_v42  ;;  %v2974_v63 = vpop.f32.mrb[50].mxu0  ;;  %v3553_v0 = vpop.f32.mrb[50].mxu1 }
 0x298   : > { %3689 = vst [vmem:[%s12957_s24 + $0x300] sm:$0xff] %v10685_v57  ;;  %3691 = vst [vmem:[%s12957_s24 + $0x310] sm:$0xff] %v10749_v58  ;;  %v10687_v1 = vadd.f32 %v2974_v63, %v12945_v39  ;;  %v10751_v2 = vadd.f32 %v3553_v0, %v12947_v40  ;;  %v2976_v3 = vpop.f32.mrb[51].mxu0  ;;  %v3555_v4 = vpop.f32.mrb[51].mxu1 }
 0x299   : > { %3690 = vst [vmem:[%s12957_s24 + $0x308] sm:$0xff] %v10686_v61  ;;  %3692 = vst [vmem:[%s12957_s24 + $0x318] sm:$0xff] %v10750_v62  ;;  %v10688_v5 = vadd.f32 %v2976_v3, %v12949_v41  ;;  %v10752_v6 = vadd.f32 %v3555_v4, %v12951_v42 }
 0x29a   : > { %3693 = vst [vmem:[%s12957_s24 + $0x320] sm:$0xff] %v10687_v1  ;;  %3695 = vst [vmem:[%s12957_s24 + $0x330] sm:$0xff] %v10751_v2 }
 0x29b   : > { %3694 = vst [vmem:[%s12957_s24 + $0x328] sm:$0xff] %v10688_v5  ;;  %3696 = vst [vmem:[%s12957_s24 + $0x338] sm:$0xff] %v10752_v6 }
 0x29d   : > { %v2980_v7 = vpop.f32.mrb[52].mxu0  ;;  %v3559_v8 = vpop.f32.mrb[52].mxu1 }
 0x29e   : > { %v10689_v9 = vadd.f32 %v2980_v7, %v12945_v39  ;;  %v10753_v10 = vadd.f32 %v3559_v8, %v12947_v40  ;;  %v2982_v11 = vpop.f32.mrb[53].mxu0  ;;  %v3561_v12 = vpop.f32.mrb[53].mxu1 }
 0x29f   : > { %v10690_v13 = vadd.f32 %v2982_v11, %v12949_v41  ;;  %v10754_v14 = vadd.f32 %v3561_v12, %v12951_v42  ;;  %v2984_v15 = vpop.f32.mrb[54].mxu0  ;;  %v3563_v16 = vpop.f32.mrb[54].mxu1 }
 0x2a0   : > { %3697 = vst [vmem:[%s12957_s24 + $0x340] sm:$0xff] %v10689_v9  ;;  %3699 = vst [vmem:[%s12957_s24 + $0x350] sm:$0xff] %v10753_v10  ;;  %v10691_v17 = vadd.f32 %v2984_v15, %v12945_v39  ;;  %v10755_v18 = vadd.f32 %v3563_v16, %v12947_v40  ;;  %v2986_v19 = vpop.f32.mrb[55].mxu0  ;;  %v3565_v20 = vpop.f32.mrb[55].mxu1 }
 0x2a1   : > { %3698 = vst [vmem:[%s12957_s24 + $0x348] sm:$0xff] %v10690_v13  ;;  %3700 = vst [vmem:[%s12957_s24 + $0x358] sm:$0xff] %v10754_v14  ;;  %v10692_v21 = vadd.f32 %v2986_v19, %v12949_v41  ;;  %v10756_v22 = vadd.f32 %v3565_v20, %v12951_v42 }
 0x2a2   : > { %3701 = vst [vmem:[%s12957_s24 + $0x360] sm:$0xff] %v10691_v17  ;;  %3703 = vst [vmem:[%s12957_s24 + $0x370] sm:$0xff] %v10755_v18 }
 0x2a3   : > { %3702 = vst [vmem:[%s12957_s24 + $0x368] sm:$0xff] %v10692_v21  ;;  %3704 = vst [vmem:[%s12957_s24 + $0x378] sm:$0xff] %v10756_v22 }
 0x2a5   : > { %v2990_v23 = vpop.f32.mrb[56].mxu0  ;;  %v3569_v24 = vpop.f32.mrb[56].mxu1 }
 0x2a6   : > { %v10693_v25 = vadd.f32 %v2990_v23, %v12945_v39  ;;  %v10757_v26 = vadd.f32 %v3569_v24, %v12947_v40  ;;  %v2992_v27 = vpop.f32.mrb[57].mxu0  ;;  %v3571_v28 = vpop.f32.mrb[57].mxu1 }
 0x2a7   : > { %v10694_v29 = vadd.f32 %v2992_v27, %v12949_v41  ;;  %v10758_v30 = vadd.f32 %v3571_v28, %v12951_v42  ;;  %v2994_v31 = vpop.f32.mrb[58].mxu0  ;;  %v3573_v32 = vpop.f32.mrb[58].mxu1 }
 0x2a8   : > { %3705 = vst [vmem:[%s12957_s24 + $0x380] sm:$0xff] %v10693_v25  ;;  %3707 = vst [vmem:[%s12957_s24 + $0x390] sm:$0xff] %v10757_v26  ;;  %v10695_v33 = vadd.f32 %v2994_v31, %v12945_v39  ;;  %v10759_v34 = vadd.f32 %v3573_v32, %v12947_v40  ;;  %v2996_v35 = vpop.f32.mrb[59].mxu0  ;;  %v3575_v36 = vpop.f32.mrb[59].mxu1 }
 0x2a9   : > { %3706 = vst [vmem:[%s12957_s24 + $0x388] sm:$0xff] %v10694_v29  ;;  %3708 = vst [vmem:[%s12957_s24 + $0x398] sm:$0xff] %v10758_v30  ;;  %v10696_v37 = vadd.f32 %v2996_v35, %v12949_v41  ;;  %v10760_v38 = vadd.f32 %v3575_v36, %v12951_v42 }
 0x2aa   : > { %3709 = vst [vmem:[%s12957_s24 + $0x3a0] sm:$0xff] %v10695_v33  ;;  %3711 = vst [vmem:[%s12957_s24 + $0x3b0] sm:$0xff] %v10759_v34 }
 0x2ab   : > { %3710 = vst [vmem:[%s12957_s24 + $0x3a8] sm:$0xff] %v10696_v37  ;;  %3712 = vst [vmem:[%s12957_s24 + $0x3b8] sm:$0xff] %v10760_v38 }
 0x2ad   : > { %v3000_v43 = vpop.f32.mrb[60].mxu0  ;;  %v3579_v44 = vpop.f32.mrb[60].mxu1 }
 0x2ae   : > { %v10697_v45 = vadd.f32 %v3000_v43, %v12945_v39  ;;  %v10761_v46 = vadd.f32 %v3579_v44, %v12947_v40  ;;  %v3002_v47 = vpop.f32.mrb[61].mxu0  ;;  %v3581_v48 = vpop.f32.mrb[61].mxu1 }
 0x2af   : > { %v10698_v49 = vadd.f32 %v3002_v47, %v12949_v41  ;;  %v10762_v50 = vadd.f32 %v3581_v48, %v12951_v42  ;;  %v3004_v51 = vpop.f32.mrb[62].mxu0  ;;  %v3583_v52 = vpop.f32.mrb[62].mxu1 }
 0x2b0   : > { %3713 = vst [vmem:[%s12957_s24 + $0x3c0] sm:$0xff] %v10697_v45  ;;  %3715 = vst [vmem:[%s12957_s24 + $0x3d0] sm:$0xff] %v10761_v46  ;;  %v10699_v53 = vadd.f32 %v3004_v51, %v12945_v39  ;;  %v10763_v54 = vadd.f32 %v3583_v52, %v12947_v40  ;;  %v3006_v55 = vpop.f32.mrb[63].mxu0  ;;  %v3585_v56 = vpop.f32.mrb[63].mxu1 }
 0x2b1   : > { %3714 = vst [vmem:[%s12957_s24 + $0x3c8] sm:$0xff] %v10698_v49  ;;  %3716 = vst [vmem:[%s12957_s24 + $0x3d8] sm:$0xff] %v10762_v50  ;;  %v10700_v57 = vadd.f32 %v3006_v55, %v12949_v41  ;;  %v10764_v58 = vadd.f32 %v3585_v56, %v12951_v42 }
 0x2b2   : > { %3717 = vst [vmem:[%s12957_s24 + $0x3e0] sm:$0xff] %v10699_v53  ;;  %3719 = vst [vmem:[%s12957_s24 + $0x3f0] sm:$0xff] %v10763_v54 }
 0x2b3   : > { %3718 = vst [vmem:[%s12957_s24 + $0x3e8] sm:$0xff] %v10700_v57  ;;  %3720 = vst [vmem:[%s12957_s24 + $0x3f8] sm:$0xff] %v10764_v58 }
 0x2b4 PF: > { %p10189_p10 = scmp.ne.s32.totalorder %s12058_s22, 1 }
 0x2b6   : > { %3724 = sbr.rel (%p10189_p10) target bundleno = 1359 (0x54f), region = 108 }
 0x2bd   : > { %s16710_s23 = sld [smem:[#allocation71_spill]]  ;;  %s3725_s21 = sshra.s32 %s12254_s26, 3 }
 0x2be   : > { %s10370_s25 = sshll.u32 %s3725_s21, 5  ;;  %p10256_p11 = scmp.ne.s32.totalorder %s12054_s1, 0 }
 0x2bf   : > { %s13359_s16 = scalar_lea.vmem [#allocation2], %s10370_s25 }
 0x2c0   : > { %v3731_v43 = vld [vmem:[%s13359_s16 + $0x8] sm:$0xff]  ;;  %v3733_v47 = vld [vmem:[%s13359_s16 + $0x18] sm:$0xff] }
 0x2c1   : > { %v3735_v45 = vld [vmem:[%s13359_s16 + $0x28] sm:$0xff]  ;;  %vm3859_vm0 = vcmp.ge.f32.partialorder %v3731_v43, 0.0  ;;  %v3987_v46 = vmul.f32 0.2, %v3731_v43  ;;  %v3737_v48 = vld [vmem:[%s13359_s16 + $0x38] sm:$0xff]  ;;  %vm3861_vm2 = vcmp.ge.f32.partialorder %v3733_v47, 0.0 }
 0x2c2   : > { %vm3863_vm1 = vcmp.ge.f32.partialorder %v3735_v45, 0.0  ;;  %v3991_v49 = vmul.f32 0.2, %v3735_v45  ;;  %vm3865_vm3 = vcmp.ge.f32.partialorder %v3737_v48, 0.0  ;;  %v3989_v52 = vmul.f32 0.2, %v3733_v47 }
 0x2c3   : > { %s16711_s30 = smov %s16710_s23  ;;  %v11694_v39 = vld [vmem:[%s16710_s23 + $0x4] ss:$8 sps:$4 sm:$0xff]   ;;  %v4115_v51 = vsel %vm3859_vm0, %v3731_v43, %v3987_v46  ;;  %v3993_v53 = vmul.f32 0.2, %v3737_v48 }
 0x2c4   : > { %v11696_v40 = vld [vmem:[%s16711_s30 + $0x104] ss:$8 sps:$4 sm:$0xff]   ;;  %4690 = vmatprep.subr.bf16.mxu1 %v11694_v39  ;;  %v11698_v41 = vld [vmem:[%s16711_s30] ss:$8 sps:$4 sm:$0xff]   ;;  %v11700_v59 = vld [vmem:[%s16711_s30 + $0x14] ss:$8 sps:$4 sm:$0xff]   ;;  %v4119_v54 = vsel %vm3863_vm1, %v3735_v45, %v3991_v49  ;;  %v4117_v56 = vsel %vm3861_vm2, %v3733_v47, %v3989_v52 }
 0x2c5   : > { %v11699_v42 = vld [vmem:[%s16711_s30 + $0x100] ss:$8 sps:$4 sm:$0xff]   ;;  %4883 = vmatprep.subr.bf16.mxu0 %v11696_v40  ;;  %4691 = vmatpush1.bf16.msra.mxu1 %v11698_v41  ;;  %v11702_v60 = vld [vmem:[%s16711_s30 + $0x114] ss:$8 sps:$4 sm:$0xff]   ;;  %v11704_v61 = vld [vmem:[%s16711_s30 + $0x10] ss:$8 sps:$4 sm:$0xff]   ;;  %v4243_v55 = vpack.c.bf16 %v4119_v54, %v4115_v51  ;;  %v4121_v57 = vsel %vm3865_vm3, %v3737_v48, %v3993_v53 }
 0x2c6   : > { %4884 = vmatpush1.bf16.msra.mxu0 %v11699_v42  ;;  %4692 = vmatprep.subr.bf16.mxu1 %v11700_v59  ;;  %v11705_v62 = vld [vmem:[%s16711_s30 + $0x110] ss:$8 sps:$4 sm:$0xff]   ;;  %v11706_v63 = vld [vmem:[%s16711_s30 + $0x24] ss:$8 sps:$4 sm:$0xff]   ;;  %v11710_v1 = vld [vmem:[%s16711_s30 + $0x20] ss:$8 sps:$4 sm:$0xff]   ;;  %v4245_v41 = vpack.c.bf16 %v4121_v57, %v4117_v56 }
 0x2c7   : > { %4885 = vmatprep.subr.bf16.mxu0 %v11702_v60  ;;  %v11708_v0 = vld [vmem:[%s16711_s30 + $0x124] ss:$8 sps:$4 sm:$0xff]   ;;  %v11711_v2 = vld [vmem:[%s16711_s30 + $0x120] ss:$8 sps:$4 sm:$0xff]   ;;  %v11712_v3 = vld [vmem:[%s16711_s30 + $0x34] ss:$8 sps:$4 sm:$0xff]   ;;  %4722 = vmatprep.mubr.bf16.mxu1 %v4243_v55 }
 0x2c8   : > { %v11714_v4 = vld [vmem:[%s16711_s30 + $0x134] ss:$8 sps:$4 sm:$0xff]   ;;  %v11716_v5 = vld [vmem:[%s16711_s30 + $0x30] ss:$8 sps:$4 sm:$0xff]   ;;  %v11718_v7 = vld [vmem:[%s16711_s30 + $0x44] ss:$8 sps:$4 sm:$0xff]   ;;  %4915 = vmatprep.mubr.bf16.mxu0 %v4245_v41 }
 0x2c9   : > { %4693 = vmatpush1.bf16.msra.mxu1 %v11704_v61  ;;  %v11717_v6 = vld [vmem:[%s16711_s30 + $0x130] ss:$8 sps:$4 sm:$0xff]   ;;  %v11720_v8 = vld [vmem:[%s16711_s30 + $0x144] ss:$8 sps:$4 sm:$0xff]   ;;  %v11722_v9 = vld [vmem:[%s16711_s30 + $0x40] ss:$8 sps:$4 sm:$0xff]  }
 0x2ca   : > { %4886 = vmatpush1.bf16.msra.mxu0 %v11705_v62  ;;  %4694 = vmatprep.subr.bf16.mxu1 %v11706_v63  ;;  %v11723_v10 = vld [vmem:[%s16711_s30 + $0x140] ss:$8 sps:$4 sm:$0xff]   ;;  %v11724_v11 = vld [vmem:[%s16711_s30 + $0x54] ss:$8 sps:$4 sm:$0xff]   ;;  %v11728_v13 = vld [vmem:[%s16711_s30 + $0x50] ss:$8 sps:$4 sm:$0xff]  }
 0x2cb   : > { %4887 = vmatprep.subr.bf16.mxu0 %v11708_v0  ;;  %v11726_v12 = vld [vmem:[%s16711_s30 + $0x154] ss:$8 sps:$4 sm:$0xff]   ;;  %v11729_v14 = vld [vmem:[%s16711_s30 + $0x150] ss:$8 sps:$4 sm:$0xff]   ;;  %v11730_v15 = vld [vmem:[%s16711_s30 + $0x64] ss:$8 sps:$4 sm:$0xff]  }
 0x2cc   : > { %v11732_v16 = vld [vmem:[%s16711_s30 + $0x164] ss:$8 sps:$4 sm:$0xff]   ;;  %v11734_v17 = vld [vmem:[%s16711_s30 + $0x60] ss:$8 sps:$4 sm:$0xff]   ;;  %v11736_v19 = vld [vmem:[%s16711_s30 + $0x74] ss:$8 sps:$4 sm:$0xff]  }
 0x2cd   : > { %4695 = vmatpush1.bf16.msra.mxu1 %v11710_v1  ;;  %v11735_v18 = vld [vmem:[%s16711_s30 + $0x160] ss:$8 sps:$4 sm:$0xff]   ;;  %v11738_v20 = vld [vmem:[%s16711_s30 + $0x174] ss:$8 sps:$4 sm:$0xff]   ;;  %v11740_v21 = vld [vmem:[%s16711_s30 + $0x70] ss:$8 sps:$4 sm:$0xff]  }
 0x2ce   : > { %4888 = vmatpush1.bf16.msra.mxu0 %v11711_v2  ;;  %4696 = vmatprep.subr.bf16.mxu1 %v11712_v3  ;;  %v11741_v22 = vld [vmem:[%s16711_s30 + $0x170] ss:$8 sps:$4 sm:$0xff]   ;;  %v11742_v23 = vld [vmem:[%s16711_s30 + $0x84] ss:$8 sps:$4 sm:$0xff]   ;;  %v11746_v25 = vld [vmem:[%s16711_s30 + $0x80] ss:$8 sps:$4 sm:$0xff]  }
 0x2cf   : > { %4889 = vmatprep.subr.bf16.mxu0 %v11714_v4  ;;  %v11744_v24 = vld [vmem:[%s16711_s30 + $0x184] ss:$8 sps:$4 sm:$0xff]   ;;  %v11747_v26 = vld [vmem:[%s16711_s30 + $0x180] ss:$8 sps:$4 sm:$0xff]   ;;  %v11748_v27 = vld [vmem:[%s16711_s30 + $0x94] ss:$8 sps:$4 sm:$0xff]  }
 0x2d0   : > { %v11750_v28 = vld [vmem:[%s16711_s30 + $0x194] ss:$8 sps:$4 sm:$0xff]   ;;  %v11752_v29 = vld [vmem:[%s16711_s30 + $0x90] ss:$8 sps:$4 sm:$0xff]   ;;  %v11754_v31 = vld [vmem:[%s16711_s30 + $0xa4] ss:$8 sps:$4 sm:$0xff]  }
 0x2d1   : > { %4697 = vmatpush1.bf16.msra.mxu1 %v11716_v5  ;;  %v11753_v30 = vld [vmem:[%s16711_s30 + $0x190] ss:$8 sps:$4 sm:$0xff]   ;;  %v11756_v32 = vld [vmem:[%s16711_s30 + $0x1a4] ss:$8 sps:$4 sm:$0xff]   ;;  %v11758_v33 = vld [vmem:[%s16711_s30 + $0xa0] ss:$8 sps:$4 sm:$0xff]  }
 0x2d2   : > { %4890 = vmatpush1.bf16.msra.mxu0 %v11717_v6  ;;  %4698 = vmatprep.subr.bf16.mxu1 %v11718_v7  ;;  %v11759_v34 = vld [vmem:[%s16711_s30 + $0x1a0] ss:$8 sps:$4 sm:$0xff]   ;;  %v11760_v35 = vld [vmem:[%s16711_s30 + $0xb4] ss:$8 sps:$4 sm:$0xff]   ;;  %v11764_v37 = vld [vmem:[%s16711_s30 + $0xb0] ss:$8 sps:$4 sm:$0xff]  }
 0x2d3   : > { %4891 = vmatprep.subr.bf16.mxu0 %v11720_v8  ;;  %v11762_v36 = vld [vmem:[%s16711_s30 + $0x1b4] ss:$8 sps:$4 sm:$0xff]   ;;  %v11765_v38 = vld [vmem:[%s16711_s30 + $0x1b0] ss:$8 sps:$4 sm:$0xff]   ;;  %v11766_v44 = vld [vmem:[%s16711_s30 + $0xc4] ss:$8 sps:$4 sm:$0xff]  }
 0x2d4   : > { %v11768_v50 = vld [vmem:[%s16711_s30 + $0x1c4] ss:$8 sps:$4 sm:$0xff]   ;;  %v11770_v58 = vld [vmem:[%s16711_s30 + $0xc0] ss:$8 sps:$4 sm:$0xff]   ;;  %v11772_v40 = vld [vmem:[%s16711_s30 + $0xd4] ss:$8 sps:$4 sm:$0xff]  }
 0x2d5   : > { %4699 = vmatpush1.bf16.msra.mxu1 %v11722_v9  ;;  %v11771_v39 = vld [vmem:[%s16711_s30 + $0x1c0] ss:$8 sps:$4 sm:$0xff]   ;;  %v11774_v42 = vld [vmem:[%s16711_s30 + $0x1d4] ss:$8 sps:$4 sm:$0xff]   ;;  %v11776_v61 = vld [vmem:[%s16711_s30 + $0xd0] ss:$8 sps:$4 sm:$0xff]  }
 0x2d6   : > { %4892 = vmatpush1.bf16.msra.mxu0 %v11723_v10  ;;  %4700 = vmatprep.subr.bf16.mxu1 %v11724_v11  ;;  %v3730_v59 = vld [vmem:[%s13359_s16] sm:$0xff]  ;;  %v11777_v62 = vld [vmem:[%s16711_s30 + $0x1d0] ss:$8 sps:$4 sm:$0xff]   ;;  %v3739_v3 = vld [vmem:[%s13359_s16 + $0x48] sm:$0xff] }
 0x2d7   : > { %4893 = vmatprep.subr.bf16.mxu0 %v11726_v12  ;;  %v3734_v60 = vld [vmem:[%s13359_s16 + $0x20] sm:$0xff]  ;;  %v3732_v63 = vld [vmem:[%s13359_s16 + $0x10] sm:$0xff]  ;;  %v3743_v4 = vld [vmem:[%s13359_s16 + $0x68] sm:$0xff]  ;;  %vm3858_vm4 = vcmp.ge.f32.partialorder %v3730_v59, 0.0  ;;  %v3986_v5 = vmul.f32 0.2, %v3730_v59 }
 0x2d8   : > { %v3736_v0 = vld [vmem:[%s13359_s16 + $0x30] sm:$0xff]  ;;  %v11778_v1 = vld [vmem:[%s16711_s30 + $0xe4] ss:$8 sps:$4 sm:$0xff]   ;;  %vm3862_vm5 = vcmp.ge.f32.partialorder %v3734_v60, 0.0  ;;  %v3741_v6 = vld [vmem:[%s13359_s16 + $0x58] sm:$0xff]  ;;  %vm3860_vm6 = vcmp.ge.f32.partialorder %v3732_v63, 0.0 }
 0x2d9   : > { %4701 = vmatpush1.bf16.msra.mxu1 %v11728_v13  ;;  %v11780_v2 = vld [vmem:[%s16711_s30 + $0x1e4] ss:$8 sps:$4 sm:$0xff]   ;;  %v3745_v7 = vld [vmem:[%s13359_s16 + $0x78] sm:$0xff]  ;;  %v3990_v8 = vmul.f32 0.2, %v3734_v60  ;;  %vm3864_vm7 = vcmp.ge.f32.partialorder %v3736_v0, 0.0 }
 0x2da   : > { %4894 = vmatpush1.bf16.msra.mxu0 %v11729_v14  ;;  %4702 = vmatprep.subr.bf16.mxu1 %v11730_v15  ;;  %v3988_v9 = vmul.f32 0.2, %v3732_v63  ;;  %v11782_v10 = vld [vmem:[%s16711_s30 + $0xe0] ss:$8 sps:$4 sm:$0xff]   ;;  %v3992_v11 = vmul.f32 0.2, %v3736_v0 }
 0x2db   : > { %4895 = vmatprep.subr.bf16.mxu0 %v11732_v16  ;;  %v3995_v12 = vmul.f32 0.2, %v3739_v3  ;;  %v3999_v13 = vmul.f32 0.2, %v3743_v4  ;;  %vm3867_vm8 = vcmp.ge.f32.partialorder %v3739_v3, 0.0  ;;  %vm3871_vm9 = vcmp.ge.f32.partialorder %v3743_v4, 0.0 }
 0x2dc   : > { %v3997_v14 = vmul.f32 0.2, %v3741_v6  ;;  %v4001_v15 = vmul.f32 0.2, %v3745_v7  ;;  %v11783_v16 = vld [vmem:[%s16711_s30 + $0x1e0] ss:$8 sps:$4 sm:$0xff]  }
 0x2dd   : > { %4703 = vmatpush1.bf16.msra.mxu1 %v11734_v17  ;;  %vm3869_vm10 = vcmp.ge.f32.partialorder %v3741_v6, 0.0  ;;  %vm3873_vm11 = vcmp.ge.f32.partialorder %v3745_v7, 0.0  ;;  %v3738_v17 = vld [vmem:[%s13359_s16 + $0x40] sm:$0xff]  ;;  %v3753_v48 = vld [vmem:[%s13359_s16 + $0xb8] sm:$0xff] }
 0x2de   : > { %4896 = vmatpush1.bf16.msra.mxu0 %v11735_v18  ;;  %4704 = vmatprep.subr.bf16.mxu1 %v11736_v19  ;;  %v3742_v18 = vld [vmem:[%s13359_s16 + $0x60] sm:$0xff]  ;;  %v11784_v19 = vld [vmem:[%s16711_s30 + $0xf4] ss:$8 sps:$4 sm:$0xff]   ;;  %vm3866_vm12 = vcmp.ge.f32.partialorder %v3738_v17, 0.0  ;;  %v4009_v55 = vmul.f32 0.2, %v3753_v48 }
 0x2df   : > { %4897 = vmatprep.subr.bf16.mxu0 %v11738_v20  ;;  %v11786_v20 = vld [vmem:[%s16711_s30 + $0x1f4] ss:$8 sps:$4 sm:$0xff]   ;;  %vm3870_vm13 = vcmp.ge.f32.partialorder %v3742_v18, 0.0  ;;  %v3746_v54 = vld [vmem:[%s13359_s16 + $0x80] sm:$0xff]  ;;  %vm3881_vm3 = vcmp.ge.f32.partialorder %v3753_v48, 0.0 }
 0x2e0   : > { %v3750_v56 = vld [vmem:[%s13359_s16 + $0xa0] sm:$0xff] }
 0x2e1   : > { %4705 = vmatpush1.bf16.msra.mxu1 %v11740_v21  ;;  %v4114_v21 = vsel %vm3858_vm4, %v3730_v59, %v3986_v5  ;;  %vm3874_vm4 = vcmp.ge.f32.partialorder %v3746_v54, 0.0 }
 0x2e2   : > { %4898 = vmatpush1.bf16.msra.mxu0 %v11741_v22  ;;  %4706 = vmatprep.subr.bf16.mxu1 %v11742_v23  ;;  %v4118_v22 = vsel %vm3862_vm5, %v3734_v60, %v3990_v8  ;;  %v11788_v23 = vld [vmem:[%s16711_s30 + $0xf0] ss:$8 sps:$4 sm:$0xff]   ;;  %v3755_v60 = vld [vmem:[%s13359_s16 + $0xc8] sm:$0xff]  ;;  %vm3878_vm5 = vcmp.ge.f32.partialorder %v3750_v56, 0.0 }
 0x2e3   : > { %4899 = vmatprep.subr.bf16.mxu0 %v11744_v24  ;;  %v4116_v24 = vsel %vm3860_vm6, %v3732_v63, %v3988_v9 }
 0x2e5   : > { %4707 = vmatpush1.bf16.msra.mxu1 %v11746_v25  ;;  %v4120_v25 = vsel %vm3864_vm7, %v3736_v0, %v3992_v11  ;;  %v4002_v0 = vmul.f32 0.2, %v3746_v54 }
 0x2e6   : > { %4900 = vmatpush1.bf16.msra.mxu0 %v11747_v26  ;;  %4708 = vmatprep.subr.bf16.mxu1 %v11748_v27  ;;  %v4123_v26 = vsel %vm3867_vm8, %v3739_v3, %v3995_v12  ;;  %v4127_v27 = vsel %vm3871_vm9, %v3743_v4, %v3999_v13  ;;  %v4137_v3 = vsel %vm3881_vm3, %v3753_v48, %v4009_v55  ;;  %vm3883_vm8 = vcmp.ge.f32.partialorder %v3755_v60, 0.0  ;;  %v3754_v13 = vld [vmem:[%s13359_s16 + $0xc0] sm:$0xff] }
 0x2e7   : > { %4901 = vmatprep.subr.bf16.mxu0 %v11750_v28  ;;  %v4125_v28 = vsel %vm3869_vm10, %v3741_v6, %v3997_v14  ;;  %v4247_v43 = vpack.c.bf16 %v4127_v27, %v4123_v26  ;;  %v3758_v14 = vld [vmem:[%s13359_s16 + $0xe0] sm:$0xff]  ;;  %v3760_v26 = vld [vmem:[%s13359_s16 + $0xf0] sm:$0xff]  ;;  %v3763_v27 = vld [vmem:[%s13359_s16 + $0x108] sm:$0xff] }
 0x2e8   : > { %v3766_v48 = vld [vmem:[%s13359_s16 + $0x120] sm:$0xff] }
 0x2e9   : > { %4709 = vmatpush1.bf16.msra.mxu1 %v11752_v29  ;;  %v4129_v29 = vsel %vm3873_vm11, %v3745_v7, %v4001_v15  ;;  %v4011_v7 = vmul.f32 0.2, %v3755_v60  ;;  %v4130_v15 = vsel %vm3874_vm4, %v3746_v54, %v4002_v0 }
 0x2ea   : > { %4902 = vmatpush1.bf16.msra.mxu0 %v11753_v30  ;;  %4710 = vmatprep.subr.bf16.mxu1 %v11754_v31  ;;  %v3994_v30 = vmul.f32 0.2, %v3738_v17  ;;  %v3998_v31 = vmul.f32 0.2, %v3742_v18  ;;  %v4249_v45 = vpack.c.bf16 %v4129_v29, %v4125_v28  ;;  %v3767_v28 = vld [vmem:[%s13359_s16 + $0x128] sm:$0xff] }
 0x2eb   : > { %4903 = vmatprep.subr.bf16.mxu0 %v11756_v32  ;;  %v3740_v32 = vld [vmem:[%s13359_s16 + $0x50] sm:$0xff] }
 0x2ec   : > { %vm3868_vm14 = vcmp.ge.f32.partialorder %v3740_v32, 0.0  ;;  %v3996_v46 = vmul.f32 0.2, %v3740_v32  ;;  %v4122_v49 = vsel %vm3866_vm12, %v3738_v17, %v3994_v30  ;;  %vm3882_vm12 = vcmp.ge.f32.partialorder %v3754_v13, 0.0 }
 0x2ed   : > { %4711 = vmatpush1.bf16.msra.mxu1 %v11758_v33  ;;  %v3744_v33 = vld [vmem:[%s13359_s16 + $0x70] sm:$0xff] }
 0x2ee   : > { %4904 = vmatpush1.bf16.msra.mxu0 %v11759_v34  ;;  %4712 = vmatprep.subr.bf16.mxu1 %v11760_v35  ;;  %v11789_v34 = vld [vmem:[%s16711_s30 + $0x1f0] ss:$8 sps:$4 sm:$0xff]   ;;  %v3747_v35 = vld [vmem:[%s13359_s16 + $0x88] sm:$0xff]  ;;  %v4000_v47 = vmul.f32 0.2, %v3744_v33  ;;  %vm3872_vm15 = vcmp.ge.f32.partialorder %v3744_v33, 0.0 }
 0x2ef   : > { %4905 = vmatprep.subr.bf16.mxu0 %v11762_v36  ;;  %v3751_v36 = vld [vmem:[%s13359_s16 + $0xa8] sm:$0xff]  ;;  %v4003_v51 = vmul.f32 0.2, %v3747_v35  ;;  %vm3875_vm0 = vcmp.ge.f32.partialorder %v3747_v35, 0.0 }
 0x2f0   : > { %v4007_v52 = vmul.f32 0.2, %v3751_v36  ;;  %vm3879_vm1 = vcmp.ge.f32.partialorder %v3751_v36, 0.0  ;;  %v4128_v41 = vsel %vm3872_vm15, %v3744_v33, %v4000_v47  ;;  %vm3888_vm15 = vcmp.ge.f32.partialorder %v3760_v26, 0.0 }
 0x2f1   : > { %4713 = vmatpush1.bf16.msra.mxu1 %v11764_v37  ;;  %v4242_v37 = vpack.c.bf16 %v4118_v22, %v4114_v21 }
 0x2f2   : > { %4906 = vmatpush1.bf16.msra.mxu0 %v11765_v38  ;;  %4714 = vmatprep.subr.bf16.mxu1 %v11766_v44  ;;  %v4244_v38 = vpack.c.bf16 %v4120_v25, %v4116_v24  ;;  %v3749_v44 = vld [vmem:[%s13359_s16 + $0x98] sm:$0xff]  ;;  %v4135_v59 = vsel %vm3879_vm1, %v3751_v36, %v4007_v52  ;;  %v4014_v24 = vmul.f32 0.2, %v3758_v14  ;;  %v3756_v25 = vld [vmem:[%s13359_s16 + $0xd0] sm:$0xff]  ;;  %vm3895_vm1 = vcmp.ge.f32.partialorder %v3767_v28, 0.0 }
 0x2f3   : > { %4907 = vmatprep.subr.bf16.mxu0 %v11768_v50  ;;  %v4126_v50 = vsel %vm3870_vm13, %v3742_v18, %v3998_v31  ;;  %v4005_v53 = vmul.f32 0.2, %v3749_v44  ;;  %vm3877_vm2 = vcmp.ge.f32.partialorder %v3749_v44, 0.0  ;;  %vm3886_vm13 = vcmp.ge.f32.partialorder %v3758_v14, 0.0  ;;  %v3769_v36 = vld [vmem:[%s13359_s16 + $0x138] sm:$0xff]  ;;  %v3768_v52 = vld [vmem:[%s13359_s16 + $0x130] sm:$0xff] }
 0x2f4   : > { %v4246_v57 = vpack.c.bf16 %v4126_v50, %v4122_v49  ;;  %v4025_v47 = vmul.f32 0.2, %v3769_v36  ;;  %vm3897_vm3 = vcmp.ge.f32.partialorder %v3769_v36, 0.0 }
 0x2f5   : > { %4715 = vmatpush1.bf16.msra.mxu1 %v11770_v58  ;;  %v4124_v58 = vsel %vm3868_vm14, %v3740_v32, %v3996_v46  ;;  %v4133_v63 = vsel %vm3877_vm2, %v3749_v44, %v4005_v53  ;;  %v3765_v32 = vld [vmem:[%s13359_s16 + $0x118] sm:$0xff]  ;;  %vm3884_vm14 = vcmp.ge.f32.partialorder %v3756_v25, 0.0  ;;  %v4023_v44 = vmul.f32 0.2, %v3767_v28  ;;  %v3762_v46 = vld [vmem:[%s13359_s16 + $0x100] sm:$0xff] }
 0x2f6   : > { %4908 = vmatpush1.bf16.msra.mxu0 %v11771_v39  ;;  %4716 = vmatprep.subr.bf16.mxu1 %v11772_v40  ;;  %v3748_v39 = vld [vmem:[%s13359_s16 + $0x90] sm:$0xff]  ;;  %v4248_v5 = vpack.c.bf16 %v4128_v41, %v4124_v58  ;;  %v4253_v12 = vpack.c.bf16 %v4137_v3, %v4133_v63  ;;  %vm3893_vm2 = vcmp.ge.f32.partialorder %v3765_v32, 0.0  ;;  %vm3890_vm4 = vcmp.ge.f32.partialorder %v3762_v46, 0.0  ;;  %v3773_v58 = vld [vmem:[%s13359_s16 + $0x158] sm:$0xff] }
 0x2f7   : > { %4909 = vmatprep.subr.bf16.mxu0 %v11774_v42  ;;  %v3752_v40 = vld [vmem:[%s13359_s16 + $0xb0] sm:$0xff]  ;;  %v4131_v42 = vsel %vm3875_vm0, %v3747_v35, %v4003_v51  ;;  %vm3876_vm6 = vcmp.ge.f32.partialorder %v3748_v39, 0.0  ;;  %v4004_v4 = vmul.f32 0.2, %v3748_v39  ;;  %v4016_v35 = vmul.f32 0.2, %v3760_v26 }
 0x2f8   : > { %vm3880_vm7 = vcmp.ge.f32.partialorder %v3752_v40, 0.0  ;;  %v4008_v6 = vmul.f32 0.2, %v3752_v40  ;;  %v4251_v11 = vpack.c.bf16 %v4135_v59, %v4131_v42  ;;  %vm3891_vm0 = vcmp.ge.f32.partialorder %v3763_v27, 0.0  ;;  %v3764_v51 = vld [vmem:[%s13359_s16 + $0x110] sm:$0xff]  ;;  %v3777_v42 = vld [vmem:[%s13359_s16 + $0x178] sm:$0xff] }
 0x2f9   : > { %4717 = vmatpush1.bf16.msra.mxu1 %v11776_v61  ;;  %v3759_v61 = vld [vmem:[%s13359_s16 + $0xe8] sm:$0xff]  ;;  %v4132_v17 = vsel %vm3876_vm6, %v3748_v39, %v4004_v4  ;;  %v4144_v53 = vsel %vm3888_vm15, %v3760_v26, %v4016_v35  ;;  %v4151_v55 = vsel %vm3895_vm1, %v3767_v28, %v4023_v44  ;;  %v4022_v41 = vmul.f32 0.2, %v3766_v48  ;;  %v3785_v28 = vld [vmem:[%s13359_s16 + $0x1b8] sm:$0xff]  ;;  %v3784_v44 = vld [vmem:[%s13359_s16 + $0x1b0] sm:$0xff] }
 0x2fa   : > { %4910 = vmatpush1.bf16.msra.mxu0 %v11777_v62  ;;  %4718 = vmatprep.subr.bf16.mxu1 %v11778_v1  ;;  %v3757_v62 = vld [vmem:[%s13359_s16 + $0xd8] sm:$0xff]  ;;  %v4006_v1 = vmul.f32 0.2, %v3750_v56  ;;  %v4015_v8 = vmul.f32 0.2, %v3759_v61  ;;  %vm3887_vm9 = vcmp.ge.f32.partialorder %v3759_v61, 0.0  ;;  %v4136_v18 = vsel %vm3880_vm7, %v3752_v40, %v4008_v6 }
 0x2fb   : > { %4911 = vmatprep.subr.bf16.mxu0 %v11780_v2  ;;  %v3761_v2 = vld [vmem:[%s13359_s16 + $0xf8] sm:$0xff]  ;;  %v4013_v9 = vmul.f32 0.2, %v3757_v62  ;;  %vm3885_vm10 = vcmp.ge.f32.partialorder %v3757_v62, 0.0  ;;  %v4252_v30 = vpack.c.bf16 %v4136_v18, %v4132_v17  ;;  %v4018_v40 = vmul.f32 0.2, %v3762_v46 }
 0x2fc   : > { %vm3889_vm11 = vcmp.ge.f32.partialorder %v3761_v2, 0.0  ;;  %v4153_v59 = vsel %vm3897_vm3, %v3769_v36, %v4025_v47  ;;  %vm3892_vm6 = vcmp.ge.f32.partialorder %v3764_v51, 0.0  ;;  %vm3896_vm7 = vcmp.ge.f32.partialorder %v3768_v52, 0.0  ;;  %v3774_v6 = vld [vmem:[%s13359_s16 + $0x160] sm:$0xff]  ;;  %v3772_v17 = vld [vmem:[%s13359_s16 + $0x150] sm:$0xff] }
 0x2fd   : > { %4719 = vmatpush1.bf16.msra.mxu1 %v11782_v10  ;;  %v4017_v10 = vmul.f32 0.2, %v3761_v2  ;;  %v4141_v21 = vsel %vm3885_vm10, %v3757_v62, %v4013_v9  ;;  %v4024_v62 = vmul.f32 0.2, %v3768_v52  ;;  %vm3901_vm10 = vcmp.ge.f32.partialorder %v3773_v58, 0.0  ;;  %v3776_v18 = vld [vmem:[%s13359_s16 + $0x170] sm:$0xff] }
 0x2fe   : > { %4912 = vmatpush1.bf16.msra.mxu0 %v11783_v16  ;;  %4720 = vmatprep.subr.bf16.mxu1 %v11784_v19  ;;  %v4134_v16 = vsel %vm3878_vm5, %v3750_v56, %v4006_v1  ;;  %v4139_v19 = vsel %vm3883_vm8, %v3755_v60, %v4011_v7  ;;  %v3771_v56 = vld [vmem:[%s13359_s16 + $0x148] sm:$0xff]  ;;  %vm3894_vm5 = vcmp.ge.f32.partialorder %v3766_v48, 0.0  ;;  %v4020_v60 = vmul.f32 0.2, %v3764_v51  ;;  %v3782_v36 = vld [vmem:[%s13359_s16 + $0x1a0] sm:$0xff] }
 0x2ff   : > { %4913 = vmatprep.subr.bf16.mxu0 %v11786_v20  ;;  %v4143_v20 = vsel %vm3887_vm9, %v3759_v61, %v4015_v8  ;;  %v4145_v22 = vsel %vm3889_vm11, %v3761_v2, %v4017_v10  ;;  %v4250_v29 = vpack.c.bf16 %v4134_v16, %v4130_v15  ;;  %v4027_v63 = vmul.f32 0.2, %v3771_v56 }
 0x300   : > { %v4255_v31 = vpack.c.bf16 %v4143_v20, %v4139_v19  ;;  %v4257_v33 = vpack.c.bf16 %v4145_v22, %v4141_v21  ;;  %vm3899_vm8 = vcmp.ge.f32.partialorder %v3771_v56, 0.0  ;;  %v4029_v1 = vmul.f32 0.2, %v3773_v58  ;;  %v3779_v19 = vld [vmem:[%s13359_s16 + $0x188] sm:$0xff] }
 0x301   : > { %4721 = vmatpush1.bf16.msra.mxu1 %v11788_v23  ;;  %v4010_v23 = vmul.f32 0.2, %v3754_v13  ;;  %v4033_v2 = vmul.f32 0.2, %v3777_v42  ;;  %vm3905_vm11 = vcmp.ge.f32.partialorder %v3777_v42, 0.0  ;;  %v4146_v7 = vsel %vm3890_vm4, %v3762_v46, %v4018_v40  ;;  %v3783_v20 = vld [vmem:[%s13359_s16 + $0x1a8] sm:$0xff] }
 0x302   : > { %4914 = vmatpush1.bf16.msra.mxu0 %v11789_v34  ;;  %v4012_v34 = vmul.f32 0.2, %v3756_v25  ;;  %v4150_v8 = vsel %vm3894_vm5, %v3766_v48, %v4022_v41  ;;  %v4148_v9 = vsel %vm3892_vm6, %v3764_v51, %v4020_v60  ;;  %v4152_v10 = vsel %vm3896_vm7, %v3768_v52, %v4024_v62  ;;  %v3787_v48 = vld [vmem:[%s13359_s16 + $0x1c8] sm:$0xff]  ;;  %v3790_v62 = vld [vmem:[%s13359_s16 + $0x1e0] sm:$0xff] }
 0x303   : > { %v4030_v16 = vmul.f32 0.2, %v3774_v6  ;;  %v4258_v21 = vpack.c.bf16 %v4150_v8, %v4146_v7  ;;  %v4260_v22 = vpack.c.bf16 %v4152_v10, %v4148_v9  ;;  %v4028_v26 = vmul.f32 0.2, %v3772_v17  ;;  %v3788_v9 = vld [vmem:[%s13359_s16 + $0x1d0] sm:$0xff] }
 0x304   : > { %4723 = vmatmul.mubr.bf16.vlgmr.msra.gmra.mrb[0].mxu1 %v4242_v37  ;;  %v4138_v37 = vsel %vm3882_vm12, %v3754_v13, %v4010_v23  ;;  %v4140_v50 = vsel %vm3884_vm14, %v3756_v25, %v4012_v34  ;;  %v4157_v13 = vsel %vm3901_vm10, %v3773_v58, %v4029_v1  ;;  %vm3900_vm14 = vcmp.ge.f32.partialorder %v3772_v17, 0.0  ;;  %v3778_v34 = vld [vmem:[%s13359_s16 + $0x180] sm:$0xff]  ;;  %v3792_v10 = vld [vmem:[%s13359_s16 + $0x1f0] sm:$0xff] }
 0x305   : > { %4916 = vmatmul.mubr.bf16.vlgmr.msra.gmra.mrb[0].mxu0 %v4244_v38  ;;  %4732 = vmatprep.mubr.bf16.mxu1 %v4247_v43  ;;  %v4142_v38 = vsel %vm3886_vm13, %v3758_v14, %v4014_v24  ;;  %v4019_v43 = vmul.f32 0.2, %v3763_v27  ;;  %v4256_v61 = vpack.c.bf16 %v4144_v53, %v4140_v50  ;;  %v4161_v14 = vsel %vm3905_vm11, %v3777_v42, %v4033_v2  ;;  %v3781_v24 = vld [vmem:[%s13359_s16 + $0x198] sm:$0xff] }
 0x306   : > { %4925 = vmatprep.mubr.bf16.mxu0 %v4249_v45  ;;  %v4021_v45 = vmul.f32 0.2, %v3765_v32  ;;  %v4254_v49 = vpack.c.bf16 %v4142_v38, %v4138_v37  ;;  %vm3902_vm13 = vcmp.ge.f32.partialorder %v3774_v6, 0.0  ;;  %v4265_v25 = vpack.c.bf16 %v4161_v14, %v4157_v13  ;;  %v3789_v50 = vld [vmem:[%s13359_s16 + $0x1d8] sm:$0xff] }
 0x307   : > { %v4147_v54 = vsel %vm3891_vm0, %v3763_v27, %v4019_v43  ;;  %v4032_v27 = vmul.f32 0.2, %v3776_v18  ;;  %vm3904_vm15 = vcmp.ge.f32.partialorder %v3776_v18, 0.0  ;;  %vm3907_vm0 = vcmp.ge.f32.partialorder %v3779_v19, 0.0  ;;  %v3780_v43 = vld [vmem:[%s13359_s16 + $0x190] sm:$0xff] }
 0x308   : > { %v4149_v39 = vsel %vm3893_vm2, %v3765_v32, %v4021_v45  ;;  %v4259_v3 = vpack.c.bf16 %v4151_v55, %v4147_v54  ;;  %v4039_v32 = vmul.f32 0.2, %v3783_v20  ;;  %vm3911_vm1 = vcmp.ge.f32.partialorder %v3783_v20, 0.0  ;;  %v3793_v54 = vld [vmem:[%s13359_s16 + $0x1f8] sm:$0xff] }
 0x309   : > { %v4261_v4 = vpack.c.bf16 %v4153_v59, %v4149_v39  ;;  %vm3909_vm2 = vcmp.ge.f32.partialorder %v3781_v24, 0.0  ;;  %v4041_v35 = vmul.f32 0.2, %v3785_v28  ;;  %v4156_v38 = vsel %vm3900_vm14, %v3772_v17, %v4028_v26  ;;  %v3794_v26 = vld [vmem:[%s13359_s16 + $0x200] sm:$0xff] }
 0x30a   : > { %vm3913_vm3 = vcmp.ge.f32.partialorder %v3785_v28, 0.0  ;;  %v4160_v45 = vsel %vm3904_vm15, %v3776_v18, %v4032_v27  ;;  %v4167_v47 = vsel %vm3911_vm1, %v3783_v20, %v4039_v32  ;;  %vm3906_vm4 = vcmp.ge.f32.partialorder %v3778_v34, 0.0  ;;  %v3801_v20 = vld [vmem:[%s13359_s16 + $0x238] sm:$0xff]  ;;  %v3800_v32 = vld [vmem:[%s13359_s16 + $0x230] sm:$0xff] }
 0x30b   : > { %vm3910_vm5 = vcmp.ge.f32.partialorder %v3782_v36, 0.0  ;;  %v4034_v52 = vmul.f32 0.2, %v3778_v34  ;;  %v4038_v53 = vmul.f32 0.2, %v3782_v36  ;;  %v4169_v55 = vsel %vm3913_vm3, %v3785_v28, %v4041_v35  ;;  %v3798_v28 = vld [vmem:[%s13359_s16 + $0x220] sm:$0xff] }
 0x30c   : > { %4733 = vmatmul.mubr.bf16.gmra.mrb[4].mxu1 %v4246_v57  ;;  %v3775_v57 = vld [vmem:[%s13359_s16 + $0x168] sm:$0xff]  ;;  %vm3908_vm6 = vcmp.ge.f32.partialorder %v3780_v43, 0.0  ;;  %vm3912_vm7 = vcmp.ge.f32.partialorder %v3784_v44, 0.0  ;;  %v4040_v58 = vmul.f32 0.2, %v3784_v44  ;;  %vm3917_vm10 = vcmp.ge.f32.partialorder %v3789_v50, 0.0 }
 0x30d   : > { %4926 = vmatmul.mubr.bf16.gmra.mrb[4].mxu0 %v4248_v5  ;;  %4742 = vmatprep.mubr.bf16.mxu1 %v4251_v11  ;;  %v4031_v0 = vmul.f32 0.2, %v3775_v57  ;;  %vm3903_vm9 = vcmp.ge.f32.partialorder %v3775_v57, 0.0  ;;  %v3770_v5 = vld [vmem:[%s13359_s16 + $0x140] sm:$0xff]  ;;  %v4155_v11 = vsel %vm3899_vm8, %v3771_v56, %v4027_v63  ;;  %v4036_v56 = vmul.f32 0.2, %v3780_v43 }
 0x30e   : > { %4935 = vmatprep.mubr.bf16.mxu0 %v4253_v12  ;;  %v4026_v15 = vmul.f32 0.2, %v3770_v5  ;;  %vm3898_vm12 = vcmp.ge.f32.partialorder %v3770_v5, 0.0  ;;  %v4043_v39 = vmul.f32 0.2, %v3787_v48  ;;  %vm3915_vm8 = vcmp.ge.f32.partialorder %v3787_v48, 0.0 }
 0x30f   : > { %v4159_v12 = vsel %vm3903_vm9, %v3775_v57, %v4031_v0  ;;  %v4264_v57 = vpack.c.bf16 %v4160_v45, %v4156_v38  ;;  %v4045_v41 = vmul.f32 0.2, %v3789_v50  ;;  %v4049_v42 = vmul.f32 0.2, %v3793_v54  ;;  %v3805_v38 = vld [vmem:[%s13359_s16 + $0x258] sm:$0xff] }
 0x310   : > { %v4263_v23 = vpack.c.bf16 %v4159_v12, %v4155_v11  ;;  %vm3921_vm11 = vcmp.ge.f32.partialorder %v3793_v54, 0.0  ;;  %v4162_v63 = vsel %vm3906_vm4, %v3778_v34, %v4034_v52  ;;  %v4166_v0 = vsel %vm3910_vm5, %v3782_v36, %v4038_v53  ;;  %v3795_v11 = vld [vmem:[%s13359_s16 + $0x208] sm:$0xff] }
 0x311   : > { %v4164_v1 = vsel %vm3908_vm6, %v3780_v43, %v4036_v56  ;;  %v4168_v2 = vsel %vm3912_vm7, %v3784_v44, %v4040_v58  ;;  %v4046_v8 = vmul.f32 0.2, %v3790_v62  ;;  %v3799_v12 = vld [vmem:[%s13359_s16 + $0x228] sm:$0xff]  ;;  %v4266_v13 = vpack.c.bf16 %v4166_v0, %v4162_v63  ;;  %v3806_v58 = vld [vmem:[%s13359_s16 + $0x260] sm:$0xff] }
 0x312   : > { %v4268_v14 = vpack.c.bf16 %v4168_v2, %v4164_v1  ;;  %vm3916_vm14 = vcmp.ge.f32.partialorder %v3788_v9, 0.0  ;;  %v4044_v18 = vmul.f32 0.2, %v3788_v9  ;;  %vm3920_vm15 = vcmp.ge.f32.partialorder %v3792_v10, 0.0  ;;  %v3803_v36 = vld [vmem:[%s13359_s16 + $0x248] sm:$0xff]  ;;  %v3804_v1 = vld [vmem:[%s13359_s16 + $0x250] sm:$0xff] }
 0x313   : > { %vm3927_vm1 = vcmp.ge.f32.partialorder %v3799_v12, 0.0  ;;  %v4057_v27 = vmul.f32 0.2, %v3801_v20  ;;  %vm3929_vm3 = vcmp.ge.f32.partialorder %v3801_v20, 0.0  ;;  %vm3922_vm4 = vcmp.ge.f32.partialorder %v3794_v26, 0.0  ;;  %v3808_v2 = vld [vmem:[%s13359_s16 + $0x270] sm:$0xff] }
 0x314   : > { %4743 = vmatmul.mubr.bf16.gmra.mrb[8].mxu1 %v4250_v29  ;;  %v4154_v29 = vsel %vm3898_vm12, %v3770_v5, %v4026_v15  ;;  %v4173_v5 = vsel %vm3917_vm10, %v3789_v50, %v4045_v41  ;;  %vm3926_vm5 = vcmp.ge.f32.partialorder %v3798_v28, 0.0  ;;  %v4050_v44 = vmul.f32 0.2, %v3794_v26 }
 0x315   : > { %4936 = vmatmul.mubr.bf16.gmra.mrb[8].mxu0 %v4252_v30  ;;  %4752 = vmatprep.mubr.bf16.mxu1 %v4255_v31  ;;  %v4158_v30 = vsel %vm3902_vm13, %v3774_v6, %v4030_v16  ;;  %v4035_v31 = vmul.f32 0.2, %v3779_v19  ;;  %v4177_v6 = vsel %vm3921_vm11, %v3793_v54, %v4049_v42  ;;  %vm3918_vm13 = vcmp.ge.f32.partialorder %v3790_v62, 0.0  ;;  %v3797_v16 = vld [vmem:[%s13359_s16 + $0x218] sm:$0xff] }
 0x316   : > { %4945 = vmatprep.mubr.bf16.mxu0 %v4257_v33  ;;  %v4037_v33 = vmul.f32 0.2, %v3781_v24  ;;  %v4262_v37 = vpack.c.bf16 %v4158_v30, %v4154_v29  ;;  %v4273_v17 = vpack.c.bf16 %v4177_v6, %v4173_v5  ;;  %v4172_v30 = vsel %vm3916_vm14, %v3788_v9, %v4044_v18  ;;  %v3810_v18 = vld [vmem:[%s13359_s16 + $0x280] sm:$0xff] }
 0x317   : > { %v4163_v46 = vsel %vm3907_vm0, %v3779_v19, %v4035_v31  ;;  %v4048_v19 = vmul.f32 0.2, %v3792_v10  ;;  %vm3923_vm0 = vcmp.ge.f32.partialorder %v3795_v11, 0.0  ;;  %v3796_v31 = vld [vmem:[%s13359_s16 + $0x210] sm:$0xff]  ;;  %v4054_v45 = vmul.f32 0.2, %v3798_v28 }
 0x318   : > { %v4165_v51 = vsel %vm3909_vm2, %v3781_v24, %v4037_v33  ;;  %v4267_v59 = vpack.c.bf16 %v4167_v47, %v4163_v46  ;;  %v4055_v24 = vmul.f32 0.2, %v3799_v12  ;;  %vm3925_vm2 = vcmp.ge.f32.partialorder %v3797_v16, 0.0  ;;  %v3809_v46 = vld [vmem:[%s13359_s16 + $0x278] sm:$0xff] }
 0x319   : > { %v4269_v60 = vpack.c.bf16 %v4169_v55, %v4165_v51  ;;  %v4176_v33 = vsel %vm3920_vm15, %v3792_v10, %v4048_v19  ;;  %v4185_v47 = vsel %vm3929_vm3, %v3801_v20, %v4057_v27  ;;  %vm3924_vm6 = vcmp.ge.f32.partialorder %v3796_v31, 0.0  ;;  %v3814_v20 = vld [vmem:[%s13359_s16 + $0x2a0] sm:$0xff] }
 0x31a   : > { %v4183_v35 = vsel %vm3927_vm1, %v3799_v12, %v4055_v24  ;;  %vm3928_vm7 = vcmp.ge.f32.partialorder %v3800_v32, 0.0  ;;  %v4056_v50 = vmul.f32 0.2, %v3800_v32  ;;  %v4059_v51 = vmul.f32 0.2, %v3803_v36  ;;  %v3817_v12 = vld [vmem:[%s13359_s16 + $0x2b8] sm:$0xff] }
 0x31b   : > { %v4061_v53 = vmul.f32 0.2, %v3805_v38  ;;  %v4065_v54 = vmul.f32 0.2, %v3809_v46  ;;  %vm3933_vm10 = vcmp.ge.f32.partialorder %v3805_v38, 0.0  ;;  %vm3937_vm11 = vcmp.ge.f32.partialorder %v3809_v46, 0.0 }
 0x31c   : > { %4753 = vmatmul.mubr.bf16.gmra.mrb[12].mxu1 %v4254_v49  ;;  %v3791_v49 = vld [vmem:[%s13359_s16 + $0x1e8] sm:$0xff]  ;;  %v4184_v42 = vsel %vm3928_vm7, %v3800_v32, %v4056_v50  ;;  %v4062_v0 = vmul.f32 0.2, %v3806_v58  ;;  %vm3932_vm14 = vcmp.ge.f32.partialorder %v3804_v1, 0.0  ;;  %v4060_v10 = vmul.f32 0.2, %v3804_v1 }
 0x31d   : > { %4946 = vmatmul.mubr.bf16.gmra.mrb[12].mxu0 %v4256_v61  ;;  %4762 = vmatprep.mubr.bf16.mxu1 %v4259_v3  ;;  %v4047_v40 = vmul.f32 0.2, %v3791_v49  ;;  %vm3919_vm9 = vcmp.ge.f32.partialorder %v3791_v49, 0.0  ;;  %v3786_v61 = vld [vmem:[%s13359_s16 + $0x1c0] sm:$0xff]  ;;  %v4171_v3 = vsel %vm3915_vm8, %v3787_v48, %v4043_v39  ;;  %v4052_v48 = vmul.f32 0.2, %v3796_v31 }
 0x31e   : > { %4955 = vmatprep.mubr.bf16.mxu0 %v4261_v4  ;;  %v4042_v7 = vmul.f32 0.2, %v3786_v61  ;;  %vm3914_vm12 = vcmp.ge.f32.partialorder %v3786_v61, 0.0  ;;  %vm3931_vm8 = vcmp.ge.f32.partialorder %v3803_v36, 0.0  ;;  %v4178_v39 = vsel %vm3922_vm4, %v3794_v26, %v4050_v44  ;;  %v3816_v24 = vld [vmem:[%s13359_s16 + $0x2b0] sm:$0xff]  ;;  %v3822_v50 = vld [vmem:[%s13359_s16 + $0x2e0] sm:$0xff] }
 0x31f   : > { %v4175_v4 = vsel %vm3919_vm9, %v3791_v49, %v4047_v40  ;;  %v4272_v49 = vpack.c.bf16 %v4176_v33, %v4172_v30  ;;  %v4182_v40 = vsel %vm3926_vm5, %v3798_v28, %v4054_v45  ;;  %v4180_v41 = vsel %vm3924_vm6, %v3796_v31, %v4052_v48  ;;  %v3819_v28 = vld [vmem:[%s13359_s16 + $0x2c8] sm:$0xff]  ;;  %v3821_v30 = vld [vmem:[%s13359_s16 + $0x2d8] sm:$0xff] }
 0x320   : > { %v4271_v15 = vpack.c.bf16 %v4175_v4, %v4171_v3  ;;  %v3811_v3 = vld [vmem:[%s13359_s16 + $0x288] sm:$0xff]  ;;  %v4274_v5 = vpack.c.bf16 %v4182_v40, %v4178_v39  ;;  %v4276_v6 = vpack.c.bf16 %v4184_v42, %v4180_v41  ;;  %vm3936_vm15 = vcmp.ge.f32.partialorder %v3808_v2, 0.0 }
 0x321   : > { %v3815_v4 = vld [vmem:[%s13359_s16 + $0x2a8] sm:$0xff]  ;;  %v4073_v19 = vmul.f32 0.2, %v3817_v12  ;;  %vm3945_vm3 = vcmp.ge.f32.partialorder %v3817_v12, 0.0  ;;  %vm3938_vm4 = vcmp.ge.f32.partialorder %v3810_v18, 0.0  ;;  %vm3942_vm5 = vcmp.ge.f32.partialorder %v3814_v20, 0.0 }
 0x322   : > { %vm3943_vm1 = vcmp.ge.f32.partialorder %v3815_v4, 0.0  ;;  %v4066_v32 = vmul.f32 0.2, %v3810_v18  ;;  %v4070_v33 = vmul.f32 0.2, %v3814_v20  ;;  %vm3944_vm7 = vcmp.ge.f32.partialorder %v3816_v24, 0.0 }
 0x323   : > { %v4077_v45 = vmul.f32 0.2, %v3821_v30  ;;  %v4078_v42 = vmul.f32 0.2, %v3822_v50 }
 0x324   : > { %4763 = vmatmul.mubr.bf16.gmra.mrb[16].mxu1 %v4258_v21  ;;  %v4170_v21 = vsel %vm3914_vm12, %v3786_v61, %v4042_v7  ;;  %v4189_v61 = vsel %vm3933_vm10, %v3805_v38, %v4061_v53  ;;  %v4072_v38 = vmul.f32 0.2, %v3816_v24  ;;  %vm3949_vm10 = vcmp.ge.f32.partialorder %v3821_v30, 0.0 }
 0x325   : > { %4956 = vmatmul.mubr.bf16.gmra.mrb[16].mxu0 %v4260_v22  ;;  %4772 = vmatprep.mubr.bf16.mxu1 %v4263_v23  ;;  %v4174_v22 = vsel %vm3918_vm13, %v3790_v62, %v4046_v8  ;;  %v4051_v23 = vmul.f32 0.2, %v3795_v11  ;;  %v4193_v62 = vsel %vm3937_vm11, %v3809_v46, %v4065_v54  ;;  %vm3934_vm13 = vcmp.ge.f32.partialorder %v3806_v58, 0.0  ;;  %v3813_v8 = vld [vmem:[%s13359_s16 + $0x298] sm:$0xff] }
 0x326   : > { %4965 = vmatprep.mubr.bf16.mxu0 %v4265_v25  ;;  %v4053_v25 = vmul.f32 0.2, %v3797_v16  ;;  %v4270_v29 = vpack.c.bf16 %v4174_v22, %v4170_v21  ;;  %v4281_v9 = vpack.c.bf16 %v4193_v62, %v4189_v61  ;;  %v4188_v22 = vsel %vm3932_vm14, %v3804_v1, %v4060_v10  ;;  %v3829_v1 = vld [vmem:[%s13359_s16 + $0x318] sm:$0xff] }
 0x327   : > { %v4179_v34 = vsel %vm3923_vm0, %v3795_v11, %v4051_v23  ;;  %v4064_v11 = vmul.f32 0.2, %v3808_v2  ;;  %vm3939_vm0 = vcmp.ge.f32.partialorder %v3811_v3, 0.0  ;;  %v3812_v23 = vld [vmem:[%s13359_s16 + $0x290] sm:$0xff]  ;;  %v4200_v54 = vsel %vm3944_vm7, %v3816_v24, %v4072_v38  ;;  %v3839_v24 = vld [vmem:[%s13359_s16 + $0x368] sm:$0xff]  ;;  %v3838_v38 = vld [vmem:[%s13359_s16 + $0x360] sm:$0xff] }
 0x328   : > { %v4181_v43 = vsel %vm3925_vm2, %v3797_v16, %v4053_v25  ;;  %v4275_v55 = vpack.c.bf16 %v4183_v35, %v4179_v34  ;;  %v4071_v16 = vmul.f32 0.2, %v3815_v4  ;;  %vm3941_vm2 = vcmp.ge.f32.partialorder %v3813_v8, 0.0  ;;  %v3825_v34 = vld [vmem:[%s13359_s16 + $0x2f8] sm:$0xff] }
 0x329   : > { %v4277_v56 = vpack.c.bf16 %v4185_v47, %v4181_v43  ;;  %v4192_v25 = vsel %vm3936_vm15, %v3808_v2, %v4064_v11  ;;  %v4201_v35 = vsel %vm3945_vm3, %v3817_v12, %v4073_v19  ;;  %vm3940_vm6 = vcmp.ge.f32.partialorder %v3812_v23, 0.0  ;;  %v3833_v2 = vld [vmem:[%s13359_s16 + $0x338] sm:$0xff]  ;;  %v3832_v19 = vld [vmem:[%s13359_s16 + $0x330] sm:$0xff] }
 0x32a   : > { %v4199_v27 = vsel %vm3943_vm1, %v3815_v4, %v4071_v16  ;;  %v4075_v43 = vmul.f32 0.2, %v3819_v28  ;;  %v4081_v46 = vmul.f32 0.2, %v3825_v34  ;;  %vm3953_vm11 = vcmp.ge.f32.partialorder %v3825_v34, 0.0 }
 0x32b   : > { %v4205_v39 = vsel %vm3949_vm10, %v3821_v30, %v4077_v45  ;;  %v4089_v10 = vmul.f32 0.2, %v3833_v2  ;;  %vm3961_vm3 = vcmp.ge.f32.partialorder %v3833_v2, 0.0  ;;  %vm3960_vm7 = vcmp.ge.f32.partialorder %v3832_v19, 0.0 }
 0x32c   : > { %4773 = vmatmul.mubr.bf16.gmra.mrb[20].mxu1 %v4262_v37  ;;  %v3807_v37 = vld [vmem:[%s13359_s16 + $0x268] sm:$0xff]  ;;  %v4209_v40 = vsel %vm3953_vm11, %v3825_v34, %v4081_v46  ;;  %v4095_v34 = vmul.f32 0.2, %v3839_v24 }
 0x32d   : > { %4966 = vmatmul.mubr.bf16.gmra.mrb[20].mxu0 %v4264_v57  ;;  %4782 = vmatprep.mubr.bf16.mxu1 %v4267_v59  ;;  %v4063_v52 = vmul.f32 0.2, %v3807_v37  ;;  %vm3935_vm9 = vcmp.ge.f32.partialorder %v3807_v37, 0.0  ;;  %v3802_v57 = vld [vmem:[%s13359_s16 + $0x240] sm:$0xff]  ;;  %v4187_v59 = vsel %vm3931_vm8, %v3803_v36, %v4059_v51  ;;  %v4068_v36 = vmul.f32 0.2, %v3812_v23 }
 0x32e   : > { %4975 = vmatprep.mubr.bf16.mxu0 %v4269_v60  ;;  %v4058_v63 = vmul.f32 0.2, %v3802_v57  ;;  %vm3930_vm12 = vcmp.ge.f32.partialorder %v3802_v57, 0.0  ;;  %vm3947_vm8 = vcmp.ge.f32.partialorder %v3819_v28, 0.0  ;;  %v4194_v51 = vsel %vm3938_vm4, %v3810_v18, %v4066_v32  ;;  %v3828_v18 = vld [vmem:[%s13359_s16 + $0x310] sm:$0xff] }
 0x32f   : > { %v4191_v60 = vsel %vm3935_vm9, %v3807_v37, %v4063_v52  ;;  %v4280_v37 = vpack.c.bf16 %v4192_v25, %v4188_v22  ;;  %v4198_v52 = vsel %vm3942_vm5, %v3814_v20, %v4070_v33  ;;  %v4196_v53 = vsel %vm3940_vm6, %v3812_v23, %v4068_v36  ;;  %v3835_v20 = vld [vmem:[%s13359_s16 + $0x348] sm:$0xff]  ;;  %v3837_v25 = vld [vmem:[%s13359_s16 + $0x358] sm:$0xff] }
 0x330   : > { %v4279_v7 = vpack.c.bf16 %v4191_v60, %v4187_v59  ;;  %v3827_v59 = vld [vmem:[%s13359_s16 + $0x308] sm:$0xff]  ;;  %v4282_v61 = vpack.c.bf16 %v4198_v52, %v4194_v51  ;;  %v4284_v62 = vpack.c.bf16 %v4200_v54, %v4196_v53  ;;  %v4289_v4 = vpack.c.bf16 %v4209_v40, %v4205_v39 }
 0x331   : > { %v3831_v60 = vld [vmem:[%s13359_s16 + $0x328] sm:$0xff]  ;;  %v4217_v23 = vsel %vm3961_vm3, %v3833_v2, %v4089_v10  ;;  %vm3956_vm6 = vcmp.ge.f32.partialorder %v3828_v18, 0.0  ;;  %v4084_v30 = vmul.f32 0.2, %v3828_v18  ;;  %v4088_v32 = vmul.f32 0.2, %v3832_v19 }
 0x332   : > { %vm3959_vm1 = vcmp.ge.f32.partialorder %v3831_v60, 0.0  ;;  %v4091_v33 = vmul.f32 0.2, %v3835_v20  ;;  %vm3965_vm10 = vcmp.ge.f32.partialorder %v3837_v25, 0.0  ;;  %v4094_v54 = vmul.f32 0.2, %v3838_v38 }
 0x333   : > { %v4212_v45 = vsel %vm3956_vm6, %v3828_v18, %v4084_v30  ;;  %v4216_v46 = vsel %vm3960_vm7, %v3832_v19, %v4088_v32  ;;  %v3848_v10 = vld [vmem:[%s13359_s16 + $0x3b0] sm:$0xff]  ;;  %v3857_v18 = vld [vmem:[%s13359_s16 + $0x3f8] sm:$0xff] }
 0x334   : > { %4783 = vmatmul.mubr.bf16.gmra.mrb[24].mxu1 %v4266_v13  ;;  %v4186_v13 = vsel %vm3930_vm12, %v3802_v57, %v4058_v63  ;;  %v3820_v57 = vld [vmem:[%s13359_s16 + $0x2d0] sm:$0xff]  ;;  %vm3976_vm7 = vcmp.ge.f32.partialorder %v3848_v10, 0.0 }
 0x335   : > { %4976 = vmatmul.mubr.bf16.gmra.mrb[24].mxu0 %v4268_v14  ;;  %4792 = vmatprep.mubr.bf16.mxu1 %v4271_v15  ;;  %v4190_v14 = vsel %vm3934_vm13, %v3806_v58, %v4062_v0  ;;  %v4067_v15 = vmul.f32 0.2, %v3811_v3  ;;  %v3824_v58 = vld [vmem:[%s13359_s16 + $0x2f0] sm:$0xff]  ;;  %vm3950_vm13 = vcmp.ge.f32.partialorder %v3822_v50, 0.0  ;;  %v4076_v63 = vmul.f32 0.2, %v3820_v57 }
 0x336   : > { %4985 = vmatprep.mubr.bf16.mxu0 %v4273_v17  ;;  %v4069_v17 = vmul.f32 0.2, %v3813_v8  ;;  %v4278_v21 = vpack.c.bf16 %v4190_v14, %v4186_v13  ;;  %v4080_v0 = vmul.f32 0.2, %v3824_v58  ;;  %vm3948_vm14 = vcmp.ge.f32.partialorder %v3820_v57, 0.0  ;;  %v3826_v13 = vld [vmem:[%s13359_s16 + $0x300] sm:$0xff] }
 0x337   : > { %v4195_v26 = vsel %vm3939_vm0, %v3811_v3, %v4067_v15  ;;  %vm3952_vm15 = vcmp.ge.f32.partialorder %v3824_v58, 0.0  ;;  %vm3955_vm0 = vcmp.ge.f32.partialorder %v3827_v59, 0.0  ;;  %v4204_v11 = vsel %vm3948_vm14, %v3820_v57, %v4076_v63  ;;  %v3830_v14 = vld [vmem:[%s13359_s16 + $0x320] sm:$0xff] }
 0x338   : > { %v4197_v31 = vsel %vm3941_vm2, %v3813_v8, %v4069_v17  ;;  %v4283_v47 = vpack.c.bf16 %v4199_v27, %v4195_v26  ;;  %v4087_v8 = vmul.f32 0.2, %v3831_v60  ;;  %v4208_v12 = vsel %vm3952_vm15, %v3824_v58, %v4080_v0  ;;  %v3841_v26 = vld [vmem:[%s13359_s16 + $0x378] sm:$0xff] }
 0x339   : > { %v4285_v48 = vpack.c.bf16 %v4201_v35, %v4197_v31  ;;  %vm3957_vm2 = vcmp.ge.f32.partialorder %v3829_v1, 0.0  ;;  %vm3954_vm4 = vcmp.ge.f32.partialorder %v3826_v13, 0.0  ;;  %vm3958_vm5 = vcmp.ge.f32.partialorder %v3830_v14, 0.0 }
 0x33a   : > { %v4215_v17 = vsel %vm3959_vm1, %v3831_v60, %v4087_v8  ;;  %v4082_v27 = vmul.f32 0.2, %v3826_v13  ;;  %v4093_v35 = vmul.f32 0.2, %v3837_v25  ;;  %v4097_v36 = vmul.f32 0.2, %v3841_v26 }
 0x33b   : > { %vm3969_vm11 = vcmp.ge.f32.partialorder %v3841_v26, 0.0  ;;  %v4292_v58 = vpack.c.bf16 %v4216_v46, %v4212_v45 }
 0x33c   : > { %4793 = vmatmul.mubr.bf16.gmra.mrb[28].mxu1 %v4270_v29  ;;  %v3823_v29 = vld [vmem:[%s13359_s16 + $0x2e8] sm:$0xff]  ;;  %v4221_v51 = vsel %vm3965_vm10, %v3837_v25, %v4093_v35  ;;  %v4225_v52 = vsel %vm3969_vm11, %v3841_v26, %v4097_v36  ;;  %vm3985_vm11 = vcmp.ge.f32.partialorder %v3857_v18, 0.0  ;;  %v3850_v35 = vld [vmem:[%s13359_s16 + $0x3c0] sm:$0xff] }
 0x33d   : > { %4986 = vmatmul.mubr.bf16.gmra.mrb[28].mxu0 %v4272_v49  ;;  %4802 = vmatprep.mubr.bf16.mxu1 %v4275_v55  ;;  %v4079_v44 = vmul.f32 0.2, %v3823_v29  ;;  %vm3951_vm9 = vcmp.ge.f32.partialorder %v3823_v29, 0.0  ;;  %v3818_v49 = vld [vmem:[%s13359_s16 + $0x2c0] sm:$0xff]  ;;  %v4203_v55 = vsel %vm3947_vm8, %v3819_v28, %v4075_v43  ;;  %v4086_v28 = vmul.f32 0.2, %v3830_v14 }
 0x33e   : > { %4995 = vmatprep.mubr.bf16.mxu0 %v4277_v56  ;;  %v4074_v41 = vmul.f32 0.2, %v3818_v49  ;;  %vm3946_vm12 = vcmp.ge.f32.partialorder %v3818_v49, 0.0  ;;  %vm3963_vm8 = vcmp.ge.f32.partialorder %v3835_v20, 0.0  ;;  %v4210_v43 = vsel %vm3954_vm4, %v3826_v13, %v4082_v27 }
 0x33f   : > { %v4207_v56 = vsel %vm3951_vm9, %v3823_v29, %v4079_v44  ;;  %vm3967_vm9 = vcmp.ge.f32.partialorder %v3839_v24, 0.0  ;;  %v4214_v44 = vsel %vm3958_vm5, %v3830_v14, %v4086_v28  ;;  %v4297_v60 = vpack.c.bf16 %v4225_v52, %v4221_v51 }
 0x340   : > { %v4287_v3 = vpack.c.bf16 %v4207_v56, %v4203_v55  ;;  %v3843_v55 = vld [vmem:[%s13359_s16 + $0x388] sm:$0xff]  ;;  %v4290_v57 = vpack.c.bf16 %v4214_v44, %v4210_v43  ;;  %v4113_v28 = vmul.f32 0.2, %v3857_v18  ;;  %v3852_v43 = vld [vmem:[%s13359_s16 + $0x3d0] sm:$0xff] }
 0x341   : > { %v3847_v56 = vld [vmem:[%s13359_s16 + $0x3a8] sm:$0xff]  ;;  %v4099_v63 = vmul.f32 0.2, %v3843_v55  ;;  %v3856_v44 = vld [vmem:[%s13359_s16 + $0x3f0] sm:$0xff]  ;;  %v4108_v51 = vmul.f32 0.2, %v3852_v43 }
 0x342   : > { %v4103_v0 = vmul.f32 0.2, %v3847_v56  ;;  %vm3975_vm1 = vcmp.ge.f32.partialorder %v3847_v56, 0.0  ;;  %v4112_v52 = vmul.f32 0.2, %v3856_v44 }
 0x344   : > { %4803 = vmatmul.mubr.bf16.gmra.mrb[32].mxu1 %v4274_v5  ;;  %v4202_v5 = vsel %vm3946_vm12, %v3818_v49, %v4074_v41  ;;  %v3836_v49 = vld [vmem:[%s13359_s16 + $0x350] sm:$0xff]  ;;  %v3845_v41 = vld [vmem:[%s13359_s16 + $0x398] sm:$0xff]  ;;  %v4231_v8 = vsel %vm3975_vm1, %v3847_v56, %v4103_v0 }
 0x345   : > { %4996 = vmatmul.mubr.bf16.gmra.mrb[32].mxu0 %v4276_v6  ;;  %4812 = vmatprep.mubr.bf16.mxu1 %v4279_v7  ;;  %v4206_v6 = vsel %vm3950_vm13, %v3822_v50, %v4078_v42  ;;  %v4083_v7 = vmul.f32 0.2, %v3827_v59  ;;  %v3840_v50 = vld [vmem:[%s13359_s16 + $0x370] sm:$0xff]  ;;  %vm3966_vm13 = vcmp.ge.f32.partialorder %v3838_v38, 0.0  ;;  %v4092_v39 = vmul.f32 0.2, %v3836_v49 }
 0x346   : > { %5005 = vmatprep.mubr.bf16.mxu0 %v4281_v9  ;;  %v4085_v9 = vmul.f32 0.2, %v3829_v1  ;;  %v4286_v15 = vpack.c.bf16 %v4206_v6, %v4202_v5  ;;  %v4096_v40 = vmul.f32 0.2, %v3840_v50  ;;  %v3849_v42 = vld [vmem:[%s13359_s16 + $0x3b8] sm:$0xff]  ;;  %vm3964_vm14 = vcmp.ge.f32.partialorder %v3836_v49, 0.0 }
 0x347   : > { %v4211_v16 = vsel %vm3955_vm0, %v3827_v59, %v4083_v7  ;;  %vm3968_vm15 = vcmp.ge.f32.partialorder %v3840_v50, 0.0  ;;  %vm3971_vm0 = vcmp.ge.f32.partialorder %v3843_v55, 0.0  ;;  %v4105_v2 = vmul.f32 0.2, %v3849_v42  ;;  %v3842_v5 = vld [vmem:[%s13359_s16 + $0x380] sm:$0xff] }
 0x348   : > { %v4213_v22 = vsel %vm3957_vm2, %v3829_v1, %v4085_v9  ;;  %v4291_v29 = vpack.c.bf16 %v4215_v17, %v4211_v16  ;;  %v4101_v1 = vmul.f32 0.2, %v3845_v41  ;;  %vm3973_vm2 = vcmp.ge.f32.partialorder %v3845_v41, 0.0  ;;  %v3846_v6 = vld [vmem:[%s13359_s16 + $0x3a0] sm:$0xff]  ;;  %v3844_v9 = vld [vmem:[%s13359_s16 + $0x390] sm:$0xff]  ;;  %v3855_v16 = vld [vmem:[%s13359_s16 + $0x3e8] sm:$0xff] }
 0x349   : > { %v4293_v31 = vpack.c.bf16 %v4217_v23, %v4213_v22  ;;  %vm3977_vm3 = vcmp.ge.f32.partialorder %v3849_v42, 0.0  ;;  %v4227_v7 = vsel %vm3971_vm0, %v3843_v55, %v4099_v63  ;;  %v3853_v17 = vld [vmem:[%s13359_s16 + $0x3d8] sm:$0xff]  ;;  %vm3970_vm4 = vcmp.ge.f32.partialorder %v3842_v5, 0.0 }
 0x34a   : > { %v4229_v14 = vsel %vm3973_vm2, %v3845_v41, %v4101_v1  ;;  %vm3974_vm5 = vcmp.ge.f32.partialorder %v3846_v6, 0.0  ;;  %v4098_v19 = vmul.f32 0.2, %v3842_v5  ;;  %vm3972_vm6 = vcmp.ge.f32.partialorder %v3844_v9, 0.0 }
 0x34b   : > { %v4100_v22 = vmul.f32 0.2, %v3844_v9  ;;  %v4111_v26 = vmul.f32 0.2, %v3855_v16  ;;  %v4109_v27 = vmul.f32 0.2, %v3853_v17 }
 0x34c   : > { %4813 = vmatmul.mubr.bf16.gmra.mrb[36].mxu1 %v4278_v21  ;;  %v4288_v21 = vpack.c.bf16 %v4208_v12, %v4204_v11  ;;  %v3851_v11 = vld [vmem:[%s13359_s16 + $0x3c8] sm:$0xff]  ;;  %vm3981_vm10 = vcmp.ge.f32.partialorder %v3853_v17, 0.0 }
 0x34d   : > { %5006 = vmatmul.mubr.bf16.gmra.mrb[36].mxu0 %v4280_v37  ;;  %4822 = vmatprep.mubr.bf16.mxu1 %v4283_v47  ;;  %v3834_v37 = vld [vmem:[%s13359_s16 + $0x340] sm:$0xff]  ;;  %v4219_v47 = vsel %vm3963_vm8, %v3835_v20, %v4091_v33  ;;  %v4102_v20 = vmul.f32 0.2, %v3846_v6  ;;  %v4107_v25 = vmul.f32 0.2, %v3851_v11  ;;  %vm3979_vm8 = vcmp.ge.f32.partialorder %v3851_v11, 0.0 }
 0x34e   : > { %5015 = vmatprep.mubr.bf16.mxu0 %v4285_v48  ;;  %v4223_v48 = vsel %vm3967_vm9, %v3839_v24, %v4095_v34  ;;  %v4090_v53 = vmul.f32 0.2, %v3834_v37  ;;  %vm3962_vm12 = vcmp.ge.f32.partialorder %v3834_v37, 0.0  ;;  %v4104_v24 = vmul.f32 0.2, %v3848_v10 }
 0x34f   : > { %v4295_v59 = vpack.c.bf16 %v4223_v48, %v4219_v47  ;;  %vm3983_vm9 = vcmp.ge.f32.partialorder %v3855_v16, 0.0  ;;  %v4230_v30 = vsel %vm3974_vm5, %v3846_v6, %v4102_v20  ;;  %v4235_v33 = vsel %vm3979_vm8, %v3851_v11, %v4107_v25 }
 0x350   : > { %v4232_v32 = vsel %vm3976_vm7, %v3848_v10, %v4104_v24  ;;  %v4239_v34 = vsel %vm3983_vm9, %v3855_v16, %v4111_v26  ;;  %v4237_v36 = vsel %vm3981_vm10, %v3853_v17, %v4109_v27  ;;  %v4106_v48 = vmul.f32 0.2, %v3850_v35 }
 0x351   : > { %v4303_v47 = vpack.c.bf16 %v4239_v34, %v4235_v33 }
 0x354   : > { %4823 = vmatmul.mubr.bf16.gmra.mrb[40].mxu1 %v4282_v61  ;;  %v4218_v61 = vsel %vm3962_vm12, %v3834_v37, %v4090_v53  ;;  %v4241_v37 = vsel %vm3985_vm11, %v3857_v18, %v4113_v28  ;;  %vm3978_vm12 = vcmp.ge.f32.partialorder %v3850_v35, 0.0 }
 0x355   : > { %5016 = vmatmul.mubr.bf16.gmra.mrb[40].mxu0 %v4284_v62  ;;  %4832 = vmatprep.mubr.bf16.mxu1 %v4287_v3  ;;  %v4222_v62 = vsel %vm3966_vm13, %v3838_v38, %v4094_v54  ;;  %v4220_v3 = vsel %vm3964_vm14, %v3836_v49, %v4092_v39  ;;  %v3854_v38 = vld [vmem:[%s13359_s16 + $0x3e0] sm:$0xff]  ;;  %v4305_v49 = vpack.c.bf16 %v4241_v37, %v4237_v36  ;;  %vm3980_vm14 = vcmp.ge.f32.partialorder %v3852_v43, 0.0 }
 0x356   : > { %5025 = vmatprep.mubr.bf16.mxu0 %v4289_v4  ;;  %v4224_v4 = vsel %vm3968_vm15, %v3840_v50, %v4096_v40  ;;  %v4294_v12 = vpack.c.bf16 %v4222_v62, %v4218_v61  ;;  %v4110_v50 = vmul.f32 0.2, %v3854_v38  ;;  %vm3982_vm13 = vcmp.ge.f32.partialorder %v3854_v38, 0.0 }
 0x357   : > { %v4296_v13 = vpack.c.bf16 %v4224_v4, %v4220_v3  ;;  %vm3984_vm15 = vcmp.ge.f32.partialorder %v3856_v44, 0.0  ;;  %v4234_v53 = vsel %vm3978_vm12, %v3850_v35, %v4106_v48  ;;  %v4236_v55 = vsel %vm3980_vm14, %v3852_v43, %v4108_v51 }
 0x358   : > { %v4238_v54 = vsel %vm3982_vm13, %v3854_v38, %v4110_v50  ;;  %v4240_v56 = vsel %vm3984_vm15, %v3856_v44, %v4112_v52 }
 0x35c   : > { %4833 = vmatmul.mubr.bf16.gmra.mrb[44].mxu1 %v4286_v15  ;;  %v4233_v15 = vsel %vm3977_vm3, %v3849_v42, %v4105_v2 }
 0x35d   : > { %5026 = vmatmul.mubr.bf16.gmra.mrb[44].mxu0 %v4288_v21  ;;  %4842 = vmatprep.mubr.bf16.mxu1 %v4291_v29  ;;  %v4299_v21 = vpack.c.bf16 %v4231_v8, %v4227_v7  ;;  %v4301_v23 = vpack.c.bf16 %v4233_v15, %v4229_v14  ;;  %v4226_v29 = vsel %vm3970_vm4, %v3842_v5, %v4098_v19 }
 0x35e   : > { %5035 = vmatprep.mubr.bf16.mxu0 %v4293_v31  ;;  %v4228_v31 = vsel %vm3972_vm6, %v3844_v9, %v4100_v22  ;;  %v4298_v45 = vpack.c.bf16 %v4230_v30, %v4226_v29 }
 0x35f   : > { %v4300_v46 = vpack.c.bf16 %v4232_v32, %v4228_v31 }
 0x364   : > { %4843 = vmatmul.mubr.bf16.gmra.mrb[48].mxu1 %v4290_v57  ;;  %v4302_v57 = vpack.c.bf16 %v4238_v54, %v4234_v53 }
 0x365   : > { %5036 = vmatmul.mubr.bf16.gmra.mrb[48].mxu0 %v4292_v58  ;;  %4852 = vmatprep.mubr.bf16.mxu1 %v4295_v59  ;;  %v4304_v58 = vpack.c.bf16 %v4240_v56, %v4236_v55 }
 0x366   : > { %5045 = vmatprep.mubr.bf16.mxu0 %v4297_v60 }
 0x36c   : > { %4853 = vmatmul.mubr.bf16.gmra.mrb[52].mxu1 %v4294_v12 }
 0x36d   : > { %5046 = vmatmul.mubr.bf16.gmra.mrb[52].mxu0 %v4296_v13  ;;  %4862 = vmatprep.mubr.bf16.mxu1 %v4299_v21 }
 0x36e   : > { %5055 = vmatprep.mubr.bf16.mxu0 %v4301_v23 }
 0x374   : > { %4863 = vmatmul.mubr.bf16.gmra.mrb[56].mxu1 %v4298_v45 }
 0x375   : > { %5056 = vmatmul.mubr.bf16.gmra.mrb[56].mxu0 %v4300_v46  ;;  %4872 = vmatprep.mubr.bf16.mxu1 %v4303_v47 }
 0x376   : > { %5065 = vmatprep.mubr.bf16.mxu0 %v4305_v49 }
 0x37c   : > { %4873 = vmatmul.mubr.bf16.gmra.mrb[60].mxu1 %v4302_v57 }
 0x37d   : > { %5066 = vmatmul.mubr.bf16.gmra.mrb[60].mxu0 %v4304_v58 }
 0x3d7   : > { %v4724_v39 = vpop.f32.mrb[0].mxu1 }
 0x3d8   : > { %v4917_v40 = vpop.f32.mrb[0].mxu0  ;;  %v4726_v42 = vpop.f32.mrb[1].mxu1 }
 0x3d9   : > { %v13588_v41 = vadd.f32 %v4917_v40, %v4724_v39  ;;  %v4919_v59 = vpop.f32.mrb[1].mxu0  ;;  %v4728_v61 = vpop.f32.mrb[2].mxu1 }
 0x3da   : > { %v13590_v60 = vadd.f32 %v4919_v59, %v4726_v42  ;;  %v4921_v62 = vpop.f32.mrb[2].mxu0  ;;  %v4730_v0 = vpop.f32.mrb[3].mxu1 }
 0x3db   : > { %16712 = vst [vmem:[#allocation11_spill] sm:$0xff] %v13588_v41  ;;  %v13592_v63 = vadd.f32 %v4921_v62, %v4728_v61  ;;  %v4923_v1 = vpop.f32.mrb[3].mxu0 }
 0x3dc   : > { %v13594_v2 = vadd.f32 %v4923_v1, %v4730_v0 }
 0x3dd   : > { %16713 = vst [vmem:[#allocation12_spill] sm:$0xff] %v13592_v63 }
 0x3df   : > { %v4734_v3 = vpop.f32.mrb[4].mxu1 }
 0x3e0   : > { %v4927_v4 = vpop.f32.mrb[4].mxu0  ;;  %v4736_v6 = vpop.f32.mrb[5].mxu1 }
 0x3e1   : > { %v13596_v5 = vadd.f32 %v4927_v4, %v4734_v3  ;;  %v4929_v7 = vpop.f32.mrb[5].mxu0  ;;  %v4738_v9 = vpop.f32.mrb[6].mxu1 }
 0x3e2   : > { %v13598_v8 = vadd.f32 %v4929_v7, %v4736_v6  ;;  %v4931_v10 = vpop.f32.mrb[6].mxu0  ;;  %v4740_v12 = vpop.f32.mrb[7].mxu1 }
 0x3e3   : > { %16714 = vst [vmem:[#allocation13_spill] sm:$0xff] %v13596_v5  ;;  %v13600_v11 = vadd.f32 %v4931_v10, %v4738_v9  ;;  %v4933_v13 = vpop.f32.mrb[7].mxu0 }
 0x3e4   : > { %v13602_v14 = vadd.f32 %v4933_v13, %v4740_v12 }
 0x3e7   : > { %v4744_v15 = vpop.f32.mrb[8].mxu1 }
 0x3e8   : > { %v4937_v16 = vpop.f32.mrb[8].mxu0  ;;  %v4746_v18 = vpop.f32.mrb[9].mxu1 }
 0x3e9   : > { %v13604_v17 = vadd.f32 %v4937_v16, %v4744_v15  ;;  %v4939_v19 = vpop.f32.mrb[9].mxu0  ;;  %v4748_v21 = vpop.f32.mrb[10].mxu1 }
 0x3ea   : > { %v13606_v20 = vadd.f32 %v4939_v19, %v4746_v18  ;;  %v4941_v22 = vpop.f32.mrb[10].mxu0  ;;  %v4750_v24 = vpop.f32.mrb[11].mxu1 }
 0x3eb   : > { %v13608_v23 = vadd.f32 %v4941_v22, %v4748_v21  ;;  %v4943_v25 = vpop.f32.mrb[11].mxu0 }
 0x3ec   : > { %v13610_v26 = vadd.f32 %v4943_v25, %v4750_v24 }
 0x3ed   : > { %16715 = vst [vmem:[#allocation14_spill] sm:$0xff] %v13608_v23 }
 0x3ef   : > { %v4754_v27 = vpop.f32.mrb[12].mxu1 }
 0x3f0   : > { %v4947_v28 = vpop.f32.mrb[12].mxu0  ;;  %v4756_v30 = vpop.f32.mrb[13].mxu1 }
 0x3f1   : > { %v13612_v29 = vadd.f32 %v4947_v28, %v4754_v27  ;;  %v4949_v31 = vpop.f32.mrb[13].mxu0  ;;  %v4758_v33 = vpop.f32.mrb[14].mxu1 }
 0x3f2   : > { %v13614_v32 = vadd.f32 %v4949_v31, %v4756_v30  ;;  %v4951_v34 = vpop.f32.mrb[14].mxu0  ;;  %v4760_v36 = vpop.f32.mrb[15].mxu1 }
 0x3f3   : > { %16716 = vst [vmem:[#allocation15_spill] sm:$0xff] %v13612_v29  ;;  %v13616_v35 = vadd.f32 %v4951_v34, %v4758_v33  ;;  %v4953_v37 = vpop.f32.mrb[15].mxu0 }
 0x3f4   : > { %v13618_v38 = vadd.f32 %v4953_v37, %v4760_v36 }
 0x3f5   : > { %16717 = vst [vmem:[#allocation16_spill] sm:$0xff] %v13616_v35 }
 0x3f7   : > { %v4764_v43 = vpop.f32.mrb[16].mxu1 }
 0x3f8   : > { %v4957_v44 = vpop.f32.mrb[16].mxu0  ;;  %v4766_v46 = vpop.f32.mrb[17].mxu1 }
 0x3f9   : > { %v13620_v45 = vadd.f32 %v4957_v44, %v4764_v43  ;;  %v4959_v47 = vpop.f32.mrb[17].mxu0  ;;  %v4768_v49 = vpop.f32.mrb[18].mxu1 }
 0x3fa   : > { %v13622_v48 = vadd.f32 %v4959_v47, %v4766_v46  ;;  %v4961_v50 = vpop.f32.mrb[18].mxu0  ;;  %v4770_v52 = vpop.f32.mrb[19].mxu1 }
 0x3fb   : > { %16718 = vst [vmem:[#allocation17_spill] sm:$0xff] %v13620_v45  ;;  %v13624_v51 = vadd.f32 %v4961_v50, %v4768_v49  ;;  %v4963_v53 = vpop.f32.mrb[19].mxu0 }
 0x3fc   : > { %v13626_v54 = vadd.f32 %v4963_v53, %v4770_v52 }
 0x3ff   : > { %v4774_v55 = vpop.f32.mrb[20].mxu1 }
 0x400   : > { %v4967_v56 = vpop.f32.mrb[20].mxu0  ;;  %v4776_v58 = vpop.f32.mrb[21].mxu1 }
 0x401   : > { %v13628_v57 = vadd.f32 %v4967_v56, %v4774_v55  ;;  %v4969_v39 = vpop.f32.mrb[21].mxu0  ;;  %v4778_v42 = vpop.f32.mrb[22].mxu1 }
 0x402   : > { %v13630_v40 = vadd.f32 %v4969_v39, %v4776_v58  ;;  %v4971_v59 = vpop.f32.mrb[22].mxu0  ;;  %v4780_v62 = vpop.f32.mrb[23].mxu1 }
 0x403   : > { %v13632_v61 = vadd.f32 %v4971_v59, %v4778_v42  ;;  %v4973_v0 = vpop.f32.mrb[23].mxu0 }
 0x404   : > { %v13634_v1 = vadd.f32 %v4973_v0, %v4780_v62 }
 0x407   : > { %v4784_v3 = vpop.f32.mrb[24].mxu1 }
 0x408   : > { %v4977_v4 = vpop.f32.mrb[24].mxu0  ;;  %v4786_v7 = vpop.f32.mrb[25].mxu1 }
 0x409   : > { %v13636_v6 = vadd.f32 %v4977_v4, %v4784_v3  ;;  %v4979_v9 = vpop.f32.mrb[25].mxu0  ;;  %v4788_v12 = vpop.f32.mrb[26].mxu1 }
 0x40a   : > { %v13638_v10 = vadd.f32 %v4979_v9, %v4786_v7  ;;  %v4981_v13 = vpop.f32.mrb[26].mxu0  ;;  %v4790_v16 = vpop.f32.mrb[27].mxu1 }
 0x40b   : > { %v13640_v15 = vadd.f32 %v4981_v13, %v4788_v12  ;;  %v4983_v18 = vpop.f32.mrb[27].mxu0 }
 0x40c   : > { %v13642_v19 = vadd.f32 %v4983_v18, %v4790_v16 }
 0x40f   : > { %v4794_v21 = vpop.f32.mrb[28].mxu1 }
 0x410   : > { %v4987_v22 = vpop.f32.mrb[28].mxu0  ;;  %v4796_v25 = vpop.f32.mrb[29].mxu1 }
 0x411   : > { %v13644_v24 = vadd.f32 %v4987_v22, %v4794_v21  ;;  %v4989_v27 = vpop.f32.mrb[29].mxu0  ;;  %v4798_v30 = vpop.f32.mrb[30].mxu1 }
 0x412   : > { %v13646_v28 = vadd.f32 %v4989_v27, %v4796_v25  ;;  %v4991_v31 = vpop.f32.mrb[30].mxu0  ;;  %v4800_v34 = vpop.f32.mrb[31].mxu1 }
 0x413   : > { %v13648_v33 = vadd.f32 %v4991_v31, %v4798_v30  ;;  %v4993_v36 = vpop.f32.mrb[31].mxu0 }
 0x414   : > { %v13650_v37 = vadd.f32 %v4993_v36, %v4800_v34 }
 0x417   : > { %v4804_v43 = vpop.f32.mrb[32].mxu1 }
 0x418   : > { %v4997_v44 = vpop.f32.mrb[32].mxu0  ;;  %v4806_v47 = vpop.f32.mrb[33].mxu1 }
 0x419   : > { %v13652_v46 = vadd.f32 %v4997_v44, %v4804_v43  ;;  %v4999_v49 = vpop.f32.mrb[33].mxu0  ;;  %v4808_v52 = vpop.f32.mrb[34].mxu1 }
 0x41a   : > { %v13654_v50 = vadd.f32 %v4999_v49, %v4806_v47  ;;  %v5001_v53 = vpop.f32.mrb[34].mxu0  ;;  %v4810_v56 = vpop.f32.mrb[35].mxu1 }
 0x41b   : > { %v13656_v55 = vadd.f32 %v5001_v53, %v4808_v52  ;;  %v5003_v58 = vpop.f32.mrb[35].mxu0 }
 0x41c   : > { %v13658_v39 = vadd.f32 %v5003_v58, %v4810_v56 }
 0x41f   : > { %v4814_v42 = vpop.f32.mrb[36].mxu1 }
 0x420   : > { %v5007_v59 = vpop.f32.mrb[36].mxu0  ;;  %v4816_v0 = vpop.f32.mrb[37].mxu1 }
 0x421   : > { %v13660_v62 = vadd.f32 %v5007_v59, %v4814_v42  ;;  %v5009_v3 = vpop.f32.mrb[37].mxu0  ;;  %v4818_v7 = vpop.f32.mrb[38].mxu1 }
 0x422   : > { %v13662_v4 = vadd.f32 %v5009_v3, %v4816_v0  ;;  %v5011_v9 = vpop.f32.mrb[38].mxu0  ;;  %v4820_v13 = vpop.f32.mrb[39].mxu1 }
 0x423   : > { %v13664_v12 = vadd.f32 %v5011_v9, %v4818_v7  ;;  %v5013_v16 = vpop.f32.mrb[39].mxu0 }
 0x424   : > { %v13666_v18 = vadd.f32 %v5013_v16, %v4820_v13 }
 0x426   : > { %16719 = vst [vmem:[#allocation18_spill] sm:$0xff] %v13666_v18 }
 0x427   : > { %v4824_v21 = vpop.f32.mrb[40].mxu1 }
 0x428   : > { %v5017_v22 = vpop.f32.mrb[40].mxu0  ;;  %v4826_v27 = vpop.f32.mrb[41].mxu1 }
 0x429   : > { %v13668_v25 = vadd.f32 %v5017_v22, %v4824_v21  ;;  %v5019_v30 = vpop.f32.mrb[41].mxu0  ;;  %v4828_v34 = vpop.f32.mrb[42].mxu1 }
 0x42a   : > { %v13670_v31 = vadd.f32 %v5019_v30, %v4826_v27  ;;  %v5021_v36 = vpop.f32.mrb[42].mxu0  ;;  %v4830_v44 = vpop.f32.mrb[43].mxu1 }
 0x42b   : > { %v13672_v43 = vadd.f32 %v5021_v36, %v4828_v34  ;;  %v5023_v47 = vpop.f32.mrb[43].mxu0 }
 0x42c   : > { %16720 = vst [vmem:[#allocation19_spill] sm:$0xff] %v13670_v31  ;;  %v13674_v49 = vadd.f32 %v5023_v47, %v4830_v44 }
 0x42d   : > { %16721 = vst [vmem:[#allocation20_spill] sm:$0xff] %v13672_v43 }
 0x42e   : > { %16722 = vst [vmem:[#allocation21_spill] sm:$0xff] %v13674_v49 }
 0x42f   : > { %v4834_v52 = vpop.f32.mrb[44].mxu1 }
 0x430   : > { %v5027_v53 = vpop.f32.mrb[44].mxu0  ;;  %v4836_v58 = vpop.f32.mrb[45].mxu1 }
 0x431   : > { %v13676_v56 = vadd.f32 %v5027_v53, %v4834_v52  ;;  %v5029_v42 = vpop.f32.mrb[45].mxu0  ;;  %v4838_v0 = vpop.f32.mrb[46].mxu1 }
 0x432   : > { %v13678_v59 = vadd.f32 %v5029_v42, %v4836_v58  ;;  %v5031_v3 = vpop.f32.mrb[46].mxu0  ;;  %v4840_v9 = vpop.f32.mrb[47].mxu1 }
 0x433   : > { %16723 = vst [vmem:[#allocation22_spill] sm:$0xff] %v13676_v56  ;;  %v13680_v7 = vadd.f32 %v5031_v3, %v4838_v0  ;;  %v5033_v13 = vpop.f32.mrb[47].mxu0 }
 0x434   : > { %16724 = vst [vmem:[#allocation23_spill] sm:$0xff] %v13678_v59  ;;  %v13682_v16 = vadd.f32 %v5033_v13, %v4840_v9 }
 0x435   : > { %16725 = vst [vmem:[#allocation24_spill] sm:$0xff] %v13680_v7 }
 0x436   : > { %16726 = vst [vmem:[#allocation25_spill] sm:$0xff] %v13682_v16 }
 0x437   : > { %v4844_v21 = vpop.f32.mrb[48].mxu1 }
 0x438   : > { %v5037_v22 = vpop.f32.mrb[48].mxu0  ;;  %v4846_v30 = vpop.f32.mrb[49].mxu1 }
 0x439   : > { %v13684_v27 = vadd.f32 %v5037_v22, %v4844_v21  ;;  %v5039_v34 = vpop.f32.mrb[49].mxu0  ;;  %v4848_v44 = vpop.f32.mrb[50].mxu1 }
 0x43a   : > { %v13686_v36 = vadd.f32 %v5039_v34, %v4846_v30  ;;  %v5041_v47 = vpop.f32.mrb[50].mxu0  ;;  %v4850_v53 = vpop.f32.mrb[51].mxu1 }
 0x43b   : > { %16727 = vst [vmem:[#allocation26_spill] sm:$0xff] %v13684_v27  ;;  %v13688_v52 = vadd.f32 %v5041_v47, %v4848_v44  ;;  %v5043_v58 = vpop.f32.mrb[51].mxu0 }
 0x43c   : > { %16728 = vst [vmem:[#allocation27_spill] sm:$0xff] %v13686_v36  ;;  %v13690_v42 = vadd.f32 %v5043_v58, %v4850_v53 }
 0x43d   : > { %16729 = vst [vmem:[#allocation28_spill] sm:$0xff] %v13688_v52 }
 0x43e   : > { %16730 = vst [vmem:[#allocation29_spill] sm:$0xff] %v13690_v42 }
 0x43f   : > { %v4854_v0 = vpop.f32.mrb[52].mxu1 }
 0x440   : > { %v5047_v3 = vpop.f32.mrb[52].mxu0  ;;  %v4856_v13 = vpop.f32.mrb[53].mxu1 }
 0x441   : > { %v13692_v9 = vadd.f32 %v5047_v3, %v4854_v0  ;;  %v5049_v16 = vpop.f32.mrb[53].mxu0  ;;  %v4858_v22 = vpop.f32.mrb[54].mxu1 }
 0x442   : > { %v13694_v21 = vadd.f32 %v5049_v16, %v4856_v13  ;;  %v5051_v59 = vpop.f32.mrb[54].mxu0  ;;  %v4860_v34 = vpop.f32.mrb[55].mxu1 }
 0x443   : > { %16731 = vst [vmem:[#allocation30_spill] sm:$0xff] %v13692_v9  ;;  %v13696_v30 = vadd.f32 %v5051_v59, %v4858_v22  ;;  %v5053_v36 = vpop.f32.mrb[55].mxu0 }
 0x444   : > { %16732 = vst [vmem:[#allocation31_spill] sm:$0xff] %v13694_v21  ;;  %v13698_v44 = vadd.f32 %v5053_v36, %v4860_v34 }
 0x445   : > { %16733 = vst [vmem:[#allocation32_spill] sm:$0xff] %v13696_v30 }
 0x446   : > { %16734 = vst [vmem:[#allocation33_spill] sm:$0xff] %v13698_v44 }
 0x447   : > { %v4864_v47 = vpop.f32.mrb[56].mxu1 }
 0x448   : > { %v5057_v49 = vpop.f32.mrb[56].mxu0  ;;  %v4866_v58 = vpop.f32.mrb[57].mxu1 }
 0x449   : > { %v13700_v53 = vadd.f32 %v5057_v49, %v4864_v47  ;;  %v5059_v42 = vpop.f32.mrb[57].mxu0  ;;  %v4868_v3 = vpop.f32.mrb[58].mxu1 }
 0x44a   : > { %v13702_v0 = vadd.f32 %v5059_v42, %v4866_v58  ;;  %v5061_v31 = vpop.f32.mrb[58].mxu0  ;;  %v4870_v13 = vpop.f32.mrb[59].mxu1 }
 0x44b   : > { %16735 = vst [vmem:[#allocation34_spill] sm:$0xff] %v13700_v53  ;;  %v13704_v16 = vadd.f32 %v5061_v31, %v4868_v3  ;;  %v5063_v21 = vpop.f32.mrb[59].mxu0 }
 0x44c   : > { %16736 = vst [vmem:[#allocation35_spill] sm:$0xff] %v13702_v0  ;;  %v13706_v59 = vadd.f32 %v5063_v21, %v4870_v13  ;;  %v12072_v21 = vmov (!%p10256_p11), 0.0  }
 0x44d   : > { %16737 = vst [vmem:[#allocation36_spill] sm:$0xff] %v13704_v16  ;;  %5080 = vst [vmem:[#allocation5] sm:$0xff] (!%p10256_p11), %v12072_v21 }
 0x44f   : > { %v4874_v22 = vpop.f32.mrb[60].mxu1 }
 0x450   : > { %v5067_v18 = vpop.f32.mrb[60].mxu0  ;;  %v4876_v34 = vpop.f32.mrb[61].mxu1  ;;  %5079 = sbr.rel (%p10256_p11) target bundleno = 1111 (0x457), region = 112 }
 0x451   : > { %v13708_v36 = vadd.f32 %v5067_v18, %v4874_v22  ;;  %v5069_v44 = vpop.f32.mrb[61].mxu0  ;;  %v4878_v47 = vpop.f32.mrb[62].mxu1 }
 0x452   : > { %v13710_v49 = vadd.f32 %v5069_v44, %v4876_v34  ;;  %v5071_v53 = vpop.f32.mrb[62].mxu0  ;;  %v4880_v58 = vpop.f32.mrb[63].mxu1 }
 0x453   : > { %16738 = vst [vmem:[#allocation37_spill] sm:$0xff] %v13708_v36  ;;  %v13712_v42 = vadd.f32 %v5071_v53, %v4878_v47  ;;  %v5073_v0 = vpop.f32.mrb[63].mxu0 }
 0x454   : > { %v13714_v31 = vadd.f32 %v5073_v0, %v4880_v58 }
 0x455   : > { %16739 = vst [vmem:[#allocation38_spill] sm:$0xff] %v13712_v42 }
 0x456   : > { %16740 = vst [vmem:[#allocation39_spill] sm:$0xff] %v13714_v31 }
 0x457 PF: > { %v5081_v18 = vadd.f32 %v13592_v63, %v13588_v41  ;;  %v5155_v53 = vmul.f32 %v13588_v41, %v13588_v41  ;;  %v5157_v0 = vmul.f32 %v13592_v63, %v13592_v63  ;;  %v5159_v22 = vmul.f32 %v13596_v5, %v13596_v5  ;;  %s12073_s16 = smov 96   ;;  %s12074_s25 = smov 112  }
 0x458   : > { %v5161_v47 = vmul.f32 %v13600_v11, %v13600_v11  ;;  %s12075_s4 = smov 80   ;;  %s12076_s3 = smov 64   ;;  %vm5413_vm0 = vcmask 122880  }
 0x459   : > { %v5082_v44 = vadd.f32 %v5081_v18, %v13596_v5  ;;  %v5219_v58 = vadd.f32 %v5157_v0, %v5155_v53  ;;  %v5163_v18 = vmul.f32 %v13604_v17, %v13604_v17  ;;  %v5156_v0 = vmul.f32 %v13590_v60, %v13590_v60  ;;  %s12077_s24 = smov 48   ;;  %s12078_s29 = smov 32  }
 0x45a   : > { %s12079_s23 = smov 16   ;;  %s10371_s2 = sshll.u32 %s3725_s21, 4 }
 0x45b   : > { %v5083_v3 = vadd.f32 %v5082_v44, %v13600_v11  ;;  %v5220_v44 = vadd.f32 %v5219_v58, %v5159_v22  ;;  %v5158_v22 = vmul.f32 %v13594_v2, %v13594_v2  ;;  %s13967_s0 = scalar_lea.vmem [#allocation3], %s10371_s2 }
 0x45c   : > { %5422 = vst [vmem:[%s13967_s0 + $0x8] sm:$0xff] %v13590_v60  ;;  %5424 = vst [vmem:[%s13967_s0 + $0x18] sm:$0xff] %v13594_v2 }
 0x45d   : > { %v5084_v13 = vadd.f32 %v5083_v3, %v13604_v17  ;;  %v5165_v3 = vmul.f32 %v13608_v23, %v13608_v23  ;;  %v5221_v63 = vadd.f32 %v5220_v44, %v5161_v47  ;;  %v5256_v44 = vadd.f32 %v5158_v22, %v5156_v0  ;;  %5426 = vst [vmem:[%s13967_s0 + $0x28] sm:$0xff] %v13598_v8 }
 0x45e   : > { %v5166_v22 = vmul.f32 %v13610_v26, %v13610_v26  ;;  %5427 = vst [vmem:[%s13967_s0 + $0x30] sm:$0xff] %v13600_v11  ;;  %5428 = vst [vmem:[%s13967_s0 + $0x38] sm:$0xff] %v13602_v14  ;;  %v16759_v11 = vld [vmem:[#allocation17_spill] sm:$0xff] }
 0x45f   : > { %v5085_v34 = vadd.f32 %v5084_v13, %v13608_v23  ;;  %v5167_v13 = vmul.f32 %v13612_v29, %v13612_v29  ;;  %v5222_v31 = vadd.f32 %v5221_v63, %v5163_v18  ;;  %v5171_v63 = vmul.f32 %v13620_v45, %v13620_v45  ;;  %5429 = vst [vmem:[%s13967_s0 + $0x40] sm:$0xff] %v13604_v17  ;;  %v16761_v17 = vld [vmem:[#allocation20_spill] sm:$0xff] }
 0x460   : > { %v5162_v18 = vmul.f32 %v13602_v14, %v13602_v14  ;;  %5430 = vst [vmem:[%s13967_s0 + $0x48] sm:$0xff] %v13606_v20  ;;  %5432 = vst [vmem:[%s13967_s0 + $0x58] sm:$0xff] %v13610_v26 }
 0x461   : > { %v5086_v21 = vadd.f32 %v5085_v34, %v13612_v29  ;;  %v5169_v34 = vmul.f32 %v13616_v35, %v13616_v35  ;;  %v5223_v58 = vadd.f32 %v5222_v31, %v5165_v3  ;;  %v5118_v29 = vadd.f32 %v13594_v2, %v13590_v60  ;;  %v16756_v60 = vld [vmem:[#allocation14_spill] sm:$0xff]  ;;  %v16757_v2 = vld [vmem:[#allocation15_spill] sm:$0xff]  ;;  %5434 = vst [vmem:[%s13967_s0 + $0x68] sm:$0xff] %v13614_v32 }
 0x462   : > { %v5173_v31 = vmul.f32 %v13624_v51, %v13624_v51  ;;  %5431 = vst [vmem:[%s13967_s0 + $0x50] sm:$0xff] %v16756_v60  ;;  %5433 = vst [vmem:[%s13967_s0 + $0x60] sm:$0xff] %v16757_v2 }
 0x463   : > { %v5087_v41 = vadd.f32 %v5086_v21, %v13616_v35  ;;  %v5224_v21 = vadd.f32 %v5223_v58, %v5167_v13  ;;  %v5164_v35 = vmul.f32 %v13606_v20, %v13606_v20  ;;  %v5119_v13 = vadd.f32 %v5118_v29, %v13598_v8  ;;  %5436 = vst [vmem:[%s13967_s0 + $0x78] sm:$0xff] %v13618_v38 }
 0x464   : > { %v5175_v58 = vmul.f32 %v13628_v57, %v13628_v57  ;;  %v5168_v29 = vmul.f32 %v13614_v32, %v13614_v32  ;;  %5437 = vst [vmem:[%s13967_s0 + $0x80] sm:$0xff] %v16759_v11  ;;  %5438 = vst [vmem:[%s13967_s0 + $0x88] sm:$0xff] %v13622_v48 }
 0x465   : > { %v5088_v5 = vadd.f32 %v5087_v41, %v13620_v45  ;;  %v5160_v41 = vmul.f32 %v13598_v8, %v13598_v8  ;;  %v5225_v3 = vadd.f32 %v5224_v21, %v5169_v34  ;;  %v5120_v34 = vadd.f32 %v5119_v13, %v13602_v14  ;;  %v16758_v8 = vld [vmem:[#allocation16_spill] sm:$0xff]  ;;  %5439 = vst [vmem:[%s13967_s0 + $0x90] sm:$0xff] %v13624_v51  ;;  %v16760_v14 = vld [vmem:[#allocation19_spill] sm:$0xff] }
 0x466   : > { %v5177_v21 = vmul.f32 %v13632_v61, %v13632_v61  ;;  %5435 = vst [vmem:[%s13967_s0 + $0x70] sm:$0xff] %v16758_v8  ;;  %5440 = vst [vmem:[%s13967_s0 + $0x98] sm:$0xff] %v13626_v54 }
 0x467   : > { %v5089_v53 = vadd.f32 %v5088_v5, %v13624_v51  ;;  %v5257_v45 = vadd.f32 %v5256_v44, %v5160_v41  ;;  %5441 = vst [vmem:[%s13967_s0 + $0xa0] sm:$0xff] %v13628_v57  ;;  %5442 = vst [vmem:[%s13967_s0 + $0xa8] sm:$0xff] %v13630_v40  ;;  %v16767_v51 = vld [vmem:[#allocation26_spill] sm:$0xff] }
 0x468   : > { %5443 = vst [vmem:[%s13967_s0 + $0xb0] sm:$0xff] %v13632_v61  ;;  %5444 = vst [vmem:[%s13967_s0 + $0xb8] sm:$0xff] %v13634_v1 }
 0x469   : > { %v5090_v47 = vadd.f32 %v5089_v53, %v13628_v57  ;;  %v5258_v23 = vadd.f32 %v5257_v45, %v5162_v18  ;;  %v5170_v18 = vmul.f32 %v13618_v38, %v13618_v38  ;;  %5445 = vst [vmem:[%s13967_s0 + $0xc0] sm:$0xff] %v13636_v6  ;;  %5446 = vst [vmem:[%s13967_s0 + $0xc8] sm:$0xff] %v13638_v10  ;;  %v16769_v57 = vld [vmem:[#allocation30_spill] sm:$0xff] }
 0x46a   : > { %5447 = vst [vmem:[%s13967_s0 + $0xd0] sm:$0xff] %v13640_v15  ;;  %5448 = vst [vmem:[%s13967_s0 + $0xd8] sm:$0xff] %v13642_v19 }
 0x46b   : > { %v5091_v5 = vadd.f32 %v5090_v47, %v13632_v61  ;;  %v5226_v47 = vadd.f32 %v5225_v3, %v5171_v63  ;;  %v5259_v44 = vadd.f32 %v5258_v23, %v5164_v35  ;;  %v5121_v63 = vadd.f32 %v5120_v34, %v13606_v20  ;;  %5449 = vst [vmem:[%s13967_s0 + $0xe0] sm:$0xff] %v13644_v24  ;;  %v16762_v20 = vld [vmem:[#allocation21_spill] sm:$0xff]  ;;  %v16771_v61 = vld [vmem:[#allocation34_spill] sm:$0xff] }
 0x46c   : > { %v5179_v3 = vmul.f32 %v13636_v6, %v13636_v6  ;;  %v5172_v35 = vmul.f32 %v13622_v48, %v13622_v48  ;;  %5450 = vst [vmem:[%s13967_s0 + $0xe8] sm:$0xff] %v13646_v28  ;;  %5451 = vst [vmem:[%s13967_s0 + $0xf0] sm:$0xff] %v13648_v33 }
 0x46d   : > { %v5092_v53 = vadd.f32 %v5091_v5, %v13636_v6  ;;  %v5227_v5 = vadd.f32 %v5226_v47, %v5173_v31  ;;  %v5260_v13 = vadd.f32 %v5259_v44, %v5166_v22  ;;  %v5122_v31 = vadd.f32 %v5121_v63, %v13610_v26  ;;  %5452 = vst [vmem:[%s13967_s0 + $0xf8] sm:$0xff] %v13650_v37  ;;  %v16763_v26 = vld [vmem:[#allocation22_spill] sm:$0xff]  ;;  %v16773_v6 = vld [vmem:[#allocation37_spill] sm:$0xff] }
 0x46e   : > { %v5181_v47 = vmul.f32 %v13640_v15, %v13640_v15  ;;  %v5174_v44 = vmul.f32 %v13626_v54, %v13626_v54  ;;  %5453 = vst [vmem:[%s13967_s0 + $0x100] sm:$0xff] %v13652_v46  ;;  %5454 = vst [vmem:[%s13967_s0 + $0x108] sm:$0xff] %v13654_v50 }
 0x46f   : > { %v5093_v0 = vadd.f32 %v5092_v53, %v13640_v15  ;;  %v5228_v53 = vadd.f32 %v5227_v5, %v5175_v58  ;;  %v5261_v34 = vadd.f32 %v5260_v13, %v5168_v29  ;;  %v5123_v58 = vadd.f32 %v5122_v31, %v13614_v32  ;;  %5455 = vst [vmem:[%s13967_s0 + $0x110] sm:$0xff] %v13656_v55  ;;  %v16764_v32 = vld [vmem:[#allocation23_spill] sm:$0xff] }
 0x470   : > { %v5183_v5 = vmul.f32 %v13644_v24, %v13644_v24  ;;  %v5176_v13 = vmul.f32 %v13630_v40, %v13630_v40  ;;  %5456 = vst [vmem:[%s13967_s0 + $0x118] sm:$0xff] %v13658_v39  ;;  %5457 = vst [vmem:[%s13967_s0 + $0x120] sm:$0xff] %v13660_v62 }
 0x471   : > { %v5094_v41 = vadd.f32 %v5093_v0, %v13644_v24  ;;  %v5229_v0 = vadd.f32 %v5228_v53, %v5177_v21  ;;  %v5262_v63 = vadd.f32 %v5261_v34, %v5170_v18  ;;  %v5124_v21 = vadd.f32 %v5123_v58, %v13618_v38  ;;  %5458 = vst [vmem:[%s13967_s0 + $0x128] sm:$0xff] %v13662_v4  ;;  %v16765_v38 = vld [vmem:[#allocation24_spill] sm:$0xff] }
 0x472   : > { %v5185_v53 = vmul.f32 %v13648_v33, %v13648_v33  ;;  %v5178_v34 = vmul.f32 %v13634_v1, %v13634_v1  ;;  %5459 = vst [vmem:[%s13967_s0 + $0x130] sm:$0xff] %v13664_v12  ;;  %5461 = vst [vmem:[%s13967_s0 + $0x140] sm:$0xff] %v13668_v25 }
 0x473   : > { %v5095_v45 = vadd.f32 %v5094_v41, %v13648_v33  ;;  %v5230_v41 = vadd.f32 %v5229_v0, %v5179_v3  ;;  %v5263_v31 = vadd.f32 %v5262_v63, %v5172_v35  ;;  %v5125_v3 = vadd.f32 %v5124_v21, %v13622_v48  ;;  %5462 = vst [vmem:[%s13967_s0 + $0x148] sm:$0xff] %v16760_v14  ;;  %v16766_v48 = vld [vmem:[#allocation25_spill] sm:$0xff] }
 0x474   : > { %v5187_v0 = vmul.f32 %v13652_v46, %v13652_v46  ;;  %v5180_v63 = vmul.f32 %v13638_v10, %v13638_v10  ;;  %5463 = vst [vmem:[%s13967_s0 + $0x150] sm:$0xff] %v16761_v17  ;;  %5464 = vst [vmem:[%s13967_s0 + $0x158] sm:$0xff] %v16762_v20 }
 0x475   : > { %v5096_v23 = vadd.f32 %v5095_v45, %v13652_v46  ;;  %v5231_v45 = vadd.f32 %v5230_v41, %v5181_v47  ;;  %v5264_v58 = vadd.f32 %v5263_v31, %v5174_v44  ;;  %v5126_v47 = vadd.f32 %v5125_v3, %v13626_v54  ;;  %5465 = vst [vmem:[%s13967_s0 + $0x160] sm:$0xff] %v16763_v26  ;;  %v16768_v54 = vld [vmem:[#allocation28_spill] sm:$0xff] }
 0x476   : > { %v5189_v41 = vmul.f32 %v13656_v55, %v13656_v55  ;;  %v5182_v31 = vmul.f32 %v13642_v19, %v13642_v19  ;;  %5466 = vst [vmem:[%s13967_s0 + $0x168] sm:$0xff] %v16764_v32  ;;  %5467 = vst [vmem:[%s13967_s0 + $0x170] sm:$0xff] %v16765_v38 }
 0x477   : > { %v5097_v22 = vadd.f32 %v5096_v23, %v13656_v55  ;;  %v5232_v23 = vadd.f32 %v5231_v45, %v5183_v5  ;;  %v5265_v21 = vadd.f32 %v5264_v58, %v5176_v13  ;;  %v5127_v5 = vadd.f32 %v5126_v47, %v13630_v40  ;;  %5468 = vst [vmem:[%s13967_s0 + $0x178] sm:$0xff] %v16766_v48  ;;  %v16770_v40 = vld [vmem:[#allocation32_spill] sm:$0xff] }
 0x478   : > { %v5191_v45 = vmul.f32 %v13660_v62, %v13660_v62  ;;  %v5184_v58 = vmul.f32 %v13646_v28, %v13646_v28  ;;  %5469 = vst [vmem:[%s13967_s0 + $0x180] sm:$0xff] %v16767_v51  ;;  %5471 = vst [vmem:[%s13967_s0 + $0x190] sm:$0xff] %v16768_v54 }
 0x479   : > { %v5098_v29 = vadd.f32 %v5097_v22, %v13660_v62  ;;  %v5233_v22 = vadd.f32 %v5232_v23, %v5185_v53  ;;  %v5266_v3 = vadd.f32 %v5265_v21, %v5178_v34  ;;  %v5128_v53 = vadd.f32 %v5127_v5, %v13634_v1  ;;  %5473 = vst [vmem:[%s13967_s0 + $0x1a0] sm:$0xff] %v16769_v57  ;;  %v16772_v1 = vld [vmem:[#allocation36_spill] sm:$0xff]  ;;  %v5415_v57 = vld [vmem:[#allocation5 + $0x1] sm:$0x1] }
 0x47a   : > { %v5193_v23 = vmul.f32 %v13664_v12, %v13664_v12  ;;  %v5186_v21 = vmul.f32 %v13650_v37, %v13650_v37  ;;  %5475 = vst [vmem:[%s13967_s0 + $0x1b0] sm:$0xff] %v16770_v40  ;;  %5477 = vst [vmem:[%s13967_s0 + $0x1c0] sm:$0xff] %v16771_v61 }
 0x47b   : > { %v5099_v18 = vadd.f32 %v5098_v29, %v13664_v12  ;;  %v5234_v29 = vadd.f32 %v5233_v22, %v5187_v0  ;;  %v5267_v47 = vadd.f32 %v5266_v3, %v5180_v63  ;;  %v5129_v0 = vadd.f32 %v5128_v53, %v13638_v10  ;;  %5479 = vst [vmem:[%s13967_s0 + $0x1d0] sm:$0xff] %v16772_v1  ;;  %v16774_v10 = vld [vmem:[#allocation38_spill] sm:$0xff] }
 0x47c   : > { %v5195_v22 = vmul.f32 %v13668_v25, %v13668_v25  ;;  %v5188_v3 = vmul.f32 %v13654_v50, %v13654_v50  ;;  %5480 = vst [vmem:[%s13967_s0 + $0x1d8] sm:$0xff] %v13706_v59  ;;  %5481 = vst [vmem:[%s13967_s0 + $0x1e0] sm:$0xff] %v16773_v6 }
 0x47d   : > { %v5100_v35 = vadd.f32 %v5099_v18, %v13668_v25  ;;  %v5235_v18 = vadd.f32 %v5234_v29, %v5189_v41  ;;  %v5268_v5 = vadd.f32 %v5267_v47, %v5182_v31  ;;  %v5130_v41 = vadd.f32 %v5129_v0, %v13642_v19  ;;  %5482 = vst [vmem:[%s13967_s0 + $0x1e8] sm:$0xff] %v13710_v49 }
 0x47e   : > { %v5197_v29 = vmul.f32 %v13672_v43, %v13672_v43  ;;  %v5190_v47 = vmul.f32 %v13658_v39, %v13658_v39  ;;  %5483 = vst [vmem:[%s13967_s0 + $0x1f0] sm:$0xff] %v16774_v10 }
 0x47f   : > { %v5101_v44 = vadd.f32 %v5100_v35, %v13672_v43  ;;  %v5236_v35 = vadd.f32 %v5235_v18, %v5191_v45  ;;  %v5269_v53 = vadd.f32 %v5268_v5, %v5184_v58  ;;  %v5131_v45 = vadd.f32 %v5130_v41, %v13646_v28 }
 0x480   : > { %v5199_v18 = vmul.f32 %v13676_v56, %v13676_v56  ;;  %v5192_v5 = vmul.f32 %v13662_v4, %v13662_v4 }
 0x481   : > { %v5102_v13 = vadd.f32 %v5101_v44, %v13676_v56  ;;  %v5237_v44 = vadd.f32 %v5236_v35, %v5193_v23  ;;  %v5270_v0 = vadd.f32 %v5269_v53, %v5186_v21  ;;  %v5132_v23 = vadd.f32 %v5131_v45, %v13650_v37  ;;  %v16741_v53 = vld [vmem:[#allocation18_spill] sm:$0xff] }
 0x482   : > { %v5201_v35 = vmul.f32 %v13680_v7, %v13680_v7  ;;  %v5194_v45 = vmul.f32 %v16741_v53, %v16741_v53  ;;  %5460 = vst [vmem:[%s13967_s0 + $0x138] sm:$0xff] %v16741_v53 }
 0x483   : > { %v5103_v34 = vadd.f32 %v5102_v13, %v13680_v7  ;;  %v5238_v13 = vadd.f32 %v5237_v44, %v5195_v22  ;;  %v5271_v41 = vadd.f32 %v5270_v0, %v5188_v3  ;;  %v5133_v22 = vadd.f32 %v5132_v23, %v13654_v50  ;;  %v16742_v7 = vld [vmem:[#allocation34_spill] sm:$0xff]  ;;  %v16743_v0 = vld [vmem:[#allocation19_spill] sm:$0xff] }
 0x484   : > { %v5203_v44 = vmul.f32 %v13684_v27, %v13684_v27  ;;  %v5196_v23 = vmul.f32 %v16743_v0, %v16743_v0 }
 0x485   : > { %v5104_v63 = vadd.f32 %v5103_v34, %v13684_v27  ;;  %v5239_v34 = vadd.f32 %v5238_v13, %v5197_v29  ;;  %v5272_v56 = vadd.f32 %v5271_v41, %v5190_v47  ;;  %v5134_v29 = vadd.f32 %v5133_v22, %v13658_v39  ;;  %v16744_v41 = vld [vmem:[#allocation21_spill] sm:$0xff] }
 0x486   : > { %v5205_v13 = vmul.f32 %v13688_v52, %v13688_v52  ;;  %v5198_v22 = vmul.f32 %v16744_v41, %v16744_v41 }
 0x487   : > { %v5105_v31 = vadd.f32 %v5104_v63, %v13688_v52  ;;  %v5240_v63 = vadd.f32 %v5239_v34, %v5199_v18  ;;  %v5273_v43 = vadd.f32 %v5272_v56, %v5192_v5  ;;  %v5135_v18 = vadd.f32 %v5134_v29, %v13662_v4  ;;  %v16745_v5 = vld [vmem:[#allocation23_spill] sm:$0xff] }
 0x488   : > { %v5207_v34 = vmul.f32 %v13692_v9, %v13692_v9  ;;  %v5200_v29 = vmul.f32 %v16745_v5, %v16745_v5 }
 0x489   : > { %v5106_v58 = vadd.f32 %v5105_v31, %v13692_v9  ;;  %v5241_v31 = vadd.f32 %v5240_v63, %v5201_v35  ;;  %v5274_v27 = vadd.f32 %v5273_v43, %v5194_v45  ;;  %v5136_v35 = vadd.f32 %v5135_v18, %v16741_v53  ;;  %v16746_v45 = vld [vmem:[#allocation25_spill] sm:$0xff] }
 0x48a   : > { %v5209_v63 = vmul.f32 %v13696_v30, %v13696_v30  ;;  %v5202_v18 = vmul.f32 %v16746_v45, %v16746_v45 }
 0x48b   : > { %v5107_v21 = vadd.f32 %v5106_v58, %v13696_v30  ;;  %v5242_v58 = vadd.f32 %v5241_v31, %v5203_v44  ;;  %v5275_v52 = vadd.f32 %v5274_v27, %v5196_v23  ;;  %v5137_v44 = vadd.f32 %v5136_v35, %v16743_v0  ;;  %v16747_v27 = vld [vmem:[#allocation27_spill] sm:$0xff]  ;;  %v16748_v0 = vld [vmem:[#allocation29_spill] sm:$0xff] }
 0x48c   : > { %v5211_v31 = vmul.f32 %v16742_v7, %v16742_v7  ;;  %v5204_v23 = vmul.f32 %v16747_v27, %v16747_v27  ;;  %5470 = vst [vmem:[%s13967_s0 + $0x188] sm:$0xff] %v16747_v27  ;;  %5472 = vst [vmem:[%s13967_s0 + $0x198] sm:$0xff] %v16748_v0 }
 0x48d   : > { %v5108_v3 = vadd.f32 %v5107_v21, %v16742_v7  ;;  %v5243_v21 = vadd.f32 %v5242_v58, %v5205_v13  ;;  %v5276_v9 = vadd.f32 %v5275_v52, %v5198_v22  ;;  %v5138_v13 = vadd.f32 %v5137_v44, %v16744_v41  ;;  %v16749_v41 = vld [vmem:[#allocation31_spill] sm:$0xff] }
 0x48e   : > { %v5213_v58 = vmul.f32 %v13704_v16, %v13704_v16  ;;  %v5206_v52 = vmul.f32 %v16748_v0, %v16748_v0  ;;  %5474 = vst [vmem:[%s13967_s0 + $0x1a8] sm:$0xff] %v16749_v41 }
 0x48f   : > { %v5109_v47 = vadd.f32 %v5108_v3, %v13704_v16  ;;  %v5244_v3 = vadd.f32 %v5243_v21, %v5207_v34  ;;  %v5277_v35 = vadd.f32 %v5276_v9, %v5200_v29  ;;  %v5139_v7 = vadd.f32 %v5138_v13, %v16745_v5 }
 0x490   : > { %v5215_v34 = vmul.f32 %v13708_v36, %v13708_v36  ;;  %v5208_v9 = vmul.f32 %v16749_v41, %v16749_v41 }
 0x491   : > { %v5110_v56 = vadd.f32 %v5109_v47, %v13708_v36  ;;  %v5245_v47 = vadd.f32 %v5244_v3, %v5209_v63  ;;  %v5278_v22 = vadd.f32 %v5277_v35, %v5202_v18  ;;  %v5140_v44 = vadd.f32 %v5139_v7, %v16746_v45  ;;  %v16751_v45 = vld [vmem:[#allocation35_spill] sm:$0xff] }
 0x492   : > { %v5217_v63 = vmul.f32 %v13712_v42, %v13712_v42  ;;  %5478 = vst [vmem:[%s13967_s0 + $0x1c8] sm:$0xff] %v16751_v45 }
 0x493   : > { %v5111_v43 = vadd.f32 %v5110_v56, %v13712_v42  ;;  %v5246_v21 = vadd.f32 %v5245_v47, %v5211_v31  ;;  %v5279_v29 = vadd.f32 %v5278_v22, %v5204_v23  ;;  %v5141_v13 = vadd.f32 %v5140_v44, %v16747_v27 }
 0x495   : > { %v5112_v30 = vrot.slane %v5111_v43, 4  ;;  %v5247_v3 = vadd.f32 %v5246_v21, %v5213_v58  ;;  %v5280_v47 = vadd.f32 %v5279_v29, %v5206_v52  ;;  %v5142_v18 = vadd.f32 %v5141_v13, %v16748_v0 }
 0x496   : > { %v5212_v58 = vmul.f32 %v16751_v45, %v16751_v45 }
 0x497   : > { %v5113_v56 = vadd.f32 %v5112_v30, %v5111_v43  ;;  %v5248_v36 = vadd.f32 %v5247_v3, %v5215_v34  ;;  %v16750_v30 = vld [vmem:[#allocation33_spill] sm:$0xff]  ;;  %v5281_v21 = vadd.f32 %v5280_v47, %v5208_v9  ;;  %v5143_v42 = vadd.f32 %v5142_v18, %v16749_v41  ;;  %v16752_v3 = vld [vmem:[#allocation39_spill] sm:$0xff] }
 0x498   : > { %v5210_v43 = vmul.f32 %v16750_v30, %v16750_v30  ;;  %v5218_v9 = vmul.f32 %v16752_v3, %v16752_v3  ;;  %5476 = vst [vmem:[%s13967_s0 + $0x1b8] sm:$0xff] %v16750_v30  ;;  %5484 = vst [vmem:[%s13967_s0 + $0x1f8] sm:$0xff] %v16752_v3 }
 0x499   : > { %v5114_v16 = vrot.slane %v5113_v56, 2  ;;  %v5249_v7 = vadd.f32 %v5248_v36, %v5217_v63  ;;  %v5216_v36 = vmul.f32 %v13710_v49, %v13710_v49 }
 0x49a   : > { %v5282_v34 = vadd.f32 %v5281_v21, %v5210_v43 }
 0x49b   : > { %v5115_v31 = vadd.f32 %v5114_v16, %v5113_v56  ;;  %v5250_v5 = vrot.slane %v5249_v7, 4  ;;  %v5214_v16 = vmul.f32 %v13706_v59, %v13706_v59  ;;  %v5144_v56 = vadd.f32 %v5143_v42, %v16750_v30 }
 0x49c   : > { %v5283_v22 = vadd.f32 %v5282_v34, %v5212_v58 }
 0x49d   : > { %v5116_v35 = vrot.slane %v5115_v31, 1  ;;  %v5251_v52 = vadd.f32 %v5250_v5, %v5249_v7  ;;  %v5145_v44 = vadd.f32 %v5144_v56, %v16751_v45 }
 0x49e   : > { %v5284_v42 = vadd.f32 %v5283_v22, %v5214_v16 }
 0x49f   : > { %v13898_v23 = vadd.f32 %v5116_v35, %v5115_v31  ;;  %v5252_v63 = vrot.slane %v5251_v52, 2  ;;  %v5146_v5 = vadd.f32 %v5145_v44, %v13706_v59 }
 0x4a0   : > { %v5285_v13 = vadd.f32 %v5284_v42, %v5216_v36  ;;  %v16753_v42 = vld [vmem:[#allocation11_spill] sm:$0xff] }
 0x4a1   : > { %5303 = vrot.lane.b32.xlu1 %v13898_v23, %s12073_s16  ;;  %5294 = vrot.lane.b32.xlu0 %v13898_v23, %s12074_s25  ;;  %v5253_v29 = vadd.f32 %v5252_v63, %v5251_v52  ;;  %v5147_v31 = vadd.f32 %v5146_v5, %v13710_v49  ;;  %5421 = vst [vmem:[%s13967_s0] sm:$0xff] %v16753_v42  ;;  %v16754_v5 = vld [vmem:[#allocation12_spill] sm:$0xff] }
 0x4a2   : > { %v5286_v47 = vadd.f32 %v5285_v13, %v5218_v9  ;;  %5423 = vst [vmem:[%s13967_s0 + $0x10] sm:$0xff] %v16754_v5 }
 0x4a3   : > { %v5254_v43 = vrot.slane %v5253_v29, 1  ;;  %v5148_v18 = vadd.f32 %v5147_v31, %v16752_v3 }
 0x4a4   : > { %v5287_v58 = vrot.slane %v5286_v47, 4 }
 0x4a5   : > { %5311 = vrot.lane.b32.xlu0 %v13898_v23, %s12075_s4  ;;  %v13917_v7 = vadd.f32 %v5254_v43, %v5253_v29  ;;  %v5149_v35 = vrot.slane %v5148_v18, 4  ;;  %v16755_v29 = vld [vmem:[#allocation13_spill] sm:$0xff] }
 0x4a6   : > { %v5288_v34 = vadd.f32 %v5287_v58, %v5286_v47  ;;  %5425 = vst [vmem:[%s13967_s0 + $0x20] sm:$0xff] %v16755_v29 }
 0x4a7   : > { %5307 = vrot.lane.b32.xlu1 %v13917_v7, %s12073_s16  ;;  %v5150_v21 = vadd.f32 %v5149_v35, %v5148_v18 }
 0x4a8   : > { %v5289_v52 = vrot.slane %v5288_v34, 2 }
 0x4a9   : > { %5319 = vrot.lane.b32.xlu0 %v13898_v23, %s12076_s3  ;;  %v5151_v16 = vrot.slane %v5150_v21, 2 }
 0x4aa   : > { %v5290_v22 = vadd.f32 %v5289_v52, %v5288_v34 }
 0x4ab   : > { %5315 = vrot.lane.b32.xlu1 %v13917_v7, %s12075_s4  ;;  %v5152_v56 = vadd.f32 %v5151_v16, %v5150_v21 }
 0x4ac   : > { %v5291_v63 = vrot.slane %v5290_v22, 1 }
 0x4ad   : > { %5327 = vrot.lane.b32.xlu0 %v13898_v23, %s12077_s24  ;;  %v5153_v36 = vrot.slane %v5152_v56, 1 }
 0x4ae   : > { %v13945_v9 = vadd.f32 %v5291_v63, %v5290_v22 }
 0x4af   : > { %5323 = vrot.lane.b32.xlu1 %v13917_v7, %s12076_s3  ;;  %v13937_v44 = vadd.f32 %v5153_v36, %v5152_v56 }
 0x4b1   : > { %5335 = vrot.lane.b32.xlu0 %v13898_v23, %s12078_s29 }
 0x4b3   : > { %5331 = vrot.lane.b32.xlu1 %v13917_v7, %s12077_s24 }
 0x4b5   : > { %5343 = vrot.lane.b32.xlu0 %v13898_v23, %s12079_s23 }
 0x4b7   : > { %5339 = vrot.lane.b32.xlu1 %v13917_v7, %s12078_s29 }
 0x4b9   : > { %5299 = vrot.lane.b32.xlu0 %v13917_v7, %s12074_s25 }
 0x4bb   : > { %5347 = vrot.lane.b32.xlu1 %v13917_v7, %s12079_s23 }
 0x4bd   : > { %5354 = vrot.lane.b32.xlu0 %v13937_v44, %s12074_s25 }
 0x4bf   : > { %5359 = vrot.lane.b32.xlu1 %v13945_v9, %s12074_s25 }
 0x4c1   : > { %5363 = vrot.lane.b32.xlu0 %v13937_v44, %s12073_s16 }
 0x4c3   : > { %5367 = vrot.lane.b32.xlu1 %v13945_v9, %s12073_s16 }
 0x4c5   : > { %5371 = vrot.lane.b32.xlu0 %v13937_v44, %s12075_s4 }
 0x4c7   : > { %5375 = vrot.lane.b32.xlu1 %v13945_v9, %s12075_s4 }
 0x4c9   : > { %5379 = vrot.lane.b32.xlu0 %v13937_v44, %s12076_s3 }
 0x4cb   : > { %5383 = vrot.lane.b32.xlu1 %v13945_v9, %s12076_s3 }
 0x4cd   : > { %5387 = vrot.lane.b32.xlu0 %v13937_v44, %s12077_s24 }
 0x4cf   : > { %5391 = vrot.lane.b32.xlu1 %v13945_v9, %s12077_s24 }
 0x4d1   : > { %5395 = vrot.lane.b32.xlu0 %v13937_v44, %s12078_s29 }
 0x4d3   : > { %5399 = vrot.lane.b32.xlu1 %v13945_v9, %s12078_s29 }
 0x4d5   : > { %5403 = vrot.lane.b32.xlu0 %v13937_v44, %s12079_s23 }
 0x4d7   : > { %5407 = vrot.lane.b32.xlu1 %v13945_v9, %s12079_s23 }
 0x513   : > { %v5295_v15 = vpop.permute.xlu0 %5294  ;;  %v5304_v19 = vpop.permute.xlu1 %5303 }
 0x514   : > { %v5297_v39 = vadd.f32 %v5295_v15, %v13898_v23 }
 0x516   : > { %v5306_v12 = vadd.f32 %v5304_v19, %v5297_v39 }
 0x517   : > { %v5312_v24 = vpop.permute.xlu0 %5311 }
 0x518   : > { %v5314_v53 = vadd.f32 %v5312_v24, %v5306_v12 }
 0x519   : > { %v5308_v33 = vpop.permute.xlu1 %5307 }
 0x51b   : > { %v5320_v28 = vpop.permute.xlu0 %5319 }
 0x51c   : > { %v5322_v45 = vadd.f32 %v5320_v28, %v5314_v53 }
 0x51d   : > { %v5316_v46 = vpop.permute.xlu1 %5315 }
 0x51f   : > { %v5328_v37 = vpop.permute.xlu0 %5327 }
 0x520   : > { %v5330_v3 = vadd.f32 %v5328_v37, %v5322_v45 }
 0x521   : > { %v5324_v55 = vpop.permute.xlu1 %5323 }
 0x523   : > { %v5336_v50 = vpop.permute.xlu0 %5335 }
 0x524   : > { %v5338_v43 = vadd.f32 %v5336_v50, %v5330_v3 }
 0x525   : > { %v5332_v4 = vpop.permute.xlu1 %5331 }
 0x527   : > { %v5344_v62 = vpop.permute.xlu0 %5343 }
 0x528   : > { %v5346_v23 = vadd.f32 %v5344_v62, %v5338_v43 }
 0x529   : > { %v5340_v59 = vpop.permute.xlu1 %5339 }
 0x52b   : > { %v5300_v25 = vpop.permute.xlu0 %5299 }
 0x52c   : > { %v5302_v49 = vadd.f32 %v5300_v25, %v13917_v7  ;;  %v5351_v7 = vadd.f32 %v5346_v23, %v13937_v44 }
 0x52d   : > { %v5348_v27 = vpop.permute.xlu1 %5347 }
 0x52e   : > { %v5310_v0 = vadd.f32 %v5308_v33, %v5302_v49 }
 0x52f   : > { %v5355_v41 = vpop.permute.xlu0 %5354 }
 0x530   : > { %v5318_v30 = vadd.f32 %v5316_v46, %v5310_v0  ;;  %v5357_v36 = vadd.f32 %v5355_v41, %v5351_v7 }
 0x531   : > { %v5360_v47 = vpop.permute.xlu1 %5359 }
 0x532   : > { %v5326_v13 = vadd.f32 %v5324_v55, %v5318_v30 }
 0x533   : > { %v5364_v31 = vpop.permute.xlu0 %5363 }
 0x534   : > { %v5334_v18 = vadd.f32 %v5332_v4, %v5326_v13  ;;  %v5366_v42 = vadd.f32 %v5364_v31, %v5357_v36 }
 0x535   : > { %v5368_v16 = vpop.permute.xlu1 %5367 }
 0x536   : > { %v5342_v35 = vadd.f32 %v5340_v59, %v5334_v18 }
 0x537   : > { %v5372_v58 = vpop.permute.xlu0 %5371 }
 0x538   : > { %v5350_v21 = vadd.f32 %v5348_v27, %v5342_v35  ;;  %v5374_v60 = vadd.f32 %v5372_v58, %v5366_v42 }
 0x539   : > { %v5376_v22 = vpop.permute.xlu1 %5375 }
 0x53a   : > { %v5352_v34 = vadd.f32 %v5350_v21, %v13945_v9  ;;  %v5411_v9 = vld [vmem:[#allocation5] sm:$0x1] }
 0x53b   : > { %v5380_v56 = vpop.permute.xlu0 %5379 }
 0x53c   : > { %v5362_v52 = vadd.f32 %v5360_v47, %v5352_v34  ;;  %v5382_v11 = vadd.f32 %v5380_v56, %v5374_v60 }
 0x53d   : > { %v5384_v2 = vpop.permute.xlu1 %5383 }
 0x53e   : > { %v5370_v63 = vadd.f32 %v5368_v16, %v5362_v52 }
 0x53f   : > { %v5388_v5 = vpop.permute.xlu0 %5387 }
 0x540   : > { %v5378_v29 = vadd.f32 %v5376_v22, %v5370_v63  ;;  %v5390_v20 = vadd.f32 %v5388_v5, %v5382_v11 }
 0x541   : > { %v5392_v17 = vpop.permute.xlu1 %5391 }
 0x542   : > { %v5386_v8 = vadd.f32 %v5384_v2, %v5378_v29 }
 0x543   : > { %v5396_v14 = vpop.permute.xlu0 %5395 }
 0x544   : > { %v5394_v26 = vadd.f32 %v5392_v17, %v5386_v8  ;;  %v5398_v32 = vadd.f32 %v5396_v14, %v5390_v20 }
 0x545   : > { %v5400_v44 = vpop.permute.xlu1 %5399 }
 0x546   : > { %v5402_v51 = vadd.f32 %v5400_v44, %v5394_v26 }
 0x547   : > { %v5404_v38 = vpop.permute.xlu0 %5403 }
 0x548   : > { %v5406_v48 = vadd.f32 %v5404_v38, %v5398_v32 }
 0x549   : > { %v5408_v40 = vpop.permute.xlu1 %5407 }
 0x54a   : > { %v5412_v54 = vadd.f32 %v5411_v9, %v5406_v48  ;;  %v5410_v61 = vadd.f32 %v5408_v40, %v5402_v51 }
 0x54c   : > { %5414 = vst.msk [vmem:[#allocation5] sm:$0x1] %vm5413_vm0, %v5412_v54  ;;  %v5416_v1 = vadd.f32 %v5415_v57, %v5410_v61 }
 0x54e   : > { %5417 = vst.msk [vmem:[#allocation5 + $0x1] sm:$0x1] %vm5413_vm0, %v5416_v1 }
 0x54f PF: > { %p10259_p12 = scmp.ne.s32.totalorder %s12058_s22, 2 }
 0x550   : > { %v5572_v37 = vlaneseq (!%p10259_p12)  ;;  %v11790_v46 = vld [vmem:[%s16608_s6 + $0x40] sm:$0xff] (!%p10259_p12)   ;;  %s16775_s3 = sld [smem:[#allocation72_spill]] (!%p10259_p12)  ;;  %v11792_v62 = vld [vmem:[%s16608_s6 + $0x48] sm:$0xff] (!%p10259_p12)   ;;  %v11794_v53 = vld [vmem:[%s16608_s6 + $0x50] sm:$0xff] (!%p10259_p12)   ;;  %s12080_s4 = smov (!%p10259_p12), 48   ;;  %vm5597_vm1 = vcmask (!%p10259_p12), 130048  }
 0x551   : > { %5488 = sbr.rel (%p10259_p12) target bundleno = 2036 (0x7f4), region = 116  ;;  %v11791_v55 = vld [vmem:[%s16608_s6] sm:$0xff] (!%p10259_p12)   ;;  %10381 = vmatprep.subr.bf16.mxu0 (!%p10259_p12), %v11790_v46  ;;  %11085 = vmatprep.subr.bf16.mxu1 (!%p10259_p12), %v11790_v46  ;;  %v11793_v12 = vld [vmem:[%s16608_s6 + $0x8] sm:$0xff] (!%p10259_p12)   ;;  %v11795_v45 = vld [vmem:[%s16608_s6 + $0x10] sm:$0xff] (!%p10259_p12)   ;;  %s12082_s0 = smov (!%p10259_p12), 32   ;;  %vm5599_vm2 = vcmask (!%p10259_p12), 261120  }
 0x552   : > { %v5573_v50 = vshrl.u32 (!%p10259_p12), %v5572_v37, 7  ;;  %10382 = vmatpush3.bf16.msra.mxu0 (!%p10259_p12), %v11791_v55  ;;  %11093 = vmatpush3.bf16.msra.mxu1 (!%p10259_p12), %v11791_v55  ;;  %v5559_v49 = vld [vmem:[%s16607_s5] sm:$0x1] (!%p10259_p12)  ;;  %v11796_v30 = vld [vmem:[%s16608_s6 + $0x58] sm:$0xff] (!%p10259_p12)   ;;  %s12083_s25 = smov (!%p10259_p12), 64   ;;  %v11800_v47 = vld [vmem:[%s16608_s6 + $0x68] sm:$0xff] (!%p10259_p12)  }
 0x553   : > { %v5560_v6 = vld [vmem:[#allocation5] sm:$0x1] (!%p10259_p12)  ;;  %10383 = vmatprep.subr.bf16.mxu0 (!%p10259_p12), %v11792_v62  ;;  %11086 = vmatprep.subr.bf16.mxu1 (!%p10259_p12), %v11792_v62  ;;  %v11797_v13 = vld [vmem:[%s16608_s6 + $0x18] sm:$0xff] (!%p10259_p12)   ;;  %v11798_v31 = vld [vmem:[%s16608_s6 + $0x60] sm:$0xff] (!%p10259_p12)   ;;  %s12084_s2 = smov (!%p10259_p12), 80   ;;  %s12085_s29 = smov (!%p10259_p12), 96  }
 0x554   : > { %v5561_v15 = vmul.f32 (!%p10259_p12), 0.00012207031, %v5560_v6  ;;  %v14122_v4 = vsub.s32 (!%p10259_p12), 0, %v5573_v50  ;;  %v11799_v43 = vld [vmem:[%s16608_s6 + $0x20] sm:$0xff] (!%p10259_p12)   ;;  %v11801_v18 = vld [vmem:[%s16608_s6 + $0x28] sm:$0xff] (!%p10259_p12)   ;;  %v11802_v23 = vld [vmem:[%s16608_s6 + $0x70] sm:$0xff] (!%p10259_p12)   ;;  %s12086_s21 = smov (!%p10259_p12), 112  }
 0x555   : > { %v5562_v10 = vld [vmem:[#allocation5 + $0x1] sm:$0x1] (!%p10259_p12)  ;;  %v11803_v35 = vld [vmem:[%s16608_s6 + $0x30] sm:$0xff] (!%p10259_p12)   ;;  %v11804_v58 = vld [vmem:[%s16608_s6 + $0x78] sm:$0xff] (!%p10259_p12)   ;;  %s5489_s27 = sshra.s32 (!%p10259_p12), %s12254_s26, 3  ;;  %vm5601_vm3 = vcmask (!%p10259_p12), 392192  }
 0x556   : > { %v5563_v19 = vmul.f32 (!%p10259_p12), 0.00012207031, %v5562_v10  ;;  %v5564_v24 = vmul.f32 (!%p10259_p12), %v5561_v15, %v5561_v15  ;;  %v5558_v39 = vld [vmem:[%s16775_s3] sm:$0x1] (!%p10259_p12)  ;;  %10384 = vmatpush3.bf16.msra.mxu0 (!%p10259_p12), %v11793_v12  ;;  %11094 = vmatpush3.bf16.msra.mxu1 (!%p10259_p12), %v11793_v12  ;;  %s12081_s3 = smov (!%p10259_p12), 16   ;;  %v11805_v21 = vld [vmem:[%s16608_s6 + $0x38] sm:$0xff] (!%p10259_p12)   ;;  %vm5603_vm4 = vcmask (!%p10259_p12), 523264  }
 0x557   : > { %10385 = vmatprep.subr.bf16.mxu0 (!%p10259_p12), %v11794_v53  ;;  %11087 = vmatprep.subr.bf16.mxu1 (!%p10259_p12), %v11794_v53  ;;  %vm5605_vm5 = vcmask (!%p10259_p12), 654336   ;;  %vm5607_vm6 = vcmask (!%p10259_p12), 785408   ;;  %vm5609_vm7 = vcmask (!%p10259_p12), 916480   ;;  %p10278_p13 = scmp.ne.s32.totalorder (!%p10259_p12), %s12054_s1, 0 }
 0x558   : > { %v5565_v28 = vsub.f32 %v5563_v19, %v5564_v24 }
 0x55a   : > { %v5566_v33 = vadd.f32 0.8, %v5565_v28  ;;  %10386 = vmatpush3.bf16.msra.mxu0 %v11795_v45  ;;  %11095 = vmatpush3.bf16.msra.mxu1 %v11795_v45 }
 0x55b   : > { %10387 = vmatprep.subr.bf16.mxu0 %v11796_v30  ;;  %11088 = vmatprep.subr.bf16.mxu1 %v11796_v30 }
 0x55c   : > { %11806 = vrsqrt.f32 %v5566_v33 }
 0x55e   : > { %10388 = vmatpush3.bf16.msra.mxu0 %v11797_v13  ;;  %11096 = vmatpush3.bf16.msra.mxu1 %v11797_v13 }
 0x55f   : > { %10389 = vmatprep.subr.bf16.mxu0 %v11798_v31  ;;  %11089 = vmatprep.subr.bf16.mxu1 %v11798_v31 }
 0x562   : > { %10390 = vmatpush3.bf16.msra.mxu0 %v11799_v43  ;;  %11097 = vmatpush3.bf16.msra.mxu1 %v11799_v43 }
 0x563   : > { %10391 = vmatprep.subr.bf16.mxu0 %v11800_v47  ;;  %11090 = vmatprep.subr.bf16.mxu1 %v11800_v47 }
 0x566   : > { %v11807_v25 = vpop.eup %11806  ;;  %10392 = vmatpush3.bf16.msra.mxu0 %v11801_v18  ;;  %11098 = vmatpush3.bf16.msra.mxu1 %v11801_v18 }
 0x567   : > { %v14127_v59 = vmul.f32 %v11807_v25, %v5558_v39  ;;  %10393 = vmatprep.subr.bf16.mxu0 %v11802_v23  ;;  %11091 = vmatprep.subr.bf16.mxu1 %v11802_v23 }
 0x569   : > { %v5575_v0 = vrot.slane %v14127_v59, %v14122_v4  ;;  %v5569_v41 = vmul.f32 %v14127_v59, %v5561_v15 }
 0x56a   : > { %10394 = vmatpush3.bf16.msra.mxu0 %v11803_v35  ;;  %11099 = vmatpush3.bf16.msra.mxu1 %v11803_v35 }
 0x56b   : > { %5582 = vrot.lane.b32.xlu1 %v5575_v0, %s12080_s4  ;;  %5576 = vrot.lane.b32.xlu0 %v5575_v0, %s12081_s3  ;;  %v14142_v27 = vsub.f32 %v5559_v49, %v5569_v41 }
 0x56c   : > { %10395 = vmatprep.subr.bf16.mxu0 %v11804_v58  ;;  %11092 = vmatprep.subr.bf16.mxu1 %v11804_v58 }
 0x56d   : > { %v5615_v3 = vrot.slane %v14142_v27, %v14122_v4 }
 0x56e   : > { %10396 = vmatpush3.bf16.msra.mxu0 %v11805_v21  ;;  %11100 = vmatpush3.bf16.msra.mxu1 %v11805_v21 }
 0x56f   : > { %5579 = vrot.lane.b32.xlu0 %v5575_v0, %s12082_s0  ;;  %5616 = vrot.lane.b32.xlu1 %v5615_v3, %s12081_s3 }
 0x573   : > { %5585 = vrot.lane.b32.xlu0 %v5575_v0, %s12083_s25  ;;  %5619 = vrot.lane.b32.xlu1 %v5615_v3, %s12082_s0 }
 0x577   : > { %5588 = vrot.lane.b32.xlu0 %v5575_v0, %s12084_s2  ;;  %5622 = vrot.lane.b32.xlu1 %v5615_v3, %s12080_s4 }
 0x57b   : > { %5591 = vrot.lane.b32.xlu0 %v5575_v0, %s12085_s29  ;;  %5625 = vrot.lane.b32.xlu1 %v5615_v3, %s12083_s25 }
 0x57f   : > { %5594 = vrot.lane.b32.xlu0 %v5575_v0, %s12086_s21  ;;  %5628 = vrot.lane.b32.xlu1 %v5615_v3, %s12084_s2  ;;  %s10372_s2 = sshll.u32 %s5489_s27, 4 }
 0x580   : > { %s14196_s28 = scalar_lea.vmem [#allocation3], %s10372_s2 }
 0x581   : > { %v5495_v9 = vld [vmem:[%s14196_s28 + $0x8] sm:$0xff]  ;;  %v5497_v38 = vld [vmem:[%s14196_s28 + $0x18] sm:$0xff]  ;;  %v5494_v57 = vld [vmem:[%s14196_s28] sm:$0xff] }
 0x582   : > { %v5527_v51 = vld [vmem:[%s14196_s28 + $0x108] sm:$0xff]  ;;  %v5529_v54 = vld [vmem:[%s14196_s28 + $0x118] sm:$0xff]  ;;  %v5496_v1 = vld [vmem:[%s14196_s28 + $0x10] sm:$0xff] }
 0x583   : > { %5631 = vrot.lane.b32.xlu0 %v5615_v3, %s12085_s29  ;;  %5634 = vrot.lane.b32.xlu1 %v5615_v3, %s12086_s21  ;;  %v5526_v6 = vld [vmem:[%s14196_s28 + $0x100] sm:$0xff]  ;;  %v5528_v10 = vld [vmem:[%s14196_s28 + $0x110] sm:$0xff] }
 0x584   : > { %v5499_v19 = vld [vmem:[%s14196_s28 + $0x28] sm:$0xff]  ;;  %v5501_v24 = vld [vmem:[%s14196_s28 + $0x38] sm:$0xff]  ;;  %v5498_v12 = vld [vmem:[%s14196_s28 + $0x20] sm:$0xff] }
 0x585   : > { %v5531_v28 = vld [vmem:[%s14196_s28 + $0x128] sm:$0xff]  ;;  %v5533_v62 = vld [vmem:[%s14196_s28 + $0x138] sm:$0xff]  ;;  %v5500_v25 = vld [vmem:[%s14196_s28 + $0x30] sm:$0xff] }
 0x586   : > { %v5530_v41 = vld [vmem:[%s14196_s28 + $0x120] sm:$0xff]  ;;  %v5532_v45 = vld [vmem:[%s14196_s28 + $0x130] sm:$0xff] }
 0x5dd   : > { %v5583_v16 = vpop.permute.xlu1 %5582  ;;  %v5577_v34 = vpop.permute.xlu0 %5576 }
 0x5de   : > { %v5598_v42 = vsel %vm5597_vm1, %v14127_v59, %v5577_v34 }
 0x5e1   : > { %v5580_v7 = vpop.permute.xlu0 %5579  ;;  %v5617_v56 = vpop.permute.xlu1 %5616 }
 0x5e2   : > { %v5600_v5 = vsel %vm5599_vm2, %v5598_v42, %v5580_v7  ;;  %v5637_v11 = vsel %vm5597_vm1, %v14142_v27, %v5617_v56  ;;  %v5503_v27 = vld [vmem:[%s14196_s28 + $0x48] sm:$0xff] }
 0x5e3   : > { %v5602_v2 = vsel %vm5601_vm3, %v5600_v5, %v5583_v16 }
 0x5e5   : > { %v5586_v52 = vpop.permute.xlu0 %5585  ;;  %v5620_v36 = vpop.permute.xlu1 %5619 }
 0x5e6   : > { %v5604_v8 = vsel %vm5603_vm4, %v5602_v2, %v5586_v52  ;;  %v5638_v17 = vsel %vm5599_vm2, %v5637_v11, %v5620_v36 }
 0x5e9   : > { %v5589_v22 = vpop.permute.xlu0 %5588  ;;  %v5623_v63 = vpop.permute.xlu1 %5622 }
 0x5ea   : > { %v5606_v14 = vsel %vm5605_vm5, %v5604_v8, %v5589_v22  ;;  %v5639_v44 = vsel %vm5601_vm3, %v5638_v17, %v5623_v63 }
 0x5ed   : > { %v5592_v29 = vpop.permute.xlu0 %5591  ;;  %v5626_v60 = vpop.permute.xlu1 %5625 }
 0x5ee   : > { %v5608_v20 = vsel %vm5607_vm6, %v5606_v14, %v5592_v29  ;;  %v5640_v40 = vsel %vm5603_vm4, %v5639_v44, %v5626_v60 }
 0x5f1   : > { %v5595_v26 = vpop.permute.xlu0 %5594  ;;  %v5629_v32 = vpop.permute.xlu1 %5628 }
 0x5f2   : > { %v5610_v48 = vsel %vm5609_vm7, %v5608_v20, %v5595_v26  ;;  %v5641_v15 = vsel %vm5605_vm5, %v5640_v40, %v5629_v32 }
 0x5f3   : > { %v14207_v61 = vrot.slane %v5610_v48, %v14122_v4 }
 0x5f5   : > { %v5632_v33 = vpop.permute.xlu0 %5631  ;;  %v5635_v37 = vpop.permute.xlu1 %5634  ;;  %v5649_v46 = vmul.f32 %v14207_v61, %v5495_v9  ;;  %v5651_v50 = vmul.f32 %v14207_v61, %v5497_v38  ;;  %v5681_v55 = vmul.f32 %v14207_v61, %v5527_v51  ;;  %v5683_v39 = vmul.f32 %v14207_v61, %v5529_v54 }
 0x5f6   : > { %v5642_v59 = vsel %vm5607_vm6, %v5641_v15, %v5632_v33  ;;  %v5648_v49 = vmul.f32 %v14207_v61, %v5494_v57  ;;  %v5650_v53 = vmul.f32 %v14207_v61, %v5496_v1  ;;  %v5680_v0 = vmul.f32 %v14207_v61, %v5526_v6 }
 0x5f7   : > { %v5643_v30 = vsel %vm5609_vm7, %v5642_v59, %v5635_v37  ;;  %v5682_v3 = vmul.f32 %v14207_v61, %v5528_v10  ;;  %v5653_v13 = vmul.f32 %v14207_v61, %v5499_v19  ;;  %v5655_v31 = vmul.f32 %v14207_v61, %v5501_v24  ;;  %v5505_v59 = vld [vmem:[%s14196_s28 + $0x58] sm:$0xff] }
 0x5f8   : > { %v14235_v43 = vrot.slane %v5643_v30, %v14122_v4  ;;  %v5685_v47 = vmul.f32 %v14207_v61, %v5531_v28  ;;  %v5687_v18 = vmul.f32 %v14207_v61, %v5533_v62  ;;  %v5652_v23 = vmul.f32 %v14207_v61, %v5498_v12 }
 0x5f9   : > { %v5654_v35 = vmul.f32 %v14207_v61, %v5500_v25  ;;  %v14242_v58 = vmul.f32 %v14207_v61, %v5530_v41  ;;  %v14245_v21 = vmul.f32 %v14207_v61, %v5532_v45  ;;  %v14248_v16 = vmul.f32 %v14207_v61, %v5503_v27 }
 0x5fa   : > { %v5717_v4 = vadd.f32 %v14235_v43, %v5649_v46  ;;  %v5719_v34 = vadd.f32 %v14235_v43, %v5651_v50  ;;  %v5749_v7 = vadd.f32 %v14235_v43, %v5681_v55  ;;  %v5751_v56 = vadd.f32 %v14235_v43, %v5683_v39 }
 0x5fb   : > { %v5716_v52 = vadd.f32 %v14235_v43, %v5648_v49  ;;  %v5718_v36 = vadd.f32 %v14235_v43, %v5650_v53  ;;  %v5748_v22 = vadd.f32 %v14235_v43, %v5680_v0  ;;  %v5750_v63 = vadd.f32 %v14235_v43, %v5682_v3  ;;  %v5535_v49 = vld [vmem:[%s14196_s28 + $0x148] sm:$0xff] }
 0x5fc   : > { %vm5781_vm8 = vcmp.ge.f32.partialorder %v5717_v4, 0.0  ;;  %vm5783_vm9 = vcmp.ge.f32.partialorder %v5719_v34, 0.0  ;;  %v5845_v42 = vmul.f32 0.2, %v5717_v4  ;;  %v5847_v5 = vmul.f32 0.2, %v5719_v34 }
 0x5fd   : > { %vm5813_vm10 = vcmp.ge.f32.partialorder %v5749_v7, 0.0  ;;  %vm5815_vm11 = vcmp.ge.f32.partialorder %v5751_v56, 0.0  ;;  %v5877_v29 = vmul.f32 0.2, %v5749_v7  ;;  %v5879_v60 = vmul.f32 0.2, %v5751_v56 }
 0x5fe   : > { %v5909_v2 = vsel %vm5781_vm8, %v5717_v4, %v5845_v42  ;;  %v5911_v8 = vsel %vm5783_vm9, %v5719_v34, %v5847_v5  ;;  %vm5780_vm12 = vcmp.ge.f32.partialorder %v5716_v52, 0.0  ;;  %vm5782_vm13 = vcmp.ge.f32.partialorder %v5718_v36, 0.0 }
 0x5ff   : > { %v5973_v11 = vpack.c.bf16 %v5911_v8, %v5909_v2  ;;  %v5941_v14 = vsel %vm5813_vm10, %v5749_v7, %v5877_v29  ;;  %v5943_v17 = vsel %vm5815_vm11, %v5751_v56, %v5879_v60  ;;  %v5844_v20 = vmul.f32 0.2, %v5716_v52  ;;  %v5504_v7 = vld [vmem:[%s14196_s28 + $0x50] sm:$0xff] }
 0x600   : > { %v5989_v26 = vpack.c.bf16 %v5943_v17, %v5941_v14  ;;  %v5846_v32 = vmul.f32 0.2, %v5718_v36  ;;  %vm5812_vm14 = vcmp.ge.f32.partialorder %v5748_v22, 0.0  ;;  %vm5814_vm15 = vcmp.ge.f32.partialorder %v5750_v63, 0.0 }
 0x601   : > { %6164 = vmatprep.mubr.bf16.mxu0 %v5973_v11  ;;  %v5908_v9 = vsel %vm5780_vm12, %v5716_v52, %v5844_v20  ;;  %v5876_v38 = vmul.f32 0.2, %v5748_v22  ;;  %v5878_v44 = vmul.f32 0.2, %v5750_v63  ;;  %v5721_v48 = vadd.f32 %v14235_v43, %v5653_v13 }
 0x602   : > { %6228 = vmatprep.mubr.bf16.mxu1 %v5989_v26  ;;  %v5910_v51 = vsel %vm5782_vm13, %v5718_v36, %v5846_v32  ;;  %v5723_v54 = vadd.f32 %v14235_v43, %v5655_v31  ;;  %v5753_v57 = vadd.f32 %v14235_v43, %v5685_v47  ;;  %v5755_v40 = vadd.f32 %v14235_v43, %v5687_v18  ;;  %v5537_v31 = vld [vmem:[%s14196_s28 + $0x158] sm:$0xff]  ;;  %v5502_v18 = vld [vmem:[%s14196_s28 + $0x40] sm:$0xff]  ;;  %v5507_v26 = vld [vmem:[%s14196_s28 + $0x68] sm:$0xff] }
 0x603   : > { %v5972_v1 = vpack.c.bf16 %v5910_v51, %v5908_v9  ;;  %v5940_v6 = vsel %vm5812_vm14, %v5748_v22, %v5876_v38  ;;  %v5942_v10 = vsel %vm5814_vm15, %v5750_v63, %v5878_v44  ;;  %vm5785_vm0 = vcmp.ge.f32.partialorder %v5721_v48, 0.0  ;;  %v5534_v22 = vld [vmem:[%s14196_s28 + $0x140] sm:$0xff]  ;;  %v5536_v63 = vld [vmem:[%s14196_s28 + $0x150] sm:$0xff]  ;;  %v5509_v32 = vld [vmem:[%s14196_s28 + $0x78] sm:$0xff] }
 0x604   : > { %v5988_v15 = vpack.c.bf16 %v5942_v10, %v5940_v6  ;;  %vm5787_vm1 = vcmp.ge.f32.partialorder %v5723_v54, 0.0  ;;  %v5849_v19 = vmul.f32 0.2, %v5721_v48  ;;  %v5851_v24 = vmul.f32 0.2, %v5723_v54  ;;  %v5539_v10 = vld [vmem:[%s14196_s28 + $0x168] sm:$0xff] }
 0x605   : > { %6165 = vmatmul.mubr.bf16.vlgmr.msra.gmra.mrb[0].mxu0 %v5972_v1  ;;  %vm5817_vm2 = vcmp.ge.f32.partialorder %v5753_v57, 0.0  ;;  %vm5819_vm3 = vcmp.ge.f32.partialorder %v5755_v40, 0.0  ;;  %v5881_v28 = vmul.f32 0.2, %v5753_v57  ;;  %v5883_v33 = vmul.f32 0.2, %v5755_v40 }
 0x606   : > { %6229 = vmatmul.mubr.bf16.vlgmr.msra.gmra.mrb[0].mxu1 %v5988_v15  ;;  %v5913_v37 = vsel %vm5785_vm0, %v5721_v48, %v5849_v19  ;;  %v5915_v46 = vsel %vm5787_vm1, %v5723_v54, %v5851_v24  ;;  %v5720_v50 = vadd.f32 %v14235_v43, %v5652_v23  ;;  %v5722_v55 = vadd.f32 %v14235_v43, %v5654_v35 }
 0x607   : > { %v5975_v39 = vpack.c.bf16 %v5915_v46, %v5913_v37  ;;  %v5945_v62 = vsel %vm5817_vm2, %v5753_v57, %v5881_v28  ;;  %v5947_v12 = vsel %vm5819_vm3, %v5755_v40, %v5883_v33  ;;  %v5752_v25 = vadd.f32 %v14235_v43, %v14242_v58  ;;  %v5541_v28 = vld [vmem:[%s14196_s28 + $0x178] sm:$0xff] }
 0x608   : > { %v5991_v53 = vpack.c.bf16 %v5947_v12, %v5945_v62  ;;  %vm5784_vm4 = vcmp.ge.f32.partialorder %v5720_v50, 0.0  ;;  %vm5786_vm5 = vcmp.ge.f32.partialorder %v5722_v55, 0.0  ;;  %v5848_v0 = vmul.f32 0.2, %v5720_v50  ;;  %v5506_v62 = vld [vmem:[%s14196_s28 + $0x60] sm:$0xff] }
 0x609   : > { %6172 = vmatprep.mubr.bf16.mxu0 %v5975_v39  ;;  %v5850_v41 = vmul.f32 0.2, %v5722_v55  ;;  %v5754_v45 = vadd.f32 %v14235_v43, %v14245_v21  ;;  %vm5816_vm6 = vcmp.ge.f32.partialorder %v5752_v25, 0.0  ;;  %v5880_v27 = vmul.f32 0.2, %v5752_v25 }
 0x60a   : > { %6236 = vmatprep.mubr.bf16.mxu1 %v5991_v53  ;;  %v5912_v30 = vsel %vm5784_vm4, %v5720_v50, %v5848_v0  ;;  %v5659_v3 = vmul.f32 %v14207_v61, %v5505_v59  ;;  %v5725_v13 = vadd.f32 %v14235_v43, %v14248_v16  ;;  %v5689_v47 = vmul.f32 %v14207_v61, %v5535_v49  ;;  %v5508_v53 = vld [vmem:[%s14196_s28 + $0x70] sm:$0xff]  ;;  %v5538_v0 = vld [vmem:[%s14196_s28 + $0x160] sm:$0xff] }
 0x60b   : > { %v5914_v23 = vsel %vm5786_vm5, %v5722_v55, %v5850_v41  ;;  %vm5818_vm7 = vcmp.ge.f32.partialorder %v5754_v45, 0.0  ;;  %v5882_v35 = vmul.f32 0.2, %v5754_v45  ;;  %v5944_v58 = vsel %vm5816_vm6, %v5752_v25, %v5880_v27  ;;  %v5540_v41 = vld [vmem:[%s14196_s28 + $0x170] sm:$0xff] }
 0x60c   : > { %v5974_v21 = vpack.c.bf16 %v5914_v23, %v5912_v30  ;;  %v5727_v4 = vadd.f32 %v14235_v43, %v5659_v3  ;;  %vm5789_vm8 = vcmp.ge.f32.partialorder %v5725_v13, 0.0  ;;  %v5853_v34 = vmul.f32 0.2, %v5725_v13 }
 0x60d   : > { %v5946_v56 = vsel %vm5818_vm7, %v5754_v45, %v5882_v35  ;;  %v5691_v52 = vmul.f32 %v14207_v61, %v5537_v31  ;;  %v5757_v16 = vadd.f32 %v14235_v43, %v5689_v47  ;;  %v5656_v36 = vmul.f32 %v14207_v61, %v5502_v18 }
 0x60e   : > { %6173 = vmatmul.mubr.bf16.gmra.mrb[4].mxu0 %v5974_v21  ;;  %v5990_v42 = vpack.c.bf16 %v5946_v56, %v5944_v58  ;;  %vm5791_vm9 = vcmp.ge.f32.partialorder %v5727_v4, 0.0  ;;  %v5855_v5 = vmul.f32 0.2, %v5727_v4  ;;  %v5917_v29 = vsel %vm5789_vm8, %v5725_v13, %v5853_v34  ;;  %v5511_v58 = vld [vmem:[%s14196_s28 + $0x88] sm:$0xff] }
 0x60f   : > { %v5759_v60 = vadd.f32 %v14235_v43, %v5691_v52  ;;  %vm5821_vm10 = vcmp.ge.f32.partialorder %v5757_v16, 0.0  ;;  %v5885_v2 = vmul.f32 0.2, %v5757_v16  ;;  %v5658_v8 = vmul.f32 %v14207_v61, %v5504_v7 }
 0x610   : > { %6237 = vmatmul.mubr.bf16.gmra.mrb[4].mxu1 %v5990_v42  ;;  %v5919_v11 = vsel %vm5791_vm9, %v5727_v4, %v5855_v5  ;;  %v5724_v14 = vadd.f32 %v14235_v43, %v5656_v36  ;;  %v5688_v17 = vmul.f32 %v14207_v61, %v5534_v22  ;;  %v5690_v20 = vmul.f32 %v14207_v61, %v5536_v63  ;;  %v5513_v63 = vld [vmem:[%s14196_s28 + $0x98] sm:$0xff] }
 0x611   : > { %v5977_v9 = vpack.c.bf16 %v5919_v11, %v5917_v29  ;;  %vm5823_vm11 = vcmp.ge.f32.partialorder %v5759_v60, 0.0  ;;  %v5887_v38 = vmul.f32 0.2, %v5759_v60  ;;  %v5949_v44 = vsel %vm5821_vm10, %v5757_v16, %v5885_v2  ;;  %v5545_v2 = vld [vmem:[%s14196_s28 + $0x198] sm:$0xff] }
 0x612   : > { %v5726_v48 = vadd.f32 %v14235_v43, %v5658_v8  ;;  %vm5788_vm12 = vcmp.ge.f32.partialorder %v5724_v14, 0.0  ;;  %v5852_v51 = vmul.f32 0.2, %v5724_v14  ;;  %v5756_v54 = vadd.f32 %v14235_v43, %v5688_v17 }
 0x613   : > { %6180 = vmatprep.mubr.bf16.mxu0 %v5977_v9  ;;  %v5951_v57 = vsel %vm5823_vm11, %v5759_v60, %v5887_v38  ;;  %v5758_v40 = vadd.f32 %v14235_v43, %v5690_v20  ;;  %v5661_v1 = vmul.f32 %v14207_v61, %v5507_v26  ;;  %v5663_v6 = vmul.f32 %v14207_v61, %v5509_v32  ;;  %v5543_v60 = vld [vmem:[%s14196_s28 + $0x188] sm:$0xff] }
 0x614   : > { %v5993_v15 = vpack.c.bf16 %v5951_v57, %v5949_v44  ;;  %vm5790_vm13 = vcmp.ge.f32.partialorder %v5726_v48, 0.0  ;;  %v5854_v19 = vmul.f32 0.2, %v5726_v48  ;;  %v5916_v24 = vsel %vm5788_vm12, %v5724_v14, %v5852_v51 }
 0x615   : > { %vm5820_vm14 = vcmp.ge.f32.partialorder %v5756_v54, 0.0  ;;  %vm5822_vm15 = vcmp.ge.f32.partialorder %v5758_v40, 0.0  ;;  %v5884_v33 = vmul.f32 0.2, %v5756_v54  ;;  %v5886_v37 = vmul.f32 0.2, %v5758_v40 }
 0x616   : > { %6244 = vmatprep.mubr.bf16.mxu1 %v5993_v15  ;;  %v5918_v46 = vsel %vm5790_vm13, %v5726_v48, %v5854_v19  ;;  %v5729_v50 = vadd.f32 %v14235_v43, %v5661_v1  ;;  %v5731_v55 = vadd.f32 %v14235_v43, %v5663_v6  ;;  %v5693_v39 = vmul.f32 %v14207_v61, %v5539_v10  ;;  %v5510_v48 = vld [vmem:[%s14196_s28 + $0x80] sm:$0xff]  ;;  %v5512_v1 = vld [vmem:[%s14196_s28 + $0x90] sm:$0xff] }
 0x617   : > { %v5976_v12 = vpack.c.bf16 %v5918_v46, %v5916_v24  ;;  %v5948_v25 = vsel %vm5820_vm14, %v5756_v54, %v5884_v33  ;;  %v5950_v59 = vsel %vm5822_vm15, %v5758_v40, %v5886_v37  ;;  %v5695_v49 = vmul.f32 %v14207_v61, %v5541_v28  ;;  %v5542_v33 = vld [vmem:[%s14196_s28 + $0x180] sm:$0xff] }
 0x618   : > { %v5992_v45 = vpack.c.bf16 %v5950_v59, %v5948_v25  ;;  %vm5793_vm0 = vcmp.ge.f32.partialorder %v5729_v50, 0.0  ;;  %vm5795_vm1 = vcmp.ge.f32.partialorder %v5731_v55, 0.0  ;;  %v5857_v27 = vmul.f32 0.2, %v5729_v50 }
 0x619   : > { %6181 = vmatmul.mubr.bf16.gmra.mrb[8].mxu0 %v5976_v12  ;;  %v5859_v30 = vmul.f32 0.2, %v5731_v55  ;;  %v5761_v3 = vadd.f32 %v14235_v43, %v5693_v39  ;;  %v5763_v13 = vadd.f32 %v14235_v43, %v5695_v49  ;;  %v5660_v31 = vmul.f32 %v14207_v61, %v5506_v62 }
 0x61a   : > { %6245 = vmatmul.mubr.bf16.gmra.mrb[8].mxu1 %v5992_v45  ;;  %v5921_v47 = vsel %vm5793_vm0, %v5729_v50, %v5857_v27  ;;  %v5662_v18 = vmul.f32 %v14207_v61, %v5508_v53  ;;  %v5692_v23 = vmul.f32 %v14207_v61, %v5538_v0  ;;  %v5694_v35 = vmul.f32 %v14207_v61, %v5540_v41  ;;  %v5515_v0 = vld [vmem:[%s14196_s28 + $0xa8] sm:$0xff]  ;;  %v5517_v41 = vld [vmem:[%s14196_s28 + $0xb8] sm:$0xff] }
 0x61b   : > { %v5923_v21 = vsel %vm5795_vm1, %v5731_v55, %v5859_v30  ;;  %vm5825_vm2 = vcmp.ge.f32.partialorder %v5761_v3, 0.0  ;;  %vm5827_vm3 = vcmp.ge.f32.partialorder %v5763_v13, 0.0  ;;  %v5889_v4 = vmul.f32 0.2, %v5761_v3  ;;  %v5544_v55 = vld [vmem:[%s14196_s28 + $0x190] sm:$0xff] }
 0x61c   : > { %v5979_v34 = vpack.c.bf16 %v5923_v21, %v5921_v47  ;;  %v5891_v7 = vmul.f32 0.2, %v5763_v13  ;;  %v5728_v56 = vadd.f32 %v14235_v43, %v5660_v31  ;;  %v5730_v52 = vadd.f32 %v14235_v43, %v5662_v18  ;;  %v5549_v21 = vld [vmem:[%s14196_s28 + $0x1b8] sm:$0xff] }
 0x61d   : > { %v5953_v16 = vsel %vm5825_vm2, %v5761_v3, %v5889_v4  ;;  %v5760_v36 = vadd.f32 %v14235_v43, %v5692_v23  ;;  %v5762_v22 = vadd.f32 %v14235_v43, %v5694_v35  ;;  %v5665_v42 = vmul.f32 %v14207_v61, %v5511_v58  ;;  %v5547_v3 = vld [vmem:[%s14196_s28 + $0x1a8] sm:$0xff] }
 0x61e   : > { %6188 = vmatprep.mubr.bf16.mxu0 %v5979_v34  ;;  %v5955_v5 = vsel %vm5827_vm3, %v5763_v13, %v5891_v7  ;;  %vm5792_vm4 = vcmp.ge.f32.partialorder %v5728_v56, 0.0  ;;  %vm5794_vm5 = vcmp.ge.f32.partialorder %v5730_v52, 0.0  ;;  %v5856_v29 = vmul.f32 0.2, %v5728_v56 }
 0x61f   : > { %v5995_v8 = vpack.c.bf16 %v5955_v5, %v5953_v16  ;;  %v5858_v11 = vmul.f32 0.2, %v5730_v52  ;;  %vm5824_vm6 = vcmp.ge.f32.partialorder %v5760_v36, 0.0  ;;  %vm5826_vm7 = vcmp.ge.f32.partialorder %v5762_v22, 0.0 }
 0x620   : > { %v5920_v14 = vsel %vm5792_vm4, %v5728_v56, %v5856_v29  ;;  %v5888_v17 = vmul.f32 0.2, %v5760_v36  ;;  %v5890_v20 = vmul.f32 0.2, %v5762_v22  ;;  %v5667_v26 = vmul.f32 %v14207_v61, %v5513_v63  ;;  %v5514_v56 = vld [vmem:[%s14196_s28 + $0xa0] sm:$0xff]  ;;  %v5516_v29 = vld [vmem:[%s14196_s28 + $0xb0] sm:$0xff] }
 0x621   : > { %6252 = vmatprep.mubr.bf16.mxu1 %v5995_v8  ;;  %v5922_v32 = vsel %vm5794_vm5, %v5730_v52, %v5858_v11  ;;  %v5733_v9 = vadd.f32 %v14235_v43, %v5665_v42  ;;  %v5697_v38 = vmul.f32 %v14207_v61, %v5543_v60  ;;  %v5699_v44 = vmul.f32 %v14207_v61, %v5545_v2 }
 0x622   : > { %v5978_v51 = vpack.c.bf16 %v5922_v32, %v5920_v14  ;;  %v5952_v54 = vsel %vm5824_vm6, %v5760_v36, %v5888_v17  ;;  %v5954_v57 = vsel %vm5826_vm7, %v5762_v22, %v5890_v20  ;;  %v5735_v40 = vadd.f32 %v14235_v43, %v5667_v26  ;;  %v5546_v20 = vld [vmem:[%s14196_s28 + $0x1a0] sm:$0xff] }
 0x623   : > { %v5994_v6 = vpack.c.bf16 %v5954_v57, %v5952_v54  ;;  %vm5797_vm8 = vcmp.ge.f32.partialorder %v5733_v9, 0.0  ;;  %v5861_v10 = vmul.f32 0.2, %v5733_v9  ;;  %v5765_v15 = vadd.f32 %v14235_v43, %v5697_v38  ;;  %v5548_v38 = vld [vmem:[%s14196_s28 + $0x1b0] sm:$0xff] }
 0x624   : > { %6189 = vmatmul.mubr.bf16.gmra.mrb[12].mxu0 %v5978_v51  ;;  %vm5799_vm9 = vcmp.ge.f32.partialorder %v5735_v40, 0.0  ;;  %v5863_v19 = vmul.f32 0.2, %v5735_v40  ;;  %v5767_v24 = vadd.f32 %v14235_v43, %v5699_v44  ;;  %v5664_v28 = vmul.f32 %v14207_v61, %v5510_v48 }
 0x625   : > { %6253 = vmatmul.mubr.bf16.gmra.mrb[12].mxu1 %v5994_v6  ;;  %v5925_v37 = vsel %vm5797_vm8, %v5733_v9, %v5861_v10  ;;  %vm5829_vm10 = vcmp.ge.f32.partialorder %v5765_v15, 0.0  ;;  %v5893_v46 = vmul.f32 0.2, %v5765_v15  ;;  %v5666_v50 = vmul.f32 %v14207_v61, %v5512_v1  ;;  %v5519_v6 = vld [vmem:[%s14196_s28 + $0xc8] sm:$0xff]  ;;  %v5521_v10 = vld [vmem:[%s14196_s28 + $0xd8] sm:$0xff] }
 0x626   : > { %v5927_v39 = vsel %vm5799_vm9, %v5735_v40, %v5863_v19  ;;  %vm5831_vm11 = vcmp.ge.f32.partialorder %v5767_v24, 0.0  ;;  %v5895_v62 = vmul.f32 0.2, %v5767_v24  ;;  %v5732_v12 = vadd.f32 %v14235_v43, %v5664_v28  ;;  %v5551_v28 = vld [vmem:[%s14196_s28 + $0x1c8] sm:$0xff] }
 0x627   : > { %v5981_v25 = vpack.c.bf16 %v5927_v39, %v5925_v37  ;;  %v5957_v59 = vsel %vm5829_vm10, %v5765_v15, %v5893_v46  ;;  %v5734_v49 = vadd.f32 %v14235_v43, %v5666_v50  ;;  %v5696_v53 = vmul.f32 %v14207_v61, %v5542_v33 }
 0x628   : > { %v5959_v45 = vsel %vm5831_vm11, %v5767_v24, %v5895_v62  ;;  %vm5796_vm12 = vcmp.ge.f32.partialorder %v5732_v12, 0.0  ;;  %v5860_v27 = vmul.f32 0.2, %v5732_v12  ;;  %v5698_v30 = vmul.f32 %v14207_v61, %v5544_v55 }
 0x629   : > { %6196 = vmatprep.mubr.bf16.mxu0 %v5981_v25  ;;  %v5997_v13 = vpack.c.bf16 %v5959_v45, %v5957_v59  ;;  %vm5798_vm13 = vcmp.ge.f32.partialorder %v5734_v49, 0.0  ;;  %v5862_v31 = vmul.f32 0.2, %v5734_v49  ;;  %v5764_v47 = vadd.f32 %v14235_v43, %v5696_v53  ;;  %v5518_v53 = vld [vmem:[%s14196_s28 + $0xc0] sm:$0xff] }
 0x62a   : > { %v5924_v18 = vsel %vm5796_vm12, %v5732_v12, %v5860_v27  ;;  %v5766_v23 = vadd.f32 %v14235_v43, %v5698_v30  ;;  %v5669_v35 = vmul.f32 %v14207_v61, %v5515_v0  ;;  %v5671_v58 = vmul.f32 %v14207_v61, %v5517_v41  ;;  %v5553_v12 = vld [vmem:[%s14196_s28 + $0x1d8] sm:$0xff] }
 0x62b   : > { %6260 = vmatprep.mubr.bf16.mxu1 %v5997_v13  ;;  %v5926_v4 = vsel %vm5798_vm13, %v5734_v49, %v5862_v31  ;;  %vm5828_vm14 = vcmp.ge.f32.partialorder %v5764_v47, 0.0  ;;  %v5892_v34 = vmul.f32 0.2, %v5764_v47  ;;  %v5701_v7 = vmul.f32 %v14207_v61, %v5547_v3  ;;  %v5520_v31 = vld [vmem:[%s14196_s28 + $0xd0] sm:$0xff] }
 0x62c   : > { %v5980_v52 = vpack.c.bf16 %v5926_v4, %v5924_v18  ;;  %vm5830_vm15 = vcmp.ge.f32.partialorder %v5766_v23, 0.0  ;;  %v5894_v16 = vmul.f32 0.2, %v5766_v23  ;;  %v5737_v36 = vadd.f32 %v14235_v43, %v5669_v35  ;;  %v5550_v4 = vld [vmem:[%s14196_s28 + $0x1c0] sm:$0xff] }
 0x62d   : > { %v5956_v22 = vsel %vm5828_vm14, %v5764_v47, %v5892_v34  ;;  %v5739_v63 = vadd.f32 %v14235_v43, %v5671_v58  ;;  %v5703_v42 = vmul.f32 %v14207_v61, %v5549_v21  ;;  %v5769_v5 = vadd.f32 %v14235_v43, %v5701_v7 }
 0x62e   : > { %6197 = vmatmul.mubr.bf16.gmra.mrb[16].mxu0 %v5980_v52  ;;  %v5958_v60 = vsel %vm5830_vm15, %v5766_v23, %v5894_v16  ;;  %vm5801_vm0 = vcmp.ge.f32.partialorder %v5737_v36, 0.0  ;;  %v5865_v2 = vmul.f32 0.2, %v5737_v36  ;;  %v5668_v8 = vmul.f32 %v14207_v61, %v5514_v56  ;;  %v5552_v52 = vld [vmem:[%s14196_s28 + $0x1d0] sm:$0xff] }
 0x62f   : > { %v5996_v11 = vpack.c.bf16 %v5958_v60, %v5956_v22  ;;  %vm5803_vm1 = vcmp.ge.f32.partialorder %v5739_v63, 0.0  ;;  %v5867_v14 = vmul.f32 0.2, %v5739_v63  ;;  %v5771_v17 = vadd.f32 %v14235_v43, %v5703_v42  ;;  %v5523_v60 = vld [vmem:[%s14196_s28 + $0xe8] sm:$0xff] }
 0x630   : > { %v5929_v26 = vsel %vm5801_vm0, %v5737_v36, %v5865_v2  ;;  %vm5833_vm2 = vcmp.ge.f32.partialorder %v5769_v5, 0.0  ;;  %v5897_v32 = vmul.f32 0.2, %v5769_v5  ;;  %v5670_v9 = vmul.f32 %v14207_v61, %v5516_v29  ;;  %v5525_v2 = vld [vmem:[%s14196_s28 + $0xf8] sm:$0xff] }
 0x631   : > { %6261 = vmatmul.mubr.bf16.gmra.mrb[16].mxu1 %v5996_v11  ;;  %v5931_v44 = vsel %vm5803_vm1, %v5739_v63, %v5867_v14  ;;  %vm5835_vm3 = vcmp.ge.f32.partialorder %v5771_v17, 0.0  ;;  %v5899_v48 = vmul.f32 0.2, %v5771_v17  ;;  %v5736_v51 = vadd.f32 %v14235_v43, %v5668_v8 }
 0x632   : > { %v5983_v54 = vpack.c.bf16 %v5931_v44, %v5929_v26  ;;  %v5961_v57 = vsel %vm5833_vm2, %v5769_v5, %v5897_v32  ;;  %v5738_v40 = vadd.f32 %v14235_v43, %v5670_v9  ;;  %v5700_v1 = vmul.f32 %v14207_v61, %v5546_v20 }
 0x633   : > { %v5963_v15 = vsel %vm5835_vm3, %v5771_v17, %v5899_v48  ;;  %vm5800_vm4 = vcmp.ge.f32.partialorder %v5736_v51, 0.0  ;;  %v5864_v19 = vmul.f32 0.2, %v5736_v51  ;;  %v5702_v24 = vmul.f32 %v14207_v61, %v5548_v38  ;;  %v5555_v17 = vld [vmem:[%s14196_s28 + $0x1e8] sm:$0xff] }
 0x634   : > { %6204 = vmatprep.mubr.bf16.mxu0 %v5983_v54  ;;  %v5999_v33 = vpack.c.bf16 %v5963_v15, %v5961_v57  ;;  %vm5802_vm5 = vcmp.ge.f32.partialorder %v5738_v40, 0.0  ;;  %v5866_v37 = vmul.f32 0.2, %v5738_v40  ;;  %v5768_v46 = vadd.f32 %v14235_v43, %v5700_v1  ;;  %v5522_v1 = vld [vmem:[%s14196_s28 + $0xe0] sm:$0xff] }
 0x635   : > { %v5928_v50 = vsel %vm5800_vm4, %v5736_v51, %v5864_v19  ;;  %v5770_v55 = vadd.f32 %v14235_v43, %v5702_v24  ;;  %v5673_v39 = vmul.f32 %v14207_v61, %v5519_v6  ;;  %v5675_v62 = vmul.f32 %v14207_v61, %v5521_v10  ;;  %v5557_v51 = vld [vmem:[%s14196_s28 + $0x1f8] sm:$0xff] }
 0x636   : > { %6268 = vmatprep.mubr.bf16.mxu1 %v5999_v33  ;;  %v5930_v25 = vsel %vm5802_vm5, %v5738_v40, %v5866_v37  ;;  %vm5832_vm6 = vcmp.ge.f32.partialorder %v5768_v46, 0.0  ;;  %v5896_v59 = vmul.f32 0.2, %v5768_v46  ;;  %v5705_v49 = vmul.f32 %v14207_v61, %v5551_v28  ;;  %v5524_v37 = vld [vmem:[%s14196_s28 + $0xf0] sm:$0xff] }
 0x637   : > { %v5982_v0 = vpack.c.bf16 %v5930_v25, %v5928_v50  ;;  %vm5834_vm7 = vcmp.ge.f32.partialorder %v5770_v55, 0.0  ;;  %v5898_v41 = vmul.f32 0.2, %v5770_v55  ;;  %v5741_v45 = vadd.f32 %v14235_v43, %v5673_v39  ;;  %v5554_v25 = vld [vmem:[%s14196_s28 + $0x1e0] sm:$0xff] }
 0x638   : > { %v5960_v27 = vsel %vm5832_vm6, %v5768_v46, %v5896_v59  ;;  %v5743_v30 = vadd.f32 %v14235_v43, %v5675_v62  ;;  %v5707_v3 = vmul.f32 %v14207_v61, %v5553_v12  ;;  %v5773_v13 = vadd.f32 %v14235_v43, %v5705_v49 }
 0x639   : > { %6205 = vmatmul.mubr.bf16.gmra.mrb[20].mxu0 %v5982_v0  ;;  %v5962_v47 = vsel %vm5834_vm7, %v5770_v55, %v5898_v41  ;;  %vm5805_vm8 = vcmp.ge.f32.partialorder %v5741_v45, 0.0  ;;  %v5869_v18 = vmul.f32 0.2, %v5741_v45  ;;  %v5672_v23 = vmul.f32 %v14207_v61, %v5518_v53  ;;  %v5556_v0 = vld [vmem:[%s14196_s28 + $0x1f0] sm:$0xff] }
 0x63a   : > { %v5998_v35 = vpack.c.bf16 %v5962_v47, %v5960_v27  ;;  %vm5807_vm9 = vcmp.ge.f32.partialorder %v5743_v30, 0.0  ;;  %v5871_v58 = vmul.f32 0.2, %v5743_v30  ;;  %v5775_v21 = vadd.f32 %v14235_v43, %v5707_v3 }
 0x63b   : > { %v5933_v34 = vsel %vm5805_vm8, %v5741_v45, %v5869_v18  ;;  %vm5837_vm10 = vcmp.ge.f32.partialorder %v5773_v13, 0.0  ;;  %v5901_v7 = vmul.f32 0.2, %v5773_v13  ;;  %v5674_v56 = vmul.f32 %v14207_v61, %v5520_v31 }
 0x63c   : > { %6269 = vmatmul.mubr.bf16.gmra.mrb[20].mxu1 %v5998_v35  ;;  %v5935_v16 = vsel %vm5807_vm9, %v5743_v30, %v5871_v58  ;;  %vm5839_vm11 = vcmp.ge.f32.partialorder %v5775_v21, 0.0  ;;  %v5903_v36 = vmul.f32 0.2, %v5775_v21  ;;  %v5740_v22 = vadd.f32 %v14235_v43, %v5672_v23 }
 0x63d   : > { %v5985_v63 = vpack.c.bf16 %v5935_v16, %v5933_v34  ;;  %v5965_v42 = vsel %vm5837_vm10, %v5773_v13, %v5901_v7  ;;  %v5742_v5 = vadd.f32 %v14235_v43, %v5674_v56  ;;  %v5704_v29 = vmul.f32 %v14207_v61, %v5550_v4 }
 0x63e   : > { %v5967_v8 = vsel %vm5839_vm11, %v5775_v21, %v5903_v36  ;;  %vm5804_vm12 = vcmp.ge.f32.partialorder %v5740_v22, 0.0  ;;  %v5868_v11 = vmul.f32 0.2, %v5740_v22  ;;  %v5706_v14 = vmul.f32 %v14207_v61, %v5552_v52 }
 0x63f   : > { %6212 = vmatprep.mubr.bf16.mxu0 %v5985_v63  ;;  %v6001_v20 = vpack.c.bf16 %v5967_v8, %v5965_v42  ;;  %vm5806_vm13 = vcmp.ge.f32.partialorder %v5742_v5, 0.0  ;;  %v5870_v26 = vmul.f32 0.2, %v5742_v5  ;;  %v5772_v32 = vadd.f32 %v14235_v43, %v5704_v29 }
 0x640   : > { %v5932_v9 = vsel %vm5804_vm12, %v5740_v22, %v5868_v11  ;;  %v5774_v38 = vadd.f32 %v14235_v43, %v5706_v14  ;;  %v5677_v44 = vmul.f32 %v14207_v61, %v5523_v60  ;;  %v5679_v48 = vmul.f32 %v14207_v61, %v5525_v2 }
 0x641   : > { %6276 = vmatprep.mubr.bf16.mxu1 %v6001_v20  ;;  %v5934_v54 = vsel %vm5806_vm13, %v5742_v5, %v5870_v26  ;;  %vm5836_vm14 = vcmp.ge.f32.partialorder %v5772_v32, 0.0  ;;  %v5900_v57 = vmul.f32 0.2, %v5772_v32  ;;  %v5709_v40 = vmul.f32 %v14207_v61, %v5555_v17 }
 0x642   : > { %v5984_v6 = vpack.c.bf16 %v5934_v54, %v5932_v9  ;;  %vm5838_vm15 = vcmp.ge.f32.partialorder %v5774_v38, 0.0  ;;  %v5902_v10 = vmul.f32 0.2, %v5774_v38  ;;  %v5745_v15 = vadd.f32 %v14235_v43, %v5677_v44 }
 0x643   : > { %v5964_v19 = vsel %vm5836_vm14, %v5772_v32, %v5900_v57  ;;  %v5747_v24 = vadd.f32 %v14235_v43, %v5679_v48  ;;  %v5711_v28 = vmul.f32 %v14207_v61, %v5557_v51  ;;  %v5777_v33 = vadd.f32 %v14235_v43, %v5709_v40 }
 0x644   : > { %6213 = vmatmul.mubr.bf16.gmra.mrb[24].mxu0 %v5984_v6  ;;  %v5966_v46 = vsel %vm5838_vm15, %v5774_v38, %v5902_v10  ;;  %vm5809_vm0 = vcmp.ge.f32.partialorder %v5745_v15, 0.0  ;;  %v5873_v50 = vmul.f32 0.2, %v5745_v15  ;;  %v5676_v55 = vmul.f32 %v14207_v61, %v5522_v1 }
 0x645   : > { %v6000_v39 = vpack.c.bf16 %v5966_v46, %v5964_v19  ;;  %vm5811_vm1 = vcmp.ge.f32.partialorder %v5747_v24, 0.0  ;;  %v5875_v62 = vmul.f32 0.2, %v5747_v24  ;;  %v5779_v12 = vadd.f32 %v14235_v43, %v5711_v28 }
 0x646   : > { %v5937_v59 = vsel %vm5809_vm0, %v5745_v15, %v5873_v50  ;;  %vm5841_vm2 = vcmp.ge.f32.partialorder %v5777_v33, 0.0  ;;  %v5905_v49 = vmul.f32 0.2, %v5777_v33  ;;  %v5678_v53 = vmul.f32 %v14207_v61, %v5524_v37 }
 0x647   : > { %6277 = vmatmul.mubr.bf16.gmra.mrb[24].mxu1 %v6000_v39  ;;  %v5939_v41 = vsel %vm5811_vm1, %v5747_v24, %v5875_v62  ;;  %vm5843_vm3 = vcmp.ge.f32.partialorder %v5779_v12, 0.0  ;;  %v5907_v45 = vmul.f32 0.2, %v5779_v12  ;;  %v5744_v27 = vadd.f32 %v14235_v43, %v5676_v55 }
 0x648   : > { %v5987_v30 = vpack.c.bf16 %v5939_v41, %v5937_v59  ;;  %v5969_v3 = vsel %vm5841_vm2, %v5777_v33, %v5905_v49  ;;  %v5746_v13 = vadd.f32 %v14235_v43, %v5678_v53  ;;  %v5708_v31 = vmul.f32 %v14207_v61, %v5554_v25 }
 0x649   : > { %v5971_v47 = vsel %vm5843_vm3, %v5779_v12, %v5907_v45  ;;  %vm5808_vm4 = vcmp.ge.f32.partialorder %v5744_v27, 0.0  ;;  %v5872_v18 = vmul.f32 0.2, %v5744_v27  ;;  %v5710_v23 = vmul.f32 %v14207_v61, %v5556_v0 }
 0x64a   : > { %6220 = vmatprep.mubr.bf16.mxu0 %v5987_v30  ;;  %v6003_v35 = vpack.c.bf16 %v5971_v47, %v5969_v3  ;;  %vm5810_vm5 = vcmp.ge.f32.partialorder %v5746_v13, 0.0  ;;  %v5874_v58 = vmul.f32 0.2, %v5746_v13  ;;  %v5776_v21 = vadd.f32 %v14235_v43, %v5708_v31 }
 0x64b   : > { %v5936_v4 = vsel %vm5808_vm4, %v5744_v27, %v5872_v18  ;;  %v5778_v34 = vadd.f32 %v14235_v43, %v5710_v23 }
 0x64c   : > { %6284 = vmatprep.mubr.bf16.mxu1 %v6003_v35  ;;  %v5938_v7 = vsel %vm5810_vm5, %v5746_v13, %v5874_v58  ;;  %vm5840_vm6 = vcmp.ge.f32.partialorder %v5776_v21, 0.0  ;;  %v5904_v56 = vmul.f32 0.2, %v5776_v21 }
 0x64d   : > { %v5986_v52 = vpack.c.bf16 %v5938_v7, %v5936_v4  ;;  %vm5842_vm7 = vcmp.ge.f32.partialorder %v5778_v34, 0.0  ;;  %v5906_v16 = vmul.f32 0.2, %v5778_v34 }
 0x64e   : > { %v5968_v36 = vsel %vm5840_vm6, %v5776_v21, %v5904_v56 }
 0x64f   : > { %6221 = vmatmul.mubr.bf16.gmra.mrb[28].mxu0 %v5986_v52  ;;  %v5970_v22 = vsel %vm5842_vm7, %v5778_v34, %v5906_v16 }
 0x650   : > { %v6002_v61 = vpack.c.bf16 %v5970_v22, %v5968_v36 }
 0x652   : > { %6285 = vmatmul.mubr.bf16.gmra.mrb[28].mxu1 %v6002_v61 }
 0x6d8   : > { %v10397_v63 = vpop.f32.mrb[0].mxu0 }
 0x6d9   : > { %v10445_v42 = vpop.f32.mrb[0].mxu1  ;;  %v10398_v5 = vpop.f32.mrb[1].mxu0 }
 0x6da   : > { %v14411_v29 = vadd.f32 %v10398_v5, %v10397_v63  ;;  %v10446_v60 = vpop.f32.mrb[1].mxu1  ;;  %v10400_v2 = vpop.f32.mrb[2].mxu0 }
 0x6db   : > { %v14413_v43 = vadd.f32 %v10446_v60, %v10445_v42  ;;  %v10448_v8 = vpop.f32.mrb[2].mxu1  ;;  %v10401_v11 = vpop.f32.mrb[3].mxu0 }
 0x6dc   : > { %v14415_v14 = vadd.f32 %v10401_v11, %v10400_v2  ;;  %v10449_v17 = vpop.f32.mrb[3].mxu1 }
 0x6dd   : > { %v14417_v20 = vadd.f32 %v10449_v17, %v10448_v8 }
 0x6e1   : > { %v10403_v26 = vpop.f32.mrb[4].mxu0 }
 0x6e2   : > { %v10404_v32 = vpop.f32.mrb[5].mxu0 }
 0x6e3   : > { %v10451_v9 = vpop.f32.mrb[4].mxu1  ;;  %v14419_v38 = vadd.f32 %v10404_v32, %v10403_v26  ;;  %v10406_v44 = vpop.f32.mrb[6].mxu0 }
 0x6e4   : > { %v10452_v48 = vpop.f32.mrb[5].mxu1  ;;  %v10407_v51 = vpop.f32.mrb[7].mxu0 }
 0x6e5   : > { %v14421_v54 = vadd.f32 %v10452_v48, %v10451_v9  ;;  %v10454_v57 = vpop.f32.mrb[6].mxu1  ;;  %v14423_v40 = vadd.f32 %v10407_v51, %v10406_v44 }
 0x6e6   : > { %v10455_v1 = vpop.f32.mrb[7].mxu1 }
 0x6e7   : > { %v14425_v6 = vadd.f32 %v10455_v1, %v10454_v57 }
 0x6ec   : > { %v10409_v10 = vpop.f32.mrb[8].mxu0 }
 0x6ed   : > { %v10457_v15 = vpop.f32.mrb[8].mxu1  ;;  %v10410_v19 = vpop.f32.mrb[9].mxu0 }
 0x6ee   : > { %v14427_v24 = vadd.f32 %v10410_v19, %v10409_v10  ;;  %v10458_v28 = vpop.f32.mrb[9].mxu1  ;;  %v10412_v33 = vpop.f32.mrb[10].mxu0 }
 0x6ef   : > { %v14429_v37 = vadd.f32 %v10458_v28, %v10457_v15  ;;  %v10460_v46 = vpop.f32.mrb[10].mxu1  ;;  %v10413_v50 = vpop.f32.mrb[11].mxu0 }
 0x6f0   : > { %v14431_v55 = vadd.f32 %v10413_v50, %v10412_v33  ;;  %v10461_v39 = vpop.f32.mrb[11].mxu1 }
 0x6f1   : > { %v14433_v62 = vadd.f32 %v10461_v39, %v10460_v46 }
 0x6f7   : > { %v10415_v12 = vpop.f32.mrb[12].mxu0 }
 0x6f8   : > { %v10463_v25 = vpop.f32.mrb[12].mxu1  ;;  %v10416_v59 = vpop.f32.mrb[13].mxu0 }
 0x6f9   : > { %v14435_v49 = vadd.f32 %v10416_v59, %v10415_v12  ;;  %v10464_v53 = vpop.f32.mrb[13].mxu1  ;;  %v10418_v0 = vpop.f32.mrb[14].mxu0 }
 0x6fa   : > { %v14437_v41 = vadd.f32 %v10464_v53, %v10463_v25  ;;  %v10466_v45 = vpop.f32.mrb[14].mxu1  ;;  %v10419_v27 = vpop.f32.mrb[15].mxu0 }
 0x6fb   : > { %v14439_v30 = vadd.f32 %v10419_v27, %v10418_v0  ;;  %v10467_v3 = vpop.f32.mrb[15].mxu1 }
 0x6fc   : > { %v14441_v13 = vadd.f32 %v10467_v3, %v10466_v45 }
 0x701   : > { %v10421_v31 = vpop.f32.mrb[16].mxu0 }
 0x702   : > { %v10422_v47 = vpop.f32.mrb[17].mxu0 }
 0x703   : > { %v14443_v18 = vadd.f32 %v10422_v47, %v10421_v31  ;;  %v10424_v23 = vpop.f32.mrb[18].mxu0  ;;  %v12087_v31 = vmov (!%p10278_p13), 0.0  }
 0x704   : > { %v10469_v35 = vpop.f32.mrb[16].mxu1  ;;  %v10425_v58 = vpop.f32.mrb[19].mxu0  ;;  %6297 = vst [vmem:[#allocation4] sm:$0xff] (!%p10278_p13), %v12087_v31 }
 0x705   : > { %v10470_v21 = vpop.f32.mrb[17].mxu1  ;;  %v14445_v4 = vadd.f32 %v10425_v58, %v10424_v23 }
 0x706   : > { %v14447_v34 = vadd.f32 %v10470_v21, %v10469_v35  ;;  %v10472_v7 = vpop.f32.mrb[18].mxu1 }
 0x707   : > { %v10473_v56 = vpop.f32.mrb[19].mxu1 }
 0x708   : > { %v14449_v52 = vadd.f32 %v10473_v56, %v10472_v7 }
 0x70c   : > { %v10427_v16 = vpop.f32.mrb[20].mxu0 }
 0x70d   : > { %v10428_v36 = vpop.f32.mrb[21].mxu0 }
 0x70e   : > { %v14451_v22 = vadd.f32 %v10428_v36, %v10427_v16  ;;  %v10430_v61 = vpop.f32.mrb[22].mxu0 }
 0x70f   : > { %v10475_v63 = vpop.f32.mrb[20].mxu1  ;;  %v10431_v42 = vpop.f32.mrb[23].mxu0 }
 0x710   : > { %v10476_v5 = vpop.f32.mrb[21].mxu1  ;;  %v14453_v60 = vadd.f32 %v10431_v42, %v10430_v61 }
 0x711   : > { %v14455_v2 = vadd.f32 %v10476_v5, %v10475_v63  ;;  %v10478_v8 = vpop.f32.mrb[22].mxu1 }
 0x712   : > { %v10479_v11 = vpop.f32.mrb[23].mxu1 }
 0x713   : > { %v14457_v17 = vadd.f32 %v10479_v11, %v10478_v8 }
 0x717   : > { %v10433_v26 = vpop.f32.mrb[24].mxu0 }
 0x718   : > { %v10434_v32 = vpop.f32.mrb[25].mxu0 }
 0x719   : > { %v14459_v9 = vadd.f32 %v10434_v32, %v10433_v26  ;;  %v10436_v44 = vpop.f32.mrb[26].mxu0 }
 0x71a   : > { %v10481_v48 = vpop.f32.mrb[24].mxu1  ;;  %v10437_v51 = vpop.f32.mrb[27].mxu0 }
 0x71b   : > { %v10482_v57 = vpop.f32.mrb[25].mxu1  ;;  %v14461_v1 = vadd.f32 %v10437_v51, %v10436_v44 }
 0x71c   : > { %v14463_v10 = vadd.f32 %v10482_v57, %v10481_v48  ;;  %v10484_v15 = vpop.f32.mrb[26].mxu1 }
 0x71d   : > { %v10485_v19 = vpop.f32.mrb[27].mxu1 }
 0x71e   : > { %v14465_v28 = vadd.f32 %v10485_v19, %v10484_v15 }
 0x722   : > { %v10439_v33 = vpop.f32.mrb[28].mxu0 }
 0x723   : > { %v10440_v46 = vpop.f32.mrb[29].mxu0  ;;  %6296 = sbr.rel (%p10278_p13) target bundleno = 1834 (0x72a), region = 120 }
 0x724   : > { %v14467_v50 = vadd.f32 %v10440_v46, %v10439_v33  ;;  %v10442_v39 = vpop.f32.mrb[30].mxu0 }
 0x725   : > { %v10487_v12 = vpop.f32.mrb[28].mxu1  ;;  %v10443_v25 = vpop.f32.mrb[31].mxu0 }
 0x726   : > { %v10488_v59 = vpop.f32.mrb[29].mxu1  ;;  %v14469_v53 = vadd.f32 %v10443_v25, %v10442_v39 }
 0x727   : > { %v14471_v0 = vadd.f32 %v10488_v59, %v10487_v12  ;;  %v10490_v45 = vpop.f32.mrb[30].mxu1 }
 0x728   : > { %v10491_v27 = vpop.f32.mrb[31].mxu1 }
 0x729   : > { %v14473_v3 = vadd.f32 %v10491_v27, %v10490_v45 }
 0x72a PF: > { %v6298_v47 = vadd.f32 %v14415_v14, %v14411_v29  ;;  %v6335_v58 = vmul.f32 %v14411_v29, %v14411_v29  ;;  %v6336_v21 = vmul.f32 %v14415_v14, %v14415_v14  ;;  %v6337_v56 = vmul.f32 %v14419_v38, %v14419_v38  ;;  %s10373_s16 = sshll.u32 %s5489_s27, 5 }
 0x72b   : > { %v6338_v36 = vmul.f32 %v14423_v40, %v14423_v40  ;;  %v6339_v42 = vmul.f32 %v14427_v24, %v14427_v24  ;;  %v6340_v11 = vmul.f32 %v14431_v55, %v14431_v55  ;;  %v6341_v44 = vmul.f32 %v14435_v49, %v14435_v49  ;;  %s14576_s3 = scalar_lea.vmem [#allocation2], %s10373_s16 }
 0x72c   : > { %v6299_v23 = vadd.f32 %v14419_v38, %v6298_v47  ;;  %v6367_v61 = vadd.f32 %v6336_v21, %v6335_v58  ;;  %v6342_v57 = vmul.f32 %v14439_v30, %v14439_v30  ;;  %v6343_v33 = vmul.f32 %v14443_v18, %v14443_v18  ;;  %6440 = vst [vmem:[%s14576_s3] sm:$0xff] %v14411_v29 }
 0x72d   : > { %v6344_v12 = vmul.f32 %v14445_v4, %v14445_v4  ;;  %v6345_v45 = vmul.f32 %v14451_v22, %v14451_v22  ;;  %v6346_v47 = vmul.f32 %v14453_v60, %v14453_v60  ;;  %v6347_v58 = vmul.f32 %v14459_v9, %v14459_v9  ;;  %6441 = vst [vmem:[%s14576_s3 + $0x20] sm:$0xff] %v14415_v14 }
 0x72e   : > { %v6300_v35 = vadd.f32 %v14423_v40, %v6299_v23  ;;  %v6368_v5 = vadd.f32 %v6367_v61, %v6337_v56  ;;  %v6348_v56 = vmul.f32 %v14461_v1, %v14461_v1  ;;  %v6349_v61 = vmul.f32 %v14467_v50, %v14467_v50  ;;  %6442 = vst [vmem:[%s14576_s3 + $0x40] sm:$0xff] %v14419_v38 }
 0x72f   : > { %6443 = vst [vmem:[%s14576_s3 + $0x60] sm:$0xff] %v14423_v40  ;;  %6444 = vst [vmem:[%s14576_s3 + $0x80] sm:$0xff] %v14427_v24  ;;  %vm6432_vm8 = vcmask 253952  }
 0x730   : > { %v6301_v7 = vadd.f32 %v14427_v24, %v6300_v35  ;;  %v6369_v26 = vadd.f32 %v6368_v5, %v6338_v36  ;;  %v6350_v5 = vmul.f32 %v14469_v53, %v14469_v53  ;;  %6445 = vst [vmem:[%s14576_s3 + $0xa0] sm:$0xff] %v14431_v55  ;;  %6446 = vst [vmem:[%s14576_s3 + $0xc0] sm:$0xff] %v14435_v49 }
 0x731   : > { %6447 = vst [vmem:[%s14576_s3 + $0xe0] sm:$0xff] %v14439_v30  ;;  %6448 = vst [vmem:[%s14576_s3 + $0x100] sm:$0xff] %v14443_v18 }
 0x732   : > { %v6302_v16 = vadd.f32 %v14431_v55, %v6301_v7  ;;  %v6370_v48 = vadd.f32 %v6369_v26, %v6339_v42  ;;  %v6351_v26 = vmul.f32 %v14413_v43, %v14413_v43  ;;  %6449 = vst [vmem:[%s14576_s3 + $0x120] sm:$0xff] %v14445_v4  ;;  %6450 = vst [vmem:[%s14576_s3 + $0x140] sm:$0xff] %v14451_v22  ;;  %v6434_v55 = vld [vmem:[#allocation4 + $0x1] sm:$0x1] }
 0x733   : > { %6451 = vst [vmem:[%s14576_s3 + $0x160] sm:$0xff] %v14453_v60  ;;  %6452 = vst [vmem:[%s14576_s3 + $0x180] sm:$0xff] %v14459_v9 }
 0x734   : > { %v6303_v63 = vadd.f32 %v14435_v49, %v6302_v16  ;;  %v6371_v15 = vadd.f32 %v6370_v48, %v6340_v11  ;;  %v6352_v48 = vmul.f32 %v14417_v20, %v14417_v20  ;;  %6453 = vst [vmem:[%s14576_s3 + $0x1a0] sm:$0xff] %v14461_v1  ;;  %6454 = vst [vmem:[%s14576_s3 + $0x1c0] sm:$0xff] %v14467_v50  ;;  %v6430_v49 = vld [vmem:[#allocation4] sm:$0x1] }
 0x735   : > { %6455 = vst [vmem:[%s14576_s3 + $0x1e0] sm:$0xff] %v14469_v53  ;;  %6456 = vst [vmem:[%s14576_s3 + $0x200] sm:$0xff] %v14413_v43 }
 0x736   : > { %v6304_v8 = vadd.f32 %v14439_v30, %v6303_v63  ;;  %v6372_v46 = vadd.f32 %v6371_v15, %v6341_v44  ;;  %v6353_v15 = vmul.f32 %v14421_v54, %v14421_v54  ;;  %6457 = vst [vmem:[%s14576_s3 + $0x220] sm:$0xff] %v14417_v20  ;;  %6458 = vst [vmem:[%s14576_s3 + $0x240] sm:$0xff] %v14421_v54 }
 0x737   : > { %6459 = vst [vmem:[%s14576_s3 + $0x260] sm:$0xff] %v14425_v6  ;;  %6460 = vst [vmem:[%s14576_s3 + $0x280] sm:$0xff] %v14429_v37 }
 0x738   : > { %v6305_v32 = vadd.f32 %v14443_v18, %v6304_v8  ;;  %v6373_v25 = vadd.f32 %v6372_v46, %v6342_v57  ;;  %v6354_v46 = vmul.f32 %v14425_v6, %v14425_v6  ;;  %6461 = vst [vmem:[%s14576_s3 + $0x2a0] sm:$0xff] %v14433_v62  ;;  %6462 = vst [vmem:[%s14576_s3 + $0x2c0] sm:$0xff] %v14437_v41 }
 0x739   : > { %6463 = vst [vmem:[%s14576_s3 + $0x2e0] sm:$0xff] %v14441_v13  ;;  %6464 = vst [vmem:[%s14576_s3 + $0x300] sm:$0xff] %v14447_v34 }
 0x73a   : > { %v6306_v51 = vadd.f32 %v14445_v4, %v6305_v32  ;;  %v6374_v27 = vadd.f32 %v6373_v25, %v6343_v33  ;;  %v6355_v25 = vmul.f32 %v14429_v37, %v14429_v37  ;;  %6465 = vst [vmem:[%s14576_s3 + $0x320] sm:$0xff] %v14449_v52  ;;  %6466 = vst [vmem:[%s14576_s3 + $0x340] sm:$0xff] %v14455_v2 }
 0x73b   : > { %6467 = vst [vmem:[%s14576_s3 + $0x360] sm:$0xff] %v14457_v17  ;;  %6468 = vst [vmem:[%s14576_s3 + $0x380] sm:$0xff] %v14463_v10 }
 0x73c   : > { %v6307_v19 = vadd.f32 %v14451_v22, %v6306_v51  ;;  %v6375_v23 = vadd.f32 %v6374_v27, %v6344_v12  ;;  %v6356_v27 = vmul.f32 %v14433_v62, %v14433_v62  ;;  %6469 = vst [vmem:[%s14576_s3 + $0x3a0] sm:$0xff] %v14465_v28  ;;  %6470 = vst [vmem:[%s14576_s3 + $0x3c0] sm:$0xff] %v14471_v0 }
 0x73d   : > { %6471 = vst [vmem:[%s14576_s3 + $0x3e0] sm:$0xff] %v14473_v3 }
 0x73e   : > { %v6308_v39 = vadd.f32 %v14453_v60, %v6307_v19  ;;  %v6376_v21 = vadd.f32 %v6375_v23, %v6345_v45  ;;  %v6357_v23 = vmul.f32 %v14437_v41, %v14437_v41 }
 0x740   : > { %v6309_v59 = vadd.f32 %v14459_v9, %v6308_v39  ;;  %v6377_v16 = vadd.f32 %v6376_v21, %v6346_v47  ;;  %v6358_v21 = vmul.f32 %v14441_v13, %v14441_v13 }
 0x742   : > { %v6310_v31 = vadd.f32 %v14461_v1, %v6309_v59  ;;  %v6378_v63 = vadd.f32 %v6377_v16, %v6347_v58  ;;  %v6359_v16 = vmul.f32 %v14447_v34, %v14447_v34 }
 0x744   : > { %v6311_v35 = vadd.f32 %v14467_v50, %v6310_v31  ;;  %v6379_v8 = vadd.f32 %v6378_v63, %v6348_v56  ;;  %v6360_v63 = vmul.f32 %v14449_v52, %v14449_v52 }
 0x746   : > { %v6312_v7 = vadd.f32 %v14469_v53, %v6311_v35  ;;  %v6380_v32 = vadd.f32 %v6379_v8, %v6349_v61  ;;  %v6361_v8 = vmul.f32 %v14455_v2, %v14455_v2 }
 0x748   : > { %v6313_v36 = vadd.f32 %v14413_v43, %v6312_v7  ;;  %v6381_v51 = vadd.f32 %v6380_v32, %v6350_v5  ;;  %v6362_v32 = vmul.f32 %v14457_v17, %v14457_v17 }
 0x74a   : > { %v6314_v42 = vadd.f32 %v14417_v20, %v6313_v36  ;;  %v6382_v19 = vadd.f32 %v6381_v51, %v6351_v26  ;;  %v6363_v51 = vmul.f32 %v14463_v10, %v14463_v10 }
 0x74c   : > { %v6315_v11 = vadd.f32 %v14421_v54, %v6314_v42  ;;  %v6383_v39 = vadd.f32 %v6382_v19, %v6352_v48  ;;  %v6364_v19 = vmul.f32 %v14465_v28, %v14465_v28 }
 0x74e   : > { %v6316_v44 = vadd.f32 %v14425_v6, %v6315_v11  ;;  %v6384_v59 = vadd.f32 %v6383_v39, %v6353_v15  ;;  %v6365_v39 = vmul.f32 %v14471_v0, %v14471_v0 }
 0x750   : > { %v6317_v57 = vadd.f32 %v14429_v37, %v6316_v44  ;;  %v6385_v31 = vadd.f32 %v6384_v59, %v6354_v46  ;;  %v6366_v59 = vmul.f32 %v14473_v3, %v14473_v3 }
 0x752   : > { %v6318_v33 = vadd.f32 %v14433_v62, %v6317_v57  ;;  %v6386_v35 = vadd.f32 %v6385_v31, %v6355_v25 }
 0x754   : > { %v6319_v12 = vadd.f32 %v14437_v41, %v6318_v33  ;;  %v6387_v7 = vadd.f32 %v6386_v35, %v6356_v27 }
 0x756   : > { %v6320_v45 = vadd.f32 %v14441_v13, %v6319_v12  ;;  %v6388_v36 = vadd.f32 %v6387_v7, %v6357_v23 }
 0x758   : > { %v6321_v47 = vadd.f32 %v14447_v34, %v6320_v45  ;;  %v6389_v42 = vadd.f32 %v6388_v36, %v6358_v21 }
 0x75a   : > { %v6322_v58 = vadd.f32 %v14449_v52, %v6321_v47  ;;  %v6390_v11 = vadd.f32 %v6389_v42, %v6359_v16 }
 0x75c   : > { %v6323_v56 = vadd.f32 %v14455_v2, %v6322_v58  ;;  %v6391_v44 = vadd.f32 %v6390_v11, %v6360_v63 }
 0x75e   : > { %v6324_v61 = vadd.f32 %v14457_v17, %v6323_v56  ;;  %v6392_v57 = vadd.f32 %v6391_v44, %v6361_v8 }
 0x760   : > { %v6325_v5 = vadd.f32 %v14463_v10, %v6324_v61  ;;  %v6393_v33 = vadd.f32 %v6392_v57, %v6362_v32 }
 0x762   : > { %v6326_v26 = vadd.f32 %v14465_v28, %v6325_v5  ;;  %v6394_v12 = vadd.f32 %v6393_v33, %v6363_v51 }
 0x764   : > { %v6327_v48 = vadd.f32 %v14471_v0, %v6326_v26  ;;  %v6395_v45 = vadd.f32 %v6394_v12, %v6364_v19 }
 0x766   : > { %v6328_v15 = vadd.f32 %v14473_v3, %v6327_v48  ;;  %v6396_v31 = vadd.f32 %v6395_v45, %v6365_v39 }
 0x768   : > { %v6329_v46 = vrot.slane %v6328_v15, 4  ;;  %v6397_v23 = vadd.f32 %v6396_v31, %v6366_v59 }
 0x76a   : > { %v6330_v25 = vadd.f32 %v6329_v46, %v6328_v15  ;;  %v6398_v58 = vrot.slane %v6397_v23, 4 }
 0x76c   : > { %v6331_v27 = vrot.slane %v6330_v25, 2  ;;  %v6399_v7 = vadd.f32 %v6398_v58, %v6397_v23 }
 0x76e   : > { %v6332_v47 = vadd.f32 %v6331_v27, %v6330_v25  ;;  %v6400_v56 = vrot.slane %v6399_v7, 2 }
 0x770   : > { %v6333_v35 = vrot.slane %v6332_v47, 1  ;;  %v6401_v16 = vadd.f32 %v6400_v56, %v6399_v7 }
 0x772   : > { %v6334_v21 = vadd.f32 %v6333_v35, %v6332_v47  ;;  %v6402_v29 = vrot.slane %v6401_v16, 1 }
 0x774   : > { %6414 = vrot.lane.b32.xlu1 %v6334_v21, %s12083_s25  ;;  %6405 = vrot.lane.b32.xlu0 %v6334_v21, %s12085_s29  ;;  %v6403_v43 = vadd.f32 %v6402_v29, %v6401_v16 }
 0x778   : > { %6418 = vrot.lane.b32.xlu1 %v6403_v43, %s12083_s25  ;;  %6410 = vrot.lane.b32.xlu0 %v6403_v43, %s12085_s29 }
 0x77c   : > { %6426 = vrot.lane.b32.xlu1 %v6403_v43, %s12082_s0  ;;  %6422 = vrot.lane.b32.xlu0 %v6334_v21, %s12082_s0 }
 0x7e6   : > { %v6415_v14 = vpop.permute.xlu1 %6414  ;;  %v6406_v20 = vpop.permute.xlu0 %6405 }
 0x7e7   : > { %v6408_v38 = vadd.f32 %v6406_v20, %v6334_v21 }
 0x7e9   : > { %v6417_v37 = vadd.f32 %v6415_v14, %v6408_v38 }
 0x7ea   : > { %v6419_v54 = vpop.permute.xlu1 %6418  ;;  %v6411_v40 = vpop.permute.xlu0 %6410 }
 0x7eb   : > { %v6413_v6 = vadd.f32 %v6411_v40, %v6403_v43 }
 0x7ed   : > { %v6421_v24 = vadd.f32 %v6419_v54, %v6413_v6 }
 0x7ee   : > { %v6427_v62 = vpop.permute.xlu1 %6426  ;;  %v6423_v41 = vpop.permute.xlu0 %6422 }
 0x7ef   : > { %v6429_v30 = vadd.f32 %v6427_v62, %v6421_v24  ;;  %v6425_v13 = vadd.f32 %v6423_v41, %v6417_v37 }
 0x7f1   : > { %v6435_v18 = vadd.f32 %v6434_v55, %v6429_v30  ;;  %v6431_v4 = vadd.f32 %v6430_v49, %v6425_v13 }
 0x7f3   : > { %6436 = vst.msk [vmem:[#allocation4 + $0x1] sm:$0x1] %vm6432_vm8, %v6435_v18  ;;  %6433 = vst.msk [vmem:[#allocation4] sm:$0x1] %vm6432_vm8, %v6431_v4 }
 0x7f4 PF: > { %p10281_p0 = scmp.ne.s32.totalorder %s12058_s22, 3 }
 0x7f5   : > { %v11808_v17 = vld [vmem:[%s16611_s9] sm:$0xff] (!%p10281_p0)   ;;  %v11809_v9 = vld [vmem:[%s16611_s9 + $0x8] sm:$0xff] (!%p10281_p0)   ;;  %v11810_v10 = vld [vmem:[%s16611_s9 + $0x10] sm:$0xff] (!%p10281_p0)   ;;  %v6527_v50 = vlaneseq (!%p10281_p0)  ;;  %s12088_s21 = smov (!%p10281_p0), 32   ;;  %s12089_s27 = smov (!%p10281_p0), 96   ;;  %vm6540_vm9 = vcmask (!%p10281_p0), 261120  }
 0x7f6   : > { %6475 = sbr.rel (%p10281_p0) target bundleno = 2532 (0x9e4), region = 124  ;;  %10541 = vmatprep.subr.bf16.mxu0 (!%p10281_p0), %v11808_v17  ;;  %11101 = vmatprep.subr.bf16.mxu1 (!%p10281_p0), %v11808_v17  ;;  %v11811_v53 = vld [vmem:[%s16611_s9 + $0x18] sm:$0xff] (!%p10281_p0)   ;;  %v11812_v3 = vld [vmem:[%s16611_s9 + $0x20] sm:$0xff] (!%p10281_p0)   ;;  %v11813_v42 = vld [vmem:[%s16611_s9 + $0x28] sm:$0xff] (!%p10281_p0)   ;;  %s12090_s16 = smov (!%p10281_p0), 64   ;;  %vm6542_vm10 = vcmask (!%p10281_p0), 523264  }
 0x7f7   : > { %10542 = vmatpush3.bf16.msra.mxu0 (!%p10281_p0), %v11808_v17  ;;  %11109 = vmatpush3.bf16.msra.mxu1 (!%p10281_p0), %v11808_v17  ;;  %v6528_v0 = vshrl.u32 (!%p10281_p0), %v6527_v50, 7  ;;  %v6513_v36 = vld [vmem:[%s16609_s7] sm:$0x1] (!%p10281_p0)  ;;  %v11814_v32 = vld [vmem:[%s16611_s9 + $0x30] sm:$0xff] (!%p10281_p0)   ;;  %v11815_v51 = vld [vmem:[%s16611_s9 + $0x38] sm:$0xff] (!%p10281_p0)   ;;  %s6476_s3 = sshra.s32 (!%p10281_p0), %s12254_s26, 3 }
 0x7f8   : > { %10543 = vmatprep.subr.bf16.mxu0 (!%p10281_p0), %v11809_v9  ;;  %11102 = vmatprep.subr.bf16.mxu1 (!%p10281_p0), %v11809_v9  ;;  %v6514_v8 = vld [vmem:[%s16610_s8] sm:$0x1] (!%p10281_p0)  ;;  %s10374_s0 = sshll.u32 (!%p10281_p0), %s6476_s3, 5  ;;  %vm6544_vm11 = vcmask (!%p10281_p0), 785408   ;;  %p10292_p1 = scmp.ne.s32.totalorder (!%p10281_p0), %s12054_s1, 0 }
 0x7f9   : > { %v14665_v61 = vsub.s32 (!%p10281_p0), 0, %v6528_v0  ;;  %s14686_s25 = scalar_lea.vmem (!%p10281_p0), [#allocation2], %s10374_s0 }
 0x7fa   : > { %v6515_v34 = vld [vmem:[#allocation4] sm:$0x1] (!%p10281_p0)  ;;  %v6517_v52 = vld [vmem:[#allocation4 + $0x1] sm:$0x1] (!%p10281_p0) }
 0x7fb   : > { %v6516_v22 = vmul.f32 (!%p10281_p0), 0.00048828125, %v6515_v34  ;;  %v6518_v60 = vmul.f32 (!%p10281_p0), 0.00048828125, %v6517_v52  ;;  %10544 = vmatpush3.bf16.msra.mxu0 (!%p10281_p0), %v11809_v9  ;;  %11110 = vmatpush3.bf16.msra.mxu1 (!%p10281_p0), %v11809_v9  ;;  %v6481_v12 = vld [vmem:[%s14686_s25] sm:$0xff] (!%p10281_p0) }
 0x7fc   : > { %10545 = vmatprep.subr.bf16.mxu0 (!%p10281_p0), %v11810_v10  ;;  %11103 = vmatprep.subr.bf16.mxu1 (!%p10281_p0), %v11810_v10  ;;  %v6482_v59 = vld [vmem:[%s14686_s25 + $0x20] sm:$0xff] (!%p10281_p0) }
 0x7fd   : > { %v6519_v2 = vmul.f32 %v6516_v22, %v6516_v22  ;;  %v6497_v45 = vld [vmem:[%s14686_s25 + $0x200] sm:$0xff] }
 0x7fe   : > { %v6498_v27 = vld [vmem:[%s14686_s25 + $0x220] sm:$0xff] }
 0x7ff   : > { %v6520_v1 = vsub.f32 %v6518_v60, %v6519_v2  ;;  %10546 = vmatpush3.bf16.msra.mxu0 %v11810_v10  ;;  %11111 = vmatpush3.bf16.msra.mxu1 %v11810_v10  ;;  %v6483_v47 = vld [vmem:[%s14686_s25 + $0x40] sm:$0xff] }
 0x800   : > { %10547 = vmatprep.subr.bf16.mxu0 %v11811_v53  ;;  %11104 = vmatprep.subr.bf16.mxu1 %v11811_v53  ;;  %v6484_v23 = vld [vmem:[%s14686_s25 + $0x60] sm:$0xff] }
 0x801   : > { %v6521_v28 = vadd.f32 0.8, %v6520_v1  ;;  %v6499_v35 = vld [vmem:[%s14686_s25 + $0x240] sm:$0xff] }
 0x802   : > { %v6500_v56 = vld [vmem:[%s14686_s25 + $0x260] sm:$0xff] }
 0x803   : > { %11816 = vrsqrt.f32 %v6521_v28  ;;  %10548 = vmatpush3.bf16.msra.mxu0 %v11811_v53  ;;  %11112 = vmatpush3.bf16.msra.mxu1 %v11811_v53  ;;  %v6485_v16 = vld [vmem:[%s14686_s25 + $0x80] sm:$0xff] }
 0x804   : > { %10549 = vmatprep.subr.bf16.mxu0 %v11812_v3  ;;  %11105 = vmatprep.subr.bf16.mxu1 %v11812_v3  ;;  %v6486_v29 = vld [vmem:[%s14686_s25 + $0xa0] sm:$0xff] }
 0x805   : > { %v6501_v54 = vld [vmem:[%s14686_s25 + $0x280] sm:$0xff] }
 0x806   : > { %v6502_v40 = vld [vmem:[%s14686_s25 + $0x2a0] sm:$0xff] }
 0x807   : > { %10550 = vmatpush3.bf16.msra.mxu0 %v11812_v3  ;;  %11113 = vmatpush3.bf16.msra.mxu1 %v11812_v3  ;;  %v6487_v6 = vld [vmem:[%s14686_s25 + $0xc0] sm:$0xff] }
 0x808   : > { %10551 = vmatprep.subr.bf16.mxu0 %v11813_v42  ;;  %11106 = vmatprep.subr.bf16.mxu1 %v11813_v42 }
 0x80b   : > { %10552 = vmatpush3.bf16.msra.mxu0 %v11813_v42  ;;  %11114 = vmatpush3.bf16.msra.mxu1 %v11813_v42 }
 0x80c   : > { %10553 = vmatprep.subr.bf16.mxu0 %v11814_v32  ;;  %11107 = vmatprep.subr.bf16.mxu1 %v11814_v32 }
 0x80d   : > { %v11817_v63 = vpop.eup %11816 }
 0x80e   : > { %v6523_v5 = vmul.f32 %v11817_v63, %v6513_v36 }
 0x80f   : > { %10554 = vmatpush3.bf16.msra.mxu0 %v11814_v32  ;;  %11115 = vmatpush3.bf16.msra.mxu1 %v11814_v32 }
 0x810   : > { %v6530_v11 = vrot.slane %v6523_v5, %v14665_v61  ;;  %v6524_v26 = vmul.f32 %v6523_v5, %v6516_v22  ;;  %10555 = vmatprep.subr.bf16.mxu0 %v11815_v51  ;;  %11108 = vmatprep.subr.bf16.mxu1 %v11815_v51 }
 0x812   : > { %6531 = vrot.lane.b32.xlu0 %v6530_v11, %s12088_s21  ;;  %6537 = vrot.lane.b32.xlu1 %v6530_v11, %s12089_s27  ;;  %v6525_v44 = vsub.f32 %v6514_v8, %v6524_v26 }
 0x813   : > { %10556 = vmatpush3.bf16.msra.mxu0 %v11815_v51  ;;  %11116 = vmatpush3.bf16.msra.mxu1 %v11815_v51 }
 0x814   : > { %v6550_v48 = vrot.slane %v6525_v44, %v14665_v61 }
 0x816   : > { %6534 = vrot.lane.b32.xlu0 %v6530_v11, %s12090_s16  ;;  %6551 = vrot.lane.b32.xlu1 %v6550_v48, %s12088_s21 }
 0x81a   : > { %6554 = vrot.lane.b32.xlu0 %v6550_v48, %s12090_s16  ;;  %6557 = vrot.lane.b32.xlu1 %v6550_v48, %s12089_s27 }
 0x884   : > { %v6532_v57 = vpop.permute.xlu0 %6531  ;;  %v6538_v15 = vpop.permute.xlu1 %6537 }
 0x885   : > { %v6541_v19 = vsel %vm6540_vm9, %v6523_v5, %v6532_v57 }
 0x888   : > { %v6535_v33 = vpop.permute.xlu0 %6534  ;;  %v6552_v46 = vpop.permute.xlu1 %6551 }
 0x889   : > { %v6543_v39 = vsel %vm6542_vm10, %v6541_v19, %v6535_v33  ;;  %v6560_v58 = vsel %vm6540_vm9, %v6525_v44, %v6552_v46 }
 0x88a   : > { %v6545_v25 = vsel %vm6544_vm11, %v6543_v39, %v6538_v15 }
 0x88b   : > { %v14694_v31 = vrot.slane %v6545_v25, %v14665_v61  ;;  %v6488_v25 = vld [vmem:[%s14686_s25 + $0xe0] sm:$0xff] }
 0x88c   : > { %v6555_v21 = vpop.permute.xlu0 %6554  ;;  %v6558_v7 = vpop.permute.xlu1 %6557 }
 0x88d   : > { %v6561_v43 = vsel %vm6542_vm10, %v6560_v58, %v6555_v21  ;;  %v6567_v14 = vmul.f32 %v14694_v31, %v6481_v12  ;;  %v6568_v20 = vmul.f32 %v14694_v31, %v6482_v59  ;;  %v6583_v38 = vmul.f32 %v14694_v31, %v6497_v45 }
 0x88e   : > { %v6562_v24 = vsel %vm6544_vm11, %v6561_v43, %v6558_v7  ;;  %v6584_v37 = vmul.f32 %v14694_v31, %v6498_v27  ;;  %v6569_v55 = vmul.f32 %v14694_v31, %v6483_v47  ;;  %v6570_v62 = vmul.f32 %v14694_v31, %v6484_v23  ;;  %v6503_v47 = vld [vmem:[%s14686_s25 + $0x2c0] sm:$0xff] }
 0x88f   : > { %v14715_v49 = vrot.slane %v6562_v24, %v14665_v61  ;;  %v6585_v41 = vmul.f32 %v14694_v31, %v6499_v35  ;;  %v6586_v30 = vmul.f32 %v14694_v31, %v6500_v56  ;;  %v6571_v13 = vmul.f32 %v14694_v31, %v6485_v16  ;;  %v6504_v16 = vld [vmem:[%s14686_s25 + $0x2e0] sm:$0xff] }
 0x890   : > { %v6572_v18 = vmul.f32 %v14694_v31, %v6486_v29  ;;  %v6587_v4 = vmul.f32 %v14694_v31, %v6501_v54  ;;  %v6588_v34 = vmul.f32 %v14694_v31, %v6502_v40  ;;  %v6573_v52 = vmul.f32 %v14694_v31, %v6487_v6  ;;  %v6489_v29 = vld [vmem:[%s14686_s25 + $0x100] sm:$0xff] }
 0x891   : > { %v6603_v22 = vadd.f32 %v14715_v49, %v6567_v14  ;;  %v6604_v60 = vadd.f32 %v14715_v49, %v6568_v20  ;;  %v6619_v2 = vadd.f32 %v14715_v49, %v6583_v38  ;;  %v6620_v17 = vadd.f32 %v14715_v49, %v6584_v37  ;;  %v6490_v43 = vld [vmem:[%s14686_s25 + $0x120] sm:$0xff] }
 0x892   : > { %v6605_v9 = vadd.f32 %v14715_v49, %v6569_v55  ;;  %v6606_v1 = vadd.f32 %v14715_v49, %v6570_v62  ;;  %v6621_v10 = vadd.f32 %v14715_v49, %v6585_v41  ;;  %v6622_v28 = vadd.f32 %v14715_v49, %v6586_v30  ;;  %v6505_v40 = vld [vmem:[%s14686_s25 + $0x300] sm:$0xff] }
 0x893   : > { %vm6635_vm12 = vcmp.ge.f32.partialorder %v6603_v22, 0.0  ;;  %vm6636_vm13 = vcmp.ge.f32.partialorder %v6604_v60, 0.0  ;;  %v6667_v50 = vmul.f32 0.2, %v6603_v22  ;;  %v6668_v53 = vmul.f32 0.2, %v6604_v60 }
 0x894   : > { %vm6651_vm14 = vcmp.ge.f32.partialorder %v6619_v2, 0.0  ;;  %vm6652_vm15 = vcmp.ge.f32.partialorder %v6620_v17, 0.0  ;;  %v6683_v0 = vmul.f32 0.2, %v6619_v2  ;;  %v6684_v3 = vmul.f32 0.2, %v6620_v17 }
 0x895   : > { %v6699_v36 = vsel %vm6635_vm12, %v6603_v22, %v6667_v50  ;;  %v6700_v61 = vsel %vm6636_vm13, %v6604_v60, %v6668_v53  ;;  %vm6637_vm0 = vcmp.ge.f32.partialorder %v6605_v9, 0.0  ;;  %vm6638_vm1 = vcmp.ge.f32.partialorder %v6606_v1, 0.0  ;;  %v6491_v53 = vld [vmem:[%s14686_s25 + $0x140] sm:$0xff] }
 0x896   : > { %v6731_v63 = vpack.c.bf16 %v6700_v61, %v6699_v36  ;;  %v6715_v42 = vsel %vm6651_vm14, %v6619_v2, %v6683_v0  ;;  %v6716_v5 = vsel %vm6652_vm15, %v6620_v17, %v6684_v3  ;;  %v6669_v8 = vmul.f32 0.2, %v6605_v9 }
 0x897   : > { %v6739_v11 = vpack.c.bf16 %v6716_v5, %v6715_v42  ;;  %v6670_v26 = vmul.f32 0.2, %v6606_v1  ;;  %vm6653_vm2 = vcmp.ge.f32.partialorder %v6621_v10, 0.0  ;;  %vm6654_vm3 = vcmp.ge.f32.partialorder %v6622_v28, 0.0  ;;  %v6492_v42 = vld [vmem:[%s14686_s25 + $0x160] sm:$0xff] }
 0x898   : > { %10557 = vmatprep.mubr.bf16.mxu0 %v6731_v63  ;;  %v6701_v32 = vsel %vm6637_vm0, %v6605_v9, %v6669_v8  ;;  %v6685_v44 = vmul.f32 0.2, %v6621_v10  ;;  %v6686_v48 = vmul.f32 0.2, %v6622_v28  ;;  %v6607_v51 = vadd.f32 %v14715_v49, %v6571_v13  ;;  %v6506_v13 = vld [vmem:[%s14686_s25 + $0x320] sm:$0xff] }
 0x899   : > { %10573 = vmatprep.mubr.bf16.mxu1 %v6739_v11  ;;  %v6702_v57 = vsel %vm6638_vm1, %v6606_v1, %v6670_v26  ;;  %v6608_v15 = vadd.f32 %v14715_v49, %v6572_v18  ;;  %v6623_v19 = vadd.f32 %v14715_v49, %v6587_v4  ;;  %v6624_v33 = vadd.f32 %v14715_v49, %v6588_v34  ;;  %v6507_v5 = vld [vmem:[%s14686_s25 + $0x340] sm:$0xff] }
 0x89a   : > { %v6732_v46 = vpack.c.bf16 %v6702_v57, %v6701_v32  ;;  %v6717_v39 = vsel %vm6653_vm2, %v6621_v10, %v6685_v44  ;;  %v6718_v12 = vsel %vm6654_vm3, %v6622_v28, %v6686_v48  ;;  %vm6639_vm4 = vcmp.ge.f32.partialorder %v6607_v51, 0.0  ;;  %v6508_v8 = vld [vmem:[%s14686_s25 + $0x360] sm:$0xff] }
 0x89b   : > { %v6740_v59 = vpack.c.bf16 %v6718_v12, %v6717_v39  ;;  %vm6640_vm5 = vcmp.ge.f32.partialorder %v6608_v15, 0.0  ;;  %v6671_v45 = vmul.f32 0.2, %v6607_v51  ;;  %v6672_v27 = vmul.f32 0.2, %v6608_v15  ;;  %v6493_v48 = vld [vmem:[%s14686_s25 + $0x180] sm:$0xff] }
 0x89c   : > { %10558 = vmatmul.mubr.bf16.vlgmr.msra.gmra.mrb[0].mxu0 %v6732_v46  ;;  %vm6655_vm6 = vcmp.ge.f32.partialorder %v6623_v19, 0.0  ;;  %vm6656_vm7 = vcmp.ge.f32.partialorder %v6624_v33, 0.0  ;;  %v6687_v23 = vmul.f32 0.2, %v6623_v19  ;;  %v6688_v35 = vmul.f32 0.2, %v6624_v33 }
 0x89d   : > { %10574 = vmatmul.mubr.bf16.vlgmr.msra.gmra.mrb[0].mxu1 %v6740_v59  ;;  %v6703_v58 = vsel %vm6639_vm4, %v6607_v51, %v6671_v45  ;;  %v6704_v21 = vsel %vm6640_vm5, %v6608_v15, %v6672_v27  ;;  %v6574_v7 = vmul.f32 %v14694_v31, %v6488_v25  ;;  %v6609_v56 = vadd.f32 %v14715_v49, %v6573_v52  ;;  %v6494_v51 = vld [vmem:[%s14686_s25 + $0x1a0] sm:$0xff] }
 0x89e   : > { %v6733_v14 = vpack.c.bf16 %v6704_v21, %v6703_v58  ;;  %v6719_v20 = vsel %vm6655_vm6, %v6623_v19, %v6687_v23  ;;  %v6720_v38 = vsel %vm6656_vm7, %v6624_v33, %v6688_v35  ;;  %v6589_v54 = vmul.f32 %v14694_v31, %v6503_v47  ;;  %v6509_v57 = vld [vmem:[%s14686_s25 + $0x380] sm:$0xff] }
 0x89f   : > { %v6741_v6 = vpack.c.bf16 %v6720_v38, %v6719_v20  ;;  %v6610_v24 = vadd.f32 %v14715_v49, %v6574_v7  ;;  %vm6641_vm8 = vcmp.ge.f32.partialorder %v6609_v56, 0.0  ;;  %v6673_v37 = vmul.f32 0.2, %v6609_v56  ;;  %v6510_v47 = vld [vmem:[%s14686_s25 + $0x3a0] sm:$0xff] }
 0x8a0   : > { %10561 = vmatprep.mubr.bf16.mxu0 %v6733_v14  ;;  %v6590_v55 = vmul.f32 %v14694_v31, %v6504_v16  ;;  %v6625_v62 = vadd.f32 %v14715_v49, %v6589_v54  ;;  %v6575_v41 = vmul.f32 %v14694_v31, %v6489_v29  ;;  %v6576_v30 = vmul.f32 %v14694_v31, %v6490_v43  ;;  %v6495_v38 = vld [vmem:[%s14686_s25 + $0x1c0] sm:$0xff] }
 0x8a1   : > { %10577 = vmatprep.mubr.bf16.mxu1 %v6741_v6  ;;  %vm6642_vm9 = vcmp.ge.f32.partialorder %v6610_v24, 0.0  ;;  %v6674_v18 = vmul.f32 0.2, %v6610_v24  ;;  %v6705_v4 = vsel %vm6641_vm8, %v6609_v56, %v6673_v37  ;;  %v6591_v34 = vmul.f32 %v14694_v31, %v6505_v40  ;;  %v6496_v37 = vld [vmem:[%s14686_s25 + $0x1e0] sm:$0xff] }
 0x8a2   : > { %v6626_v52 = vadd.f32 %v14715_v49, %v6590_v55  ;;  %vm6657_vm10 = vcmp.ge.f32.partialorder %v6625_v62, 0.0  ;;  %v6689_v22 = vmul.f32 0.2, %v6625_v62  ;;  %v6611_v60 = vadd.f32 %v14715_v49, %v6575_v41  ;;  %v6511_v55 = vld [vmem:[%s14686_s25 + $0x3c0] sm:$0xff] }
 0x8a3   : > { %v6706_v2 = vsel %vm6642_vm9, %v6610_v24, %v6674_v18  ;;  %v6612_v17 = vadd.f32 %v14715_v49, %v6576_v30  ;;  %v6592_v9 = vmul.f32 %v14694_v31, %v6506_v13  ;;  %v6627_v1 = vadd.f32 %v14715_v49, %v6591_v34 }
 0x8a4   : > { %v6734_v10 = vpack.c.bf16 %v6706_v2, %v6705_v4  ;;  %vm6658_vm11 = vcmp.ge.f32.partialorder %v6626_v52, 0.0  ;;  %v6690_v28 = vmul.f32 0.2, %v6626_v52  ;;  %v6721_v50 = vsel %vm6657_vm10, %v6625_v62, %v6689_v22 }
 0x8a5   : > { %vm6643_vm12 = vcmp.ge.f32.partialorder %v6611_v60, 0.0  ;;  %vm6644_vm13 = vcmp.ge.f32.partialorder %v6612_v17, 0.0  ;;  %v6675_v0 = vmul.f32 0.2, %v6611_v60  ;;  %v6676_v3 = vmul.f32 0.2, %v6612_v17 }
 0x8a6   : > { %10562 = vmatmul.mubr.bf16.gmra.mrb[4].mxu0 %v6734_v10  ;;  %v6722_v36 = vsel %vm6658_vm11, %v6626_v52, %v6690_v28  ;;  %v6628_v61 = vadd.f32 %v14715_v49, %v6592_v9  ;;  %vm6659_vm14 = vcmp.ge.f32.partialorder %v6627_v1, 0.0  ;;  %v6691_v63 = vmul.f32 0.2, %v6627_v1 }
 0x8a7   : > { %v6742_v11 = vpack.c.bf16 %v6722_v36, %v6721_v50  ;;  %v6707_v26 = vsel %vm6643_vm12, %v6611_v60, %v6675_v0  ;;  %v6708_v32 = vsel %vm6644_vm13, %v6612_v17, %v6676_v3  ;;  %v6577_v44 = vmul.f32 %v14694_v31, %v6491_v53  ;;  %v6512_v17 = vld [vmem:[%s14686_s25 + $0x3e0] sm:$0xff] }
 0x8a8   : > { %v6735_v15 = vpack.c.bf16 %v6708_v32, %v6707_v26  ;;  %vm6660_vm15 = vcmp.ge.f32.partialorder %v6628_v61, 0.0  ;;  %v6692_v19 = vmul.f32 0.2, %v6628_v61  ;;  %v6723_v33 = vsel %vm6659_vm14, %v6627_v1, %v6691_v63 }
 0x8a9   : > { %10578 = vmatmul.mubr.bf16.gmra.mrb[4].mxu1 %v6742_v11  ;;  %v6578_v46 = vmul.f32 %v14694_v31, %v6492_v42  ;;  %v6613_v39 = vadd.f32 %v14715_v49, %v6577_v44  ;;  %v6593_v12 = vmul.f32 %v14694_v31, %v6507_v5  ;;  %v6594_v25 = vmul.f32 %v14694_v31, %v6508_v8 }
 0x8aa   : > { %10565 = vmatprep.mubr.bf16.mxu0 %v6735_v15  ;;  %v6724_v59 = vsel %vm6660_vm15, %v6628_v61, %v6692_v19  ;;  %v6579_v45 = vmul.f32 %v14694_v31, %v6493_v48  ;;  %v6580_v27 = vmul.f32 %v14694_v31, %v6494_v51  ;;  %v6595_v23 = vmul.f32 %v14694_v31, %v6509_v57 }
 0x8ab   : > { %v6743_v35 = vpack.c.bf16 %v6724_v59, %v6723_v33  ;;  %v6614_v58 = vadd.f32 %v14715_v49, %v6578_v46  ;;  %vm6645_vm0 = vcmp.ge.f32.partialorder %v6613_v39, 0.0  ;;  %v6677_v21 = vmul.f32 0.2, %v6613_v39 }
 0x8ac   : > { %v6629_v7 = vadd.f32 %v14715_v49, %v6593_v12  ;;  %v6630_v56 = vadd.f32 %v14715_v49, %v6594_v25  ;;  %v6615_v16 = vadd.f32 %v14715_v49, %v6579_v45  ;;  %v6616_v29 = vadd.f32 %v14715_v49, %v6580_v27 }
 0x8ad   : > { %10581 = vmatprep.mubr.bf16.mxu1 %v6743_v35  ;;  %vm6646_vm1 = vcmp.ge.f32.partialorder %v6614_v58, 0.0  ;;  %v6678_v43 = vmul.f32 0.2, %v6614_v58  ;;  %v6709_v14 = vsel %vm6645_vm0, %v6613_v39, %v6677_v21  ;;  %v6596_v20 = vmul.f32 %v14694_v31, %v6510_v47 }
 0x8ae   : > { %vm6661_vm2 = vcmp.ge.f32.partialorder %v6629_v7, 0.0  ;;  %vm6662_vm3 = vcmp.ge.f32.partialorder %v6630_v56, 0.0  ;;  %v6693_v54 = vmul.f32 0.2, %v6629_v7  ;;  %v6694_v40 = vmul.f32 0.2, %v6630_v56 }
 0x8af   : > { %v6710_v6 = vsel %vm6646_vm1, %v6614_v58, %v6678_v43  ;;  %vm6647_vm4 = vcmp.ge.f32.partialorder %v6615_v16, 0.0  ;;  %vm6648_vm5 = vcmp.ge.f32.partialorder %v6616_v29, 0.0  ;;  %v6679_v24 = vmul.f32 0.2, %v6615_v16 }
 0x8b0   : > { %v6736_v62 = vpack.c.bf16 %v6710_v6, %v6709_v14  ;;  %v6725_v41 = vsel %vm6661_vm2, %v6629_v7, %v6693_v54  ;;  %v6726_v30 = vsel %vm6662_vm3, %v6630_v56, %v6694_v40  ;;  %v6680_v13 = vmul.f32 0.2, %v6616_v29 }
 0x8b1   : > { %v6744_v18 = vpack.c.bf16 %v6726_v30, %v6725_v41  ;;  %v6711_v4 = vsel %vm6647_vm4, %v6615_v16, %v6679_v24  ;;  %v6631_v34 = vadd.f32 %v14715_v49, %v6595_v23  ;;  %v6632_v52 = vadd.f32 %v14715_v49, %v6596_v20 }
 0x8b2   : > { %10566 = vmatmul.mubr.bf16.gmra.mrb[8].mxu0 %v6736_v62  ;;  %v6712_v22 = vsel %vm6648_vm5, %v6616_v29, %v6680_v13  ;;  %v6581_v60 = vmul.f32 %v14694_v31, %v6495_v38  ;;  %v6582_v2 = vmul.f32 %v14694_v31, %v6496_v37  ;;  %v6597_v9 = vmul.f32 %v14694_v31, %v6511_v55 }
 0x8b3   : > { %10582 = vmatmul.mubr.bf16.gmra.mrb[8].mxu1 %v6744_v18  ;;  %v6737_v1 = vpack.c.bf16 %v6712_v22, %v6711_v4  ;;  %vm6663_vm6 = vcmp.ge.f32.partialorder %v6631_v34, 0.0  ;;  %vm6664_vm7 = vcmp.ge.f32.partialorder %v6632_v52, 0.0  ;;  %v6695_v10 = vmul.f32 0.2, %v6631_v34 }
 0x8b4   : > { %v6696_v28 = vmul.f32 0.2, %v6632_v52  ;;  %v6617_v50 = vadd.f32 %v14715_v49, %v6581_v60  ;;  %v6618_v53 = vadd.f32 %v14715_v49, %v6582_v2  ;;  %v6598_v3 = vmul.f32 %v14694_v31, %v6512_v17 }
 0x8b5   : > { %10569 = vmatprep.mubr.bf16.mxu0 %v6737_v1  ;;  %v6727_v0 = vsel %vm6663_vm6, %v6631_v34, %v6695_v10  ;;  %v6633_v36 = vadd.f32 %v14715_v49, %v6597_v9  ;;  %v12091_v30 = vmov (!%p10292_p1), 0.0  }
 0x8b6   : > { %v6728_v61 = vsel %vm6664_vm7, %v6632_v52, %v6696_v28  ;;  %vm6649_vm8 = vcmp.ge.f32.partialorder %v6617_v50, 0.0  ;;  %vm6650_vm9 = vcmp.ge.f32.partialorder %v6618_v53, 0.0  ;;  %v6681_v63 = vmul.f32 0.2, %v6617_v50  ;;  %6976 = vst [vmem:[#allocation5] sm:$0xff] (!%p10292_p1), %v12091_v30 }
 0x8b7   : > { %v6745_v42 = vpack.c.bf16 %v6728_v61, %v6727_v0  ;;  %v6682_v5 = vmul.f32 0.2, %v6618_v53  ;;  %v6634_v8 = vadd.f32 %v14715_v49, %v6598_v3  ;;  %vm6665_vm10 = vcmp.ge.f32.partialorder %v6633_v36, 0.0 }
 0x8b8   : > { %v6713_v11 = vsel %vm6649_vm8, %v6617_v50, %v6681_v63  ;;  %v6697_v26 = vmul.f32 0.2, %v6633_v36 }
 0x8b9   : > { %10585 = vmatprep.mubr.bf16.mxu1 %v6745_v42  ;;  %v6714_v32 = vsel %vm6650_vm9, %v6618_v53, %v6682_v5  ;;  %vm6666_vm11 = vcmp.ge.f32.partialorder %v6634_v8, 0.0  ;;  %v6698_v44 = vmul.f32 0.2, %v6634_v8 }
 0x8ba   : > { %v6738_v48 = vpack.c.bf16 %v6714_v32, %v6713_v11  ;;  %v6729_v51 = vsel %vm6665_vm10, %v6633_v36, %v6697_v26 }
 0x8bb   : > { %v6730_v31 = vsel %vm6666_vm11, %v6634_v8, %v6698_v44 }
 0x8bc   : > { %10570 = vmatmul.mubr.bf16.gmra.mrb[12].mxu0 %v6738_v48  ;;  %v6746_v57 = vpack.c.bf16 %v6730_v31, %v6729_v51 }
 0x8be   : > { %10586 = vmatmul.mubr.bf16.gmra.mrb[12].mxu1 %v6746_v57 }
 0x96f   : > { %v14794_v15 = vpop.f32.mrb[0].mxu0 }
 0x970   : > { %v14796_v19 = vpop.f32.mrb[0].mxu1  ;;  %v14798_v33 = vpop.f32.mrb[1].mxu0 }
 0x971   : > { %v14800_v49 = vpop.f32.mrb[1].mxu1  ;;  %v14802_v46 = vpop.f32.mrb[2].mxu0 }
 0x972   : > { %v14804_v39 = vpop.f32.mrb[2].mxu1  ;;  %v14806_v12 = vpop.f32.mrb[3].mxu0 }
 0x973   : > { %v14808_v25 = vpop.f32.mrb[3].mxu1 }
 0x979   : > { %v14810_v59 = vpop.f32.mrb[4].mxu0 }
 0x97a   : > { %v14812_v45 = vpop.f32.mrb[5].mxu0 }
 0x97b   : > { %v14814_v27 = vpop.f32.mrb[6].mxu0 }
 0x97c   : > { %v14816_v47 = vpop.f32.mrb[4].mxu1  ;;  %v14818_v23 = vpop.f32.mrb[7].mxu0 }
 0x97d   : > { %v14820_v35 = vpop.f32.mrb[5].mxu1 }
 0x97e   : > { %v14822_v58 = vpop.f32.mrb[6].mxu1 }
 0x97f   : > { %v14824_v21 = vpop.f32.mrb[7].mxu1 }
 0x985   : > { %v14826_v7 = vpop.f32.mrb[8].mxu0 }
 0x986   : > { %v14828_v56 = vpop.f32.mrb[8].mxu1  ;;  %v14830_v16 = vpop.f32.mrb[9].mxu0 }
 0x987   : > { %v14832_v29 = vpop.f32.mrb[9].mxu1  ;;  %v14834_v43 = vpop.f32.mrb[10].mxu0 }
 0x988   : > { %v14836_v14 = vpop.f32.mrb[10].mxu1  ;;  %v14838_v20 = vpop.f32.mrb[11].mxu0 }
 0x989   : > { %v14840_v38 = vpop.f32.mrb[11].mxu1 }
 0x98e   : > { %6975 = sbr.rel (%p10292_p1) target bundleno = 2453 (0x995), region = 128 }
 0x98f   : > { %v14842_v54 = vpop.f32.mrb[12].mxu0 }
 0x990   : > { %v14844_v40 = vpop.f32.mrb[13].mxu0 }
 0x991   : > { %v14846_v6 = vpop.f32.mrb[12].mxu1  ;;  %v14848_v24 = vpop.f32.mrb[14].mxu0 }
 0x992   : > { %v14850_v37 = vpop.f32.mrb[13].mxu1  ;;  %v14852_v55 = vpop.f32.mrb[15].mxu0 }
 0x993   : > { %v14854_v62 = vpop.f32.mrb[14].mxu1 }
 0x994   : > { %v14856_v41 = vpop.f32.mrb[15].mxu1 }
 0x995 PF: > { %v6977_v13 = vadd.f32 %v14806_v12, %v14798_v33  ;;  %s10375_s24 = sshll.u32 %s6476_s3, 4  ;;  %v7014_v34 = vmul.f32 %v14798_v33, %v14798_v33  ;;  %v7015_v52 = vmul.f32 %v14806_v12, %v14806_v12  ;;  %v7016_v60 = vmul.f32 %v14794_v15, %v14794_v15 }
 0x996   : > { %s14864_s29 = scalar_lea.vmem [#allocation3], %s10375_s24  ;;  %v7017_v17 = vmul.f32 %v14802_v46, %v14802_v46  ;;  %v7018_v10 = vmul.f32 %v14812_v45, %v14812_v45  ;;  %v7019_v53 = vmul.f32 %v14818_v23, %v14818_v23  ;;  %v7020_v36 = vmul.f32 %v14810_v59, %v14810_v59 }
 0x997   : > { %v6978_v18 = vadd.f32 %v14794_v15, %v6977_v13  ;;  %7092 = vst [vmem:[%s14864_s29] sm:$0xff] %v14798_v33  ;;  %7093 = vst [vmem:[%s14864_s29 + $0x10] sm:$0xff] %v14806_v12  ;;  %v7046_v9 = vadd.f32 %v7015_v52, %v7014_v34  ;;  %v7021_v42 = vmul.f32 %v14814_v27, %v14814_v27 }
 0x998   : > { %7094 = vst [vmem:[%s14864_s29 + $0x20] sm:$0xff] %v14794_v15  ;;  %7095 = vst [vmem:[%s14864_s29 + $0x30] sm:$0xff] %v14802_v46  ;;  %v7022_v11 = vmul.f32 %v14830_v16, %v14830_v16  ;;  %v7023_v44 = vmul.f32 %v14838_v20, %v14838_v20  ;;  %v7024_v31 = vmul.f32 %v14826_v7, %v14826_v7 }
 0x999   : > { %7096 = vst [vmem:[%s14864_s29 + $0x40] sm:$0xff] %v14812_v45  ;;  %7097 = vst [vmem:[%s14864_s29 + $0x50] sm:$0xff] %v14818_v23  ;;  %v6979_v4 = vadd.f32 %v14802_v46, %v6978_v18  ;;  %v7047_v28 = vadd.f32 %v7046_v9, %v7016_v60  ;;  %v7025_v33 = vmul.f32 %v14834_v43, %v14834_v43 }
 0x99a   : > { %7098 = vst [vmem:[%s14864_s29 + $0x60] sm:$0xff] %v14810_v59  ;;  %7099 = vst [vmem:[%s14864_s29 + $0x70] sm:$0xff] %v14814_v27  ;;  %v7029_v13 = vmul.f32 %v14848_v24, %v14848_v24  ;;  %v7031_v52 = vmul.f32 %v14808_v25, %v14808_v25  ;;  %v7032_v60 = vmul.f32 %v14796_v19, %v14796_v19 }
 0x99b   : > { %7100 = vst [vmem:[%s14864_s29 + $0x80] sm:$0xff] %v14830_v16  ;;  %7101 = vst [vmem:[%s14864_s29 + $0x90] sm:$0xff] %v14838_v20  ;;  %v6980_v22 = vadd.f32 %v6979_v4, %v14812_v45  ;;  %v7048_v0 = vadd.f32 %v7047_v28, %v7017_v17  ;;  %v7030_v4 = vmul.f32 %v14800_v49, %v14800_v49 }
 0x99c   : > { %7102 = vst [vmem:[%s14864_s29 + $0xa0] sm:$0xff] %v14826_v7  ;;  %7103 = vst [vmem:[%s14864_s29 + $0xb0] sm:$0xff] %v14834_v43  ;;  %v7033_v17 = vmul.f32 %v14804_v39, %v14804_v39  ;;  %v7035_v28 = vmul.f32 %v14824_v21, %v14824_v21 }
 0x99d   : > { %7104 = vst [vmem:[%s14864_s29 + $0xc0] sm:$0xff] %v14844_v40  ;;  %7105 = vst [vmem:[%s14864_s29 + $0xd0] sm:$0xff] %v14852_v55  ;;  %v6981_v2 = vadd.f32 %v6980_v22, %v14818_v23  ;;  %v7049_v61 = vadd.f32 %v7048_v0, %v7018_v10  ;;  %v7027_v23 = vmul.f32 %v14852_v55, %v14852_v55 }
 0x99e   : > { %7106 = vst [vmem:[%s14864_s29 + $0xe0] sm:$0xff] %v14842_v54  ;;  %7107 = vst [vmem:[%s14864_s29 + $0xf0] sm:$0xff] %v14848_v24 }
 0x99f   : > { %7108 = vst [vmem:[%s14864_s29 + $0x100] sm:$0xff] %v14800_v49  ;;  %7109 = vst [vmem:[%s14864_s29 + $0x110] sm:$0xff] %v14808_v25  ;;  %v6982_v1 = vadd.f32 %v14810_v59, %v6981_v2  ;;  %v7050_v5 = vadd.f32 %v7049_v61, %v7019_v53  ;;  %v7026_v59 = vmul.f32 %v14844_v40, %v14844_v40 }
 0x9a0   : > { %7110 = vst [vmem:[%s14864_s29 + $0x120] sm:$0xff] %v14796_v19  ;;  %7111 = vst [vmem:[%s14864_s29 + $0x130] sm:$0xff] %v14804_v39  ;;  %v7036_v53 = vmul.f32 %v14816_v47, %v14816_v47  ;;  %v7038_v61 = vmul.f32 %v14832_v29, %v14832_v29 }
 0x9a1   : > { %7112 = vst [vmem:[%s14864_s29 + $0x140] sm:$0xff] %v14820_v35  ;;  %7113 = vst [vmem:[%s14864_s29 + $0x150] sm:$0xff] %v14824_v21  ;;  %v6983_v50 = vadd.f32 %v14814_v27, %v6982_v1  ;;  %v7051_v26 = vadd.f32 %v7050_v5, %v7020_v36  ;;  %v7034_v1 = vmul.f32 %v14820_v35, %v14820_v35 }
 0x9a2   : > { %7114 = vst [vmem:[%s14864_s29 + $0x160] sm:$0xff] %v14816_v47  ;;  %7115 = vst [vmem:[%s14864_s29 + $0x170] sm:$0xff] %v14822_v58 }
 0x9a3   : > { %7116 = vst [vmem:[%s14864_s29 + $0x180] sm:$0xff] %v14832_v29  ;;  %7117 = vst [vmem:[%s14864_s29 + $0x190] sm:$0xff] %v14840_v38  ;;  %v6984_v3 = vadd.f32 %v6983_v50, %v14830_v16  ;;  %v7052_v48 = vadd.f32 %v7051_v26, %v7021_v42  ;;  %v7039_v42 = vmul.f32 %v14840_v38, %v14840_v38 }
 0x9a4   : > { %7118 = vst [vmem:[%s14864_s29 + $0x1a0] sm:$0xff] %v14828_v56  ;;  %7119 = vst [vmem:[%s14864_s29 + $0x1b0] sm:$0xff] %v14836_v14  ;;  %v7041_v26 = vmul.f32 %v14836_v14, %v14836_v14 }
 0x9a5   : > { %7120 = vst [vmem:[%s14864_s29 + $0x1c0] sm:$0xff] %v14850_v37  ;;  %7121 = vst [vmem:[%s14864_s29 + $0x1d0] sm:$0xff] %v14856_v41  ;;  %v6985_v63 = vadd.f32 %v6984_v3, %v14838_v20  ;;  %v7053_v57 = vadd.f32 %v7052_v48, %v7022_v11  ;;  %v7028_v20 = vmul.f32 %v14842_v54, %v14842_v54 }
 0x9a6   : > { %7122 = vst [vmem:[%s14864_s29 + $0x1e0] sm:$0xff] %v14846_v6  ;;  %7123 = vst [vmem:[%s14864_s29 + $0x1f0] sm:$0xff] %v14854_v62  ;;  %v7037_v3 = vmul.f32 %v14822_v58, %v14822_v58 }
 0x9a7   : > { %v6986_v8 = vadd.f32 %v14826_v7, %v6985_v63  ;;  %v7054_v46 = vadd.f32 %v7053_v57, %v7023_v44  ;;  %v7042_v44 = vmul.f32 %v14850_v37, %v14850_v37  ;;  %v7044_v57 = vmul.f32 %v14846_v6, %v14846_v6 }
 0x9a9   : > { %v6987_v32 = vadd.f32 %v14834_v43, %v6986_v8  ;;  %v7055_v45 = vadd.f32 %v7054_v46, %v7024_v31  ;;  %v7040_v8 = vmul.f32 %v14828_v56, %v14828_v56 }
 0x9ab   : > { %v6988_v51 = vadd.f32 %v6987_v32, %v14844_v40  ;;  %v7056_v16 = vadd.f32 %v7055_v45, %v7025_v33 }
 0x9ad   : > { %v6989_v15 = vadd.f32 %v6988_v51, %v14852_v55  ;;  %v7057_v30 = vadd.f32 %v7056_v16, %v7026_v59  ;;  %v7043_v51 = vmul.f32 %v14856_v41, %v14856_v41 }
 0x9af   : > { %v6990_v12 = vadd.f32 %v14842_v54, %v6989_v15  ;;  %v7058_v18 = vadd.f32 %v7057_v30, %v7027_v23  ;;  %v7083_v23 = vld [vmem:[#allocation5] sm:$0x1] }
 0x9b1   : > { %v6991_v27 = vadd.f32 %v14848_v24, %v6990_v12  ;;  %v7059_v34 = vadd.f32 %v7058_v18, %v7028_v20 }
 0x9b3   : > { %v6992_v7 = vadd.f32 %v6991_v27, %v14800_v49  ;;  %v7060_v22 = vadd.f32 %v7059_v34, %v7029_v13  ;;  %v7086_v13 = vld [vmem:[#allocation5 + $0x1] sm:$0x1] }
 0x9b5   : > { %v6993_v43 = vadd.f32 %v6992_v7, %v14808_v25  ;;  %v7061_v2 = vadd.f32 %v7060_v22, %v7030_v4 }
 0x9b7   : > { %v6994_v40 = vadd.f32 %v14796_v19, %v6993_v43  ;;  %v7062_v9 = vadd.f32 %v7061_v2, %v7031_v52 }
 0x9b9   : > { %v6995_v55 = vadd.f32 %v14804_v39, %v6994_v40  ;;  %v7063_v10 = vadd.f32 %v7062_v9, %v7032_v60 }
 0x9bb   : > { %v6996_v54 = vadd.f32 %v6995_v55, %v14820_v35  ;;  %v7064_v50 = vadd.f32 %v7063_v10, %v7033_v17 }
 0x9bd   : > { %v6997_v24 = vadd.f32 %v6996_v54, %v14824_v21  ;;  %v7065_v0 = vadd.f32 %v7064_v50, %v7034_v1 }
 0x9bf   : > { %v6998_v49 = vadd.f32 %v14816_v47, %v6997_v24  ;;  %v7066_v36 = vadd.f32 %v7065_v0, %v7035_v28 }
 0x9c1   : > { %v6999_v25 = vadd.f32 %v14822_v58, %v6998_v49  ;;  %v7067_v63 = vadd.f32 %v7066_v36, %v7036_v53 }
 0x9c3   : > { %v7000_v19 = vadd.f32 %v6999_v25, %v14832_v29  ;;  %v7068_v5 = vadd.f32 %v7067_v63, %v7037_v3 }
 0x9c5   : > { %v7001_v39 = vadd.f32 %v7000_v19, %v14840_v38  ;;  %v7069_v11 = vadd.f32 %v7068_v5, %v7038_v61 }
 0x9c7   : > { %v7002_v35 = vadd.f32 %v14828_v56, %v7001_v39  ;;  %v7070_v32 = vadd.f32 %v7069_v11, %v7039_v42 }
 0x9c9   : > { %v7003_v21 = vadd.f32 %v14836_v14, %v7002_v35  ;;  %v7071_v48 = vadd.f32 %v7070_v32, %v7040_v8  ;;  %v7045_v14 = vmul.f32 %v14854_v62, %v14854_v62 }
 0x9cb   : > { %v7004_v47 = vadd.f32 %v7003_v21, %v14850_v37  ;;  %v7072_v31 = vadd.f32 %v7071_v48, %v7041_v26 }
 0x9cd   : > { %v7005_v58 = vadd.f32 %v7004_v47, %v14856_v41  ;;  %v7073_v15 = vadd.f32 %v7072_v31, %v7042_v44 }
 0x9cf   : > { %v7006_v29 = vadd.f32 %v14846_v6, %v7005_v58  ;;  %v7074_v46 = vadd.f32 %v7073_v15, %v7043_v51 }
 0x9d1   : > { %v7007_v38 = vadd.f32 %v14854_v62, %v7006_v29  ;;  %v7075_v59 = vadd.f32 %v7074_v46, %v7044_v57 }
 0x9d3   : > { %v7008_v56 = vrot.slane %v7007_v38, 4  ;;  %v7076_v45 = vadd.f32 %v7075_v59, %v7045_v14 }
 0x9d5   : > { %v7009_v33 = vadd.f32 %v7008_v56, %v7007_v38  ;;  %v7077_v16 = vrot.slane %v7076_v45, 4 }
 0x9d7   : > { %v7010_v12 = vrot.slane %v7009_v33, 2  ;;  %v7078_v41 = vadd.f32 %v7077_v16, %v7076_v45 }
 0x9d9   : > { %v7011_v37 = vadd.f32 %v7010_v12, %v7009_v33  ;;  %v7079_v30 = vrot.slane %v7078_v41, 2 }
 0x9db   : > { %v7012_v27 = vrot.slane %v7011_v37, 1  ;;  %v7080_v43 = vadd.f32 %v7079_v30, %v7078_v41 }
 0x9dd   : > { %v7013_v7 = vadd.f32 %v7012_v27, %v7011_v37  ;;  %v7081_v6 = vrot.slane %v7080_v43, 1 }
 0x9df   : > { %v7084_v20 = vadd.f32 %v7083_v23, %v7013_v7  ;;  %v7082_v18 = vadd.f32 %v7081_v6, %v7080_v43 }
 0x9e1   : > { %7085 = vst [vmem:[#allocation5] sm:$0x1] %v7084_v20  ;;  %v7087_v40 = vadd.f32 %v7086_v13, %v7082_v18 }
 0x9e3   : > { %7088 = vst [vmem:[#allocation5 + $0x1] sm:$0x1] %v7087_v40 }
 0x9e4 PF: > { %p10295_p2 = scmp.ne.s32.totalorder %s12058_s22, 4 }
 0x9e5   : > { %v11818_v62 = vld [vmem:[%s16614_s12] sm:$0xff] (!%p10295_p2)   ;;  %v11819_v4 = vld [vmem:[%s16614_s12 + $0x8] sm:$0xff] (!%p10295_p2)   ;;  %v11820_v34 = vld [vmem:[%s16614_s12 + $0x10] sm:$0xff] (!%p10295_p2)   ;;  %v7179_v1 = vlaneseq (!%p10295_p2)  ;;  %s7128_s21 = sshra.s32 (!%p10295_p2), %s12254_s26, 3  ;;  %p10306_p3 = scmp.ne.s32.totalorder (!%p10295_p2), %s12054_s1, 0 }
 0x9e6   : > { %7127 = sbr.rel (%p10295_p2) target bundleno = 3025 (0xbd1), region = 132  ;;  %10589 = vmatprep.subr.bf16.mxu0 (!%p10295_p2), %v11818_v62  ;;  %11117 = vmatprep.subr.bf16.mxu1 (!%p10295_p2), %v11818_v62  ;;  %v11821_v55 = vld [vmem:[%s16614_s12 + $0x18] sm:$0xff] (!%p10295_p2)   ;;  %v11822_v2 = vld [vmem:[%s16614_s12 + $0x20] sm:$0xff] (!%p10295_p2)   ;;  %v11823_v9 = vld [vmem:[%s16614_s12 + $0x28] sm:$0xff] (!%p10295_p2)   ;;  %s10376_s27 = sshll.u32 (!%p10295_p2), %s7128_s21, 4 }
 0x9e7   : > { %10590 = vmatpush3.bf16.msra.mxu0 (!%p10295_p2), %v11818_v62  ;;  %11125 = vmatpush3.bf16.msra.mxu1 (!%p10295_p2), %v11818_v62  ;;  %v11824_v10 = vld [vmem:[%s16614_s12 + $0x30] sm:$0xff] (!%p10295_p2)   ;;  %v7180_v25 = vshrl.u32 (!%p10295_p2), %v7179_v1, 7  ;;  %v11825_v28 = vld [vmem:[%s16614_s12 + $0x38] sm:$0xff] (!%p10295_p2)   ;;  %v7165_v50 = vld [vmem:[%s16612_s10] sm:$0x1] (!%p10295_p2)  ;;  %s15054_s0 = scalar_lea.vmem (!%p10295_p2), [#allocation3], %s10376_s27 }
 0x9e8   : > { %10591 = vmatprep.subr.bf16.mxu0 (!%p10295_p2), %v11819_v4  ;;  %11118 = vmatprep.subr.bf16.mxu1 (!%p10295_p2), %v11819_v4  ;;  %v7167_v52 = vld [vmem:[#allocation5] sm:$0x1] (!%p10295_p2)  ;;  %v7133_v0 = vld [vmem:[%s15054_s0] sm:$0xff] (!%p10295_p2)  ;;  %v7134_v39 = vld [vmem:[%s15054_s0 + $0x10] sm:$0xff] (!%p10295_p2) }
 0x9e9   : > { %v7168_v54 = vmul.f32 (!%p10295_p2), 0.001953125, %v7167_v52  ;;  %v7181_v19 = vsub.s32 (!%p10295_p2), 0, %v7180_v25  ;;  %v7166_v3 = vld [vmem:[%s16613_s11] sm:$0x1] (!%p10295_p2)  ;;  %v7150_v61 = vld [vmem:[%s15054_s0 + $0x110] sm:$0xff] (!%p10295_p2) }
 0x9ea   : > { %v7169_v22 = vld [vmem:[#allocation5 + $0x1] sm:$0x1] (!%p10295_p2)  ;;  %v7149_v35 = vld [vmem:[%s15054_s0 + $0x100] sm:$0xff] (!%p10295_p2)  ;;  %v7136_v5 = vld [vmem:[%s15054_s0 + $0x30] sm:$0xff] (!%p10295_p2) }
 0x9eb   : > { %10592 = vmatpush3.bf16.msra.mxu0 (!%p10295_p2), %v11819_v4  ;;  %11126 = vmatpush3.bf16.msra.mxu1 (!%p10295_p2), %v11819_v4  ;;  %v7170_v60 = vmul.f32 (!%p10295_p2), 0.001953125, %v7169_v22  ;;  %v7171_v24 = vmul.f32 (!%p10295_p2), %v7168_v54, %v7168_v54  ;;  %v7135_v63 = vld [vmem:[%s15054_s0 + $0x20] sm:$0xff] (!%p10295_p2)  ;;  %v7152_v8 = vld [vmem:[%s15054_s0 + $0x130] sm:$0xff] (!%p10295_p2) }
 0x9ec   : > { %10593 = vmatprep.subr.bf16.mxu0 (!%p10295_p2), %v11820_v34  ;;  %11119 = vmatprep.subr.bf16.mxu1 (!%p10295_p2), %v11820_v34  ;;  %v7151_v47 = vld [vmem:[%s15054_s0 + $0x120] sm:$0xff] (!%p10295_p2)  ;;  %v7138_v58 = vld [vmem:[%s15054_s0 + $0x50] sm:$0xff] (!%p10295_p2) }
 0x9ed   : > { %v7172_v17 = vsub.f32 %v7170_v60, %v7171_v24  ;;  %v7137_v11 = vld [vmem:[%s15054_s0 + $0x40] sm:$0xff]  ;;  %v7154_v38 = vld [vmem:[%s15054_s0 + $0x150] sm:$0xff] }
 0x9ee   : > { %v7153_v26 = vld [vmem:[%s15054_s0 + $0x140] sm:$0xff]  ;;  %v7140_v31 = vld [vmem:[%s15054_s0 + $0x70] sm:$0xff] }
 0x9ef   : > { %10594 = vmatpush3.bf16.msra.mxu0 %v11820_v34  ;;  %11127 = vmatpush3.bf16.msra.mxu1 %v11820_v34  ;;  %v7173_v49 = vadd.f32 0.8, %v7172_v17  ;;  %v7139_v51 = vld [vmem:[%s15054_s0 + $0x60] sm:$0xff] }
 0x9f0   : > { %10595 = vmatprep.subr.bf16.mxu0 %v11821_v55  ;;  %11120 = vmatprep.subr.bf16.mxu1 %v11821_v55 }
 0x9f1   : > { %11826 = vrsqrt.f32 %v7173_v49 }
 0x9f3   : > { %10596 = vmatpush3.bf16.msra.mxu0 %v11821_v55  ;;  %11128 = vmatpush3.bf16.msra.mxu1 %v11821_v55 }
 0x9f4   : > { %10597 = vmatprep.subr.bf16.mxu0 %v11822_v2  ;;  %11121 = vmatprep.subr.bf16.mxu1 %v11822_v2 }
 0x9f7   : > { %10598 = vmatpush3.bf16.msra.mxu0 %v11822_v2  ;;  %11129 = vmatpush3.bf16.msra.mxu1 %v11822_v2 }
 0x9f8   : > { %10599 = vmatprep.subr.bf16.mxu0 %v11823_v9  ;;  %11122 = vmatprep.subr.bf16.mxu1 %v11823_v9 }
 0x9fb   : > { %10600 = vmatpush3.bf16.msra.mxu0 %v11823_v9  ;;  %11130 = vmatpush3.bf16.msra.mxu1 %v11823_v9  ;;  %v11827_v53 = vpop.eup %11826 }
 0x9fc   : > { %10601 = vmatprep.subr.bf16.mxu0 %v11824_v10  ;;  %11123 = vmatprep.subr.bf16.mxu1 %v11824_v10  ;;  %v7175_v36 = vmul.f32 %v11827_v53, %v7165_v50 }
 0x9fe   : > { %v7176_v21 = vmul.f32 %v7175_v36, %v7168_v54  ;;  %v15064_v42 = vrot.slane %v7175_v36, %v7181_v19 }
 0x9ff   : > { %10602 = vmatpush3.bf16.msra.mxu0 %v11824_v10  ;;  %11131 = vmatpush3.bf16.msra.mxu1 %v11824_v10 }
 0xa00   : > { %10603 = vmatprep.subr.bf16.mxu0 %v11825_v28  ;;  %11124 = vmatprep.subr.bf16.mxu1 %v11825_v28  ;;  %v7177_v32 = vsub.f32 %v7166_v3, %v7176_v21  ;;  %v7184_v29 = vmul.f32 %v15064_v42, %v7133_v0  ;;  %v7185_v44 = vmul.f32 %v15064_v42, %v7134_v39 }
 0xa01   : > { %v7200_v48 = vmul.f32 %v15064_v42, %v7149_v35  ;;  %v7201_v56 = vmul.f32 %v15064_v42, %v7150_v61  ;;  %v7186_v57 = vmul.f32 %v15064_v42, %v7135_v63  ;;  %v7187_v15 = vmul.f32 %v15064_v42, %v7136_v5  ;;  %v7155_v35 = vld [vmem:[%s15054_s0 + $0x160] sm:$0xff] }
 0xa02   : > { %v7202_v33 = vmul.f32 %v15064_v42, %v7151_v47  ;;  %v15082_v14 = vrot.slane %v7177_v32, %v7181_v19  ;;  %v7203_v46 = vmul.f32 %v15064_v42, %v7152_v8  ;;  %v7188_v12 = vmul.f32 %v15064_v42, %v7137_v11  ;;  %v7156_v11 = vld [vmem:[%s15054_s0 + $0x170] sm:$0xff] }
 0xa03   : > { %10604 = vmatpush3.bf16.msra.mxu0 %v11825_v28  ;;  %11132 = vmatpush3.bf16.msra.mxu1 %v11825_v28  ;;  %v7189_v59 = vmul.f32 %v15064_v42, %v7138_v58  ;;  %v7204_v37 = vmul.f32 %v15064_v42, %v7153_v26  ;;  %v7205_v45 = vmul.f32 %v15064_v42, %v7154_v38  ;;  %v7141_v58 = vld [vmem:[%s15054_s0 + $0x80] sm:$0xff] }
 0xa04   : > { %v7190_v27 = vmul.f32 %v15064_v42, %v7139_v51  ;;  %v7191_v23 = vmul.f32 %v15064_v42, %v7140_v31  ;;  %v7222_v16 = vadd.f32 %v15082_v14, %v7184_v29  ;;  %v7223_v7 = vadd.f32 %v15082_v14, %v7185_v44  ;;  %v7157_v38 = vld [vmem:[%s15054_s0 + $0x180] sm:$0xff]  ;;  %v7158_v51 = vld [vmem:[%s15054_s0 + $0x190] sm:$0xff] }
 0xa05   : > { %v7238_v41 = vadd.f32 %v15082_v14, %v7200_v48  ;;  %v7239_v20 = vadd.f32 %v15082_v14, %v7201_v56  ;;  %v7224_v30 = vadd.f32 %v15082_v14, %v7186_v57  ;;  %v7225_v43 = vadd.f32 %v15082_v14, %v7187_v15  ;;  %v7142_v48 = vld [vmem:[%s15054_s0 + $0x90] sm:$0xff] }
 0xa06   : > { %v7240_v6 = vadd.f32 %v15082_v14, %v7202_v33  ;;  %v7241_v13 = vadd.f32 %v15082_v14, %v7203_v46  ;;  %vm7254_vm12 = vcmp.ge.f32.partialorder %v7222_v16, 0.0  ;;  %vm7255_vm13 = vcmp.ge.f32.partialorder %v7223_v7, 0.0 }
 0xa07   : > { %v7286_v18 = vmul.f32 0.2, %v7222_v16  ;;  %v7287_v40 = vmul.f32 0.2, %v7223_v7  ;;  %vm7270_vm14 = vcmp.ge.f32.partialorder %v7238_v41, 0.0  ;;  %vm7271_vm15 = vcmp.ge.f32.partialorder %v7239_v20, 0.0 }
 0xa08   : > { %v7302_v62 = vmul.f32 0.2, %v7238_v41  ;;  %v7303_v4 = vmul.f32 0.2, %v7239_v20  ;;  %vm7256_vm0 = vcmp.ge.f32.partialorder %v7224_v30, 0.0  ;;  %vm7257_vm1 = vcmp.ge.f32.partialorder %v7225_v43, 0.0 }
 0xa09   : > { %v7318_v34 = vsel %vm7254_vm12, %v7222_v16, %v7286_v18  ;;  %v7319_v55 = vsel %vm7255_vm13, %v7223_v7, %v7287_v40  ;;  %v7288_v60 = vmul.f32 0.2, %v7224_v30  ;;  %v7289_v24 = vmul.f32 0.2, %v7225_v43  ;;  %v7143_v18 = vld [vmem:[%s15054_s0 + $0xa0] sm:$0xff]  ;;  %v7144_v40 = vld [vmem:[%s15054_s0 + $0xb0] sm:$0xff] }
 0xa0a   : > { %v7350_v52 = vpack.c.bf16 %v7319_v55, %v7318_v34  ;;  %v7334_v22 = vsel %vm7270_vm14, %v7238_v41, %v7302_v62  ;;  %v7335_v54 = vsel %vm7271_vm15, %v7239_v20, %v7303_v4  ;;  %vm7272_vm2 = vcmp.ge.f32.partialorder %v7240_v6, 0.0  ;;  %v7159_v62 = vld [vmem:[%s15054_s0 + $0x1a0] sm:$0xff] }
 0xa0b   : > { %v7358_v2 = vpack.c.bf16 %v7335_v54, %v7334_v22  ;;  %vm7273_vm3 = vcmp.ge.f32.partialorder %v7241_v13, 0.0  ;;  %v7320_v17 = vsel %vm7256_vm0, %v7224_v30, %v7288_v60  ;;  %v7304_v9 = vmul.f32 0.2, %v7240_v6  ;;  %v7160_v22 = vld [vmem:[%s15054_s0 + $0x1b0] sm:$0xff]  ;;  %v7145_v54 = vld [vmem:[%s15054_s0 + $0xc0] sm:$0xff] }
 0xa0c   : > { %10605 = vmatprep.mubr.bf16.mxu0 %v7350_v52  ;;  %v7305_v49 = vmul.f32 0.2, %v7241_v13  ;;  %v7226_v1 = vadd.f32 %v15082_v14, %v7188_v12  ;;  %v7321_v10 = vsel %vm7257_vm1, %v7225_v43, %v7289_v24  ;;  %v7227_v25 = vadd.f32 %v15082_v14, %v7189_v59 }
 0xa0d   : > { %10621 = vmatprep.mubr.bf16.mxu1 %v7358_v2  ;;  %v7242_v28 = vadd.f32 %v15082_v14, %v7204_v37  ;;  %v7243_v50 = vadd.f32 %v15082_v14, %v7205_v45  ;;  %v7351_v19 = vpack.c.bf16 %v7321_v10, %v7320_v17  ;;  %v7336_v53 = vsel %vm7272_vm2, %v7240_v6, %v7304_v9  ;;  %v7146_v9 = vld [vmem:[%s15054_s0 + $0xd0] sm:$0xff] }
 0xa0e   : > { %v7337_v0 = vsel %vm7273_vm3, %v7241_v13, %v7305_v49  ;;  %vm7258_vm4 = vcmp.ge.f32.partialorder %v7226_v1, 0.0  ;;  %vm7259_vm5 = vcmp.ge.f32.partialorder %v7227_v25, 0.0  ;;  %v7290_v3 = vmul.f32 0.2, %v7226_v1 }
 0xa0f   : > { %v7359_v39 = vpack.c.bf16 %v7337_v0, %v7336_v53  ;;  %v7291_v36 = vmul.f32 0.2, %v7227_v25  ;;  %10606 = vmatmul.mubr.bf16.vlgmr.msra.gmra.mrb[0].mxu0 %v7351_v19  ;;  %vm7274_vm6 = vcmp.ge.f32.partialorder %v7242_v28, 0.0  ;;  %vm7275_vm7 = vcmp.ge.f32.partialorder %v7243_v50, 0.0 }
 0xa10   : > { %v7306_v61 = vmul.f32 0.2, %v7242_v28  ;;  %v7307_v63 = vmul.f32 0.2, %v7243_v50  ;;  %v7322_v21 = vsel %vm7258_vm4, %v7226_v1, %v7290_v3  ;;  %v7228_v47 = vadd.f32 %v15082_v14, %v7190_v27 }
 0xa11   : > { %10622 = vmatmul.mubr.bf16.vlgmr.msra.gmra.mrb[0].mxu1 %v7359_v39  ;;  %v7323_v5 = vsel %vm7259_vm5, %v7227_v25, %v7291_v36  ;;  %v7229_v8 = vadd.f32 %v15082_v14, %v7191_v23  ;;  %v7206_v44 = vmul.f32 %v15064_v42, %v7155_v35  ;;  %v7207_v15 = vmul.f32 %v15064_v42, %v7156_v11 }
 0xa12   : > { %v7352_v26 = vpack.c.bf16 %v7323_v5, %v7322_v21  ;;  %v7338_v32 = vsel %vm7274_vm6, %v7242_v28, %v7306_v61  ;;  %v7339_v29 = vsel %vm7275_vm7, %v7243_v50, %v7307_v63  ;;  %vm7260_vm8 = vcmp.ge.f32.partialorder %v7228_v47, 0.0  ;;  %v7161_v28 = vld [vmem:[%s15054_s0 + $0x1c0] sm:$0xff]  ;;  %v7162_v5 = vld [vmem:[%s15054_s0 + $0x1d0] sm:$0xff] }
 0xa13   : > { %v7360_v31 = vpack.c.bf16 %v7339_v29, %v7338_v32  ;;  %vm7261_vm9 = vcmp.ge.f32.partialorder %v7229_v8, 0.0  ;;  %v7292_v56 = vmul.f32 0.2, %v7228_v47  ;;  %v7293_v57 = vmul.f32 0.2, %v7229_v8 }
 0xa14   : > { %10609 = vmatprep.mubr.bf16.mxu0 %v7352_v26  ;;  %v7244_v33 = vadd.f32 %v15082_v14, %v7206_v44  ;;  %v7192_v46 = vmul.f32 %v15064_v42, %v7141_v58  ;;  %v7193_v59 = vmul.f32 %v15064_v42, %v7142_v48  ;;  %v7208_v37 = vmul.f32 %v15064_v42, %v7157_v38  ;;  %v7147_v48 = vld [vmem:[%s15054_s0 + $0xe0] sm:$0xff]  ;;  %v7148_v38 = vld [vmem:[%s15054_s0 + $0xf0] sm:$0xff] }
 0xa15   : > { %10625 = vmatprep.mubr.bf16.mxu1 %v7360_v31  ;;  %v7324_v12 = vsel %vm7260_vm8, %v7228_v47, %v7292_v56  ;;  %v7209_v45 = vmul.f32 %v15064_v42, %v7158_v51  ;;  %v7325_v27 = vsel %vm7261_vm9, %v7229_v8, %v7293_v57  ;;  %v7245_v23 = vadd.f32 %v15082_v14, %v7207_v15  ;;  %v7163_v15 = vld [vmem:[%s15054_s0 + $0x1e0] sm:$0xff] }
 0xa16   : > { %vm7276_vm10 = vcmp.ge.f32.partialorder %v7244_v33, 0.0  ;;  %v7308_v16 = vmul.f32 0.2, %v7244_v33  ;;  %v7353_v7 = vpack.c.bf16 %v7325_v27, %v7324_v12  ;;  %v7230_v41 = vadd.f32 %v15082_v14, %v7192_v46 }
 0xa17   : > { %v7231_v20 = vadd.f32 %v15082_v14, %v7193_v59  ;;  %v7246_v30 = vadd.f32 %v15082_v14, %v7208_v37  ;;  %vm7277_vm11 = vcmp.ge.f32.partialorder %v7245_v23, 0.0  ;;  %v7309_v43 = vmul.f32 0.2, %v7245_v23 }
 0xa18   : > { %v7340_v6 = vsel %vm7276_vm10, %v7244_v33, %v7308_v16  ;;  %v7247_v13 = vadd.f32 %v15082_v14, %v7209_v45  ;;  %10610 = vmatmul.mubr.bf16.gmra.mrb[4].mxu0 %v7353_v7  ;;  %vm7262_vm12 = vcmp.ge.f32.partialorder %v7230_v41, 0.0  ;;  %v7294_v4 = vmul.f32 0.2, %v7230_v41  ;;  %v7164_v33 = vld [vmem:[%s15054_s0 + $0x1f0] sm:$0xff] }
 0xa19   : > { %vm7263_vm13 = vcmp.ge.f32.partialorder %v7231_v20, 0.0  ;;  %v7295_v34 = vmul.f32 0.2, %v7231_v20  ;;  %v7341_v55 = vsel %vm7277_vm11, %v7245_v23, %v7309_v43  ;;  %vm7278_vm14 = vcmp.ge.f32.partialorder %v7246_v30, 0.0 }
 0xa1a   : > { %vm7279_vm15 = vcmp.ge.f32.partialorder %v7247_v13, 0.0  ;;  %v7310_v52 = vmul.f32 0.2, %v7246_v30  ;;  %v7361_v60 = vpack.c.bf16 %v7341_v55, %v7340_v6  ;;  %v7326_v2 = vsel %vm7262_vm12, %v7230_v41, %v7294_v4 }
 0xa1b   : > { %v7327_v24 = vsel %vm7263_vm13, %v7231_v20, %v7295_v34  ;;  %v7311_v17 = vmul.f32 0.2, %v7247_v13  ;;  %v7194_v10 = vmul.f32 %v15064_v42, %v7143_v18  ;;  %v7195_v25 = vmul.f32 %v15064_v42, %v7144_v40 }
 0xa1c   : > { %v7354_v49 = vpack.c.bf16 %v7327_v24, %v7326_v2  ;;  %v7342_v1 = vsel %vm7278_vm14, %v7246_v30, %v7310_v52  ;;  %10626 = vmatmul.mubr.bf16.gmra.mrb[4].mxu1 %v7361_v60  ;;  %v7210_v19 = vmul.f32 %v15064_v42, %v7159_v62  ;;  %v7211_v53 = vmul.f32 %v15064_v42, %v7160_v22 }
 0xa1d   : > { %v7343_v50 = vsel %vm7279_vm15, %v7247_v13, %v7311_v17  ;;  %v7196_v0 = vmul.f32 %v15064_v42, %v7145_v54  ;;  %v7232_v3 = vadd.f32 %v15082_v14, %v7194_v10  ;;  %v7233_v36 = vadd.f32 %v15082_v14, %v7195_v25 }
 0xa1e   : > { %10613 = vmatprep.mubr.bf16.mxu0 %v7354_v49  ;;  %v7362_v39 = vpack.c.bf16 %v7343_v50, %v7342_v1  ;;  %v7197_v35 = vmul.f32 %v15064_v42, %v7146_v9  ;;  %v7248_v61 = vadd.f32 %v15082_v14, %v7210_v19  ;;  %v7249_v63 = vadd.f32 %v15082_v14, %v7211_v53 }
 0xa1f   : > { %v7234_v21 = vadd.f32 %v15082_v14, %v7196_v0  ;;  %v7212_v47 = vmul.f32 %v15064_v42, %v7161_v28  ;;  %vm7264_vm0 = vcmp.ge.f32.partialorder %v7232_v3, 0.0  ;;  %vm7265_vm1 = vcmp.ge.f32.partialorder %v7233_v36, 0.0 }
 0xa20   : > { %10629 = vmatprep.mubr.bf16.mxu1 %v7362_v39  ;;  %v7296_v8 = vmul.f32 0.2, %v7232_v3  ;;  %v7297_v11 = vmul.f32 0.2, %v7233_v36  ;;  %vm7280_vm2 = vcmp.ge.f32.partialorder %v7248_v61, 0.0  ;;  %vm7281_vm3 = vcmp.ge.f32.partialorder %v7249_v63, 0.0 }
 0xa21   : > { %v7312_v58 = vmul.f32 0.2, %v7248_v61  ;;  %v7313_v26 = vmul.f32 0.2, %v7249_v63  ;;  %v7235_v44 = vadd.f32 %v15082_v14, %v7197_v35  ;;  %vm7266_vm4 = vcmp.ge.f32.partialorder %v7234_v21, 0.0 }
 0xa22   : > { %v7328_v32 = vsel %vm7264_vm0, %v7232_v3, %v7296_v8  ;;  %v7329_v29 = vsel %vm7265_vm1, %v7233_v36, %v7297_v11  ;;  %v7298_v57 = vmul.f32 0.2, %v7234_v21  ;;  %v7213_v59 = vmul.f32 %v15064_v42, %v7162_v5 }
 0xa23   : > { %v7355_v51 = vpack.c.bf16 %v7329_v29, %v7328_v32  ;;  %v7344_v31 = vsel %vm7280_vm2, %v7248_v61, %v7312_v58  ;;  %v7345_v56 = vsel %vm7281_vm3, %v7249_v63, %v7313_v26  ;;  %vm7267_vm5 = vcmp.ge.f32.partialorder %v7235_v44, 0.0 }
 0xa24   : > { %v7363_v46 = vpack.c.bf16 %v7345_v56, %v7344_v31  ;;  %v7299_v12 = vmul.f32 0.2, %v7235_v44  ;;  %v7330_v37 = vsel %vm7266_vm4, %v7234_v21, %v7298_v57  ;;  %v7250_v45 = vadd.f32 %v15082_v14, %v7212_v47 }
 0xa25   : > { %10614 = vmatmul.mubr.bf16.gmra.mrb[8].mxu0 %v7355_v51  ;;  %v7198_v27 = vmul.f32 %v15064_v42, %v7147_v48  ;;  %v7199_v23 = vmul.f32 %v15064_v42, %v7148_v38  ;;  %v7251_v7 = vadd.f32 %v15082_v14, %v7213_v59  ;;  %v7214_v41 = vmul.f32 %v15064_v42, %v7163_v15 }
 0xa26   : > { %10630 = vmatmul.mubr.bf16.gmra.mrb[8].mxu1 %v7363_v46  ;;  %v7331_v16 = vsel %vm7267_vm5, %v7235_v44, %v7299_v12  ;;  %v7215_v20 = vmul.f32 %v15064_v42, %v7164_v33  ;;  %vm7282_vm6 = vcmp.ge.f32.partialorder %v7250_v45, 0.0  ;;  %v7314_v43 = vmul.f32 0.2, %v7250_v45 }
 0xa27   : > { %v7356_v30 = vpack.c.bf16 %v7331_v16, %v7330_v37  ;;  %v7236_v6 = vadd.f32 %v15082_v14, %v7198_v27  ;;  %vm7283_vm7 = vcmp.ge.f32.partialorder %v7251_v7, 0.0  ;;  %v7315_v13 = vmul.f32 0.2, %v7251_v7 }
 0xa28   : > { %v7237_v18 = vadd.f32 %v15082_v14, %v7199_v23  ;;  %v7252_v40 = vadd.f32 %v15082_v14, %v7214_v41  ;;  %v7346_v62 = vsel %vm7282_vm6, %v7250_v45, %v7314_v43  ;;  %v7253_v34 = vadd.f32 %v15082_v14, %v7215_v20 }
 0xa29   : > { %10617 = vmatprep.mubr.bf16.mxu0 %v7356_v30  ;;  %vm7268_vm8 = vcmp.ge.f32.partialorder %v7236_v6, 0.0  ;;  %v7300_v4 = vmul.f32 0.2, %v7236_v6  ;;  %v7347_v55 = vsel %vm7283_vm7, %v7251_v7, %v7315_v13  ;;  %v12092_v33 = vmov (!%p10306_p3), 0.0  }
 0xa2a   : > { %vm7269_vm9 = vcmp.ge.f32.partialorder %v7237_v18, 0.0  ;;  %v7301_v42 = vmul.f32 0.2, %v7237_v18  ;;  %vm7284_vm10 = vcmp.ge.f32.partialorder %v7252_v40, 0.0  ;;  %v7364_v52 = vpack.c.bf16 %v7347_v55, %v7346_v62  ;;  %7595 = vst [vmem:[#allocation4] sm:$0xff] (!%p10306_p3), %v12092_v33 }
 0xa2b   : > { %v7332_v22 = vsel %vm7268_vm8, %v7236_v6, %v7300_v4  ;;  %vm7285_vm11 = vcmp.ge.f32.partialorder %v7253_v34, 0.0  ;;  %v7316_v54 = vmul.f32 0.2, %v7252_v40  ;;  %v7317_v2 = vmul.f32 0.2, %v7253_v34 }
 0xa2c   : > { %v7333_v60 = vsel %vm7269_vm9, %v7237_v18, %v7301_v42  ;;  %10633 = vmatprep.mubr.bf16.mxu1 %v7364_v52 }
 0xa2d   : > { %v7357_v24 = vpack.c.bf16 %v7333_v60, %v7332_v22  ;;  %v7348_v17 = vsel %vm7284_vm10, %v7252_v40, %v7316_v54  ;;  %v7349_v9 = vsel %vm7285_vm11, %v7253_v34, %v7317_v2 }
 0xa2e   : > { %v7365_v49 = vpack.c.bf16 %v7349_v9, %v7348_v17 }
 0xa2f   : > { %10618 = vmatmul.mubr.bf16.gmra.mrb[12].mxu0 %v7357_v24 }
 0xa30   : > { %10634 = vmatmul.mubr.bf16.gmra.mrb[12].mxu1 %v7365_v49 }
 0xae2   : > { %v15159_v1 = vpop.f32.mrb[0].mxu0 }
 0xae3   : > { %v15163_v10 = vpop.f32.mrb[1].mxu0 }
 0xae4   : > { %v15161_v14 = vpop.f32.mrb[0].mxu1  ;;  %v15167_v28 = vpop.f32.mrb[2].mxu0 }
 0xae5   : > { %v15165_v25 = vpop.f32.mrb[1].mxu1  ;;  %v15171_v19 = vpop.f32.mrb[3].mxu0 }
 0xae6   : > { %v15169_v50 = vpop.f32.mrb[2].mxu1 }
 0xae7   : > { %v15173_v53 = vpop.f32.mrb[3].mxu1 }
 0xaeb   : > { %v15175_v0 = vpop.f32.mrb[4].mxu0 }
 0xaec   : > { %v15177_v39 = vpop.f32.mrb[5].mxu0 }
 0xaed   : > { %v15179_v3 = vpop.f32.mrb[6].mxu0 }
 0xaee   : > { %v15181_v36 = vpop.f32.mrb[7].mxu0 }
 0xaef   : > { %v15183_v35 = vpop.f32.mrb[4].mxu1 }
 0xaf0   : > { %v15185_v61 = vpop.f32.mrb[5].mxu1 }
 0xaf1   : > { %v15187_v63 = vpop.f32.mrb[6].mxu1 }
 0xaf2   : > { %v15189_v21 = vpop.f32.mrb[7].mxu1 }
 0xaf8   : > { %v15191_v5 = vpop.f32.mrb[8].mxu0 }
 0xaf9   : > { %v15193_v47 = vpop.f32.mrb[8].mxu1  ;;  %v15195_v8 = vpop.f32.mrb[9].mxu0 }
 0xafa   : > { %v15197_v11 = vpop.f32.mrb[9].mxu1  ;;  %v15199_v58 = vpop.f32.mrb[10].mxu0 }
 0xafb   : > { %v15201_v26 = vpop.f32.mrb[10].mxu1  ;;  %v15203_v32 = vpop.f32.mrb[11].mxu0 }
 0xafc   : > { %v15205_v29 = vpop.f32.mrb[11].mxu1 }
 0xb00   : > { %7594 = sbr.rel (%p10306_p3) target bundleno = 2823 (0xb07), region = 136 }
 0xb02   : > { %v15207_v44 = vpop.f32.mrb[12].mxu0 }
 0xb03   : > { %v15209_v48 = vpop.f32.mrb[13].mxu0  ;;  %v15211_v38 = vpop.f32.mrb[12].mxu1 }
 0xb04   : > { %v15213_v51 = vpop.f32.mrb[14].mxu0  ;;  %v15215_v31 = vpop.f32.mrb[13].mxu1 }
 0xb05   : > { %v15217_v56 = vpop.f32.mrb[15].mxu0  ;;  %v15219_v57 = vpop.f32.mrb[14].mxu1 }
 0xb06   : > { %v15221_v15 = vpop.f32.mrb[15].mxu1 }
 0xb07 PF: > { %v7596_v46 = vadd.f32 %v15171_v19, %v15163_v10  ;;  %v7633_v37 = vmul.f32 %v15163_v10, %v15163_v10  ;;  %v7634_v45 = vmul.f32 %v15171_v19, %v15171_v19  ;;  %v7635_v23 = vmul.f32 %v15159_v1, %v15159_v1  ;;  %s12093_s29 = smov 64   ;;  %s12094_s4 = smov 96  }
 0xb08   : > { %v7636_v7 = vmul.f32 %v15167_v28, %v15167_v28  ;;  %v7637_v30 = vmul.f32 %v15177_v39, %v15177_v39  ;;  %v7638_v13 = vmul.f32 %v15181_v36, %v15181_v36  ;;  %v7639_v62 = vmul.f32 %v15175_v0, %v15175_v0  ;;  %s10377_s23 = sshll.u32 %s7128_s21, 5  ;;  %s12095_s21 = smov 32  }
 0xb09   : > { %v7597_v12 = vadd.f32 %v15159_v1, %v7596_v46  ;;  %v7665_v41 = vadd.f32 %v7634_v45, %v7633_v37  ;;  %v7640_v55 = vmul.f32 %v15179_v3, %v15179_v3  ;;  %v7641_v22 = vmul.f32 %v15195_v8, %v15195_v8  ;;  %s15324_s27 = scalar_lea.vmem [#allocation2], %s10377_s23 }
 0xb0a   : > { %v7642_v2 = vmul.f32 %v15203_v32, %v15203_v32  ;;  %v7643_v9 = vmul.f32 %v15191_v5, %v15191_v5  ;;  %v7644_v46 = vmul.f32 %v15199_v58, %v15199_v58  ;;  %v7645_v37 = vmul.f32 %v15209_v48, %v15209_v48  ;;  %7738 = vst [vmem:[%s15324_s27] sm:$0xff] %v15163_v10 }
 0xb0b   : > { %v7598_v59 = vadd.f32 %v15167_v28, %v7597_v12  ;;  %v7666_v43 = vadd.f32 %v7665_v41, %v7635_v23  ;;  %v7646_v23 = vmul.f32 %v15217_v56, %v15217_v56  ;;  %v7647_v41 = vmul.f32 %v15207_v44, %v15207_v44  ;;  %7739 = vst [vmem:[%s15324_s27 + $0x20] sm:$0xff] %v15171_v19 }
 0xb0c   : > { %7740 = vst [vmem:[%s15324_s27 + $0x40] sm:$0xff] %v15159_v1  ;;  %7741 = vst [vmem:[%s15324_s27 + $0x60] sm:$0xff] %v15167_v28  ;;  %vm7730_vm12 = vcmask 253952  }
 0xb0d   : > { %v7599_v27 = vadd.f32 %v7598_v59, %v15177_v39  ;;  %v7667_v18 = vadd.f32 %v7666_v43, %v7636_v7  ;;  %v7648_v43 = vmul.f32 %v15213_v51, %v15213_v51  ;;  %7742 = vst [vmem:[%s15324_s27 + $0x80] sm:$0xff] %v15177_v39  ;;  %7743 = vst [vmem:[%s15324_s27 + $0xa0] sm:$0xff] %v15181_v36 }
 0xb0e   : > { %7744 = vst [vmem:[%s15324_s27 + $0xc0] sm:$0xff] %v15175_v0  ;;  %7745 = vst [vmem:[%s15324_s27 + $0xe0] sm:$0xff] %v15179_v3 }
 0xb0f   : > { %v7600_v16 = vadd.f32 %v7599_v27, %v15181_v36  ;;  %v7668_v4 = vadd.f32 %v7667_v18, %v7637_v30  ;;  %v7649_v18 = vmul.f32 %v15165_v25, %v15165_v25  ;;  %7746 = vst [vmem:[%s15324_s27 + $0x100] sm:$0xff] %v15195_v8  ;;  %7747 = vst [vmem:[%s15324_s27 + $0x120] sm:$0xff] %v15203_v32 }
 0xb10   : > { %7748 = vst [vmem:[%s15324_s27 + $0x140] sm:$0xff] %v15191_v5  ;;  %7749 = vst [vmem:[%s15324_s27 + $0x160] sm:$0xff] %v15199_v58 }
 0xb11   : > { %v7601_v20 = vadd.f32 %v15175_v0, %v7600_v16  ;;  %v7669_v42 = vadd.f32 %v7668_v4, %v7638_v13  ;;  %v7650_v4 = vmul.f32 %v15173_v53, %v15173_v53  ;;  %7750 = vst [vmem:[%s15324_s27 + $0x180] sm:$0xff] %v15209_v48  ;;  %7751 = vst [vmem:[%s15324_s27 + $0x1a0] sm:$0xff] %v15217_v56 }
 0xb12   : > { %7752 = vst [vmem:[%s15324_s27 + $0x1c0] sm:$0xff] %v15207_v44  ;;  %7753 = vst [vmem:[%s15324_s27 + $0x1e0] sm:$0xff] %v15213_v51 }
 0xb13   : > { %v7602_v6 = vadd.f32 %v15179_v3, %v7601_v20  ;;  %v7670_v54 = vadd.f32 %v7669_v42, %v7639_v62  ;;  %v7651_v42 = vmul.f32 %v15161_v14, %v15161_v14  ;;  %7754 = vst [vmem:[%s15324_s27 + $0x200] sm:$0xff] %v15165_v25  ;;  %7755 = vst [vmem:[%s15324_s27 + $0x220] sm:$0xff] %v15173_v53  ;;  %v7732_v3 = vld [vmem:[#allocation4 + $0x1] sm:$0x1] }
 0xb14   : > { %7756 = vst [vmem:[%s15324_s27 + $0x240] sm:$0xff] %v15161_v14  ;;  %7757 = vst [vmem:[%s15324_s27 + $0x260] sm:$0xff] %v15169_v50 }
 0xb15   : > { %v7603_v40 = vadd.f32 %v7602_v6, %v15195_v8  ;;  %v7671_v24 = vadd.f32 %v7670_v54, %v7640_v55  ;;  %v7652_v54 = vmul.f32 %v15169_v50, %v15169_v50  ;;  %7758 = vst [vmem:[%s15324_s27 + $0x280] sm:$0xff] %v15185_v61  ;;  %7759 = vst [vmem:[%s15324_s27 + $0x2a0] sm:$0xff] %v15189_v21 }
 0xb16   : > { %7760 = vst [vmem:[%s15324_s27 + $0x2c0] sm:$0xff] %v15183_v35  ;;  %7761 = vst [vmem:[%s15324_s27 + $0x2e0] sm:$0xff] %v15187_v63 }
 0xb17   : > { %v7604_v34 = vadd.f32 %v7603_v40, %v15203_v32  ;;  %v7672_v49 = vadd.f32 %v7671_v24, %v7641_v22  ;;  %v7653_v24 = vmul.f32 %v15185_v61, %v15185_v61  ;;  %7762 = vst [vmem:[%s15324_s27 + $0x300] sm:$0xff] %v15197_v11  ;;  %7763 = vst [vmem:[%s15324_s27 + $0x320] sm:$0xff] %v15205_v29 }
 0xb18   : > { %7764 = vst [vmem:[%s15324_s27 + $0x340] sm:$0xff] %v15193_v47  ;;  %7765 = vst [vmem:[%s15324_s27 + $0x360] sm:$0xff] %v15201_v26 }
 0xb19   : > { %v7605_v52 = vadd.f32 %v15191_v5, %v7604_v34  ;;  %v7673_v12 = vadd.f32 %v7672_v49, %v7642_v2  ;;  %v7654_v49 = vmul.f32 %v15189_v21, %v15189_v21  ;;  %7766 = vst [vmem:[%s15324_s27 + $0x380] sm:$0xff] %v15215_v31  ;;  %7767 = vst [vmem:[%s15324_s27 + $0x3a0] sm:$0xff] %v15221_v15 }
 0xb1a   : > { %7768 = vst [vmem:[%s15324_s27 + $0x3c0] sm:$0xff] %v15211_v38  ;;  %7769 = vst [vmem:[%s15324_s27 + $0x3e0] sm:$0xff] %v15219_v57 }
 0xb1b   : > { %v7606_v60 = vadd.f32 %v15199_v58, %v7605_v52  ;;  %v7674_v45 = vadd.f32 %v7673_v12, %v7643_v9  ;;  %v7655_v12 = vmul.f32 %v15183_v35, %v15183_v35 }
 0xb1d   : > { %v7607_v17 = vadd.f32 %v7606_v60, %v15209_v48  ;;  %v7675_v16 = vadd.f32 %v7674_v45, %v7644_v46  ;;  %v7656_v45 = vmul.f32 %v15187_v63, %v15187_v63 }
 0xb1f   : > { %v7608_v33 = vadd.f32 %v7607_v17, %v15217_v56  ;;  %v7676_v20 = vadd.f32 %v7675_v16, %v7645_v37  ;;  %v7657_v16 = vmul.f32 %v15197_v11, %v15197_v11 }
 0xb21   : > { %v7609_v59 = vadd.f32 %v15207_v44, %v7608_v33  ;;  %v7677_v6 = vadd.f32 %v7676_v20, %v7646_v23  ;;  %v7658_v20 = vmul.f32 %v15205_v29, %v15205_v29 }
 0xb23   : > { %v7610_v27 = vadd.f32 %v15213_v51, %v7609_v59  ;;  %v7678_v40 = vadd.f32 %v7677_v6, %v7647_v41  ;;  %v7659_v6 = vmul.f32 %v15193_v47, %v15193_v47 }
 0xb25   : > { %v7611_v7 = vadd.f32 %v7610_v27, %v15165_v25  ;;  %v7679_v34 = vadd.f32 %v7678_v40, %v7648_v43  ;;  %v7660_v40 = vmul.f32 %v15201_v26, %v15201_v26 }
 0xb27   : > { %v7612_v30 = vadd.f32 %v7611_v7, %v15173_v53  ;;  %v7680_v52 = vadd.f32 %v7679_v34, %v7649_v18  ;;  %v7661_v34 = vmul.f32 %v15215_v31, %v15215_v31 }
 0xb29   : > { %v7613_v13 = vadd.f32 %v15161_v14, %v7612_v30  ;;  %v7681_v60 = vadd.f32 %v7680_v52, %v7650_v4  ;;  %v7662_v52 = vmul.f32 %v15221_v15, %v15221_v15 }
 0xb2b   : > { %v7614_v62 = vadd.f32 %v15169_v50, %v7613_v13  ;;  %v7682_v17 = vadd.f32 %v7681_v60, %v7651_v42  ;;  %v7663_v60 = vmul.f32 %v15211_v38, %v15211_v38 }
 0xb2d   : > { %v7615_v55 = vadd.f32 %v7614_v62, %v15185_v61  ;;  %v7683_v33 = vadd.f32 %v7682_v17, %v7652_v54  ;;  %v7664_v17 = vmul.f32 %v15219_v57, %v15219_v57 }
 0xb2f   : > { %v7616_v22 = vadd.f32 %v7615_v55, %v15189_v21  ;;  %v7684_v59 = vadd.f32 %v7683_v33, %v7653_v24 }
 0xb31   : > { %v7617_v2 = vadd.f32 %v15183_v35, %v7616_v22  ;;  %v7685_v27 = vadd.f32 %v7684_v59, %v7654_v49  ;;  %v7728_v35 = vld [vmem:[#allocation4] sm:$0x1] }
 0xb33   : > { %v7618_v9 = vadd.f32 %v15187_v63, %v7617_v2  ;;  %v7686_v7 = vadd.f32 %v7685_v27, %v7655_v12 }
 0xb35   : > { %v7619_v46 = vadd.f32 %v7618_v9, %v15197_v11  ;;  %v7687_v30 = vadd.f32 %v7686_v7, %v7656_v45 }
 0xb37   : > { %v7620_v37 = vadd.f32 %v7619_v46, %v15205_v29  ;;  %v7688_v13 = vadd.f32 %v7687_v30, %v7657_v16 }
 0xb39   : > { %v7621_v23 = vadd.f32 %v15193_v47, %v7620_v37  ;;  %v7689_v62 = vadd.f32 %v7688_v13, %v7658_v20 }
 0xb3b   : > { %v7622_v41 = vadd.f32 %v15201_v26, %v7621_v23  ;;  %v7690_v55 = vadd.f32 %v7689_v62, %v7659_v6 }
 0xb3d   : > { %v7623_v43 = vadd.f32 %v7622_v41, %v15215_v31  ;;  %v7691_v22 = vadd.f32 %v7690_v55, %v7660_v40 }
 0xb3f   : > { %v7624_v18 = vadd.f32 %v7623_v43, %v15221_v15  ;;  %v7692_v2 = vadd.f32 %v7691_v22, %v7661_v34 }
 0xb41   : > { %v7625_v4 = vadd.f32 %v15211_v38, %v7624_v18  ;;  %v7693_v9 = vadd.f32 %v7692_v2, %v7662_v52 }
 0xb43   : > { %v7626_v42 = vadd.f32 %v15219_v57, %v7625_v4  ;;  %v7694_v33 = vadd.f32 %v7693_v9, %v7663_v60 }
 0xb45   : > { %v7627_v54 = vrot.slane %v7626_v42, 4  ;;  %v7695_v12 = vadd.f32 %v7694_v33, %v7664_v17 }
 0xb47   : > { %v7628_v24 = vadd.f32 %v7627_v54, %v7626_v42  ;;  %v7696_v37 = vrot.slane %v7695_v12, 4 }
 0xb49   : > { %v7629_v49 = vrot.slane %v7628_v24, 2  ;;  %v7697_v27 = vadd.f32 %v7696_v37, %v7695_v12 }
 0xb4b   : > { %v7630_v46 = vadd.f32 %v7629_v49, %v7628_v24  ;;  %v7698_v23 = vrot.slane %v7697_v27, 2 }
 0xb4d   : > { %v7631_v59 = vrot.slane %v7630_v46, 1  ;;  %v7699_v16 = vadd.f32 %v7698_v23, %v7697_v27 }
 0xb4f   : > { %v7632_v45 = vadd.f32 %v7631_v59, %v7630_v46  ;;  %v7700_v1 = vrot.slane %v7699_v16, 1 }
 0xb51   : > { %7712 = vrot.lane.b32.xlu1 %v7632_v45, %s12093_s29  ;;  %7703 = vrot.lane.b32.xlu0 %v7632_v45, %s12094_s4  ;;  %v7701_v14 = vadd.f32 %v7700_v1, %v7699_v16 }
 0xb55   : > { %7716 = vrot.lane.b32.xlu1 %v7701_v14, %s12093_s29  ;;  %7708 = vrot.lane.b32.xlu0 %v7701_v14, %s12094_s4 }
 0xb59   : > { %7724 = vrot.lane.b32.xlu1 %v7701_v14, %s12095_s21  ;;  %7720 = vrot.lane.b32.xlu0 %v7632_v45, %s12095_s21 }
 0xbc3   : > { %v7713_v10 = vpop.permute.xlu1 %7712  ;;  %v7704_v25 = vpop.permute.xlu0 %7703 }
 0xbc4   : > { %v7706_v28 = vadd.f32 %v7704_v25, %v7632_v45 }
 0xbc6   : > { %v7715_v39 = vadd.f32 %v7713_v10, %v7706_v28 }
 0xbc7   : > { %v7717_v50 = vpop.permute.xlu1 %7716  ;;  %v7709_v19 = vpop.permute.xlu0 %7708 }
 0xbc8   : > { %v7711_v53 = vadd.f32 %v7709_v19, %v7701_v14 }
 0xbca   : > { %v7719_v0 = vadd.f32 %v7717_v50, %v7711_v53 }
 0xbcb   : > { %v7725_v36 = vpop.permute.xlu1 %7724  ;;  %v7721_v61 = vpop.permute.xlu0 %7720 }
 0xbcc   : > { %v7727_v63 = vadd.f32 %v7725_v36, %v7719_v0  ;;  %v7723_v21 = vadd.f32 %v7721_v61, %v7715_v39 }
 0xbce   : > { %v7733_v5 = vadd.f32 %v7732_v3, %v7727_v63  ;;  %v7729_v47 = vadd.f32 %v7728_v35, %v7723_v21 }
 0xbd0   : > { %7734 = vst.msk [vmem:[#allocation4 + $0x1] sm:$0x1] %vm7730_vm12, %v7733_v5  ;;  %7731 = vst.msk [vmem:[#allocation4] sm:$0x1] %vm7730_vm12, %v7729_v47 }
 0xbd1 PF: > { %p10309_p4 = scmp.ne.s32.totalorder %s12058_s22, 5 }
 0xbd3   : > { %7773 = sbr.rel (%p10309_p4) target bundleno = 3713 (0xe81), region = 140 }
 0xbda   : > { %v7813_v8 = vld [vmem:[#allocation4] sm:$0x1]  ;;  %v7815_v11 = vld [vmem:[#allocation4 + $0x1] sm:$0x1]  ;;  %v11828_v32 = vld [vmem:[%s16617_s15 + $0x4] ss:$8 sps:$4 sm:$0xff]   ;;  %v7825_v15 = vlaneseq }
 0xbdb   : > { %v7814_v58 = vmul.f32 0.00048828125, %v7813_v8  ;;  %v7816_v26 = vmul.f32 0.00048828125, %v7815_v11  ;;  %v11830_v44 = vld [vmem:[%s16617_s15] ss:$8 sps:$4 sm:$0xff]   ;;  %8141 = vmatprep.subr.bf16.mxu0 %v11828_v32  ;;  %11133 = vmatprep.subr.bf16.mxu1 %v11828_v32  ;;  %v11831_v48 = vld [vmem:[%s16617_s15 + $0x14] ss:$8 sps:$4 sm:$0xff]  }
 0xbdc   : > { %8142 = vmatpush1.bf16.msra.mxu0 %v11830_v44  ;;  %11141 = vmatpush1.bf16.msra.mxu1 %v11830_v44  ;;  %v11833_v51 = vld [vmem:[%s16617_s15 + $0x10] ss:$8 sps:$4 sm:$0xff]   ;;  %v11834_v31 = vld [vmem:[%s16617_s15 + $0x24] ss:$8 sps:$4 sm:$0xff]   ;;  %v11836_v57 = vld [vmem:[%s16617_s15 + $0x20] ss:$8 sps:$4 sm:$0xff]  }
 0xbdd   : > { %v7817_v29 = vmul.f32 %v7814_v58, %v7814_v58  ;;  %8143 = vmatprep.subr.bf16.mxu0 %v11831_v48  ;;  %11134 = vmatprep.subr.bf16.mxu1 %v11831_v48  ;;  %v11837_v7 = vld [vmem:[%s16617_s15 + $0x34] ss:$8 sps:$4 sm:$0xff]   ;;  %v11839_v41 = vld [vmem:[%s16617_s15 + $0x30] ss:$8 sps:$4 sm:$0xff]   ;;  %v7826_v20 = vshrl.u32 %v7825_v15, 7  ;;  %v12096_v22 = vmov 0  }
 0xbde   : > { %v11840_v30 = vld [vmem:[%s16617_s15 + $0x44] ss:$8 sps:$4 sm:$0xff]   ;;  %v7811_v43 = vld [vmem:[%s16615_s13] sm:$0x1]  ;;  %v11843_v18 = vld [vmem:[%s16617_s15 + $0x54] ss:$8 sps:$4 sm:$0xff]   ;;  %8173 = vmatprep.mubr.bf16.mxu0 %v12096_v22  ;;  %8253 = vmatprep.mubr.bf16.mxu1 %v12096_v22 }
 0xbdf   : > { %v7818_v38 = vsub.f32 %v7816_v26, %v7817_v29  ;;  %v11842_v6 = vld [vmem:[%s16617_s15 + $0x40] ss:$8 sps:$4 sm:$0xff]   ;;  %v15426_v13 = vsub.s32 0, %v7826_v20  ;;  %v11845_v34 = vld [vmem:[%s16617_s15 + $0x50] ss:$8 sps:$4 sm:$0xff]   ;;  %s12097_s24 = smov 32  }
 0xbe0   : > { %8144 = vmatpush1.bf16.msra.mxu0 %v11833_v51  ;;  %11142 = vmatpush1.bf16.msra.mxu1 %v11833_v51  ;;  %v7812_v4 = vld [vmem:[%s16616_s14] sm:$0x1]  ;;  %v11846_v52 = vld [vmem:[%s16617_s15 + $0x64] ss:$8 sps:$4 sm:$0xff]   ;;  %s12098_s29 = smov 96   ;;  %s12099_s2 = smov 64  }
 0xbe1   : > { %v7819_v56 = vadd.f32 0.8, %v7818_v38  ;;  %8145 = vmatprep.subr.bf16.mxu0 %v11834_v31  ;;  %11135 = vmatprep.subr.bf16.mxu1 %v11834_v31  ;;  %v11848_v60 = vld [vmem:[%s16617_s15 + $0x60] ss:$8 sps:$4 sm:$0xff]   ;;  %v11849_v24 = vld [vmem:[%s16617_s15 + $0x74] ss:$8 sps:$4 sm:$0xff]  }
 0xbe2   : > { %v11851_v17 = vld [vmem:[%s16617_s15 + $0x70] ss:$8 sps:$4 sm:$0xff]   ;;  %s7774_s3 = sshra.s32 %s12254_s26, 3  ;;  %vm7838_vm13 = vcmask 261120   ;;  %vm7840_vm14 = vcmask 523264   ;;  %vm7842_vm15 = vcmask 785408  }
 0xbe3   : > { %11852 = vrsqrt.f32 %v7819_v56  ;;  %s10378_s0 = sshll.u32 %s7774_s3, 5  ;;  %p10328_p5 = scmp.ne.s32.totalorder %s12054_s1, 0 }
 0xbe4   : > { %8146 = vmatpush1.bf16.msra.mxu0 %v11836_v57  ;;  %11143 = vmatpush1.bf16.msra.mxu1 %v11836_v57  ;;  %s15467_s25 = scalar_lea.vmem [#allocation2], %s10378_s0 }
 0xbe5   : > { %8147 = vmatprep.subr.bf16.mxu0 %v11837_v7  ;;  %11136 = vmatprep.subr.bf16.mxu1 %v11837_v7  ;;  %v7779_v27 = vld [vmem:[%s15467_s25] sm:$0xff] }
 0xbe6   : > { %v7780_v23 = vld [vmem:[%s15467_s25 + $0x20] sm:$0xff] }
 0xbe7   : > { %v7795_v10 = vld [vmem:[%s15467_s25 + $0x200] sm:$0xff] }
 0xbe8   : > { %8148 = vmatpush1.bf16.msra.mxu0 %v11839_v41  ;;  %11144 = vmatpush1.bf16.msra.mxu1 %v11839_v41  ;;  %v7796_v25 = vld [vmem:[%s15467_s25 + $0x220] sm:$0xff] }
 0xbe9   : > { %8149 = vmatprep.subr.bf16.mxu0 %v11840_v30  ;;  %11137 = vmatprep.subr.bf16.mxu1 %v11840_v30  ;;  %v7781_v28 = vld [vmem:[%s15467_s25 + $0x40] sm:$0xff] }
 0xbea   : > { %v7782_v19 = vld [vmem:[%s15467_s25 + $0x60] sm:$0xff] }
 0xbeb   : > { %v7797_v53 = vld [vmem:[%s15467_s25 + $0x240] sm:$0xff] }
 0xbec   : > { %8150 = vmatpush1.bf16.msra.mxu0 %v11842_v6  ;;  %11145 = vmatpush1.bf16.msra.mxu1 %v11842_v6  ;;  %v7798_v0 = vld [vmem:[%s15467_s25 + $0x260] sm:$0xff] }
 0xbed   : > { %v11853_v40 = vpop.eup %11852  ;;  %8151 = vmatprep.subr.bf16.mxu0 %v11843_v18  ;;  %11138 = vmatprep.subr.bf16.mxu1 %v11843_v18  ;;  %v7784_v6 = vld [vmem:[%s15467_s25 + $0xa0] sm:$0xff] }
 0xbee   : > { %v7821_v62 = vmul.f32 %v11853_v40, %v7811_v43  ;;  %v7783_v43 = vld [vmem:[%s15467_s25 + $0x80] sm:$0xff] }
 0xbf0   : > { %v7828_v55 = vrot.slane %v7821_v62, %v15426_v13  ;;  %v7822_v42 = vmul.f32 %v7821_v62, %v7814_v58  ;;  %8152 = vmatpush1.bf16.msra.mxu0 %v11845_v34  ;;  %11146 = vmatpush1.bf16.msra.mxu1 %v11845_v34 }
 0xbf1   : > { %8153 = vmatprep.subr.bf16.mxu0 %v11846_v52  ;;  %11139 = vmatprep.subr.bf16.mxu1 %v11846_v52 }
 0xbf2   : > { %7829 = vrot.lane.b32.xlu0 %v7828_v55, %s12097_s24  ;;  %7835 = vrot.lane.b32.xlu1 %v7828_v55, %s12098_s29  ;;  %v7823_v54 = vsub.f32 %v7812_v4, %v7822_v42  ;;  %v7800_v4 = vld [vmem:[%s15467_s25 + $0x2a0] sm:$0xff] }
 0xbf4   : > { %v7848_v2 = vrot.slane %v7823_v54, %v15426_v13  ;;  %8154 = vmatpush1.bf16.msra.mxu0 %v11848_v60  ;;  %11147 = vmatpush1.bf16.msra.mxu1 %v11848_v60 }
 0xbf5   : > { %8155 = vmatprep.subr.bf16.mxu0 %v11849_v24  ;;  %11140 = vmatprep.subr.bf16.mxu1 %v11849_v24 }
 0xbf6   : > { %7832 = vrot.lane.b32.xlu0 %v7828_v55, %s12099_s2  ;;  %7849 = vrot.lane.b32.xlu1 %v7848_v2, %s12097_s24 }
 0xbf8   : > { %8156 = vmatpush1.bf16.msra.mxu0 %v11851_v17  ;;  %11148 = vmatpush1.bf16.msra.mxu1 %v11851_v17 }
 0xbfa   : > { %7852 = vrot.lane.b32.xlu0 %v7848_v2, %s12099_s2  ;;  %7855 = vrot.lane.b32.xlu1 %v7848_v2, %s12098_s29 }
 0xc64   : > { %v7830_v9 = vpop.permute.xlu0 %7829  ;;  %v7836_v49 = vpop.permute.xlu1 %7835 }
 0xc65   : > { %v7839_v33 = vsel %vm7838_vm13, %v7821_v62, %v7830_v9  ;;  %v7799_v62 = vld [vmem:[%s15467_s25 + $0x280] sm:$0xff] }
 0xc68   : > { %v7833_v46 = vpop.permute.xlu0 %7832  ;;  %v7850_v12 = vpop.permute.xlu1 %7849 }
 0xc69   : > { %v7841_v59 = vsel %vm7840_vm14, %v7839_v33, %v7833_v46  ;;  %v7858_v16 = vsel %vm7838_vm13, %v7823_v54, %v7850_v12 }
 0xc6a   : > { %v7843_v37 = vsel %vm7842_vm15, %v7841_v59, %v7836_v49 }
 0xc6b   : > { %v15465_v45 = vrot.slane %v7843_v37, %v15426_v13  ;;  %v7785_v37 = vld [vmem:[%s15467_s25 + $0xc0] sm:$0xff] }
 0xc6c   : > { %v7853_v1 = vpop.permute.xlu0 %7852  ;;  %v7856_v14 = vpop.permute.xlu1 %7855 }
 0xc6d   : > { %v7859_v50 = vsel %vm7840_vm14, %v7858_v16, %v7853_v1  ;;  %v7865_v3 = vmul.f32 %v15465_v45, %v7779_v27  ;;  %v7866_v35 = vmul.f32 %v15465_v45, %v7780_v23  ;;  %v7881_v61 = vmul.f32 %v15465_v45, %v7795_v10  ;;  %v7786_v27 = vld [vmem:[%s15467_s25 + $0xe0] sm:$0xff] }
 0xc6e   : > { %v7860_v39 = vsel %vm7842_vm15, %v7859_v50, %v7856_v14  ;;  %v7882_v63 = vmul.f32 %v15465_v45, %v7796_v25  ;;  %v7867_v21 = vmul.f32 %v15465_v45, %v7781_v28  ;;  %v7868_v5 = vmul.f32 %v15465_v45, %v7782_v19  ;;  %v7801_v14 = vld [vmem:[%s15467_s25 + $0x2c0] sm:$0xff] }
 0xc6f   : > { %v15481_v36 = vrot.slane %v7860_v39, %v15426_v13  ;;  %v7883_v47 = vmul.f32 %v15465_v45, %v7797_v53  ;;  %v7884_v8 = vmul.f32 %v15465_v45, %v7798_v0  ;;  %v7869_v42 = vmul.f32 %v15465_v45, %v7783_v43  ;;  %v7802_v10 = vld [vmem:[%s15467_s25 + $0x2e0] sm:$0xff] }
 0xc70   : > { %v7870_v52 = vmul.f32 %v15465_v45, %v7784_v6  ;;  %v7885_v54 = vmul.f32 %v15465_v45, %v7799_v62  ;;  %v7886_v60 = vmul.f32 %v15465_v45, %v7800_v4  ;;  %v7871_v50 = vmul.f32 %v15465_v45, %v7785_v37  ;;  %v7789_v62 = vld [vmem:[%s15467_s25 + $0x140] sm:$0xff] }
 0xc71   : > { %v7901_v11 = vadd.f32 %v15481_v36, %v7865_v3  ;;  %v7902_v58 = vadd.f32 %v15481_v36, %v7866_v35  ;;  %v7917_v26 = vadd.f32 %v15481_v36, %v7881_v61  ;;  %v7918_v32 = vadd.f32 %v15481_v36, %v7882_v63  ;;  %v7790_v4 = vld [vmem:[%s15467_s25 + $0x160] sm:$0xff] }
 0xc72   : > { %v7903_v29 = vadd.f32 %v15481_v36, %v7867_v21  ;;  %v7904_v44 = vadd.f32 %v15481_v36, %v7868_v5  ;;  %v7919_v48 = vadd.f32 %v15481_v36, %v7883_v47  ;;  %v7920_v38 = vadd.f32 %v15481_v36, %v7884_v8 }
 0xc73   : > { %vm7933_vm0 = vcmp.ge.f32.partialorder %v7901_v11, 0.0  ;;  %vm7934_vm1 = vcmp.ge.f32.partialorder %v7902_v58, 0.0  ;;  %v7965_v51 = vmul.f32 0.2, %v7901_v11  ;;  %v7966_v31 = vmul.f32 0.2, %v7902_v58 }
 0xc74   : > { %vm7949_vm2 = vcmp.ge.f32.partialorder %v7917_v26, 0.0  ;;  %vm7950_vm3 = vcmp.ge.f32.partialorder %v7918_v32, 0.0  ;;  %v7981_v56 = vmul.f32 0.2, %v7917_v26  ;;  %v7982_v57 = vmul.f32 0.2, %v7918_v32 }
 0xc75   : > { %v7997_v15 = vsel %vm7933_vm0, %v7901_v11, %v7965_v51  ;;  %v7998_v7 = vsel %vm7934_vm1, %v7902_v58, %v7966_v31  ;;  %v7967_v18 = vmul.f32 0.2, %v7903_v29  ;;  %v7968_v40 = vmul.f32 0.2, %v7904_v44  ;;  %v7787_v11 = vld [vmem:[%s15467_s25 + $0x100] sm:$0xff] }
 0xc76   : > { %v8029_v41 = vpack.c.bf16 %v7998_v7, %v7997_v15  ;;  %v8013_v20 = vsel %vm7949_vm2, %v7917_v26, %v7981_v56  ;;  %v8014_v30 = vsel %vm7950_vm3, %v7918_v32, %v7982_v57  ;;  %vm7935_vm4 = vcmp.ge.f32.partialorder %v7903_v29, 0.0  ;;  %v7788_v58 = vld [vmem:[%s15467_s25 + $0x120] sm:$0xff] }
 0xc77   : > { %v8037_v13 = vpack.c.bf16 %v8014_v30, %v8013_v20  ;;  %vm7936_vm5 = vcmp.ge.f32.partialorder %v7904_v44, 0.0  ;;  %v7983_v34 = vmul.f32 0.2, %v7919_v48  ;;  %v7984_v55 = vmul.f32 0.2, %v7920_v38 }
 0xc78   : > { %8174 = vmatmul.mubr.bf16.vlgmr.msra.gmra.mrb[0].mxu0 %v8029_v41  ;;  %vm7951_vm6 = vcmp.ge.f32.partialorder %v7919_v48, 0.0  ;;  %vm7952_vm7 = vcmp.ge.f32.partialorder %v7920_v38, 0.0  ;;  %v7999_v2 = vsel %vm7935_vm4, %v7903_v29, %v7967_v18  ;;  %v8000_v24 = vsel %vm7936_vm5, %v7904_v44, %v7968_v40  ;;  %v7803_v44 = vld [vmem:[%s15467_s25 + $0x300] sm:$0xff] }
 0xc79   : > { %8254 = vmatmul.mubr.bf16.vlgmr.msra.gmra.mrb[0].mxu1 %v8037_v13  ;;  %8183 = vmatprep.mubr.bf16.mxu0 %v12096_v22  ;;  %v7905_v17 = vadd.f32 %v15481_v36, %v7869_v42  ;;  %v7906_v9 = vadd.f32 %v15481_v36, %v7870_v52  ;;  %v8015_v49 = vsel %vm7951_vm6, %v7919_v48, %v7983_v34  ;;  %v7804_v48 = vld [vmem:[%s15467_s25 + $0x320] sm:$0xff] }
 0xc7a   : > { %8263 = vmatprep.mubr.bf16.mxu1 %v12096_v22  ;;  %v8016_v33 = vsel %vm7952_vm7, %v7920_v38, %v7984_v55  ;;  %v7921_v46 = vadd.f32 %v15481_v36, %v7885_v54  ;;  %v7922_v12 = vadd.f32 %v15481_v36, %v7886_v60  ;;  %v8030_v59 = vpack.c.bf16 %v8000_v24, %v7999_v2  ;;  %v7805_v52 = vld [vmem:[%s15467_s25 + $0x340] sm:$0xff] }
 0xc7b   : > { %v8038_v23 = vpack.c.bf16 %v8016_v33, %v8015_v49  ;;  %v7969_v16 = vmul.f32 0.2, %v7905_v17  ;;  %v7970_v1 = vmul.f32 0.2, %v7906_v9  ;;  %vm7937_vm8 = vcmp.ge.f32.partialorder %v7905_v17, 0.0  ;;  %v7806_v54 = vld [vmem:[%s15467_s25 + $0x360] sm:$0xff] }
 0xc7c   : > { %vm7938_vm9 = vcmp.ge.f32.partialorder %v7906_v9, 0.0  ;;  %v7985_v25 = vmul.f32 0.2, %v7921_v46  ;;  %v7986_v28 = vmul.f32 0.2, %v7922_v12  ;;  %vm7953_vm10 = vcmp.ge.f32.partialorder %v7921_v46, 0.0 }
 0xc7d   : > { %vm7954_vm11 = vcmp.ge.f32.partialorder %v7922_v12, 0.0  ;;  %v7872_v19 = vmul.f32 %v15465_v45, %v7786_v27  ;;  %v7887_v53 = vmul.f32 %v15465_v45, %v7801_v14  ;;  %v7888_v0 = vmul.f32 %v15465_v45, %v7802_v10  ;;  %v7791_v14 = vld [vmem:[%s15467_s25 + $0x180] sm:$0xff] }
 0xc7e   : > { %v8001_v39 = vsel %vm7937_vm8, %v7905_v17, %v7969_v16  ;;  %v8002_v3 = vsel %vm7938_vm9, %v7906_v9, %v7970_v1  ;;  %v7907_v35 = vadd.f32 %v15481_v36, %v7871_v50  ;;  %v8017_v63 = vsel %vm7953_vm10, %v7921_v46, %v7985_v25  ;;  %v7792_v10 = vld [vmem:[%s15467_s25 + $0x1a0] sm:$0xff] }
 0xc7f   : > { %v7908_v61 = vadd.f32 %v15481_v36, %v7872_v19  ;;  %v8018_v21 = vsel %vm7954_vm11, %v7922_v12, %v7986_v28  ;;  %v7923_v5 = vadd.f32 %v15481_v36, %v7887_v53  ;;  %v7924_v47 = vadd.f32 %v15481_v36, %v7888_v0  ;;  %v7807_v19 = vld [vmem:[%s15467_s25 + $0x380] sm:$0xff] }
 0xc80   : > { %8184 = vmatmul.mubr.bf16.gmra.mrb[4].mxu0 %v8030_v59  ;;  %v8031_v8 = vpack.c.bf16 %v8002_v3, %v8001_v39  ;;  %v8039_v26 = vpack.c.bf16 %v8018_v21, %v8017_v63  ;;  %v7971_v32 = vmul.f32 0.2, %v7907_v35  ;;  %vm7939_vm12 = vcmp.ge.f32.partialorder %v7907_v35, 0.0  ;;  %v7808_v53 = vld [vmem:[%s15467_s25 + $0x3a0] sm:$0xff] }
 0xc81   : > { %8264 = vmatmul.mubr.bf16.gmra.mrb[4].mxu1 %v8038_v23  ;;  %8193 = vmatprep.mubr.bf16.mxu0 %v12096_v22  ;;  %v7972_v29 = vmul.f32 0.2, %v7908_v61  ;;  %vm7940_vm13 = vcmp.ge.f32.partialorder %v7908_v61, 0.0  ;;  %v7987_v38 = vmul.f32 0.2, %v7923_v5  ;;  %vm7955_vm14 = vcmp.ge.f32.partialorder %v7923_v5, 0.0 }
 0xc82   : > { %8273 = vmatprep.mubr.bf16.mxu1 %v12096_v22  ;;  %v7988_v51 = vmul.f32 0.2, %v7924_v47  ;;  %vm7956_vm15 = vcmp.ge.f32.partialorder %v7924_v47, 0.0  ;;  %v7873_v31 = vmul.f32 %v15465_v45, %v7787_v11  ;;  %v7874_v56 = vmul.f32 %v15465_v45, %v7788_v58 }
 0xc83   : > { %v7889_v57 = vmul.f32 %v15465_v45, %v7803_v44  ;;  %v7890_v15 = vmul.f32 %v15465_v45, %v7804_v48  ;;  %v8003_v7 = vsel %vm7939_vm12, %v7907_v35, %v7971_v32  ;;  %v8004_v41 = vsel %vm7940_vm13, %v7908_v61, %v7972_v29  ;;  %v7793_v44 = vld [vmem:[%s15467_s25 + $0x1c0] sm:$0xff] }
 0xc84   : > { %v7909_v20 = vadd.f32 %v15481_v36, %v7873_v31  ;;  %v7910_v30 = vadd.f32 %v15481_v36, %v7874_v56  ;;  %v8019_v43 = vsel %vm7955_vm14, %v7923_v5, %v7987_v38  ;;  %v8020_v6 = vsel %vm7956_vm15, %v7924_v47, %v7988_v51  ;;  %v7794_v48 = vld [vmem:[%s15467_s25 + $0x1e0] sm:$0xff] }
 0xc85   : > { %v7925_v13 = vadd.f32 %v15481_v36, %v7889_v57  ;;  %v7926_v18 = vadd.f32 %v15481_v36, %v7890_v15  ;;  %v8032_v40 = vpack.c.bf16 %v8004_v41, %v8003_v7  ;;  %v8040_v34 = vpack.c.bf16 %v8020_v6, %v8019_v43  ;;  %v7809_v56 = vld [vmem:[%s15467_s25 + $0x3c0] sm:$0xff] }
 0xc86   : > { %v7973_v55 = vmul.f32 0.2, %v7909_v20  ;;  %v7974_v42 = vmul.f32 0.2, %v7910_v30  ;;  %vm7941_vm0 = vcmp.ge.f32.partialorder %v7909_v20, 0.0  ;;  %vm7942_vm1 = vcmp.ge.f32.partialorder %v7910_v30, 0.0 }
 0xc87   : > { %v7989_v60 = vmul.f32 0.2, %v7925_v13  ;;  %v7990_v2 = vmul.f32 0.2, %v7926_v18  ;;  %vm7957_vm2 = vcmp.ge.f32.partialorder %v7925_v13, 0.0  ;;  %vm7958_vm3 = vcmp.ge.f32.partialorder %v7926_v18, 0.0 }
 0xc88   : > { %8194 = vmatmul.mubr.bf16.gmra.mrb[8].mxu0 %v8031_v8  ;;  %v7875_v24 = vmul.f32 %v15465_v45, %v7789_v62  ;;  %v7876_v17 = vmul.f32 %v15465_v45, %v7790_v4  ;;  %v7891_v9 = vmul.f32 %v15465_v45, %v7805_v52  ;;  %v7892_v49 = vmul.f32 %v15465_v45, %v7806_v54  ;;  %v7810_v57 = vld [vmem:[%s15467_s25 + $0x3e0] sm:$0xff] }
 0xc89   : > { %8274 = vmatmul.mubr.bf16.gmra.mrb[8].mxu1 %v8039_v26  ;;  %8203 = vmatprep.mubr.bf16.mxu0 %v12096_v22  ;;  %v8005_v33 = vsel %vm7941_vm0, %v7909_v20, %v7973_v55  ;;  %v8006_v46 = vsel %vm7942_vm1, %v7910_v30, %v7974_v42  ;;  %v8021_v37 = vsel %vm7957_vm2, %v7925_v13, %v7989_v60 }
 0xc8a   : > { %8283 = vmatprep.mubr.bf16.mxu1 %v12096_v22  ;;  %v7911_v12 = vadd.f32 %v15481_v36, %v7875_v24  ;;  %v7912_v59 = vadd.f32 %v15481_v36, %v7876_v17  ;;  %v8022_v27 = vsel %vm7958_vm3, %v7926_v18, %v7990_v2  ;;  %v7927_v23 = vadd.f32 %v15481_v36, %v7891_v9 }
 0xc8b   : > { %v7928_v16 = vadd.f32 %v15481_v36, %v7892_v49  ;;  %v8033_v1 = vpack.c.bf16 %v8006_v46, %v8005_v33  ;;  %v8041_v25 = vpack.c.bf16 %v8022_v27, %v8021_v37  ;;  %v7877_v3 = vmul.f32 %v15465_v45, %v7791_v14 }
 0xc8c   : > { %v7975_v28 = vmul.f32 0.2, %v7911_v12  ;;  %v7976_v50 = vmul.f32 0.2, %v7912_v59  ;;  %vm7943_vm4 = vcmp.ge.f32.partialorder %v7911_v12, 0.0  ;;  %vm7944_vm5 = vcmp.ge.f32.partialorder %v7912_v59, 0.0 }
 0xc8d   : > { %v7991_v0 = vmul.f32 0.2, %v7927_v23  ;;  %v7992_v39 = vmul.f32 0.2, %v7928_v16  ;;  %vm7959_vm6 = vcmp.ge.f32.partialorder %v7927_v23, 0.0  ;;  %vm7960_vm7 = vcmp.ge.f32.partialorder %v7928_v16, 0.0 }
 0xc8e   : > { %v7878_v35 = vmul.f32 %v15465_v45, %v7792_v10  ;;  %v7893_v61 = vmul.f32 %v15465_v45, %v7807_v19  ;;  %v7894_v63 = vmul.f32 %v15465_v45, %v7808_v53  ;;  %v8007_v21 = vsel %vm7943_vm4, %v7911_v12, %v7975_v28 }
 0xc8f   : > { %v8008_v5 = vsel %vm7944_vm5, %v7912_v59, %v7976_v50  ;;  %v7913_v47 = vadd.f32 %v15481_v36, %v7877_v3  ;;  %v8023_v11 = vsel %vm7959_vm6, %v7927_v23, %v7991_v0  ;;  %v8024_v58 = vsel %vm7960_vm7, %v7928_v16, %v7992_v39 }
 0xc90   : > { %8204 = vmatmul.mubr.bf16.gmra.mrb[12].mxu0 %v8032_v40  ;;  %v7914_v8 = vadd.f32 %v15481_v36, %v7878_v35  ;;  %v7929_v26 = vadd.f32 %v15481_v36, %v7893_v61  ;;  %v7930_v32 = vadd.f32 %v15481_v36, %v7894_v63  ;;  %v8034_v29 = vpack.c.bf16 %v8008_v5, %v8007_v21 }
 0xc91   : > { %8284 = vmatmul.mubr.bf16.gmra.mrb[12].mxu1 %v8040_v34  ;;  %8213 = vmatprep.mubr.bf16.mxu0 %v12096_v22  ;;  %v8042_v38 = vpack.c.bf16 %v8024_v58, %v8023_v11  ;;  %v7977_v51 = vmul.f32 0.2, %v7913_v47  ;;  %vm7945_vm8 = vcmp.ge.f32.partialorder %v7913_v47, 0.0  ;;  %v7879_v41 = vmul.f32 %v15465_v45, %v7793_v44 }
 0xc92   : > { %8293 = vmatprep.mubr.bf16.mxu1 %v12096_v22  ;;  %v7978_v31 = vmul.f32 0.2, %v7914_v8  ;;  %vm7946_vm9 = vcmp.ge.f32.partialorder %v7914_v8, 0.0  ;;  %v7993_v15 = vmul.f32 0.2, %v7929_v26  ;;  %vm7961_vm10 = vcmp.ge.f32.partialorder %v7929_v26, 0.0 }
 0xc93   : > { %v7994_v7 = vmul.f32 0.2, %v7930_v32  ;;  %vm7962_vm11 = vcmp.ge.f32.partialorder %v7930_v32, 0.0  ;;  %v7880_v20 = vmul.f32 %v15465_v45, %v7794_v48  ;;  %v7895_v30 = vmul.f32 %v15465_v45, %v7809_v56 }
 0xc94   : > { %v7896_v43 = vmul.f32 %v15465_v45, %v7810_v57  ;;  %v8009_v6 = vsel %vm7945_vm8, %v7913_v47, %v7977_v51  ;;  %v8010_v13 = vsel %vm7946_vm9, %v7914_v8, %v7978_v31  ;;  %v7915_v18 = vadd.f32 %v15481_v36, %v7879_v41 }
 0xc95   : > { %v7916_v40 = vadd.f32 %v15481_v36, %v7880_v20  ;;  %v8025_v62 = vsel %vm7961_vm10, %v7929_v26, %v7993_v15  ;;  %v8026_v4 = vsel %vm7962_vm11, %v7930_v32, %v7994_v7  ;;  %v7931_v34 = vadd.f32 %v15481_v36, %v7895_v30 }
 0xc96   : > { %v7932_v55 = vadd.f32 %v15481_v36, %v7896_v43  ;;  %v8035_v42 = vpack.c.bf16 %v8010_v13, %v8009_v6  ;;  %v8043_v52 = vpack.c.bf16 %v8026_v4, %v8025_v62  ;;  %v7979_v54 = vmul.f32 0.2, %v7915_v18 }
 0xc97   : > { %v7980_v60 = vmul.f32 0.2, %v7916_v40  ;;  %vm7947_vm12 = vcmp.ge.f32.partialorder %v7915_v18, 0.0  ;;  %vm7948_vm13 = vcmp.ge.f32.partialorder %v7916_v40, 0.0  ;;  %v7995_v45 = vmul.f32 0.2, %v7931_v34 }
 0xc98   : > { %8214 = vmatmul.mubr.bf16.gmra.mrb[16].mxu0 %v8033_v1  ;;  %v7996_v2 = vmul.f32 0.2, %v7932_v55  ;;  %vm7963_vm14 = vcmp.ge.f32.partialorder %v7931_v34, 0.0  ;;  %vm7964_vm15 = vcmp.ge.f32.partialorder %v7932_v55, 0.0  ;;  %v8011_v24 = vsel %vm7947_vm12, %v7915_v18, %v7979_v54 }
 0xc99   : > { %8294 = vmatmul.mubr.bf16.gmra.mrb[16].mxu1 %v8041_v25  ;;  %8223 = vmatprep.mubr.bf16.mxu0 %v12096_v22  ;;  %v8012_v17 = vsel %vm7948_vm13, %v7916_v40, %v7980_v60  ;;  %v8027_v9 = vsel %vm7963_vm14, %v7931_v34, %v7995_v45 }
 0xc9a   : > { %8303 = vmatprep.mubr.bf16.mxu1 %v12096_v22  ;;  %v8028_v36 = vsel %vm7964_vm15, %v7932_v55, %v7996_v2  ;;  %v8036_v49 = vpack.c.bf16 %v8012_v17, %v8011_v24 }
 0xc9b   : > { %v8044_v33 = vpack.c.bf16 %v8028_v36, %v8027_v9 }
 0xca0   : > { %8224 = vmatmul.mubr.bf16.gmra.mrb[20].mxu0 %v8034_v29 }
 0xca1   : > { %8304 = vmatmul.mubr.bf16.gmra.mrb[20].mxu1 %v8042_v38  ;;  %8233 = vmatprep.mubr.bf16.mxu0 %v12096_v22 }
 0xca2   : > { %8313 = vmatprep.mubr.bf16.mxu1 %v12096_v22 }
 0xca8   : > { %8234 = vmatmul.mubr.bf16.gmra.mrb[24].mxu0 %v8035_v42 }
 0xca9   : > { %8314 = vmatmul.mubr.bf16.gmra.mrb[24].mxu1 %v8043_v52  ;;  %8243 = vmatprep.mubr.bf16.mxu0 %v12096_v22 }
 0xcaa   : > { %8323 = vmatprep.mubr.bf16.mxu1 %v12096_v22 }
 0xcb0   : > { %8244 = vmatmul.mubr.bf16.gmra.mrb[28].mxu0 %v8036_v49 }
 0xcb1   : > { %8324 = vmatmul.mubr.bf16.gmra.mrb[28].mxu1 %v8044_v33 }
 0xd4b   : > { %v15584_v46 = vpop.f32.mrb[0].mxu0 }
 0xd4c   : > { %16776 = vst [vmem:[#allocation40_spill] sm:$0xff] %v15584_v46  ;;  %v15586_v12 = vpop.f32.mrb[0].mxu1  ;;  %v15588_v59 = vpop.f32.mrb[1].mxu0 }
 0xd4d   : > { %v15590_v37 = vpop.f32.mrb[1].mxu1  ;;  %v15592_v27 = vpop.f32.mrb[2].mxu0 }
 0xd4e   : > { %16777 = vst [vmem:[#allocation41_spill] sm:$0xff] %v15592_v27  ;;  %v15594_v23 = vpop.f32.mrb[2].mxu1  ;;  %v15596_v22 = vpop.f32.mrb[3].mxu0 }
 0xd4f   : > { %v15598_v16 = vpop.f32.mrb[3].mxu1 }
 0xd53   : > { %v15600_v1 = vpop.f32.mrb[4].mxu0 }
 0xd54   : > { %16778 = vst [vmem:[#allocation42_spill] sm:$0xff] %v15600_v1  ;;  %v15602_v14 = vpop.f32.mrb[4].mxu1  ;;  %v15604_v10 = vpop.f32.mrb[5].mxu0 }
 0xd55   : > { %v15606_v25 = vpop.f32.mrb[5].mxu1  ;;  %v15608_v28 = vpop.f32.mrb[6].mxu0 }
 0xd56   : > { %v15610_v50 = vpop.f32.mrb[6].mxu1  ;;  %v15612_v19 = vpop.f32.mrb[7].mxu0 }
 0xd57   : > { %v15614_v53 = vpop.f32.mrb[7].mxu1 }
 0xd5b   : > { %v15616_v0 = vpop.f32.mrb[8].mxu0 }
 0xd5c   : > { %v15618_v39 = vpop.f32.mrb[8].mxu1  ;;  %v15620_v3 = vpop.f32.mrb[9].mxu0 }
 0xd5d   : > { %v15622_v35 = vpop.f32.mrb[9].mxu1  ;;  %v15624_v61 = vpop.f32.mrb[10].mxu0 }
 0xd5e   : > { %16779 = vst [vmem:[#allocation43_spill] sm:$0xff] %v15624_v61  ;;  %v15626_v63 = vpop.f32.mrb[10].mxu1  ;;  %v15628_v21 = vpop.f32.mrb[11].mxu0 }
 0xd5f   : > { %v15630_v5 = vpop.f32.mrb[11].mxu1 }
 0xd60   : > { %16780 = vst [vmem:[#allocation44_spill] sm:$0xff] %v15630_v5 }
 0xd63   : > { %v15632_v47 = vpop.f32.mrb[12].mxu0 }
 0xd64   : > { %16781 = vst [vmem:[#allocation45_spill] sm:$0xff] %v15632_v47  ;;  %v15634_v8 = vpop.f32.mrb[12].mxu1  ;;  %v15636_v11 = vpop.f32.mrb[13].mxu0 }
 0xd65   : > { %16782 = vst [vmem:[#allocation46_spill] sm:$0xff] %v15634_v8  ;;  %v15638_v58 = vpop.f32.mrb[13].mxu1  ;;  %v15640_v26 = vpop.f32.mrb[14].mxu0 }
 0xd66   : > { %16783 = vst [vmem:[#allocation47_spill] sm:$0xff] %v15638_v58  ;;  %16784 = vst [vmem:[#allocation48_spill] sm:$0xff] %v15640_v26  ;;  %v15642_v32 = vpop.f32.mrb[14].mxu1  ;;  %v15644_v29 = vpop.f32.mrb[15].mxu0 }
 0xd67   : > { %16785 = vst [vmem:[#allocation49_spill] sm:$0xff] %v15642_v32  ;;  %v15646_v44 = vpop.f32.mrb[15].mxu1 }
 0xd68   : > { %16786 = vst [vmem:[#allocation50_spill] sm:$0xff] %v15646_v44 }
 0xd6b   : > { %v15648_v48 = vpop.f32.mrb[16].mxu0 }
 0xd6c   : > { %16787 = vst [vmem:[#allocation51_spill] sm:$0xff] %v15648_v48  ;;  %v15650_v38 = vpop.f32.mrb[16].mxu1  ;;  %v15652_v51 = vpop.f32.mrb[17].mxu0 }
 0xd6d   : > { %16788 = vst [vmem:[#allocation52_spill] sm:$0xff] %v15650_v38  ;;  %v15654_v31 = vpop.f32.mrb[17].mxu1  ;;  %v15656_v56 = vpop.f32.mrb[18].mxu0 }
 0xd6e   : > { %16789 = vst [vmem:[#allocation53_spill] sm:$0xff] %v15654_v31  ;;  %v15658_v57 = vpop.f32.mrb[18].mxu1  ;;  %v15660_v15 = vpop.f32.mrb[19].mxu0 }
 0xd6f   : > { %16790 = vst [vmem:[#allocation54_spill] sm:$0xff] %v15658_v57  ;;  %v15662_v7 = vpop.f32.mrb[19].mxu1 }
 0xd70   : > { %16791 = vst [vmem:[#allocation55_spill] sm:$0xff] %v15662_v7 }
 0xd73   : > { %v15664_v41 = vpop.f32.mrb[20].mxu0 }
 0xd74   : > { %v15666_v20 = vpop.f32.mrb[20].mxu1  ;;  %v15668_v30 = vpop.f32.mrb[21].mxu0 }
 0xd75   : > { %16792 = vst [vmem:[#allocation56_spill] sm:$0xff] %v15666_v20  ;;  %v15670_v43 = vpop.f32.mrb[21].mxu1  ;;  %v15672_v6 = vpop.f32.mrb[22].mxu0 }
 0xd76   : > { %16793 = vst [vmem:[#allocation57_spill] sm:$0xff] %v15670_v43  ;;  %v15674_v13 = vpop.f32.mrb[22].mxu1  ;;  %v15676_v18 = vpop.f32.mrb[23].mxu0 }
 0xd77   : > { %16794 = vst [vmem:[#allocation58_spill] sm:$0xff] %v15674_v13  ;;  %v15678_v40 = vpop.f32.mrb[23].mxu1 }
 0xd78   : > { %16795 = vst [vmem:[#allocation59_spill] sm:$0xff] %v15678_v40 }
 0xd7b   : > { %v15680_v62 = vpop.f32.mrb[24].mxu0 }
 0xd7c   : > { %v15682_v4 = vpop.f32.mrb[24].mxu1  ;;  %v15684_v34 = vpop.f32.mrb[25].mxu0 }
 0xd7d   : > { %16796 = vst [vmem:[#allocation60_spill] sm:$0xff] %v15682_v4  ;;  %v15686_v55 = vpop.f32.mrb[25].mxu1  ;;  %v15688_v42 = vpop.f32.mrb[26].mxu0 }
 0xd7e   : > { %16797 = vst [vmem:[#allocation61_spill] sm:$0xff] %v15686_v55  ;;  %v15690_v52 = vpop.f32.mrb[26].mxu1  ;;  %v15692_v54 = vpop.f32.mrb[27].mxu0 }
 0xd7f   : > { %16798 = vst [vmem:[#allocation62_spill] sm:$0xff] %v15690_v52  ;;  %v15694_v60 = vpop.f32.mrb[27].mxu1 }
 0xd80   : > { %16799 = vst [vmem:[#allocation63_spill] sm:$0xff] %v15694_v60  ;;  %v12100_v60 = vmov (!%p10328_p5), 0.0  }
 0xd81   : > { %8338 = vst [vmem:[#allocation5] sm:$0xff] (!%p10328_p5), %v12100_v60 }
 0xd82   : > { %8337 = sbr.rel (%p10328_p5) target bundleno = 3465 (0xd89), region = 144 }
 0xd83   : > { %v15696_v45 = vpop.f32.mrb[28].mxu0 }
 0xd84   : > { %v15698_v2 = vpop.f32.mrb[28].mxu1  ;;  %v15700_v24 = vpop.f32.mrb[29].mxu0 }
 0xd85   : > { %16800 = vst [vmem:[#allocation64_spill] sm:$0xff] %v15698_v2  ;;  %v15702_v17 = vpop.f32.mrb[29].mxu1  ;;  %v15704_v9 = vpop.f32.mrb[30].mxu0 }
 0xd86   : > { %16801 = vst [vmem:[#allocation65_spill] sm:$0xff] %v15702_v17  ;;  %v15706_v36 = vpop.f32.mrb[30].mxu1  ;;  %v15708_v49 = vpop.f32.mrb[31].mxu0 }
 0xd87   : > { %16802 = vst [vmem:[#allocation66_spill] sm:$0xff] %v15706_v36  ;;  %v15710_v33 = vpop.f32.mrb[31].mxu1 }
 0xd88   : > { %16803 = vst [vmem:[#allocation67_spill] sm:$0xff] %v15710_v33 }
 0xd89 PF: > { %v8339_v55 = vadd.f32 %v15592_v27, %v15584_v46  ;;  %v8413_v43 = vmul.f32 %v15584_v46, %v15584_v46  ;;  %v8415_v7 = vmul.f32 %v15592_v27, %v15592_v27  ;;  %v8417_v31 = vmul.f32 %v15600_v1, %v15600_v1  ;;  %s12101_s1 = smov 112   ;;  %s12102_s4 = smov 80  }
 0xd8a   : > { %v8419_v44 = vmul.f32 %v15608_v28, %v15608_v28  ;;  %s12103_s23 = smov 48   ;;  %s12104_s27 = smov 16   ;;  %vm8671_vm0 = vcmask 122880  }
 0xd8b   : > { %v8340_v40 = vadd.f32 %v8339_v55, %v15600_v1  ;;  %v8477_v36 = vadd.f32 %v8415_v7, %v8413_v43  ;;  %v8414_v43 = vmul.f32 %v15588_v59, %v15588_v59  ;;  %s10379_s21 = sshll.u32 %s7774_s3, 4 }
 0xd8c   : > { %s15963_s28 = scalar_lea.vmem [#allocation3], %s10379_s21 }
 0xd8d   : > { %v8341_v17 = vadd.f32 %v8340_v40, %v15608_v28  ;;  %v8421_v40 = vmul.f32 %v15616_v0, %v15616_v0  ;;  %v8478_v46 = vadd.f32 %v8477_v36, %v8417_v31  ;;  %v8416_v31 = vmul.f32 %v15596_v22, %v15596_v22  ;;  %8680 = vst [vmem:[%s15963_s28 + $0x8] sm:$0xff] %v15588_v59 }
 0xd8e   : > { %v8427_v36 = vmul.f32 %v15640_v26, %v15640_v26  ;;  %8682 = vst [vmem:[%s15963_s28 + $0x18] sm:$0xff] %v15596_v22  ;;  %8684 = vst [vmem:[%s15963_s28 + $0x28] sm:$0xff] %v15604_v10 }
 0xd8f   : > { %v8342_v33 = vadd.f32 %v8341_v17, %v15616_v0  ;;  %v8423_v17 = vmul.f32 %v15624_v61, %v15624_v61  ;;  %v8479_v27 = vadd.f32 %v8478_v46, %v8419_v44  ;;  %8685 = vst [vmem:[%s15963_s28 + $0x30] sm:$0xff] %v15608_v28  ;;  %8686 = vst [vmem:[%s15963_s28 + $0x38] sm:$0xff] %v15612_v19  ;;  %v16822_v28 = vld [vmem:[#allocation51_spill] sm:$0xff] }
 0xd90   : > { %8687 = vst [vmem:[%s15963_s28 + $0x40] sm:$0xff] %v15616_v0  ;;  %8688 = vst [vmem:[%s15963_s28 + $0x48] sm:$0xff] %v15620_v3  ;;  %v16832_v0 = vld [vmem:[#allocation60_spill] sm:$0xff] }
 0xd91   : > { %v8343_v60 = vadd.f32 %v8342_v33, %v15624_v61  ;;  %v8425_v33 = vmul.f32 %v15632_v47, %v15632_v47  ;;  %v8480_v2 = vadd.f32 %v8479_v27, %v8421_v40  ;;  %v8429_v27 = vmul.f32 %v15648_v48, %v15648_v48  ;;  %8690 = vst [vmem:[%s15963_s28 + $0x58] sm:$0xff] %v15628_v21 }
 0xd92   : > { %v8514_v40 = vadd.f32 %v8416_v31, %v8414_v43  ;;  %v8424_v31 = vmul.f32 %v15628_v21, %v15628_v21  ;;  %8692 = vst [vmem:[%s15963_s28 + $0x68] sm:$0xff] %v15636_v11  ;;  %8694 = vst [vmem:[%s15963_s28 + $0x78] sm:$0xff] %v15644_v29 }
 0xd93   : > { %v8344_v55 = vadd.f32 %v8343_v60, %v15632_v47  ;;  %v8481_v60 = vadd.f32 %v8480_v2, %v8423_v17  ;;  %v8376_v47 = vadd.f32 %v15596_v22, %v15588_v59  ;;  %v8431_v2 = vmul.f32 %v15656_v56, %v15656_v56  ;;  %v16819_v59 = vld [vmem:[#allocation43_spill] sm:$0xff]  ;;  %v16820_v22 = vld [vmem:[#allocation45_spill] sm:$0xff]  ;;  %8695 = vst [vmem:[%s15963_s28 + $0x80] sm:$0xff] %v16822_v28 }
 0xd94   : > { %8689 = vst [vmem:[%s15963_s28 + $0x50] sm:$0xff] %v16819_v59  ;;  %8691 = vst [vmem:[%s15963_s28 + $0x60] sm:$0xff] %v16820_v22 }
 0xd95   : > { %v8345_v58 = vadd.f32 %v8344_v55, %v15640_v26  ;;  %v8482_v44 = vadd.f32 %v8481_v60, %v8425_v33  ;;  %v8420_v55 = vmul.f32 %v15612_v19, %v15612_v19  ;;  %v8422_v26 = vmul.f32 %v15620_v3, %v15620_v3  ;;  %8696 = vst [vmem:[%s15963_s28 + $0x88] sm:$0xff] %v15652_v51 }
 0xd96   : > { %v8377_v33 = vadd.f32 %v8376_v47, %v15604_v10  ;;  %v8433_v60 = vmul.f32 %v15664_v41, %v15664_v41  ;;  %v8426_v47 = vmul.f32 %v15636_v11, %v15636_v11  ;;  %8697 = vst [vmem:[%s15963_s28 + $0x90] sm:$0xff] %v15656_v56  ;;  %8698 = vst [vmem:[%s15963_s28 + $0x98] sm:$0xff] %v15660_v15 }
 0xd97   : > { %v8346_v1 = vadd.f32 %v8345_v58, %v15648_v48  ;;  %v8418_v58 = vmul.f32 %v15604_v10, %v15604_v10  ;;  %v8483_v17 = vadd.f32 %v8482_v44, %v8427_v36  ;;  %v8435_v44 = vmul.f32 %v15672_v6, %v15672_v6  ;;  %v16821_v10 = vld [vmem:[#allocation48_spill] sm:$0xff]  ;;  %8699 = vst [vmem:[%s15963_s28 + $0xa0] sm:$0xff] %v15664_v41 }
 0xd98   : > { %v8378_v36 = vadd.f32 %v8377_v33, %v15612_v19  ;;  %8693 = vst [vmem:[%s15963_s28 + $0x70] sm:$0xff] %v16821_v10  ;;  %8700 = vst [vmem:[%s15963_s28 + $0xa8] sm:$0xff] %v15668_v30  ;;  %v16830_v19 = vld [vmem:[#allocation56_spill] sm:$0xff] }
 0xd99   : > { %v8347_v7 = vadd.f32 %v8346_v1, %v15656_v56  ;;  %v8515_v48 = vadd.f32 %v8514_v40, %v8418_v58  ;;  %8701 = vst [vmem:[%s15963_s28 + $0xb0] sm:$0xff] %v15672_v6  ;;  %8702 = vst [vmem:[%s15963_s28 + $0xb8] sm:$0xff] %v15676_v18 }
 0xd9a   : > { %8703 = vst [vmem:[%s15963_s28 + $0xc0] sm:$0xff] %v15680_v62  ;;  %8704 = vst [vmem:[%s15963_s28 + $0xc8] sm:$0xff] %v15684_v34 }
 0xd9b   : > { %v8348_v46 = vadd.f32 %v8347_v7, %v15664_v41  ;;  %v8516_v61 = vadd.f32 %v8515_v48, %v8420_v55  ;;  %v8428_v55 = vmul.f32 %v15644_v29, %v15644_v29  ;;  %8705 = vst [vmem:[%s15963_s28 + $0xd0] sm:$0xff] %v15688_v42  ;;  %8706 = vst [vmem:[%s15963_s28 + $0xd8] sm:$0xff] %v15692_v54 }
 0xd9c   : > { %8707 = vst [vmem:[%s15963_s28 + $0xe0] sm:$0xff] %v15696_v45  ;;  %8708 = vst [vmem:[%s15963_s28 + $0xe8] sm:$0xff] %v15700_v24 }
 0xd9d   : > { %v8349_v1 = vadd.f32 %v8348_v46, %v15672_v6  ;;  %v8484_v46 = vadd.f32 %v8483_v17, %v8429_v27  ;;  %v8517_v40 = vadd.f32 %v8516_v61, %v8422_v26  ;;  %v8379_v27 = vadd.f32 %v8378_v36, %v15620_v3  ;;  %8709 = vst [vmem:[%s15963_s28 + $0xf0] sm:$0xff] %v15704_v9  ;;  %v16834_v3 = vld [vmem:[#allocation64_spill] sm:$0xff] }
 0xd9e   : > { %v8437_v17 = vmul.f32 %v15680_v62, %v15680_v62  ;;  %v8430_v26 = vmul.f32 %v15652_v51, %v15652_v51  ;;  %8710 = vst [vmem:[%s15963_s28 + $0xf8] sm:$0xff] %v15708_v49  ;;  %8711 = vst [vmem:[%s15963_s28 + $0x100] sm:$0xff] %v15586_v12 }
 0xd9f   : > { %v8350_v7 = vadd.f32 %v8349_v1, %v15680_v62  ;;  %v8485_v1 = vadd.f32 %v8484_v46, %v8431_v2  ;;  %v8518_v33 = vadd.f32 %v8517_v40, %v8424_v31  ;;  %v8380_v2 = vadd.f32 %v8379_v27, %v15628_v21  ;;  %8712 = vst [vmem:[%s15963_s28 + $0x108] sm:$0xff] %v15590_v37 }
 0xda0   : > { %v8439_v46 = vmul.f32 %v15688_v42, %v15688_v42  ;;  %v8432_v40 = vmul.f32 %v15660_v15, %v15660_v15  ;;  %8713 = vst [vmem:[%s15963_s28 + $0x110] sm:$0xff] %v15594_v23  ;;  %8714 = vst [vmem:[%s15963_s28 + $0x118] sm:$0xff] %v15598_v16 }
 0xda1   : > { %v8351_v43 = vadd.f32 %v8350_v7, %v15688_v42  ;;  %v8486_v7 = vadd.f32 %v8485_v1, %v8433_v60  ;;  %v8519_v36 = vadd.f32 %v8518_v33, %v8426_v47  ;;  %v8381_v60 = vadd.f32 %v8380_v2, %v15636_v11  ;;  %8715 = vst [vmem:[%s15963_s28 + $0x120] sm:$0xff] %v15602_v14 }
 0xda2   : > { %v8441_v1 = vmul.f32 %v15696_v45, %v15696_v45  ;;  %v8434_v33 = vmul.f32 %v15668_v30, %v15668_v30  ;;  %8716 = vst [vmem:[%s15963_s28 + $0x128] sm:$0xff] %v15606_v25  ;;  %8717 = vst [vmem:[%s15963_s28 + $0x130] sm:$0xff] %v15610_v50 }
 0xda3   : > { %v8352_v58 = vadd.f32 %v8351_v43, %v15696_v45  ;;  %v8487_v43 = vadd.f32 %v8486_v7, %v8435_v44  ;;  %v8520_v27 = vadd.f32 %v8519_v36, %v8428_v55  ;;  %v8382_v44 = vadd.f32 %v8381_v60, %v15644_v29  ;;  %8718 = vst [vmem:[%s15963_s28 + $0x138] sm:$0xff] %v15614_v53 }
 0xda4   : > { %v8443_v7 = vmul.f32 %v15704_v9, %v15704_v9  ;;  %v8436_v36 = vmul.f32 %v15676_v18, %v15676_v18  ;;  %8719 = vst [vmem:[%s15963_s28 + $0x140] sm:$0xff] %v15618_v39  ;;  %8720 = vst [vmem:[%s15963_s28 + $0x148] sm:$0xff] %v15622_v35 }
 0xda5   : > { %v8353_v48 = vadd.f32 %v8352_v58, %v15704_v9  ;;  %v8488_v58 = vadd.f32 %v8487_v43, %v8437_v17  ;;  %v8521_v2 = vadd.f32 %v8520_v27, %v8430_v26  ;;  %v8383_v17 = vadd.f32 %v8382_v44, %v15652_v51  ;;  %8721 = vst [vmem:[%s15963_s28 + $0x150] sm:$0xff] %v15626_v63 }
 0xda6   : > { %v8445_v43 = vmul.f32 %v15586_v12, %v15586_v12  ;;  %v8438_v27 = vmul.f32 %v15684_v34, %v15684_v34  ;;  %8731 = vst [vmem:[%s15963_s28 + $0x1a0] sm:$0xff] %v16830_v19  ;;  %8735 = vst [vmem:[%s15963_s28 + $0x1c0] sm:$0xff] %v16832_v0  ;;  %v8673_v19 = vld [vmem:[#allocation5 + $0x1] sm:$0x1] }
 0xda7   : > { %v8354_v61 = vadd.f32 %v8353_v48, %v15586_v12  ;;  %v8489_v48 = vadd.f32 %v8488_v58, %v8439_v46  ;;  %v8522_v60 = vadd.f32 %v8521_v2, %v8432_v40  ;;  %v8384_v46 = vadd.f32 %v8383_v17, %v15660_v15  ;;  %v16823_v12 = vld [vmem:[#allocation44_spill] sm:$0xff]  ;;  %8739 = vst [vmem:[%s15963_s28 + $0x1e0] sm:$0xff] %v16834_v3 }
 0xda8   : > { %v8447_v58 = vmul.f32 %v15594_v23, %v15594_v23  ;;  %v8440_v2 = vmul.f32 %v15692_v54, %v15692_v54  ;;  %8722 = vst [vmem:[%s15963_s28 + $0x158] sm:$0xff] %v16823_v12 }
 0xda9   : > { %v8355_v31 = vadd.f32 %v8354_v61, %v15594_v23  ;;  %v8490_v61 = vadd.f32 %v8489_v48, %v8441_v1  ;;  %v8523_v44 = vadd.f32 %v8522_v60, %v8434_v33  ;;  %v8385_v1 = vadd.f32 %v8384_v46, %v15668_v30  ;;  %v16825_v23 = vld [vmem:[#allocation47_spill] sm:$0xff] }
 0xdaa   : > { %v8449_v48 = vmul.f32 %v15602_v14, %v15602_v14  ;;  %v8442_v60 = vmul.f32 %v15700_v24, %v15700_v24  ;;  %8724 = vst [vmem:[%s15963_s28 + $0x168] sm:$0xff] %v16825_v23 }
 0xdab   : > { %v8356_v47 = vadd.f32 %v8355_v31, %v15602_v14  ;;  %v8491_v31 = vadd.f32 %v8490_v61, %v8443_v7  ;;  %v8524_v17 = vadd.f32 %v8523_v44, %v8436_v36  ;;  %v8386_v7 = vadd.f32 %v8385_v1, %v15676_v18  ;;  %v16827_v14 = vld [vmem:[#allocation50_spill] sm:$0xff] }
 0xdac   : > { %v8451_v61 = vmul.f32 %v15610_v50, %v15610_v50  ;;  %v8444_v44 = vmul.f32 %v15708_v49, %v15708_v49  ;;  %8726 = vst [vmem:[%s15963_s28 + $0x178] sm:$0xff] %v16827_v14 }
 0xdad   : > { %v8357_v55 = vadd.f32 %v8356_v47, %v15610_v50  ;;  %v8492_v47 = vadd.f32 %v8491_v31, %v8445_v43  ;;  %v8525_v46 = vadd.f32 %v8524_v17, %v8438_v27  ;;  %v8387_v43 = vadd.f32 %v8386_v7, %v15684_v34  ;;  %v16829_v50 = vld [vmem:[#allocation54_spill] sm:$0xff] }
 0xdae   : > { %v8453_v31 = vmul.f32 %v15618_v39, %v15618_v39  ;;  %v8446_v17 = vmul.f32 %v15590_v37, %v15590_v37  ;;  %8729 = vst [vmem:[%s15963_s28 + $0x190] sm:$0xff] %v16829_v50 }
 0xdaf   : > { %v8358_v26 = vadd.f32 %v8357_v55, %v15618_v39  ;;  %v8493_v55 = vadd.f32 %v8492_v47, %v8447_v58  ;;  %v8526_v1 = vadd.f32 %v8525_v46, %v8440_v2  ;;  %v8388_v58 = vadd.f32 %v8387_v43, %v15692_v54  ;;  %v16833_v39 = vld [vmem:[#allocation62_spill] sm:$0xff] }
 0xdb0   : > { %v8455_v47 = vmul.f32 %v15626_v63, %v15626_v63  ;;  %v8448_v46 = vmul.f32 %v15598_v16, %v15598_v16  ;;  %8737 = vst [vmem:[%s15963_s28 + $0x1d0] sm:$0xff] %v16833_v39 }
 0xdb1   : > { %v8359_v40 = vadd.f32 %v8358_v26, %v15626_v63  ;;  %v8494_v26 = vadd.f32 %v8493_v55, %v8449_v48  ;;  %v8527_v7 = vadd.f32 %v8526_v1, %v8442_v60  ;;  %v8389_v48 = vadd.f32 %v8388_v58, %v15700_v24 }
 0xdb2   : > { %v8457_v55 = vmul.f32 %v15634_v8, %v15634_v8  ;;  %v8450_v1 = vmul.f32 %v15606_v25, %v15606_v25 }
 0xdb3   : > { %v8360_v33 = vadd.f32 %v8359_v40, %v15634_v8  ;;  %v8495_v40 = vadd.f32 %v8494_v26, %v8451_v61  ;;  %v8528_v43 = vadd.f32 %v8527_v7, %v8444_v44  ;;  %v8390_v61 = vadd.f32 %v8389_v48, %v15708_v49  ;;  %v16809_v8 = vld [vmem:[#allocation55_spill] sm:$0xff] }
 0xdb4   : > { %v8459_v26 = vmul.f32 %v15642_v32, %v15642_v32  ;;  %v8452_v7 = vmul.f32 %v15614_v53, %v15614_v53  ;;  %8730 = vst [vmem:[%s15963_s28 + $0x198] sm:$0xff] %v16809_v8 }
 0xdb5   : > { %v8361_v36 = vadd.f32 %v8360_v33, %v15642_v32  ;;  %v8496_v33 = vadd.f32 %v8495_v40, %v8453_v31  ;;  %v8529_v58 = vadd.f32 %v8528_v43, %v8446_v17  ;;  %v8391_v31 = vadd.f32 %v8390_v61, %v15590_v37  ;;  %v16824_v37 = vld [vmem:[#allocation46_spill] sm:$0xff] }
 0xdb6   : > { %v8461_v40 = vmul.f32 %v15650_v38, %v15650_v38  ;;  %v8454_v43 = vmul.f32 %v15622_v35, %v15622_v35  ;;  %8723 = vst [vmem:[%s15963_s28 + $0x160] sm:$0xff] %v16824_v37 }
 0xdb7   : > { %v8362_v27 = vadd.f32 %v8361_v36, %v15650_v38  ;;  %v8497_v36 = vadd.f32 %v8496_v33, %v8455_v47  ;;  %v8530_v48 = vadd.f32 %v8529_v58, %v8448_v46  ;;  %v8392_v47 = vadd.f32 %v8391_v31, %v15598_v16  ;;  %v16826_v16 = vld [vmem:[#allocation49_spill] sm:$0xff] }
 0xdb8   : > { %v8463_v33 = vmul.f32 %v15658_v57, %v15658_v57  ;;  %v8456_v58 = vmul.f32 %v15630_v5, %v15630_v5  ;;  %8725 = vst [vmem:[%s15963_s28 + $0x170] sm:$0xff] %v16826_v16 }
 0xdb9   : > { %v8363_v2 = vadd.f32 %v8362_v27, %v15658_v57  ;;  %v8498_v27 = vadd.f32 %v8497_v36, %v8457_v55  ;;  %v8531_v61 = vadd.f32 %v8530_v48, %v8450_v1  ;;  %v8393_v55 = vadd.f32 %v8392_v47, %v15606_v25  ;;  %v16804_v57 = vld [vmem:[#allocation64_spill] sm:$0xff]  ;;  %v16805_v48 = vld [vmem:[#allocation47_spill] sm:$0xff] }
 0xdba   : > { %v8465_v36 = vmul.f32 %v15666_v20, %v15666_v20  ;;  %v8458_v47 = vmul.f32 %v16805_v48, %v16805_v48  ;;  %v16828_v25 = vld [vmem:[#allocation52_spill] sm:$0xff] }
 0xdbb   : > { %v8364_v60 = vadd.f32 %v8363_v2, %v15666_v20  ;;  %v8499_v2 = vadd.f32 %v8498_v27, %v8459_v26  ;;  %v8532_v31 = vadd.f32 %v8531_v61, %v8452_v7  ;;  %v8394_v26 = vadd.f32 %v8393_v55, %v15614_v53  ;;  %v16806_v20 = vld [vmem:[#allocation66_spill] sm:$0xff]  ;;  %8727 = vst [vmem:[%s15963_s28 + $0x180] sm:$0xff] %v16828_v25 }
 0xdbc   : > { %v8467_v27 = vmul.f32 %v15674_v13, %v15674_v13  ;;  %v16807_v61 = vld [vmem:[#allocation50_spill] sm:$0xff] }
 0xdbd   : > { %v8365_v44 = vadd.f32 %v8364_v60, %v15674_v13  ;;  %v8500_v60 = vadd.f32 %v8499_v2, %v8461_v40  ;;  %v8533_v38 = vadd.f32 %v8532_v31, %v8454_v43  ;;  %v8395_v40 = vadd.f32 %v8394_v26, %v15622_v35  ;;  %v16808_v43 = vld [vmem:[#allocation53_spill] sm:$0xff]  ;;  %v16831_v53 = vld [vmem:[#allocation58_spill] sm:$0xff] }
 0xdbe   : > { %v8469_v2 = vmul.f32 %v15682_v4, %v15682_v4  ;;  %v8460_v55 = vmul.f32 %v16807_v61, %v16807_v61  ;;  %v8462_v31 = vmul.f32 %v16808_v43, %v16808_v43  ;;  %8728 = vst [vmem:[%s15963_s28 + $0x188] sm:$0xff] %v16808_v43  ;;  %8733 = vst [vmem:[%s15963_s28 + $0x1b0] sm:$0xff] %v16831_v53  ;;  %v16835_v35 = vld [vmem:[#allocation66_spill] sm:$0xff] }
 0xdbf   : > { %v8366_v17 = vadd.f32 %v8365_v44, %v15682_v4  ;;  %v8501_v44 = vadd.f32 %v8500_v60, %v8463_v33  ;;  %v8534_v32 = vadd.f32 %v8533_v38, %v8456_v58  ;;  %v8396_v33 = vadd.f32 %v8395_v40, %v15630_v5  ;;  %v16810_v5 = vld [vmem:[#allocation57_spill] sm:$0xff]  ;;  %8741 = vst [vmem:[%s15963_s28 + $0x1f0] sm:$0xff] %v16835_v35 }
 0xdc0   : > { %v8471_v60 = vmul.f32 %v15690_v52, %v15690_v52  ;;  %v8464_v38 = vmul.f32 %v16809_v8, %v16809_v8  ;;  %8732 = vst [vmem:[%s15963_s28 + $0x1a8] sm:$0xff] %v16810_v5 }
 0xdc1   : > { %v8367_v46 = vadd.f32 %v8366_v17, %v15690_v52  ;;  %v8502_v17 = vadd.f32 %v8501_v44, %v8465_v36  ;;  %v8535_v26 = vadd.f32 %v8534_v32, %v8458_v47  ;;  %v8397_v4 = vadd.f32 %v8396_v33, %v16805_v48 }
 0xdc2   : > { %v8473_v36 = vmul.f32 %v16804_v57, %v16804_v57  ;;  %v8466_v32 = vmul.f32 %v16810_v5, %v16810_v5 }
 0xdc3   : > { %v8368_v1 = vadd.f32 %v8367_v46, %v16804_v57  ;;  %v8503_v46 = vadd.f32 %v8502_v17, %v8467_v27  ;;  %v8536_v58 = vadd.f32 %v8535_v26, %v8460_v55  ;;  %v8398_v40 = vadd.f32 %v8397_v4, %v16807_v61  ;;  %v16812_v61 = vld [vmem:[#allocation61_spill] sm:$0xff] }
 0xdc4   : > { %v8475_v27 = vmul.f32 %v16806_v20, %v16806_v20  ;;  %8736 = vst [vmem:[%s15963_s28 + $0x1c8] sm:$0xff] %v16812_v61 }
 0xdc5   : > { %v8369_v7 = vadd.f32 %v8368_v1, %v16806_v20  ;;  %v8504_v44 = vadd.f32 %v8503_v46, %v8469_v2  ;;  %v8537_v47 = vadd.f32 %v8536_v58, %v8462_v31  ;;  %v8399_v33 = vadd.f32 %v8398_v40, %v16808_v43  ;;  %v16813_v58 = vld [vmem:[#allocation63_spill] sm:$0xff] }
 0xdc6   : > { %8738 = vst [vmem:[%s15963_s28 + $0x1d8] sm:$0xff] %v16813_v58 }
 0xdc7   : > { %v8370_v13 = vrot.slane %v8369_v7, 4  ;;  %v8505_v17 = vadd.f32 %v8504_v44, %v8471_v60  ;;  %v8538_v46 = vadd.f32 %v8537_v47, %v8464_v38  ;;  %v8400_v55 = vadd.f32 %v8399_v33, %v16809_v8  ;;  %v16815_v47 = vld [vmem:[#allocation67_spill] sm:$0xff] }
 0xdc8   : > { %v8470_v60 = vmul.f32 %v16812_v61, %v16812_v61  ;;  %v8476_v33 = vmul.f32 %v16815_v47, %v16815_v47  ;;  %8742 = vst [vmem:[%s15963_s28 + $0x1f8] sm:$0xff] %v16815_v47 }
 0xdc9   : > { %v8371_v1 = vadd.f32 %v8370_v13, %v8369_v7  ;;  %v8506_v57 = vadd.f32 %v8505_v17, %v8473_v36  ;;  %v16811_v13 = vld [vmem:[#allocation59_spill] sm:$0xff]  ;;  %v8539_v44 = vadd.f32 %v8538_v46, %v8466_v32  ;;  %v8401_v20 = vadd.f32 %v8400_v55, %v16810_v5 }
 0xdca   : > { %v8468_v7 = vmul.f32 %v16811_v13, %v16811_v13  ;;  %8734 = vst [vmem:[%s15963_s28 + $0x1b8] sm:$0xff] %v16811_v13 }
 0xdcb   : > { %v8372_v52 = vrot.slane %v8371_v1, 2  ;;  %v8507_v4 = vadd.f32 %v8506_v57, %v8475_v27  ;;  %v16814_v57 = vld [vmem:[#allocation65_spill] sm:$0xff] }
 0xdcc   : > { %v8540_v36 = vadd.f32 %v8539_v44, %v8468_v7  ;;  %v8474_v40 = vmul.f32 %v16814_v57, %v16814_v57  ;;  %8740 = vst [vmem:[%s15963_s28 + $0x1e8] sm:$0xff] %v16814_v57 }
 0xdcd   : > { %v8373_v2 = vadd.f32 %v8372_v52, %v8371_v1  ;;  %v8508_v48 = vrot.slane %v8507_v4, 4  ;;  %v8472_v52 = vmul.f32 %v16813_v58, %v16813_v58  ;;  %v8402_v1 = vadd.f32 %v8401_v20, %v16811_v13 }
 0xdce   : > { %v8541_v27 = vadd.f32 %v8540_v36, %v8470_v60 }
 0xdcf   : > { %v8374_v26 = vrot.slane %v8373_v2, 1  ;;  %v8509_v38 = vadd.f32 %v8508_v48, %v8507_v4  ;;  %v8403_v17 = vadd.f32 %v8402_v1, %v16812_v61 }
 0xdd1   : > { %v15894_v31 = vadd.f32 %v8374_v26, %v8373_v2  ;;  %v8510_v32 = vrot.slane %v8509_v38, 2  ;;  %v8542_v2 = vadd.f32 %v8541_v27, %v8472_v52  ;;  %v8404_v20 = vadd.f32 %v8403_v17, %v16813_v58 }
 0xdd3   : > { %8561 = vrot.lane.b32.xlu1 %v15894_v31, %s12098_s29  ;;  %8552 = vrot.lane.b32.xlu0 %v15894_v31, %s12101_s1  ;;  %v8511_v48 = vadd.f32 %v8510_v32, %v8509_v38  ;;  %v8543_v7 = vadd.f32 %v8542_v2, %v8474_v40  ;;  %v8405_v46 = vadd.f32 %v8404_v20, %v16814_v57 }
 0xdd5   : > { %v8512_v55 = vrot.slane %v8511_v48, 1  ;;  %v8544_v4 = vadd.f32 %v8543_v7, %v8476_v33  ;;  %v8406_v26 = vadd.f32 %v8405_v46, %v16815_v47  ;;  %v16817_v7 = vld [vmem:[#allocation41_spill] sm:$0xff]  ;;  %v16818_v46 = vld [vmem:[#allocation42_spill] sm:$0xff] }
 0xdd6   : > { %8681 = vst [vmem:[%s15963_s28 + $0x10] sm:$0xff] %v16817_v7  ;;  %8683 = vst [vmem:[%s15963_s28 + $0x20] sm:$0xff] %v16818_v46 }
 0xdd7   : > { %8569 = vrot.lane.b32.xlu0 %v15894_v31, %s12102_s4  ;;  %v15913_v60 = vadd.f32 %v8512_v55, %v8511_v48  ;;  %v8407_v44 = vrot.slane %v8406_v26, 4  ;;  %v8545_v52 = vrot.slane %v8544_v4, 4  ;;  %v16816_v48 = vld [vmem:[#allocation40_spill] sm:$0xff] }
 0xdd8   : > { %8679 = vst [vmem:[%s15963_s28] sm:$0xff] %v16816_v48 }
 0xdd9   : > { %8565 = vrot.lane.b32.xlu1 %v15913_v60, %s12098_s29  ;;  %v8408_v36 = vadd.f32 %v8407_v44, %v8406_v26  ;;  %v8546_v38 = vadd.f32 %v8545_v52, %v8544_v4 }
 0xddb   : > { %8577 = vrot.lane.b32.xlu0 %v15894_v31, %s12099_s2  ;;  %v8409_v1 = vrot.slane %v8408_v36, 2  ;;  %v8547_v27 = vrot.slane %v8546_v38, 2 }
 0xddd   : > { %8573 = vrot.lane.b32.xlu1 %v15913_v60, %s12102_s4  ;;  %v8410_v40 = vadd.f32 %v8409_v1, %v8408_v36  ;;  %v8548_v32 = vadd.f32 %v8547_v27, %v8546_v38 }
 0xddf   : > { %8585 = vrot.lane.b32.xlu0 %v15894_v31, %s12103_s23  ;;  %v8411_v17 = vrot.slane %v8410_v40, 1  ;;  %v8549_v2 = vrot.slane %v8548_v32, 1 }
 0xde1   : > { %8581 = vrot.lane.b32.xlu1 %v15913_v60, %s12099_s2  ;;  %v15933_v33 = vadd.f32 %v8411_v17, %v8410_v40  ;;  %v15941_v20 = vadd.f32 %v8549_v2, %v8548_v32 }
 0xde3   : > { %8593 = vrot.lane.b32.xlu0 %v15894_v31, %s12097_s24 }
 0xde5   : > { %8589 = vrot.lane.b32.xlu1 %v15913_v60, %s12103_s23 }
 0xde7   : > { %8601 = vrot.lane.b32.xlu0 %v15894_v31, %s12104_s27 }
 0xde9   : > { %8597 = vrot.lane.b32.xlu1 %v15913_v60, %s12097_s24 }
 0xdeb   : > { %8557 = vrot.lane.b32.xlu0 %v15913_v60, %s12101_s1 }
 0xded   : > { %8605 = vrot.lane.b32.xlu1 %v15913_v60, %s12104_s27 }
 0xdef   : > { %8612 = vrot.lane.b32.xlu0 %v15933_v33, %s12101_s1 }
 0xdf1   : > { %8617 = vrot.lane.b32.xlu1 %v15941_v20, %s12101_s1 }
 0xdf3   : > { %8621 = vrot.lane.b32.xlu0 %v15933_v33, %s12098_s29 }
 0xdf5   : > { %8625 = vrot.lane.b32.xlu1 %v15941_v20, %s12098_s29 }
 0xdf7   : > { %8629 = vrot.lane.b32.xlu0 %v15933_v33, %s12102_s4 }
 0xdf9   : > { %8633 = vrot.lane.b32.xlu1 %v15941_v20, %s12102_s4 }
 0xdfb   : > { %8637 = vrot.lane.b32.xlu0 %v15933_v33, %s12099_s2 }
 0xdfd   : > { %8641 = vrot.lane.b32.xlu1 %v15941_v20, %s12099_s2 }
 0xdff   : > { %8645 = vrot.lane.b32.xlu0 %v15933_v33, %s12103_s23 }
 0xe01   : > { %8649 = vrot.lane.b32.xlu1 %v15941_v20, %s12103_s23 }
 0xe03   : > { %8653 = vrot.lane.b32.xlu0 %v15933_v33, %s12097_s24 }
 0xe05   : > { %8657 = vrot.lane.b32.xlu1 %v15941_v20, %s12097_s24 }
 0xe07   : > { %8661 = vrot.lane.b32.xlu0 %v15933_v33, %s12104_s27 }
 0xe09   : > { %8665 = vrot.lane.b32.xlu1 %v15941_v20, %s12104_s27 }
 0xe45   : > { %v8553_v63 = vpop.permute.xlu0 %8552  ;;  %v8562_v21 = vpop.permute.xlu1 %8561 }
 0xe46   : > { %v8555_v41 = vadd.f32 %v8553_v63, %v15894_v31 }
 0xe48   : > { %v8564_v18 = vadd.f32 %v8562_v21, %v8555_v41 }
 0xe49   : > { %v8570_v5 = vpop.permute.xlu0 %8569 }
 0xe4a   : > { %v8572_v54 = vadd.f32 %v8570_v5, %v8564_v18 }
 0xe4b   : > { %v8566_v11 = vpop.permute.xlu1 %8565 }
 0xe4d   : > { %v8578_v8 = vpop.permute.xlu0 %8577 }
 0xe4e   : > { %v8580_v9 = vadd.f32 %v8578_v8, %v8572_v54 }
 0xe4f   : > { %v8574_v51 = vpop.permute.xlu1 %8573 }
 0xe51   : > { %v8586_v29 = vpop.permute.xlu0 %8585 }
 0xe52   : > { %v8588_v43 = vadd.f32 %v8586_v29, %v8580_v9 }
 0xe53   : > { %v8582_v15 = vpop.permute.xlu1 %8581 }
 0xe55   : > { %v8594_v56 = vpop.permute.xlu0 %8593 }
 0xe56   : > { %v8596_v57 = vadd.f32 %v8594_v56, %v8588_v43 }
 0xe57   : > { %v8590_v6 = vpop.permute.xlu1 %8589 }
 0xe59   : > { %v8602_v30 = vpop.permute.xlu0 %8601 }
 0xe5a   : > { %v8604_v31 = vadd.f32 %v8602_v30, %v8596_v57 }
 0xe5b   : > { %v8598_v34 = vpop.permute.xlu1 %8597 }
 0xe5d   : > { %v8558_v62 = vpop.permute.xlu0 %8557 }
 0xe5e   : > { %v8560_v42 = vadd.f32 %v8558_v62, %v15913_v60  ;;  %v8609_v60 = vadd.f32 %v8604_v31, %v15933_v33 }
 0xe5f   : > { %v8606_v49 = vpop.permute.xlu1 %8605 }
 0xe60   : > { %v8568_v45 = vadd.f32 %v8566_v11, %v8560_v42 }
 0xe61   : > { %v8613_v24 = vpop.permute.xlu0 %8612 }
 0xe62   : > { %v8576_v61 = vadd.f32 %v8574_v51, %v8568_v45  ;;  %v8615_v40 = vadd.f32 %v8613_v24, %v8609_v60 }
 0xe63   : > { %v8618_v47 = vpop.permute.xlu1 %8617 }
 0xe64   : > { %v8584_v13 = vadd.f32 %v8582_v15, %v8576_v61 }
 0xe65   : > { %v8622_v58 = vpop.permute.xlu0 %8621 }
 0xe66   : > { %v8592_v55 = vadd.f32 %v8590_v6, %v8584_v13  ;;  %v8624_v32 = vadd.f32 %v8622_v58, %v8615_v40 }
 0xe67   : > { %v8626_v52 = vpop.permute.xlu1 %8625 }
 0xe68   : > { %v8600_v4 = vadd.f32 %v8598_v34, %v8592_v55 }
 0xe69   : > { %v8630_v26 = vpop.permute.xlu0 %8629 }
 0xe6a   : > { %v8608_v44 = vadd.f32 %v8606_v49, %v8600_v4  ;;  %v8632_v7 = vadd.f32 %v8630_v26, %v8624_v32 }
 0xe6b   : > { %v8634_v27 = vpop.permute.xlu1 %8633 }
 0xe6c   : > { %v8610_v36 = vadd.f32 %v8608_v44, %v15941_v20  ;;  %v8669_v20 = vld [vmem:[#allocation5] sm:$0x1] }
 0xe6d   : > { %v8638_v1 = vpop.permute.xlu0 %8637 }
 0xe6e   : > { %v8620_v38 = vadd.f32 %v8618_v47, %v8610_v36  ;;  %v8640_v22 = vadd.f32 %v8638_v1, %v8632_v7 }
 0xe6f   : > { %v8642_v46 = vpop.permute.xlu1 %8641 }
 0xe70   : > { %v8628_v17 = vadd.f32 %v8626_v52, %v8620_v38 }
 0xe71   : > { %v8646_v2 = vpop.permute.xlu0 %8645 }
 0xe72   : > { %v8636_v48 = vadd.f32 %v8634_v27, %v8628_v17  ;;  %v8648_v12 = vadd.f32 %v8646_v2, %v8640_v22 }
 0xe73   : > { %v8650_v28 = vpop.permute.xlu1 %8649 }
 0xe74   : > { %v8644_v59 = vadd.f32 %v8642_v46, %v8636_v48 }
 0xe75   : > { %v8654_v10 = vpop.permute.xlu0 %8653 }
 0xe76   : > { %v8652_v37 = vadd.f32 %v8650_v28, %v8644_v59  ;;  %v8656_v23 = vadd.f32 %v8654_v10, %v8648_v12 }
 0xe77   : > { %v8658_v33 = vpop.permute.xlu1 %8657 }
 0xe78   : > { %v8660_v25 = vadd.f32 %v8658_v33, %v8652_v37 }
 0xe79   : > { %v8662_v16 = vpop.permute.xlu0 %8661 }
 0xe7a   : > { %v8664_v14 = vadd.f32 %v8662_v16, %v8656_v23 }
 0xe7b   : > { %v8666_v53 = vpop.permute.xlu1 %8665 }
 0xe7c   : > { %v8670_v50 = vadd.f32 %v8669_v20, %v8664_v14  ;;  %v8668_v0 = vadd.f32 %v8666_v53, %v8660_v25 }
 0xe7e   : > { %8672 = vst.msk [vmem:[#allocation5] sm:$0x1] %vm8671_vm0, %v8670_v50  ;;  %v8674_v39 = vadd.f32 %v8673_v19, %v8668_v0 }
 0xe80   : > { %8675 = vst.msk [vmem:[#allocation5 + $0x1] sm:$0x1] %vm8671_vm0, %v8674_v39 }
 0xe81 PF: > { %p10331_p6 = scmp.ne.s32.totalorder %s12058_s22, 6 }
 0xe82   : > { %v11854_v8 = vld [vmem:[%s16620_s18 + $0x4] ss:$8 sps:$4 sm:$0xff] (!%p10331_p6)   ;;  %v11856_v11 = vld [vmem:[%s16620_s18] ss:$8 sps:$4 sm:$0xff] (!%p10331_p6)   ;;  %v11857_v51 = vld [vmem:[%s16620_s18 + $0x14] ss:$8 sps:$4 sm:$0xff] (!%p10331_p6)   ;;  %v8830_v30 = vlaneseq (!%p10331_p6) }
 0xe83   : > { %8746 = sbr.rel (%p10331_p6) target bundleno = 4203 (0x106b), region = 148  ;;  %9466 = vmatprep.subr.bf16.mxu0 (!%p10331_p6), %v11854_v8  ;;  %11149 = vmatprep.subr.bf16.mxu1 (!%p10331_p6), %v11854_v8  ;;  %v11859_v56 = vld [vmem:[%s16620_s18 + $0x10] ss:$8 sps:$4 sm:$0xff] (!%p10331_p6)   ;;  %v11860_v41 = vld [vmem:[%s16620_s18 + $0x24] ss:$8 sps:$4 sm:$0xff] (!%p10331_p6)   ;;  %s16836_s22 = sld [smem:[#allocation73_spill]] (!%p10331_p6) }
 0xe84   : > { %9467 = vmatpush1.bf16.msra.mxu0 (!%p10331_p6), %v11856_v11  ;;  %11165 = vmatpush1.bf16.msra.mxu1 (!%p10331_p6), %v11856_v11  ;;  %v11862_v6 = vld [vmem:[%s16620_s18 + $0x20] ss:$8 sps:$4 sm:$0xff] (!%p10331_p6)   ;;  %v11863_v18 = vld [vmem:[%s16620_s18 + $0x34] ss:$8 sps:$4 sm:$0xff] (!%p10331_p6)   ;;  %v16127_v62 = vshrl.u32 (!%p10331_p6), %v8830_v30, 7  ;;  %s16837_s28 = sld [smem:[#allocation74_spill]] (!%p10331_p6) }
 0xe85   : > { %v8818_v3 = vld [vmem:[#allocation5] sm:$0x1] (!%p10331_p6)  ;;  %9468 = vmatprep.subr.bf16.mxu0 (!%p10331_p6), %v11857_v51  ;;  %11150 = vmatprep.subr.bf16.mxu1 (!%p10331_p6), %v11857_v51  ;;  %v11865_v34 = vld [vmem:[%s16620_s18 + $0x30] ss:$8 sps:$4 sm:$0xff] (!%p10331_p6)   ;;  %v11866_v42 = vld [vmem:[%s16620_s18 + $0x44] ss:$8 sps:$4 sm:$0xff] (!%p10331_p6)  }
 0xe86   : > { %v8819_v63 = vmul.f32 (!%p10331_p6), 0.00012207031, %v8818_v3  ;;  %v11868_v45 = vld [vmem:[%s16620_s18 + $0x40] ss:$8 sps:$4 sm:$0xff] (!%p10331_p6)   ;;  %v16142_v24 = vsub.s32 (!%p10331_p6), 0, %v16127_v62  ;;  %v11869_v9 = vld [vmem:[%s16620_s18 + $0x54] ss:$8 sps:$4 sm:$0xff] (!%p10331_p6)  }
 0xe87   : > { %v8820_v35 = vld [vmem:[#allocation5 + $0x1] sm:$0x1] (!%p10331_p6)  ;;  %v11871_v57 = vld [vmem:[%s16620_s18 + $0x50] ss:$8 sps:$4 sm:$0xff] (!%p10331_p6)   ;;  %v11872_v47 = vld [vmem:[%s16620_s18 + $0x64] ss:$8 sps:$4 sm:$0xff] (!%p10331_p6)  }
 0xe88   : > { %v8821_v21 = vmul.f32 (!%p10331_p6), 0.00012207031, %v8820_v35  ;;  %v8822_v5 = vmul.f32 (!%p10331_p6), %v8819_v63, %v8819_v63  ;;  %9469 = vmatpush1.bf16.msra.mxu0 (!%p10331_p6), %v11859_v56  ;;  %11166 = vmatpush1.bf16.msra.mxu1 (!%p10331_p6), %v11859_v56  ;;  %s12105_s3 = smov (!%p10331_p6), 48   ;;  %s12106_s0 = smov (!%p10331_p6), 16   ;;  %v11874_v4 = vld [vmem:[%s16620_s18 + $0x60] ss:$8 sps:$4 sm:$0xff] (!%p10331_p6)   ;;  %vm8855_vm1 = vcmask (!%p10331_p6), 130048  }
 0xe89   : > { %9470 = vmatprep.subr.bf16.mxu0 (!%p10331_p6), %v11860_v41  ;;  %11151 = vmatprep.subr.bf16.mxu1 (!%p10331_p6), %v11860_v41  ;;  %v8816_v54 = vld [vmem:[%s16836_s22] sm:$0x1] (!%p10331_p6)  ;;  %v11875_v26 = vld [vmem:[%s16620_s18 + $0x74] ss:$8 sps:$4 sm:$0xff] (!%p10331_p6)   ;;  %s12107_s23 = smov (!%p10331_p6), 32   ;;  %s12108_s29 = smov (!%p10331_p6), 64  }
 0xe8a   : > { %v8823_v29 = vsub.f32 %v8821_v21, %v8822_v5  ;;  %v8817_v43 = vld [vmem:[%s16837_s28] sm:$0x1]  ;;  %v11877_v44 = vld [vmem:[%s16620_s18 + $0x70] ss:$8 sps:$4 sm:$0xff]   ;;  %v11878_v52 = vld [vmem:[%s16620_s18 + $0x84] ss:$8 sps:$4 sm:$0xff]  }
 0xe8b   : > { %v11880_v36 = vld [vmem:[%s16620_s18 + $0x80] ss:$8 sps:$4 sm:$0xff]   ;;  %v11881_v60 = vld [vmem:[%s16620_s18 + $0x94] ss:$8 sps:$4 sm:$0xff]   ;;  %s12109_s25 = smov 80   ;;  %s12110_s21 = smov 96  }
 0xe8c   : > { %v8824_v15 = vadd.f32 0.8, %v8823_v29  ;;  %9471 = vmatpush1.bf16.msra.mxu0 %v11862_v6  ;;  %11167 = vmatpush1.bf16.msra.mxu1 %v11862_v6  ;;  %v11883_v1 = vld [vmem:[%s16620_s18 + $0x90] ss:$8 sps:$4 sm:$0xff]   ;;  %v11884_v38 = vld [vmem:[%s16620_s18 + $0xa4] ss:$8 sps:$4 sm:$0xff]  }
 0xe8d   : > { %9472 = vmatprep.subr.bf16.mxu0 %v11863_v18  ;;  %11152 = vmatprep.subr.bf16.mxu1 %v11863_v18  ;;  %v11886_v40 = vld [vmem:[%s16620_s18 + $0xa0] ss:$8 sps:$4 sm:$0xff]   ;;  %v11887_v27 = vld [vmem:[%s16620_s18 + $0xb4] ss:$8 sps:$4 sm:$0xff]   ;;  %s12111_s16 = smov 112   ;;  %vm8857_vm2 = vcmask 261120  }
 0xe8e   : > { %11902 = vrsqrt.f32 %v8824_v15  ;;  %v11889_v17 = vld [vmem:[%s16620_s18 + $0xb0] ss:$8 sps:$4 sm:$0xff]   ;;  %v11890_v32 = vld [vmem:[%s16620_s18 + $0xc4] ss:$8 sps:$4 sm:$0xff]   ;;  %v11892_v2 = vld [vmem:[%s16620_s18 + $0xc0] ss:$8 sps:$4 sm:$0xff]  }
 0xe8f   : > { %v11893_v48 = vld [vmem:[%s16620_s18 + $0xd4] ss:$8 sps:$4 sm:$0xff]   ;;  %v11895_v7 = vld [vmem:[%s16620_s18 + $0xd0] ss:$8 sps:$4 sm:$0xff]   ;;  %v11896_v46 = vld [vmem:[%s16620_s18 + $0xe4] ss:$8 sps:$4 sm:$0xff]  }
 0xe90   : > { %9473 = vmatpush1.bf16.msra.mxu0 %v11865_v34  ;;  %11168 = vmatpush1.bf16.msra.mxu1 %v11865_v34  ;;  %v11898_v59 = vld [vmem:[%s16620_s18 + $0xe0] ss:$8 sps:$4 sm:$0xff]   ;;  %v11899_v22 = vld [vmem:[%s16620_s18 + $0xf4] ss:$8 sps:$4 sm:$0xff]   ;;  %v11901_v10 = vld [vmem:[%s16620_s18 + $0xf0] ss:$8 sps:$4 sm:$0xff]  }
 0xe91   : > { %9474 = vmatprep.subr.bf16.mxu0 %v11866_v42  ;;  %11153 = vmatprep.subr.bf16.mxu1 %v11866_v42  ;;  %s8747_s4 = sshra.s32 %s12254_s26, 3  ;;  %vm8859_vm3 = vcmask 392192   ;;  %vm8861_vm4 = vcmask 523264   ;;  %vm8863_vm5 = vcmask 654336   ;;  %vm8865_vm6 = vcmask 785408   ;;  %s16838_s28 = sld [smem:[#allocation75_spill]] }
 0xe92   : > { %vm8867_vm7 = vcmask 916480  }
 0xe94   : > { %9475 = vmatpush1.bf16.msra.mxu0 %v11868_v45  ;;  %11169 = vmatpush1.bf16.msra.mxu1 %v11868_v45 }
 0xe95   : > { %9476 = vmatprep.subr.bf16.mxu0 %v11869_v9  ;;  %11154 = vmatprep.subr.bf16.mxu1 %v11869_v9 }
 0xe98   : > { %v11903_v49 = vpop.eup %11902  ;;  %9477 = vmatpush1.bf16.msra.mxu0 %v11871_v57  ;;  %11170 = vmatpush1.bf16.msra.mxu1 %v11871_v57 }
 0xe99   : > { %v16147_v61 = vmul.f32 %v11903_v49, %v8816_v54  ;;  %9478 = vmatprep.subr.bf16.mxu0 %v11872_v47  ;;  %11155 = vmatprep.subr.bf16.mxu1 %v11872_v47 }
 0xe9b   : > { %v8833_v13 = vrot.slane %v16147_v61, %v16142_v24  ;;  %v8827_v58 = vmul.f32 %v16147_v61, %v8819_v63 }
 0xe9c   : > { %9479 = vmatpush1.bf16.msra.mxu0 %v11874_v4  ;;  %11171 = vmatpush1.bf16.msra.mxu1 %v11874_v4 }
 0xe9d   : > { %8840 = vrot.lane.b32.xlu1 %v8833_v13, %s12105_s3  ;;  %8834 = vrot.lane.b32.xlu0 %v8833_v13, %s12106_s0  ;;  %v16162_v55 = vsub.f32 %v8817_v43, %v8827_v58 }
 0xe9e   : > { %9480 = vmatprep.subr.bf16.mxu0 %v11875_v26  ;;  %11156 = vmatprep.subr.bf16.mxu1 %v11875_v26 }
 0xe9f   : > { %v8873_v31 = vrot.slane %v16162_v55, %v16142_v24 }
 0xea0   : > { %9481 = vmatpush1.bf16.msra.mxu0 %v11877_v44  ;;  %11172 = vmatpush1.bf16.msra.mxu1 %v11877_v44 }
 0xea1   : > { %8837 = vrot.lane.b32.xlu0 %v8833_v13, %s12107_s23  ;;  %8874 = vrot.lane.b32.xlu1 %v8873_v31, %s12106_s0 }
 0xea2   : > { %9482 = vmatprep.subr.bf16.mxu0 %v11878_v52  ;;  %11157 = vmatprep.subr.bf16.mxu1 %v11878_v52 }
 0xea4   : > { %9483 = vmatpush1.bf16.msra.mxu0 %v11880_v36  ;;  %11173 = vmatpush1.bf16.msra.mxu1 %v11880_v36 }
 0xea5   : > { %8843 = vrot.lane.b32.xlu0 %v8833_v13, %s12108_s29  ;;  %8877 = vrot.lane.b32.xlu1 %v8873_v31, %s12107_s23  ;;  %s10380_s23 = sshll.u32 %s8747_s4, 4 }
 0xea6   : > { %9484 = vmatprep.subr.bf16.mxu0 %v11881_v60  ;;  %11158 = vmatprep.subr.bf16.mxu1 %v11881_v60  ;;  %s16235_s26 = scalar_lea.vmem [#allocation3], %s10380_s23 }
 0xea7   : > { %v8753_v11 = vld [vmem:[%s16235_s26 + $0x8] sm:$0xff]  ;;  %v8755_v29 = vld [vmem:[%s16235_s26 + $0x18] sm:$0xff]  ;;  %v8752_v30 = vld [vmem:[%s16235_s26] sm:$0xff] }
 0xea8   : > { %9485 = vmatpush1.bf16.msra.mxu0 %v11883_v1  ;;  %11174 = vmatpush1.bf16.msra.mxu1 %v11883_v1  ;;  %v8785_v15 = vld [vmem:[%s16235_s26 + $0x108] sm:$0xff]  ;;  %v8787_v41 = vld [vmem:[%s16235_s26 + $0x118] sm:$0xff]  ;;  %v8754_v34 = vld [vmem:[%s16235_s26 + $0x10] sm:$0xff] }
 0xea9   : > { %8846 = vrot.lane.b32.xlu0 %v8833_v13, %s12109_s25  ;;  %8880 = vrot.lane.b32.xlu1 %v8873_v31, %s12105_s3  ;;  %v8784_v42 = vld [vmem:[%s16235_s26 + $0x100] sm:$0xff]  ;;  %v8786_v54 = vld [vmem:[%s16235_s26 + $0x110] sm:$0xff] }
 0xeaa   : > { %9486 = vmatprep.subr.bf16.mxu0 %v11884_v38  ;;  %11159 = vmatprep.subr.bf16.mxu1 %v11884_v38  ;;  %v8757_v9 = vld [vmem:[%s16235_s26 + $0x28] sm:$0xff]  ;;  %v8759_v49 = vld [vmem:[%s16235_s26 + $0x38] sm:$0xff]  ;;  %v8756_v4 = vld [vmem:[%s16235_s26 + $0x20] sm:$0xff] }
 0xeab   : > { %v8758_v26 = vld [vmem:[%s16235_s26 + $0x30] sm:$0xff]  ;;  %v8788_v1 = vld [vmem:[%s16235_s26 + $0x120] sm:$0xff] }
 0xeac   : > { %9487 = vmatpush1.bf16.msra.mxu0 %v11886_v40  ;;  %11175 = vmatpush1.bf16.msra.mxu1 %v11886_v40  ;;  %v8790_v38 = vld [vmem:[%s16235_s26 + $0x130] sm:$0xff]  ;;  %v8761_v40 = vld [vmem:[%s16235_s26 + $0x48] sm:$0xff] }
 0xead   : > { %8849 = vrot.lane.b32.xlu0 %v8833_v13, %s12110_s21  ;;  %8883 = vrot.lane.b32.xlu1 %v8873_v31, %s12108_s29 }
 0xeae   : > { %9488 = vmatprep.subr.bf16.mxu0 %v11887_v27  ;;  %11160 = vmatprep.subr.bf16.mxu1 %v11887_v27 }
 0xeb0   : > { %9489 = vmatpush1.bf16.msra.mxu0 %v11889_v17  ;;  %11176 = vmatpush1.bf16.msra.mxu1 %v11889_v17 }
 0xeb1   : > { %8852 = vrot.lane.b32.xlu0 %v8833_v13, %s12111_s16  ;;  %8886 = vrot.lane.b32.xlu1 %v8873_v31, %s12109_s25 }
 0xeb2   : > { %9490 = vmatprep.subr.bf16.mxu0 %v11890_v32  ;;  %11161 = vmatprep.subr.bf16.mxu1 %v11890_v32 }
 0xeb4   : > { %9491 = vmatpush1.bf16.msra.mxu0 %v11892_v2  ;;  %11177 = vmatpush1.bf16.msra.mxu1 %v11892_v2 }
 0xeb5   : > { %8889 = vrot.lane.b32.xlu0 %v8873_v31, %s12110_s21  ;;  %8892 = vrot.lane.b32.xlu1 %v8873_v31, %s12111_s16  ;;  %v8791_v31 = vld [vmem:[%s16235_s26 + $0x138] sm:$0xff] }
 0xeb6   : > { %9492 = vmatprep.subr.bf16.mxu0 %v11893_v48  ;;  %11162 = vmatprep.subr.bf16.mxu1 %v11893_v48 }
 0xeb8   : > { %9493 = vmatpush1.bf16.msra.mxu0 %v11895_v7  ;;  %11178 = vmatpush1.bf16.msra.mxu1 %v11895_v7 }
 0xeb9   : > { %9494 = vmatprep.subr.bf16.mxu0 %v11896_v46  ;;  %11163 = vmatprep.subr.bf16.mxu1 %v11896_v46 }
 0xebc   : > { %9495 = vmatpush1.bf16.msra.mxu0 %v11898_v59  ;;  %11179 = vmatpush1.bf16.msra.mxu1 %v11898_v59 }
 0xebd   : > { %9496 = vmatprep.subr.bf16.mxu0 %v11899_v22  ;;  %11164 = vmatprep.subr.bf16.mxu1 %v11899_v22 }
 0xec0   : > { %9497 = vmatpush1.bf16.msra.mxu0 %v11901_v10  ;;  %11180 = vmatpush1.bf16.msra.mxu1 %v11901_v10 }
 0xf0f   : > { %v8841_v28 = vpop.permute.xlu1 %8840  ;;  %v8835_v12 = vpop.permute.xlu0 %8834 }
 0xf10   : > { %v8856_v25 = vsel %vm8855_vm1, %v16147_v61, %v8835_v12  ;;  %v8789_v61 = vld [vmem:[%s16235_s26 + $0x128] sm:$0xff] }
 0xf13   : > { %v8838_v37 = vpop.permute.xlu0 %8837  ;;  %v8875_v23 = vpop.permute.xlu1 %8874 }
 0xf14   : > { %v8858_v50 = vsel %vm8857_vm2, %v8856_v25, %v8838_v37  ;;  %v8895_v3 = vsel %vm8855_vm1, %v16162_v55, %v8875_v23 }
 0xf15   : > { %v8860_v0 = vsel %vm8859_vm3, %v8858_v50, %v8841_v28 }
 0xf17   : > { %v8844_v20 = vpop.permute.xlu0 %8843  ;;  %v8878_v16 = vpop.permute.xlu1 %8877 }
 0xf18   : > { %v8862_v39 = vsel %vm8861_vm4, %v8860_v0, %v8844_v20  ;;  %v8896_v63 = vsel %vm8857_vm2, %v8895_v3, %v8878_v16 }
 0xf1b   : > { %v8847_v33 = vpop.permute.xlu0 %8846  ;;  %v8881_v14 = vpop.permute.xlu1 %8880 }
 0xf1c   : > { %v8864_v35 = vsel %vm8863_vm5, %v8862_v39, %v8847_v33  ;;  %v8897_v51 = vsel %vm8859_vm3, %v8896_v63, %v8881_v14 }
 0xf1f   : > { %v8850_v19 = vpop.permute.xlu0 %8849  ;;  %v8884_v53 = vpop.permute.xlu1 %8883 }
 0xf20   : > { %v8866_v21 = vsel %vm8865_vm6, %v8864_v35, %v8850_v19  ;;  %v8898_v6 = vsel %vm8861_vm4, %v8897_v51, %v8884_v53 }
 0xf23   : > { %v8853_v5 = vpop.permute.xlu0 %8852  ;;  %v8887_v8 = vpop.permute.xlu1 %8886 }
 0xf24   : > { %v8868_v56 = vsel %vm8867_vm7, %v8866_v21, %v8853_v5  ;;  %v8899_v45 = vsel %vm8863_vm5, %v8898_v6, %v8887_v8 }
 0xf25   : > { %v16246_v18 = vrot.slane %v8868_v56, %v16142_v24 }
 0xf27   : > { %v8890_v43 = vpop.permute.xlu0 %8889  ;;  %v8893_v13 = vpop.permute.xlu1 %8892  ;;  %v8907_v58 = vmul.f32 %v16246_v18, %v8753_v11  ;;  %v8909_v57 = vmul.f32 %v16246_v18, %v8755_v29  ;;  %v8939_v47 = vmul.f32 %v16246_v18, %v8785_v15  ;;  %v8941_v55 = vmul.f32 %v16246_v18, %v8787_v41 }
 0xf28   : > { %v8900_v44 = vsel %vm8865_vm6, %v8899_v45, %v8890_v43  ;;  %v8906_v52 = vmul.f32 %v16246_v18, %v8752_v30  ;;  %v8908_v36 = vmul.f32 %v16246_v18, %v8754_v34  ;;  %v8938_v60 = vmul.f32 %v16246_v18, %v8784_v42 }
 0xf29   : > { %v8901_v27 = vsel %vm8867_vm7, %v8900_v44, %v8893_v13  ;;  %v8940_v17 = vmul.f32 %v16246_v18, %v8786_v54  ;;  %v8911_v32 = vmul.f32 %v16246_v18, %v8757_v9  ;;  %v8913_v2 = vmul.f32 %v16246_v18, %v8759_v49 }
 0xf2a   : > { %v16274_v48 = vrot.slane %v8901_v27, %v16142_v24  ;;  %v8943_v7 = vmul.f32 %v16246_v18, %v8789_v61  ;;  %v8945_v46 = vmul.f32 %v16246_v18, %v8791_v31  ;;  %v8910_v59 = vmul.f32 %v16246_v18, %v8756_v4 }
 0xf2b   : > { %v8912_v22 = vmul.f32 %v16246_v18, %v8758_v26  ;;  %v16281_v10 = vmul.f32 %v16246_v18, %v8788_v1  ;;  %v16284_v28 = vmul.f32 %v16246_v18, %v8790_v38  ;;  %v16287_v12 = vmul.f32 %v16246_v18, %v8761_v40 }
 0xf2c   : > { %v8975_v37 = vadd.f32 %v16274_v48, %v8907_v58  ;;  %v8977_v23 = vadd.f32 %v16274_v48, %v8909_v57  ;;  %v9007_v20 = vadd.f32 %v16274_v48, %v8939_v47  ;;  %v9009_v16 = vadd.f32 %v16274_v48, %v8941_v55 }
 0xf2d   : > { %v8974_v33 = vadd.f32 %v16274_v48, %v8906_v52  ;;  %v8976_v14 = vadd.f32 %v16274_v48, %v8908_v36  ;;  %v9006_v25 = vadd.f32 %v16274_v48, %v8938_v60  ;;  %v9008_v50 = vadd.f32 %v16274_v48, %v8940_v17  ;;  %v8763_v36 = vld [vmem:[%s16235_s26 + $0x58] sm:$0xff]  ;;  %v8793_v60 = vld [vmem:[%s16235_s26 + $0x148] sm:$0xff] }
 0xf2e   : > { %vm9039_vm8 = vcmp.ge.f32.partialorder %v8975_v37, 0.0  ;;  %vm9041_vm9 = vcmp.ge.f32.partialorder %v8977_v23, 0.0  ;;  %v9103_v19 = vmul.f32 0.2, %v8975_v37  ;;  %v9105_v53 = vmul.f32 0.2, %v8977_v23 }
 0xf2f   : > { %vm9071_vm10 = vcmp.ge.f32.partialorder %v9007_v20, 0.0  ;;  %vm9073_vm11 = vcmp.ge.f32.partialorder %v9009_v16, 0.0  ;;  %v9135_v0 = vmul.f32 0.2, %v9007_v20  ;;  %v9137_v39 = vmul.f32 0.2, %v9009_v16 }
 0xf30   : > { %v9167_v3 = vsel %vm9039_vm8, %v8975_v37, %v9103_v19  ;;  %v9169_v35 = vsel %vm9041_vm9, %v8977_v23, %v9105_v53  ;;  %vm9038_vm12 = vcmp.ge.f32.partialorder %v8974_v33, 0.0  ;;  %vm9040_vm13 = vcmp.ge.f32.partialorder %v8976_v14, 0.0  ;;  %v8792_v19 = vld [vmem:[%s16235_s26 + $0x140] sm:$0xff]  ;;  %v8794_v53 = vld [vmem:[%s16235_s26 + $0x150] sm:$0xff] }
 0xf31   : > { %v9231_v63 = vpack.c.bf16 %v9169_v35, %v9167_v3  ;;  %v9199_v21 = vsel %vm9071_vm10, %v9007_v20, %v9135_v0  ;;  %v9201_v5 = vsel %vm9073_vm11, %v9009_v16, %v9137_v39  ;;  %v9102_v8 = vmul.f32 0.2, %v8974_v33 }
 0xf32   : > { %v9247_v11 = vpack.c.bf16 %v9201_v5, %v9199_v21  ;;  %v9104_v29 = vmul.f32 0.2, %v8976_v14  ;;  %vm9070_vm14 = vcmp.ge.f32.partialorder %v9006_v25, 0.0  ;;  %vm9072_vm15 = vcmp.ge.f32.partialorder %v9008_v50, 0.0 }
 0xf33   : > { %9498 = vmatprep.mubr.bf16.mxu0 %v9231_v63  ;;  %v9166_v51 = vsel %vm9038_vm12, %v8974_v33, %v9102_v8  ;;  %v9134_v56 = vmul.f32 0.2, %v9006_v25  ;;  %v9136_v15 = vmul.f32 0.2, %v9008_v50  ;;  %v8979_v41 = vadd.f32 %v16274_v48, %v8911_v32  ;;  %v8762_v33 = vld [vmem:[%s16235_s26 + $0x50] sm:$0xff] }
 0xf34   : > { %9578 = vmatprep.mubr.bf16.mxu1 %v9247_v11  ;;  %v9168_v30 = vsel %vm9040_vm13, %v8976_v14, %v9104_v29  ;;  %v8981_v6 = vadd.f32 %v16274_v48, %v8913_v2  ;;  %v9011_v34 = vadd.f32 %v16274_v48, %v8943_v7  ;;  %v9013_v42 = vadd.f32 %v16274_v48, %v8945_v46  ;;  %v8795_v46 = vld [vmem:[%s16235_s26 + $0x158] sm:$0xff] }
 0xf35   : > { %v9230_v54 = vpack.c.bf16 %v9168_v30, %v9166_v51  ;;  %v9198_v45 = vsel %vm9070_vm14, %v9006_v25, %v9134_v56  ;;  %v9200_v9 = vsel %vm9072_vm15, %v9008_v50, %v9136_v15  ;;  %vm9043_vm0 = vcmp.ge.f32.partialorder %v8979_v41, 0.0  ;;  %v8765_v51 = vld [vmem:[%s16235_s26 + $0x68] sm:$0xff]  ;;  %v8767_v56 = vld [vmem:[%s16235_s26 + $0x78] sm:$0xff] }
 0xf36   : > { %v9246_v49 = vpack.c.bf16 %v9200_v9, %v9198_v45  ;;  %vm9045_vm1 = vcmp.ge.f32.partialorder %v8981_v6, 0.0  ;;  %v9107_v61 = vmul.f32 0.2, %v8979_v41  ;;  %v9109_v43 = vmul.f32 0.2, %v8981_v6 }
 0xf37   : > { %9499 = vmatmul.mubr.bf16.vlgmr.msra.gmra.mrb[0].mxu0 %v9230_v54  ;;  %vm9075_vm2 = vcmp.ge.f32.partialorder %v9011_v34, 0.0  ;;  %vm9077_vm3 = vcmp.ge.f32.partialorder %v9013_v42, 0.0  ;;  %v9139_v13 = vmul.f32 0.2, %v9011_v34  ;;  %v9141_v58 = vmul.f32 0.2, %v9013_v42 }
 0xf38   : > { %9579 = vmatmul.mubr.bf16.vlgmr.msra.gmra.mrb[0].mxu1 %v9246_v49  ;;  %v9171_v57 = vsel %vm9043_vm0, %v8979_v41, %v9107_v61  ;;  %v9173_v47 = vsel %vm9045_vm1, %v8981_v6, %v9109_v43  ;;  %v8978_v55 = vadd.f32 %v16274_v48, %v8910_v59  ;;  %v8980_v31 = vadd.f32 %v16274_v48, %v8912_v22  ;;  %v8760_v22 = vld [vmem:[%s16235_s26 + $0x40] sm:$0xff]  ;;  %v8797_v61 = vld [vmem:[%s16235_s26 + $0x168] sm:$0xff] }
 0xf39   : > { %v9233_v4 = vpack.c.bf16 %v9173_v47, %v9171_v57  ;;  %v9203_v26 = vsel %vm9075_vm2, %v9011_v34, %v9139_v13  ;;  %v9205_v44 = vsel %vm9077_vm3, %v9013_v42, %v9141_v58  ;;  %v9010_v52 = vadd.f32 %v16274_v48, %v16281_v10  ;;  %v8799_v57 = vld [vmem:[%s16235_s26 + $0x178] sm:$0xff] }
 0xf3a   : > { %v9249_v1 = vpack.c.bf16 %v9205_v44, %v9203_v26  ;;  %vm9042_vm4 = vcmp.ge.f32.partialorder %v8978_v55, 0.0  ;;  %vm9044_vm5 = vcmp.ge.f32.partialorder %v8980_v31, 0.0  ;;  %v9106_v38 = vmul.f32 0.2, %v8978_v55 }
 0xf3b   : > { %9508 = vmatprep.mubr.bf16.mxu0 %v9233_v4  ;;  %v9108_v40 = vmul.f32 0.2, %v8980_v31  ;;  %v9012_v27 = vadd.f32 %v16274_v48, %v16284_v28  ;;  %vm9074_vm6 = vcmp.ge.f32.partialorder %v9010_v52, 0.0  ;;  %v9138_v17 = vmul.f32 0.2, %v9010_v52 }
 0xf3c   : > { %9588 = vmatprep.mubr.bf16.mxu1 %v9249_v1  ;;  %v9170_v32 = vsel %vm9042_vm4, %v8978_v55, %v9106_v38  ;;  %v8917_v2 = vmul.f32 %v16246_v18, %v8763_v36  ;;  %v8983_v7 = vadd.f32 %v16274_v48, %v16287_v12  ;;  %v8947_v59 = vmul.f32 %v16246_v18, %v8793_v60 }
 0xf3d   : > { %v9172_v10 = vsel %vm9044_vm5, %v8980_v31, %v9108_v40  ;;  %vm9076_vm7 = vcmp.ge.f32.partialorder %v9012_v27, 0.0  ;;  %v9140_v37 = vmul.f32 0.2, %v9012_v27  ;;  %v9202_v28 = vsel %vm9074_vm6, %v9010_v52, %v9138_v17  ;;  %v8764_v52 = vld [vmem:[%s16235_s26 + $0x60] sm:$0xff]  ;;  %v8766_v40 = vld [vmem:[%s16235_s26 + $0x70] sm:$0xff] }
 0xf3e   : > { %v9232_v23 = vpack.c.bf16 %v9172_v10, %v9170_v32  ;;  %v8985_v20 = vadd.f32 %v16274_v48, %v8917_v2  ;;  %vm9047_vm8 = vcmp.ge.f32.partialorder %v8983_v7, 0.0  ;;  %v9111_v16 = vmul.f32 0.2, %v8983_v7  ;;  %v8798_v17 = vld [vmem:[%s16235_s26 + $0x170] sm:$0xff] }
 0xf3f   : > { %v9204_v14 = vsel %vm9076_vm7, %v9012_v27, %v9140_v37  ;;  %v8949_v25 = vmul.f32 %v16246_v18, %v8795_v46  ;;  %v9015_v12 = vadd.f32 %v16274_v48, %v8947_v59  ;;  %v8914_v50 = vmul.f32 %v16246_v18, %v8760_v22  ;;  %v8796_v27 = vld [vmem:[%s16235_s26 + $0x160] sm:$0xff] }
 0xf40   : > { %9509 = vmatmul.mubr.bf16.gmra.mrb[4].mxu0 %v9232_v23  ;;  %v9248_v0 = vpack.c.bf16 %v9204_v14, %v9202_v28  ;;  %vm9049_vm9 = vcmp.ge.f32.partialorder %v8985_v20, 0.0  ;;  %v9113_v39 = vmul.f32 0.2, %v8985_v20  ;;  %v9175_v3 = vsel %vm9047_vm8, %v8983_v7, %v9111_v16 }
 0xf41   : > { %v9017_v35 = vadd.f32 %v16274_v48, %v8949_v25  ;;  %vm9079_vm10 = vcmp.ge.f32.partialorder %v9015_v12, 0.0  ;;  %v9143_v63 = vmul.f32 0.2, %v9015_v12  ;;  %v8916_v21 = vmul.f32 %v16246_v18, %v8762_v33 }
 0xf42   : > { %9589 = vmatmul.mubr.bf16.gmra.mrb[4].mxu1 %v9248_v0  ;;  %v9177_v5 = vsel %vm9049_vm9, %v8985_v20, %v9113_v39  ;;  %v8982_v8 = vadd.f32 %v16274_v48, %v8914_v50  ;;  %v8946_v11 = vmul.f32 %v16246_v18, %v8792_v19  ;;  %v8948_v29 = vmul.f32 %v16246_v18, %v8794_v53  ;;  %v8769_v20 = vld [vmem:[%s16235_s26 + $0x88] sm:$0xff]  ;;  %v8771_v39 = vld [vmem:[%s16235_s26 + $0x98] sm:$0xff] }
 0xf43   : > { %v9235_v15 = vpack.c.bf16 %v9177_v5, %v9175_v3  ;;  %vm9081_vm11 = vcmp.ge.f32.partialorder %v9017_v35, 0.0  ;;  %v9145_v41 = vmul.f32 0.2, %v9017_v35  ;;  %v9207_v30 = vsel %vm9079_vm10, %v9015_v12, %v9143_v63  ;;  %v8803_v5 = vld [vmem:[%s16235_s26 + $0x198] sm:$0xff] }
 0xf44   : > { %v8984_v6 = vadd.f32 %v16274_v48, %v8916_v21  ;;  %vm9046_vm12 = vcmp.ge.f32.partialorder %v8982_v8, 0.0  ;;  %v9110_v34 = vmul.f32 0.2, %v8982_v8  ;;  %v9014_v42 = vadd.f32 %v16274_v48, %v8946_v11  ;;  %v8801_v21 = vld [vmem:[%s16235_s26 + $0x188] sm:$0xff] }
 0xf45   : > { %9518 = vmatprep.mubr.bf16.mxu0 %v9235_v15  ;;  %v9209_v54 = vsel %vm9081_vm11, %v9017_v35, %v9145_v41  ;;  %v9016_v45 = vadd.f32 %v16274_v48, %v8948_v29  ;;  %v8919_v9 = vmul.f32 %v16246_v18, %v8765_v51  ;;  %v8921_v49 = vmul.f32 %v16246_v18, %v8767_v56 }
 0xf46   : > { %v9251_v43 = vpack.c.bf16 %v9209_v54, %v9207_v30  ;;  %vm9048_vm13 = vcmp.ge.f32.partialorder %v8984_v6, 0.0  ;;  %v9112_v13 = vmul.f32 0.2, %v8984_v6  ;;  %v9174_v58 = vsel %vm9046_vm12, %v8982_v8, %v9110_v34 }
 0xf47   : > { %vm9078_vm14 = vcmp.ge.f32.partialorder %v9014_v42, 0.0  ;;  %vm9080_vm15 = vcmp.ge.f32.partialorder %v9016_v45, 0.0  ;;  %v9142_v47 = vmul.f32 0.2, %v9014_v42  ;;  %v9144_v55 = vmul.f32 0.2, %v9016_v45 }
 0xf48   : > { %9598 = vmatprep.mubr.bf16.mxu1 %v9251_v43  ;;  %v9176_v31 = vsel %vm9048_vm13, %v8984_v6, %v9112_v13  ;;  %v8987_v4 = vadd.f32 %v16274_v48, %v8919_v9  ;;  %v8989_v26 = vadd.f32 %v16274_v48, %v8921_v49  ;;  %v8951_v44 = vmul.f32 %v16246_v18, %v8797_v61  ;;  %v8770_v61 = vld [vmem:[%s16235_s26 + $0x90] sm:$0xff] }
 0xf49   : > { %v9234_v36 = vpack.c.bf16 %v9176_v31, %v9174_v58  ;;  %v9206_v60 = vsel %vm9078_vm14, %v9014_v42, %v9142_v47  ;;  %v9208_v1 = vsel %vm9080_vm15, %v9016_v45, %v9144_v55  ;;  %v8953_v38 = vmul.f32 %v16246_v18, %v8799_v57  ;;  %v8768_v42 = vld [vmem:[%s16235_s26 + $0x80] sm:$0xff] }
 0xf4a   : > { %v9250_v32 = vpack.c.bf16 %v9208_v1, %v9206_v60  ;;  %vm9051_vm0 = vcmp.ge.f32.partialorder %v8987_v4, 0.0  ;;  %vm9053_vm1 = vcmp.ge.f32.partialorder %v8989_v26, 0.0  ;;  %v9115_v2 = vmul.f32 0.2, %v8987_v4  ;;  %v8800_v31 = vld [vmem:[%s16235_s26 + $0x180] sm:$0xff] }
 0xf4b   : > { %9519 = vmatmul.mubr.bf16.gmra.mrb[8].mxu0 %v9234_v36  ;;  %v9117_v7 = vmul.f32 0.2, %v8989_v26  ;;  %v9019_v46 = vadd.f32 %v16274_v48, %v8951_v44  ;;  %v9021_v59 = vadd.f32 %v16274_v48, %v8953_v38  ;;  %v8918_v22 = vmul.f32 %v16246_v18, %v8764_v52  ;;  %v8802_v52 = vld [vmem:[%s16235_s26 + $0x190] sm:$0xff] }
 0xf4c   : > { %9599 = vmatmul.mubr.bf16.gmra.mrb[8].mxu1 %v9250_v32  ;;  %v9179_v10 = vsel %vm9051_vm0, %v8987_v4, %v9115_v2  ;;  %v8920_v37 = vmul.f32 %v16246_v18, %v8766_v40  ;;  %v8950_v28 = vmul.f32 %v16246_v18, %v8796_v27  ;;  %v8952_v23 = vmul.f32 %v16246_v18, %v8798_v17  ;;  %v8773_v32 = vld [vmem:[%s16235_s26 + $0xa8] sm:$0xff]  ;;  %v8775_v2 = vld [vmem:[%s16235_s26 + $0xb8] sm:$0xff] }
 0xf4d   : > { %v9181_v16 = vsel %vm9053_vm1, %v8989_v26, %v9117_v7  ;;  %vm9083_vm2 = vcmp.ge.f32.partialorder %v9019_v46, 0.0  ;;  %vm9085_vm3 = vcmp.ge.f32.partialorder %v9021_v59, 0.0  ;;  %v9147_v33 = vmul.f32 0.2, %v9019_v46 }
 0xf4e   : > { %v9237_v14 = vpack.c.bf16 %v9181_v16, %v9179_v10  ;;  %v9149_v25 = vmul.f32 0.2, %v9021_v59  ;;  %v8986_v12 = vadd.f32 %v16274_v48, %v8918_v22  ;;  %v8988_v50 = vadd.f32 %v16274_v48, %v8920_v37  ;;  %v8805_v22 = vld [vmem:[%s16235_s26 + $0x1a8] sm:$0xff] }
 0xf4f   : > { %v9211_v19 = vsel %vm9083_vm2, %v9019_v46, %v9147_v33  ;;  %v9018_v53 = vadd.f32 %v16274_v48, %v8950_v28  ;;  %v9020_v0 = vadd.f32 %v16274_v48, %v8952_v23  ;;  %v8923_v3 = vmul.f32 %v16246_v18, %v8769_v20 }
 0xf50   : > { %9528 = vmatprep.mubr.bf16.mxu0 %v9237_v14  ;;  %v9213_v35 = vsel %vm9085_vm3, %v9021_v59, %v9149_v25  ;;  %vm9050_vm4 = vcmp.ge.f32.partialorder %v8986_v12, 0.0  ;;  %vm9052_vm5 = vcmp.ge.f32.partialorder %v8988_v50, 0.0  ;;  %v9114_v63 = vmul.f32 0.2, %v8986_v12  ;;  %v8807_v14 = vld [vmem:[%s16235_s26 + $0x1b8] sm:$0xff] }
 0xf51   : > { %v9253_v8 = vpack.c.bf16 %v9213_v35, %v9211_v19  ;;  %v9116_v11 = vmul.f32 0.2, %v8988_v50  ;;  %vm9082_vm6 = vcmp.ge.f32.partialorder %v9018_v53, 0.0  ;;  %vm9084_vm7 = vcmp.ge.f32.partialorder %v9020_v0, 0.0  ;;  %v8772_v19 = vld [vmem:[%s16235_s26 + $0xa0] sm:$0xff] }
 0xf52   : > { %v9178_v29 = vsel %vm9050_vm4, %v8986_v12, %v9114_v63  ;;  %v9146_v51 = vmul.f32 0.2, %v9018_v53  ;;  %v9148_v56 = vmul.f32 0.2, %v9020_v0  ;;  %v8925_v15 = vmul.f32 %v16246_v18, %v8771_v39 }
 0xf53   : > { %9608 = vmatprep.mubr.bf16.mxu1 %v9253_v8  ;;  %v9180_v41 = vsel %vm9052_vm5, %v8988_v50, %v9116_v11  ;;  %v8991_v30 = vadd.f32 %v16274_v48, %v8923_v3  ;;  %v8955_v6 = vmul.f32 %v16246_v18, %v8801_v21  ;;  %v8957_v34 = vmul.f32 %v16246_v18, %v8803_v5  ;;  %v8774_v5 = vld [vmem:[%s16235_s26 + $0xb0] sm:$0xff] }
 0xf54   : > { %v9236_v54 = vpack.c.bf16 %v9180_v41, %v9178_v29  ;;  %v9210_v45 = vsel %vm9082_vm6, %v9018_v53, %v9146_v51  ;;  %v9212_v9 = vsel %vm9084_vm7, %v9020_v0, %v9148_v56  ;;  %v8993_v49 = vadd.f32 %v16274_v48, %v8925_v15  ;;  %v8804_v41 = vld [vmem:[%s16235_s26 + $0x1a0] sm:$0xff] }
 0xf55   : > { %v9252_v43 = vpack.c.bf16 %v9212_v9, %v9210_v45  ;;  %vm9055_vm8 = vcmp.ge.f32.partialorder %v8991_v30, 0.0  ;;  %v9119_v13 = vmul.f32 0.2, %v8991_v30  ;;  %v9023_v58 = vadd.f32 %v16274_v48, %v8955_v6 }
 0xf56   : > { %9529 = vmatmul.mubr.bf16.gmra.mrb[12].mxu0 %v9236_v54  ;;  %vm9057_vm9 = vcmp.ge.f32.partialorder %v8993_v49, 0.0  ;;  %v9121_v57 = vmul.f32 0.2, %v8993_v49  ;;  %v9025_v47 = vadd.f32 %v16274_v48, %v8957_v34  ;;  %v8922_v55 = vmul.f32 %v16246_v18, %v8768_v42  ;;  %v8806_v42 = vld [vmem:[%s16235_s26 + $0x1b0] sm:$0xff] }
 0xf57   : > { %9609 = vmatmul.mubr.bf16.gmra.mrb[12].mxu1 %v9252_v43  ;;  %v9183_v4 = vsel %vm9055_vm8, %v8991_v30, %v9119_v13  ;;  %vm9087_vm10 = vcmp.ge.f32.partialorder %v9023_v58, 0.0  ;;  %v9151_v26 = vmul.f32 0.2, %v9023_v58  ;;  %v8924_v44 = vmul.f32 %v16246_v18, %v8770_v61 }
 0xf58   : > { %v9185_v36 = vsel %vm9057_vm9, %v8993_v49, %v9121_v57  ;;  %vm9089_vm11 = vcmp.ge.f32.partialorder %v9025_v47, 0.0  ;;  %v9153_v60 = vmul.f32 0.2, %v9025_v47  ;;  %v8990_v1 = vadd.f32 %v16274_v48, %v8922_v55  ;;  %v8779_v57 = vld [vmem:[%s16235_s26 + $0xd8] sm:$0xff] }
 0xf59   : > { %v9239_v38 = vpack.c.bf16 %v9185_v36, %v9183_v4  ;;  %v9215_v40 = vsel %vm9087_vm10, %v9023_v58, %v9151_v26  ;;  %v8992_v27 = vadd.f32 %v16274_v48, %v8924_v44  ;;  %v8954_v17 = vmul.f32 %v16246_v18, %v8800_v31  ;;  %v8777_v58 = vld [vmem:[%s16235_s26 + $0xc8] sm:$0xff] }
 0xf5a   : > { %v9217_v7 = vsel %vm9089_vm11, %v9025_v47, %v9153_v60  ;;  %vm9054_vm12 = vcmp.ge.f32.partialorder %v8990_v1, 0.0  ;;  %v9118_v46 = vmul.f32 0.2, %v8990_v1  ;;  %v8956_v59 = vmul.f32 %v16246_v18, %v8802_v52  ;;  %v8809_v4 = vld [vmem:[%s16235_s26 + $0x1c8] sm:$0xff] }
 0xf5b   : > { %9538 = vmatprep.mubr.bf16.mxu0 %v9239_v38  ;;  %v9255_v10 = vpack.c.bf16 %v9217_v7, %v9215_v40  ;;  %vm9056_vm13 = vcmp.ge.f32.partialorder %v8992_v27, 0.0  ;;  %v9120_v37 = vmul.f32 0.2, %v8992_v27  ;;  %v9022_v28 = vadd.f32 %v16274_v48, %v8954_v17  ;;  %v8811_v40 = vld [vmem:[%s16235_s26 + $0x1d8] sm:$0xff] }
 0xf5c   : > { %v9182_v23 = vsel %vm9054_vm12, %v8990_v1, %v9118_v46  ;;  %v9024_v20 = vadd.f32 %v16274_v48, %v8956_v59  ;;  %v8927_v16 = vmul.f32 %v16246_v18, %v8773_v32  ;;  %v8929_v33 = vmul.f32 %v16246_v18, %v8775_v2  ;;  %v8776_v2 = vld [vmem:[%s16235_s26 + $0xc0] sm:$0xff] }
 0xf5d   : > { %9618 = vmatprep.mubr.bf16.mxu1 %v9255_v10  ;;  %v9184_v25 = vsel %vm9056_vm13, %v8992_v27, %v9120_v37  ;;  %vm9086_vm14 = vcmp.ge.f32.partialorder %v9022_v28, 0.0  ;;  %v9150_v12 = vmul.f32 0.2, %v9022_v28  ;;  %v8959_v50 = vmul.f32 %v16246_v18, %v8805_v22 }
 0xf5e   : > { %v9238_v53 = vpack.c.bf16 %v9184_v25, %v9182_v23  ;;  %vm9088_vm15 = vcmp.ge.f32.partialorder %v9024_v20, 0.0  ;;  %v9152_v0 = vmul.f32 0.2, %v9024_v20  ;;  %v8995_v39 = vadd.f32 %v16274_v48, %v8927_v16  ;;  %v8778_v23 = vld [vmem:[%s16235_s26 + $0xd0] sm:$0xff] }
 0xf5f   : > { %v9214_v3 = vsel %vm9086_vm14, %v9022_v28, %v9150_v12  ;;  %v8997_v35 = vadd.f32 %v16274_v48, %v8929_v33  ;;  %v8961_v63 = vmul.f32 %v16246_v18, %v8807_v14  ;;  %v9027_v21 = vadd.f32 %v16274_v48, %v8959_v50  ;;  %v8808_v50 = vld [vmem:[%s16235_s26 + $0x1c0] sm:$0xff] }
 0xf60   : > { %9539 = vmatmul.mubr.bf16.gmra.mrb[16].mxu0 %v9238_v53  ;;  %v9216_v8 = vsel %vm9088_vm15, %v9024_v20, %v9152_v0  ;;  %vm9059_vm0 = vcmp.ge.f32.partialorder %v8995_v39, 0.0  ;;  %v9123_v11 = vmul.f32 0.2, %v8995_v39  ;;  %v8926_v29 = vmul.f32 %v16246_v18, %v8772_v19 }
 0xf61   : > { %v9254_v51 = vpack.c.bf16 %v9216_v8, %v9214_v3  ;;  %vm9061_vm1 = vcmp.ge.f32.partialorder %v8997_v35, 0.0  ;;  %v9125_v56 = vmul.f32 0.2, %v8997_v35  ;;  %v9029_v15 = vadd.f32 %v16274_v48, %v8961_v63 }
 0xf62   : > { %v9187_v30 = vsel %vm9059_vm0, %v8995_v39, %v9123_v11  ;;  %vm9091_vm2 = vcmp.ge.f32.partialorder %v9027_v21, 0.0  ;;  %v9155_v6 = vmul.f32 0.2, %v9027_v21  ;;  %v8928_v34 = vmul.f32 %v16246_v18, %v8774_v5  ;;  %v8810_v39 = vld [vmem:[%s16235_s26 + $0x1d0] sm:$0xff] }
 0xf63   : > { %9619 = vmatmul.mubr.bf16.gmra.mrb[16].mxu1 %v9254_v51  ;;  %v9189_v54 = vsel %vm9061_vm1, %v8997_v35, %v9125_v56  ;;  %vm9093_vm3 = vcmp.ge.f32.partialorder %v9029_v15, 0.0  ;;  %v9157_v45 = vmul.f32 0.2, %v9029_v15  ;;  %v8994_v9 = vadd.f32 %v16274_v48, %v8926_v29  ;;  %v8781_v29 = vld [vmem:[%s16235_s26 + $0xe8] sm:$0xff]  ;;  %v8783_v51 = vld [vmem:[%s16235_s26 + $0xf8] sm:$0xff] }
 0xf64   : > { %v9241_v49 = vpack.c.bf16 %v9189_v54, %v9187_v30  ;;  %v9219_v61 = vsel %vm9091_vm2, %v9027_v21, %v9155_v6  ;;  %v8996_v43 = vadd.f32 %v16274_v48, %v8928_v34  ;;  %v8958_v13 = vmul.f32 %v16246_v18, %v8804_v41  ;;  %v8813_v30 = vld [vmem:[%s16235_s26 + $0x1e8] sm:$0xff] }
 0xf65   : > { %v9221_v47 = vsel %vm9093_vm3, %v9029_v15, %v9157_v45  ;;  %vm9058_vm4 = vcmp.ge.f32.partialorder %v8994_v9, 0.0  ;;  %v9122_v55 = vmul.f32 0.2, %v8994_v9  ;;  %v8960_v31 = vmul.f32 %v16246_v18, %v8806_v42 }
 0xf66   : > { %9548 = vmatprep.mubr.bf16.mxu0 %v9241_v49  ;;  %v9257_v26 = vpack.c.bf16 %v9221_v47, %v9219_v61  ;;  %vm9060_vm5 = vcmp.ge.f32.partialorder %v8996_v43, 0.0  ;;  %v9124_v44 = vmul.f32 0.2, %v8996_v43  ;;  %v9026_v52 = vadd.f32 %v16274_v48, %v8958_v13  ;;  %v8815_v61 = vld [vmem:[%s16235_s26 + $0x1f8] sm:$0xff] }
 0xf67   : > { %v9186_v36 = vsel %vm9058_vm4, %v8994_v9, %v9122_v55  ;;  %v9028_v60 = vadd.f32 %v16274_v48, %v8960_v31  ;;  %v8931_v1 = vmul.f32 %v16246_v18, %v8777_v58  ;;  %v8933_v38 = vmul.f32 %v16246_v18, %v8779_v57  ;;  %v8780_v57 = vld [vmem:[%s16235_s26 + $0xe0] sm:$0xff] }
 0xf68   : > { %9628 = vmatprep.mubr.bf16.mxu1 %v9257_v26  ;;  %v9188_v27 = vsel %vm9060_vm5, %v8996_v43, %v9124_v44  ;;  %vm9090_vm6 = vcmp.ge.f32.partialorder %v9026_v52, 0.0  ;;  %v9154_v17 = vmul.f32 0.2, %v9026_v52  ;;  %v8963_v32 = vmul.f32 %v16246_v18, %v8809_v4 }
 0xf69   : > { %v9240_v7 = vpack.c.bf16 %v9188_v27, %v9186_v36  ;;  %vm9092_vm7 = vcmp.ge.f32.partialorder %v9028_v60, 0.0  ;;  %v9156_v46 = vmul.f32 0.2, %v9028_v60  ;;  %v8999_v59 = vadd.f32 %v16274_v48, %v8931_v1  ;;  %v8782_v36 = vld [vmem:[%s16235_s26 + $0xf0] sm:$0xff] }
 0xf6a   : > { %v9218_v22 = vsel %vm9090_vm6, %v9026_v52, %v9154_v17  ;;  %v9001_v10 = vadd.f32 %v16274_v48, %v8933_v38  ;;  %v8965_v37 = vmul.f32 %v16246_v18, %v8811_v40  ;;  %v9031_v28 = vadd.f32 %v16274_v48, %v8963_v32  ;;  %v8812_v32 = vld [vmem:[%s16235_s26 + $0x1e0] sm:$0xff] }
 0xf6b   : > { %9549 = vmatmul.mubr.bf16.gmra.mrb[20].mxu0 %v9240_v7  ;;  %v9220_v20 = vsel %vm9092_vm7, %v9028_v60, %v9156_v46  ;;  %vm9063_vm8 = vcmp.ge.f32.partialorder %v8999_v59, 0.0  ;;  %v9127_v16 = vmul.f32 0.2, %v8999_v59  ;;  %v8930_v33 = vmul.f32 %v16246_v18, %v8776_v2 }
 0xf6c   : > { %v9256_v14 = vpack.c.bf16 %v9220_v20, %v9218_v22  ;;  %vm9065_vm9 = vcmp.ge.f32.partialorder %v9001_v10, 0.0  ;;  %v9129_v25 = vmul.f32 0.2, %v9001_v10  ;;  %v9033_v12 = vadd.f32 %v16274_v48, %v8965_v37 }
 0xf6d   : > { %v9191_v19 = vsel %vm9063_vm8, %v8999_v59, %v9127_v16  ;;  %vm9095_vm10 = vcmp.ge.f32.partialorder %v9031_v28, 0.0  ;;  %v9159_v53 = vmul.f32 0.2, %v9031_v28  ;;  %v8932_v0 = vmul.f32 %v16246_v18, %v8778_v23  ;;  %v8814_v59 = vld [vmem:[%s16235_s26 + $0x1f0] sm:$0xff] }
 0xf6e   : > { %9629 = vmatmul.mubr.bf16.gmra.mrb[20].mxu1 %v9256_v14  ;;  %v9193_v3 = vsel %vm9065_vm9, %v9001_v10, %v9129_v25  ;;  %vm9097_vm11 = vcmp.ge.f32.partialorder %v9033_v12, 0.0  ;;  %v9161_v35 = vmul.f32 0.2, %v9033_v12  ;;  %v8998_v63 = vadd.f32 %v16274_v48, %v8930_v33 }
 0xf6f   : > { %v9243_v21 = vpack.c.bf16 %v9193_v3, %v9191_v19  ;;  %v9223_v5 = vsel %vm9095_vm10, %v9031_v28, %v9159_v53  ;;  %v9000_v8 = vadd.f32 %v16274_v48, %v8932_v0  ;;  %v8962_v11 = vmul.f32 %v16246_v18, %v8808_v50 }
 0xf70   : > { %v9225_v56 = vsel %vm9097_vm11, %v9033_v12, %v9161_v35  ;;  %vm9062_vm12 = vcmp.ge.f32.partialorder %v8998_v63, 0.0  ;;  %v9126_v15 = vmul.f32 0.2, %v8998_v63  ;;  %v8964_v41 = vmul.f32 %v16246_v18, %v8810_v39 }
 0xf71   : > { %9558 = vmatprep.mubr.bf16.mxu0 %v9243_v21  ;;  %v9259_v6 = vpack.c.bf16 %v9225_v56, %v9223_v5  ;;  %vm9064_vm13 = vcmp.ge.f32.partialorder %v9000_v8, 0.0  ;;  %v9128_v34 = vmul.f32 0.2, %v9000_v8  ;;  %v9030_v42 = vadd.f32 %v16274_v48, %v8962_v11 }
 0xf72   : > { %v9190_v54 = vsel %vm9062_vm12, %v8998_v63, %v9126_v15  ;;  %v9032_v45 = vadd.f32 %v16274_v48, %v8964_v41  ;;  %v8935_v9 = vmul.f32 %v16246_v18, %v8781_v29  ;;  %v8937_v49 = vmul.f32 %v16246_v18, %v8783_v51 }
 0xf73   : > { %9638 = vmatprep.mubr.bf16.mxu1 %v9259_v6  ;;  %v9192_v43 = vsel %vm9064_vm13, %v9000_v8, %v9128_v34  ;;  %vm9094_vm14 = vcmp.ge.f32.partialorder %v9030_v42, 0.0  ;;  %v9158_v13 = vmul.f32 0.2, %v9030_v42  ;;  %v8967_v58 = vmul.f32 %v16246_v18, %v8813_v30  ;;  %v9294_v8 = vld [vmem:[%s16838_s28] sm:$0x3] }
 0xf74   : > { %v9242_v47 = vpack.c.bf16 %v9192_v43, %v9190_v54  ;;  %vm9096_vm15 = vcmp.ge.f32.partialorder %v9032_v45, 0.0  ;;  %v9160_v55 = vmul.f32 0.2, %v9032_v45  ;;  %v9003_v31 = vadd.f32 %v16274_v48, %v8935_v9 }
 0xf75   : > { %v9222_v4 = vsel %vm9094_vm14, %v9030_v42, %v9158_v13  ;;  %v9005_v26 = vadd.f32 %v16274_v48, %v8937_v49  ;;  %v8969_v44 = vmul.f32 %v16246_v18, %v8815_v61  ;;  %v9035_v52 = vadd.f32 %v16274_v48, %v8967_v58 }
 0xf76   : > { %9559 = vmatmul.mubr.bf16.gmra.mrb[24].mxu0 %v9242_v47  ;;  %v9224_v60 = vsel %vm9096_vm15, %v9032_v45, %v9160_v55  ;;  %vm9067_vm0 = vcmp.ge.f32.partialorder %v9003_v31, 0.0  ;;  %v9131_v1 = vmul.f32 0.2, %v9003_v31  ;;  %v8934_v38 = vmul.f32 %v16246_v18, %v8780_v57 }
 0xf77   : > { %v9258_v40 = vpack.c.bf16 %v9224_v60, %v9222_v4  ;;  %vm9069_vm1 = vcmp.ge.f32.partialorder %v9005_v26, 0.0  ;;  %v9133_v27 = vmul.f32 0.2, %v9005_v26  ;;  %v9037_v17 = vadd.f32 %v16274_v48, %v8969_v44 }
 0xf78   : > { %v9195_v2 = vsel %vm9067_vm0, %v9003_v31, %v9131_v1  ;;  %vm9099_vm2 = vcmp.ge.f32.partialorder %v9035_v52, 0.0  ;;  %v9163_v7 = vmul.f32 0.2, %v9035_v52  ;;  %v8936_v46 = vmul.f32 %v16246_v18, %v8782_v36 }
 0xf79   : > { %9639 = vmatmul.mubr.bf16.gmra.mrb[24].mxu1 %v9258_v40  ;;  %v9197_v22 = vsel %vm9069_vm1, %v9005_v26, %v9133_v27  ;;  %vm9101_vm3 = vcmp.ge.f32.partialorder %v9037_v17, 0.0  ;;  %v9165_v10 = vmul.f32 0.2, %v9037_v17  ;;  %v9002_v37 = vadd.f32 %v16274_v48, %v8934_v38 }
 0xf7a   : > { %v9245_v28 = vpack.c.bf16 %v9197_v22, %v9195_v2  ;;  %v9227_v23 = vsel %vm9099_vm2, %v9035_v52, %v9163_v7  ;;  %v9004_v20 = vadd.f32 %v16274_v48, %v8936_v46  ;;  %v8966_v16 = vmul.f32 %v16246_v18, %v8812_v32 }
 0xf7b   : > { %v9229_v33 = vsel %vm9101_vm3, %v9037_v17, %v9165_v10  ;;  %vm9066_vm4 = vcmp.ge.f32.partialorder %v9002_v37, 0.0  ;;  %v9130_v14 = vmul.f32 0.2, %v9002_v37  ;;  %v8968_v25 = vmul.f32 %v16246_v18, %v8814_v59 }
 0xf7c   : > { %9568 = vmatprep.mubr.bf16.mxu0 %v9245_v28  ;;  %v9261_v12 = vpack.c.bf16 %v9229_v33, %v9227_v23  ;;  %vm9068_vm5 = vcmp.ge.f32.partialorder %v9004_v20, 0.0  ;;  %v9132_v50 = vmul.f32 0.2, %v9004_v20  ;;  %v9034_v19 = vadd.f32 %v16274_v48, %v8966_v16 }
 0xf7d   : > { %v9194_v53 = vsel %vm9066_vm4, %v9002_v37, %v9130_v14  ;;  %v9036_v0 = vadd.f32 %v16274_v48, %v8968_v25  ;;  %v9302_v11 = vsub.s32 1, %v16127_v62  ;;  %v16455_v48 = vrot.slane %v9294_v8, %v16142_v24 }
 0xf7e   : > { %9648 = vmatprep.mubr.bf16.mxu1 %v9261_v12  ;;  %v9196_v39 = vsel %vm9068_vm5, %v9004_v20, %v9132_v50  ;;  %vm9098_vm6 = vcmp.ge.f32.partialorder %v9034_v19, 0.0  ;;  %v9162_v3 = vmul.f32 0.2, %v9034_v19 }
 0xf7f   : > { %v9244_v35 = vpack.c.bf16 %v9196_v39, %v9194_v53  ;;  %vm9100_vm7 = vcmp.ge.f32.partialorder %v9036_v0, 0.0  ;;  %v9164_v63 = vmul.f32 0.2, %v9036_v0  ;;  %v16457_v29 = vrot.slane %v9294_v8, %v9302_v11 }
 0xf80   : > { %v9226_v21 = vsel %vm9098_vm6, %v9034_v19, %v9162_v3 }
 0xf81   : > { %9569 = vmatmul.mubr.bf16.gmra.mrb[28].mxu0 %v9244_v35  ;;  %v9228_v5 = vsel %vm9100_vm7, %v9036_v0, %v9164_v63 }
 0xf82   : > { %v9260_v18 = vpack.c.bf16 %v9228_v5, %v9226_v21 }
 0xf84   : > { %9649 = vmatmul.mubr.bf16.gmra.mrb[28].mxu1 %v9260_v18 }
0x100a   : > { %v9500_v51 = vpop.f32.mrb[0].mxu0 }
0x100b   : > { %v9501_v56 = vadd.f32 %v9500_v51, %v16455_v48  ;;  %v9580_v15 = vpop.f32.mrb[0].mxu1  ;;  %v9502_v41 = vpop.f32.mrb[1].mxu0 }
0x100c   : > { %v9581_v30 = vadd.f32 %v9580_v15, %v16455_v48  ;;  %v9503_v6 = vadd.f32 %v9502_v41, %v16457_v29  ;;  %v9582_v34 = vpop.f32.mrb[1].mxu1  ;;  %v9504_v42 = vpop.f32.mrb[2].mxu0 }
0x100d   : > { %11904 = vtanh.f32 %v9501_v56  ;;  %v9583_v54 = vadd.f32 %v9582_v34, %v16457_v29  ;;  %v9505_v62 = vadd.f32 %v9504_v42, %v16455_v48  ;;  %v9584_v24 = vpop.f32.mrb[2].mxu1  ;;  %v9506_v45 = vpop.f32.mrb[3].mxu0 }
0x100e   : > { %11906 = vtanh.f32 %v9581_v30  ;;  %v9585_v9 = vadd.f32 %v9584_v24, %v16455_v48  ;;  %v9586_v49 = vpop.f32.mrb[3].mxu1  ;;  %v9507_v61 = vadd.f32 %v9506_v45, %v16457_v29 }
0x100f   : > { %11908 = vtanh.f32 %v9503_v6  ;;  %v9587_v43 = vadd.f32 %v9586_v49, %v16457_v29 }
0x1010   : > { %11910 = vtanh.f32 %v9583_v54 }
0x1011   : > { %11912 = vtanh.f32 %v9505_v62 }
0x1012   : > { %11914 = vtanh.f32 %v9585_v9 }
0x1013   : > { %11916 = vtanh.f32 %v9507_v61  ;;  %v9510_v13 = vpop.f32.mrb[4].mxu0 }
0x1014   : > { %11918 = vtanh.f32 %v9587_v43  ;;  %v9511_v58 = vadd.f32 %v9510_v13, %v16455_v48  ;;  %v9512_v57 = vpop.f32.mrb[5].mxu0 }
0x1015   : > { %v9590_v47 = vpop.f32.mrb[4].mxu1  ;;  %v9513_v55 = vadd.f32 %v9512_v57, %v16457_v29  ;;  %v9514_v31 = vpop.f32.mrb[6].mxu0 }
0x1016   : > { %11920 = vtanh.f32 %v9511_v58  ;;  %v9591_v4 = vadd.f32 %v9590_v47, %v16455_v48  ;;  %v9592_v26 = vpop.f32.mrb[5].mxu1  ;;  %v9515_v44 = vadd.f32 %v9514_v31, %v16455_v48  ;;  %v9516_v52 = vpop.f32.mrb[7].mxu0 }
0x1017   : > { %v11905_v36 = vpop.eup %11904  ;;  %11922 = vtanh.f32 %v9513_v55  ;;  %v9593_v60 = vadd.f32 %v9592_v26, %v16457_v29  ;;  %v9594_v1 = vpop.f32.mrb[6].mxu1  ;;  %v9517_v27 = vadd.f32 %v9516_v52, %v16457_v29 }
0x1018   : > { %v11907_v38 = vpop.eup %11906  ;;  %9723 = vst [vmem:[%s12266_s19] sm:$0xff] %v11905_v36  ;;  %11924 = vtanh.f32 %v9591_v4  ;;  %v9595_v40 = vadd.f32 %v9594_v1, %v16455_v48  ;;  %v9596_v17 = vpop.f32.mrb[7].mxu1 }
0x1019   : > { %v11909_v32 = vpop.eup %11908  ;;  %9755 = vst [vmem:[%s12266_s19 + $0x100] sm:$0xff] %v11907_v38  ;;  %11926 = vtanh.f32 %v9593_v60  ;;  %v9597_v2 = vadd.f32 %v9596_v17, %v16457_v29 }
0x101a   : > { %v11911_v7 = vpop.eup %11910  ;;  %9724 = vst [vmem:[%s12266_s19 + $0x8] sm:$0xff] %v11909_v32  ;;  %11928 = vtanh.f32 %v9515_v44 }
0x101b   : > { %v11913_v46 = vpop.eup %11912  ;;  %9756 = vst [vmem:[%s12266_s19 + $0x108] sm:$0xff] %v11911_v7  ;;  %11930 = vtanh.f32 %v9595_v40 }
0x101c   : > { %v11915_v59 = vpop.eup %11914  ;;  %9725 = vst [vmem:[%s12266_s19 + $0x10] sm:$0xff] %v11913_v46  ;;  %11932 = vtanh.f32 %v9517_v27 }
0x101d   : > { %v11917_v22 = vpop.eup %11916  ;;  %9757 = vst [vmem:[%s12266_s19 + $0x110] sm:$0xff] %v11915_v59  ;;  %11934 = vtanh.f32 %v9597_v2 }
0x101e   : > { %v11919_v10 = vpop.eup %11918  ;;  %9726 = vst [vmem:[%s12266_s19 + $0x18] sm:$0xff] %v11917_v22  ;;  %v9520_v37 = vpop.f32.mrb[8].mxu0 }
0x101f   : > { %9758 = vst [vmem:[%s12266_s19 + $0x118] sm:$0xff] %v11919_v10  ;;  %v9521_v28 = vadd.f32 %v9520_v37, %v16455_v48  ;;  %v9600_v23 = vpop.f32.mrb[8].mxu1  ;;  %v9522_v20 = vpop.f32.mrb[9].mxu0 }
0x1020   : > { %v11921_v16 = vpop.eup %11920  ;;  %v9601_v33 = vadd.f32 %v9600_v23, %v16455_v48  ;;  %v9523_v14 = vadd.f32 %v9522_v20, %v16457_v29  ;;  %v9602_v25 = vpop.f32.mrb[9].mxu1 }
0x1021   : > { %v9524_v12 = vpop.f32.mrb[10].mxu0  ;;  %v11923_v50 = vpop.eup %11922  ;;  %9727 = vst [vmem:[%s12266_s19 + $0x20] sm:$0xff] %v11921_v16  ;;  %11936 = vtanh.f32 %v9521_v28  ;;  %v9603_v19 = vadd.f32 %v9602_v25, %v16457_v29 }
0x1022   : > { %v9525_v53 = vadd.f32 %v9524_v12, %v16455_v48  ;;  %v9604_v0 = vpop.f32.mrb[10].mxu1  ;;  %v9526_v39 = vpop.f32.mrb[11].mxu0  ;;  %9728 = vst [vmem:[%s12266_s19 + $0x28] sm:$0xff] %v11923_v50  ;;  %11938 = vtanh.f32 %v9601_v33 }
0x1023   : > { %v11925_v3 = vpop.eup %11924  ;;  %v9605_v35 = vadd.f32 %v9604_v0, %v16455_v48  ;;  %v9606_v63 = vpop.f32.mrb[11].mxu1  ;;  %11940 = vtanh.f32 %v9523_v14  ;;  %v9527_v5 = vadd.f32 %v9526_v39, %v16457_v29 }
0x1024   : > { %v11927_v21 = vpop.eup %11926  ;;  %9759 = vst [vmem:[%s12266_s19 + $0x120] sm:$0xff] %v11925_v3  ;;  %11942 = vtanh.f32 %v9603_v19  ;;  %v9607_v8 = vadd.f32 %v9606_v63, %v16457_v29 }
0x1025   : > { %v11929_v18 = vpop.eup %11928  ;;  %9760 = vst [vmem:[%s12266_s19 + $0x128] sm:$0xff] %v11927_v21  ;;  %11944 = vtanh.f32 %v9525_v53 }
0x1026   : > { %v11931_v11 = vpop.eup %11930  ;;  %9729 = vst [vmem:[%s12266_s19 + $0x30] sm:$0xff] %v11929_v18  ;;  %11946 = vtanh.f32 %v9605_v35 }
0x1027   : > { %v11933_v51 = vpop.eup %11932  ;;  %9761 = vst [vmem:[%s12266_s19 + $0x130] sm:$0xff] %v11931_v11  ;;  %11948 = vtanh.f32 %v9527_v5 }
0x1028   : > { %v11935_v56 = vpop.eup %11934  ;;  %9730 = vst [vmem:[%s12266_s19 + $0x38] sm:$0xff] %v11933_v51  ;;  %11950 = vtanh.f32 %v9607_v8 }
0x1029   : > { %9762 = vst [vmem:[%s12266_s19 + $0x138] sm:$0xff] %v11935_v56  ;;  %v9530_v15 = vpop.f32.mrb[12].mxu0 }
0x102a   : > { %v9531_v41 = vadd.f32 %v9530_v15, %v16455_v48  ;;  %v9610_v30 = vpop.f32.mrb[12].mxu1  ;;  %v9532_v6 = vpop.f32.mrb[13].mxu0 }
0x102b   : > { %v11937_v34 = vpop.eup %11936  ;;  %v9611_v42 = vadd.f32 %v9610_v30, %v16455_v48  ;;  %v9533_v54 = vadd.f32 %v9532_v6, %v16457_v29  ;;  %v9612_v62 = vpop.f32.mrb[13].mxu1 }
0x102c   : > { %v9534_v24 = vpop.f32.mrb[14].mxu0  ;;  %v11939_v45 = vpop.eup %11938  ;;  %9731 = vst [vmem:[%s12266_s19 + $0x40] sm:$0xff] %v11937_v34  ;;  %11952 = vtanh.f32 %v9531_v41  ;;  %v9613_v9 = vadd.f32 %v9612_v62, %v16457_v29 }
0x102d   : > { %v9535_v49 = vadd.f32 %v9534_v24, %v16455_v48  ;;  %v9614_v61 = vpop.f32.mrb[14].mxu1  ;;  %v9536_v43 = vpop.f32.mrb[15].mxu0  ;;  %9763 = vst [vmem:[%s12266_s19 + $0x140] sm:$0xff] %v11939_v45  ;;  %11954 = vtanh.f32 %v9611_v42 }
0x102e   : > { %v11941_v13 = vpop.eup %11940  ;;  %v9615_v58 = vadd.f32 %v9614_v61, %v16455_v48  ;;  %v9616_v57 = vpop.f32.mrb[15].mxu1  ;;  %11956 = vtanh.f32 %v9533_v54  ;;  %v9537_v55 = vadd.f32 %v9536_v43, %v16457_v29 }
0x102f   : > { %v11943_v47 = vpop.eup %11942  ;;  %9732 = vst [vmem:[%s12266_s19 + $0x48] sm:$0xff] %v11941_v13  ;;  %11958 = vtanh.f32 %v9613_v9  ;;  %v9617_v4 = vadd.f32 %v9616_v57, %v16457_v29 }
0x1030   : > { %v11945_v31 = vpop.eup %11944  ;;  %9764 = vst [vmem:[%s12266_s19 + $0x148] sm:$0xff] %v11943_v47  ;;  %11960 = vtanh.f32 %v9535_v49 }
0x1031   : > { %v11947_v26 = vpop.eup %11946  ;;  %9733 = vst [vmem:[%s12266_s19 + $0x50] sm:$0xff] %v11945_v31  ;;  %11962 = vtanh.f32 %v9615_v58 }
0x1032   : > { %v11949_v44 = vpop.eup %11948  ;;  %9765 = vst [vmem:[%s12266_s19 + $0x150] sm:$0xff] %v11947_v26  ;;  %11964 = vtanh.f32 %v9537_v55 }
0x1033   : > { %v11951_v52 = vpop.eup %11950  ;;  %9734 = vst [vmem:[%s12266_s19 + $0x58] sm:$0xff] %v11949_v44  ;;  %11966 = vtanh.f32 %v9617_v4  ;;  %v9540_v36 = vpop.f32.mrb[16].mxu0 }
0x1034   : > { %9766 = vst [vmem:[%s12266_s19 + $0x158] sm:$0xff] %v11951_v52  ;;  %v9541_v60 = vadd.f32 %v9540_v36, %v16455_v48  ;;  %v9542_v1 = vpop.f32.mrb[17].mxu0 }
0x1035   : > { %v9543_v38 = vadd.f32 %v9542_v1, %v16457_v29  ;;  %v9544_v40 = vpop.f32.mrb[18].mxu0 }
0x1036   : > { %v11953_v27 = vpop.eup %11952  ;;  %11968 = vtanh.f32 %v9541_v60  ;;  %v9620_v17 = vpop.f32.mrb[16].mxu1  ;;  %v9545_v32 = vadd.f32 %v9544_v40, %v16455_v48 }
0x1037   : > { %v9546_v2 = vpop.f32.mrb[19].mxu0  ;;  %v11955_v7 = vpop.eup %11954  ;;  %9735 = vst [vmem:[%s12266_s19 + $0x60] sm:$0xff] %v11953_v27  ;;  %v9621_v46 = vadd.f32 %v9620_v17, %v16455_v48  ;;  %11970 = vtanh.f32 %v9543_v38 }
0x1038   : > { %v9622_v59 = vpop.f32.mrb[17].mxu1  ;;  %v11957_v22 = vpop.eup %11956  ;;  %9767 = vst [vmem:[%s12266_s19 + $0x160] sm:$0xff] %v11955_v7  ;;  %11972 = vtanh.f32 %v9545_v32  ;;  %v9547_v28 = vadd.f32 %v9546_v2, %v16457_v29 }
0x1039   : > { %v9623_v10 = vadd.f32 %v9622_v59, %v16457_v29  ;;  %v9624_v37 = vpop.f32.mrb[18].mxu1  ;;  %v11959_v23 = vpop.eup %11958  ;;  %9736 = vst [vmem:[%s12266_s19 + $0x68] sm:$0xff] %v11957_v22  ;;  %11974 = vtanh.f32 %v9621_v46 }
0x103a   : > { %v9625_v20 = vadd.f32 %v9624_v37, %v16455_v48  ;;  %v9626_v16 = vpop.f32.mrb[19].mxu1  ;;  %v11961_v33 = vpop.eup %11960  ;;  %9768 = vst [vmem:[%s12266_s19 + $0x168] sm:$0xff] %v11959_v23 }
0x103b   : > { %11976 = vtanh.f32 %v9623_v10  ;;  %v9627_v14 = vadd.f32 %v9626_v16, %v16457_v29  ;;  %v11963_v25 = vpop.eup %11962  ;;  %9737 = vst [vmem:[%s12266_s19 + $0x70] sm:$0xff] %v11961_v33 }
0x103c   : > { %11978 = vtanh.f32 %v9625_v20  ;;  %v11965_v12 = vpop.eup %11964  ;;  %9769 = vst [vmem:[%s12266_s19 + $0x170] sm:$0xff] %v11963_v25 }
0x103d   : > { %11980 = vtanh.f32 %v9547_v28  ;;  %v11967_v50 = vpop.eup %11966  ;;  %9738 = vst [vmem:[%s12266_s19 + $0x78] sm:$0xff] %v11965_v12 }
0x103e   : > { %11982 = vtanh.f32 %v9627_v14  ;;  %9770 = vst [vmem:[%s12266_s19 + $0x178] sm:$0xff] %v11967_v50  ;;  %v9550_v19 = vpop.f32.mrb[20].mxu0 }
0x103f   : > { %v9551_v53 = vadd.f32 %v9550_v19, %v16455_v48  ;;  %v9552_v0 = vpop.f32.mrb[21].mxu0 }
0x1040   : > { %v11969_v39 = vpop.eup %11968  ;;  %v9553_v3 = vadd.f32 %v9552_v0, %v16457_v29  ;;  %v9554_v35 = vpop.f32.mrb[22].mxu0 }
0x1041   : > { %v11971_v63 = vpop.eup %11970  ;;  %9739 = vst [vmem:[%s12266_s19 + $0x80] sm:$0xff] %v11969_v39  ;;  %11984 = vtanh.f32 %v9551_v53  ;;  %v9630_v21 = vpop.f32.mrb[20].mxu1  ;;  %v9555_v5 = vadd.f32 %v9554_v35, %v16455_v48 }
0x1042   : > { %v9556_v18 = vpop.f32.mrb[23].mxu0  ;;  %v11973_v8 = vpop.eup %11972  ;;  %9740 = vst [vmem:[%s12266_s19 + $0x88] sm:$0xff] %v11971_v63  ;;  %v9631_v11 = vadd.f32 %v9630_v21, %v16455_v48  ;;  %11986 = vtanh.f32 %v9553_v3 }
0x1043   : > { %v9632_v51 = vpop.f32.mrb[21].mxu1  ;;  %v11975_v56 = vpop.eup %11974  ;;  %9741 = vst [vmem:[%s12266_s19 + $0x90] sm:$0xff] %v11973_v8  ;;  %11988 = vtanh.f32 %v9555_v5  ;;  %v9557_v30 = vadd.f32 %v9556_v18, %v16457_v29 }
0x1044   : > { %v9633_v15 = vadd.f32 %v9632_v51, %v16457_v29  ;;  %v9634_v41 = vpop.f32.mrb[22].mxu1  ;;  %9771 = vst [vmem:[%s12266_s19 + $0x180] sm:$0xff] %v11975_v56  ;;  %11990 = vtanh.f32 %v9631_v11 }
0x1045   : > { %v11977_v6 = vpop.eup %11976  ;;  %v9635_v34 = vadd.f32 %v9634_v41, %v16455_v48  ;;  %v9636_v42 = vpop.f32.mrb[23].mxu1 }
0x1046   : > { %v11979_v54 = vpop.eup %11978  ;;  %9772 = vst [vmem:[%s12266_s19 + $0x188] sm:$0xff] %v11977_v6  ;;  %11992 = vtanh.f32 %v9633_v15  ;;  %v9637_v62 = vadd.f32 %v9636_v42, %v16457_v29 }
0x1047   : > { %v11981_v24 = vpop.eup %11980  ;;  %9773 = vst [vmem:[%s12266_s19 + $0x190] sm:$0xff] %v11979_v54  ;;  %11994 = vtanh.f32 %v9635_v34 }
0x1048   : > { %v11983_v45 = vpop.eup %11982  ;;  %9742 = vst [vmem:[%s12266_s19 + $0x98] sm:$0xff] %v11981_v24  ;;  %11996 = vtanh.f32 %v9557_v30 }
0x1049   : > { %9774 = vst [vmem:[%s12266_s19 + $0x198] sm:$0xff] %v11983_v45  ;;  %11998 = vtanh.f32 %v9637_v62  ;;  %v9560_v9 = vpop.f32.mrb[24].mxu0 }
0x104a   : > { %v9561_v49 = vadd.f32 %v9560_v9, %v16455_v48  ;;  %v9562_v61 = vpop.f32.mrb[25].mxu0 }
0x104b   : > { %v11985_v43 = vpop.eup %11984  ;;  %v9563_v13 = vadd.f32 %v9562_v61, %v16457_v29  ;;  %v9564_v58 = vpop.f32.mrb[26].mxu0 }
0x104c   : > { %v11987_v57 = vpop.eup %11986  ;;  %9743 = vst [vmem:[%s12266_s19 + $0xa0] sm:$0xff] %v11985_v43  ;;  %12000 = vtanh.f32 %v9561_v49  ;;  %v9640_v47 = vpop.f32.mrb[24].mxu1  ;;  %v9565_v55 = vadd.f32 %v9564_v58, %v16455_v48 }
0x104d   : > { %v9566_v31 = vpop.f32.mrb[27].mxu0  ;;  %v11989_v4 = vpop.eup %11988  ;;  %9744 = vst [vmem:[%s12266_s19 + $0xa8] sm:$0xff] %v11987_v57  ;;  %v9641_v26 = vadd.f32 %v9640_v47, %v16455_v48  ;;  %12002 = vtanh.f32 %v9563_v13 }
0x104e   : > { %v9642_v44 = vpop.f32.mrb[25].mxu1  ;;  %v11991_v52 = vpop.eup %11990  ;;  %9745 = vst [vmem:[%s12266_s19 + $0xb0] sm:$0xff] %v11989_v4  ;;  %12004 = vtanh.f32 %v9565_v55  ;;  %v9567_v1 = vadd.f32 %v9566_v31, %v16457_v29 }
0x104f   : > { %v9643_v36 = vadd.f32 %v9642_v44, %v16457_v29  ;;  %v9644_v60 = vpop.f32.mrb[26].mxu1  ;;  %9775 = vst [vmem:[%s12266_s19 + $0x1a0] sm:$0xff] %v11991_v52  ;;  %12006 = vtanh.f32 %v9641_v26 }
0x1050   : > { %v11993_v38 = vpop.eup %11992  ;;  %v9645_v40 = vadd.f32 %v9644_v60, %v16455_v48  ;;  %v9646_v27 = vpop.f32.mrb[27].mxu1 }
0x1051   : > { %v11995_v17 = vpop.eup %11994  ;;  %9776 = vst [vmem:[%s12266_s19 + $0x1a8] sm:$0xff] %v11993_v38  ;;  %12008 = vtanh.f32 %v9643_v36  ;;  %v9647_v32 = vadd.f32 %v9646_v27, %v16457_v29 }
0x1052   : > { %v11997_v2 = vpop.eup %11996  ;;  %9777 = vst [vmem:[%s12266_s19 + $0x1b0] sm:$0xff] %v11995_v17  ;;  %12010 = vtanh.f32 %v9645_v40 }
0x1053   : > { %v11999_v7 = vpop.eup %11998  ;;  %9746 = vst [vmem:[%s12266_s19 + $0xb8] sm:$0xff] %v11997_v2  ;;  %12012 = vtanh.f32 %v9567_v1 }
0x1054   : > { %9778 = vst [vmem:[%s12266_s19 + $0x1b8] sm:$0xff] %v11999_v7  ;;  %12014 = vtanh.f32 %v9647_v32  ;;  %v9570_v46 = vpop.f32.mrb[28].mxu0 }
0x1055   : > { %v9571_v59 = vadd.f32 %v9570_v46, %v16455_v48  ;;  %v9572_v22 = vpop.f32.mrb[29].mxu0 }
0x1056   : > { %v12001_v10 = vpop.eup %12000  ;;  %v9573_v37 = vadd.f32 %v9572_v22, %v16457_v29  ;;  %v9574_v28 = vpop.f32.mrb[30].mxu0 }
0x1057   : > { %v12003_v23 = vpop.eup %12002  ;;  %9747 = vst [vmem:[%s12266_s19 + $0xc0] sm:$0xff] %v12001_v10  ;;  %12016 = vtanh.f32 %v9571_v59  ;;  %v9650_v20 = vpop.f32.mrb[28].mxu1  ;;  %v9575_v16 = vadd.f32 %v9574_v28, %v16455_v48 }
0x1058   : > { %v9576_v33 = vpop.f32.mrb[31].mxu0  ;;  %v12005_v14 = vpop.eup %12004  ;;  %9748 = vst [vmem:[%s12266_s19 + $0xc8] sm:$0xff] %v12003_v23  ;;  %v9651_v25 = vadd.f32 %v9650_v20, %v16455_v48  ;;  %12018 = vtanh.f32 %v9573_v37 }
0x1059   : > { %v9652_v12 = vpop.f32.mrb[29].mxu1  ;;  %v12007_v50 = vpop.eup %12006  ;;  %9749 = vst [vmem:[%s12266_s19 + $0xd0] sm:$0xff] %v12005_v14  ;;  %12020 = vtanh.f32 %v9575_v16  ;;  %v9577_v0 = vadd.f32 %v9576_v33, %v16457_v29 }
0x105a   : > { %v9653_v19 = vadd.f32 %v9652_v12, %v16457_v29  ;;  %v9654_v53 = vpop.f32.mrb[30].mxu1  ;;  %9779 = vst [vmem:[%s12266_s19 + $0x1c0] sm:$0xff] %v12007_v50  ;;  %12022 = vtanh.f32 %v9651_v25 }
0x105b   : > { %v12009_v39 = vpop.eup %12008  ;;  %v9655_v3 = vadd.f32 %v9654_v53, %v16455_v48  ;;  %v9656_v35 = vpop.f32.mrb[31].mxu1 }
0x105c   : > { %v12011_v63 = vpop.eup %12010  ;;  %9780 = vst [vmem:[%s12266_s19 + $0x1c8] sm:$0xff] %v12009_v39  ;;  %12024 = vtanh.f32 %v9653_v19  ;;  %v9657_v21 = vadd.f32 %v9656_v35, %v16457_v29 }
0x105d   : > { %v12013_v5 = vpop.eup %12012  ;;  %9781 = vst [vmem:[%s12266_s19 + $0x1d0] sm:$0xff] %v12011_v63  ;;  %12026 = vtanh.f32 %v9655_v3 }
0x105e   : > { %v12015_v18 = vpop.eup %12014  ;;  %9750 = vst [vmem:[%s12266_s19 + $0xd8] sm:$0xff] %v12013_v5  ;;  %12028 = vtanh.f32 %v9577_v0 }
0x105f   : > { %9782 = vst [vmem:[%s12266_s19 + $0x1d8] sm:$0xff] %v12015_v18  ;;  %12030 = vtanh.f32 %v9657_v21 }
0x1061   : > { %v12017_v48 = vpop.eup %12016 }
0x1062   : > { %v12019_v8 = vpop.eup %12018  ;;  %9751 = vst [vmem:[%s12266_s19 + $0xe0] sm:$0xff] %v12017_v48 }
0x1063   : > { %v12021_v11 = vpop.eup %12020  ;;  %9752 = vst [vmem:[%s12266_s19 + $0xe8] sm:$0xff] %v12019_v8 }
0x1064   : > { %v12023_v51 = vpop.eup %12022  ;;  %9753 = vst [vmem:[%s12266_s19 + $0xf0] sm:$0xff] %v12021_v11 }
0x1065   : > { %9783 = vst [vmem:[%s12266_s19 + $0x1e0] sm:$0xff] %v12023_v51 }
0x1066   : > { %v12025_v29 = vpop.eup %12024 }
0x1067   : > { %v12027_v56 = vpop.eup %12026  ;;  %9784 = vst [vmem:[%s12266_s19 + $0x1e8] sm:$0xff] %v12025_v29 }
0x1068   : > { %v12029_v15 = vpop.eup %12028  ;;  %9785 = vst [vmem:[%s12266_s19 + $0x1f0] sm:$0xff] %v12027_v56 }
0x1069   : > { %v12031_v41 = vpop.eup %12030  ;;  %9754 = vst [vmem:[%s12266_s19 + $0xf8] sm:$0xff] %v12029_v15 }
0x106a   : > { %9786 = vst [vmem:[%s12266_s19 + $0x1f8] sm:$0xff] %v12031_v41 }
0x106b PF: > { %s16839_s24 = sld [smem:[#allocation8_spill]]  ;;  %s16840_s1 = sld [smem:[#allocation6_spill]] }
0x106c   : > { %s16841_s22 = sld [smem:[#allocation7_spill]]  ;;  %s16842_s23 = sld [smem:[#allocation9_spill]] }
0x1071   : > { %s30_s2 = sadd.s32 1, %s16839_s24   ;;  %s16843_s24 = sld [smem:[#allocation10_spill]] }
0x1072   : > { %p27_p7 = scmp.ge.s32.totalorder %s30_s2, 16  }
0x1074   :  { %29 = sbr.rel (!%p27_p7) target bundleno = 9 (0x9), region = 190 }

</bundles_post_ra>
